<compile_context>
chip_gen: v5e
topology: v5e:2x2
jax: 0.10.0
libtpu: 0.0.40
codegen_flags: <defaults>
</compile_context>

<pallas_src>
import numpy as np

import jax
import jax.numpy as jnp
from jax import lax
from jax.experimental import pallas as pl
from jax.experimental.pallas import tpu as pltpu

LN_EPS = 1e-5
MATMUL_DTYPE = jnp.bfloat16   # MXU operand dtype; accumulation stays f32


# ----------------------------------------------------------------------------- kernels
def make_window_attn_kernel(num_heads, head_dim, scale):
    def kernel(x_ref, g_ref, bln_ref, wqkv_ref, bqkv_ref, wp_ref, bp_ref,
               bias_ref, o_ref):
        # x_ref: (1, nW, N, C) raw (un-normalized) window tokens of one batch.
        # bias_ref: (nH, nWb, N, N) = rel_pos_bias (+ shift mask if any).
        x = x_ref[0].astype(jnp.float32)                        # (nW, N, C)
        nW, N, C = x.shape

        # ---- fused norm1 (LayerNorm over channels, f32 stats) ----
        mu = jnp.mean(x, axis=-1, keepdims=True)
        xc = x - mu
        var = jnp.mean(xc * xc, axis=-1, keepdims=True)
        xn = xc * lax.rsqrt(var + LN_EPS) * g_ref[...] + bln_ref[...]

        # ---- QKV projection: one big (nW*N, C) @ (C, 3C) matmul ----
        xf = xn.reshape(nW * N, C)
        qkv = jnp.dot(xf.astype(MATMUL_DTYPE), wqkv_ref[...],
                      preferred_element_type=jnp.float32) + bqkv_ref[...]
        q = qkv[:, 0:C].reshape(nW, N, C) * scale               # f32
        k = qkv[:, C:2 * C].reshape(nW, N, C)
        v = qkv[:, 2 * C:3 * C].reshape(nW, N, C)
        qb = q.astype(MATMUL_DTYPE)
        kb = k.astype(MATMUL_DTYPE)
        vb = v.astype(MATMUL_DTYPE)

        # ---- per-head attention, all windows batched in each dot ----
        outs = []
        for h in range(num_heads):                              # small static loop
            lo = h * head_dim
            hi = lo + head_dim
            s = jnp.einsum('wqd,wkd->wqk', qb[..., lo:hi], kb[..., lo:hi],
                           preferred_element_type=jnp.float32)  # (nW, N, N)
            s = s + bias_ref[h]                                 # (nWb,N,N) broadcasts
            s = s - jnp.max(s, axis=-1, keepdims=True)
            e = jnp.exp(s)
            p = e * pl.reciprocal(jnp.sum(e, axis=-1, keepdims=True), approx=True)
            outs.append(jnp.einsum('wqk,wkd->wqd',
                                   p.astype(MATMUL_DTYPE), vb[..., lo:hi],
                                   preferred_element_type=jnp.float32))

        concat = jnp.concatenate(outs, axis=-1)                 # (nW, N, C) f32

        # ---- output projection: one big (nW*N, C) @ (C, C) matmul ----
        out = jnp.dot(concat.reshape(nW * N, C).astype(MATMUL_DTYPE), wp_ref[...],
                      preferred_element_type=jnp.float32) + bp_ref[...]
        o_ref[0] = out.reshape(nW, N, C).astype(o_ref.dtype)

    return kernel


def res_ln_mlp_kernel(sc_ref, at_ref, g_ref, b_ref, w1_ref, b1_ref, w2_ref, b2_ref,
                      o_ref):
    # x = shortcut + attn_out ; out = x + fc2(gelu(fc1(LN(x))))
    x = sc_ref[...].astype(jnp.float32) + at_ref[...].astype(jnp.float32)
    mu = jnp.mean(x, axis=-1, keepdims=True)
    xc = x - mu
    var = jnp.mean(xc * xc, axis=-1, keepdims=True)
    xn = xc * lax.rsqrt(var + LN_EPS) * g_ref[...] + b_ref[...]
    h = jnp.dot(xn.astype(MATMUL_DTYPE), w1_ref[...],
                preferred_element_type=jnp.float32) + b1_ref[...]
    # exact GELU (PyTorch nn.GELU default), kept in f32
    h = 0.5 * h * (1.0 + lax.erf(h * 0.7071067811865476))
    y = jnp.dot(h.astype(MATMUL_DTYPE), w2_ref[...],
                preferred_element_type=jnp.float32) + b2_ref[...]
    o_ref[...] = (x + y).astype(o_ref.dtype)


# ----------------------------------------------------------------------------- pallas wrappers
def window_attention(win, g1, b1, wqkv, bqkv, wproj, bproj, attn_bias, num_heads):
    # win: (B, nW, N, C) raw tokens (norm1 fused inside the kernel)
    B, nW, N, C = win.shape
    nH, nWb, _, _ = attn_bias.shape
    head_dim = C // num_heads
    scale = head_dim ** -0.5
    kernel = make_window_attn_kernel(num_heads, head_dim, scale)
    return pl.pallas_call(
        kernel,
        out_shape=jax.ShapeDtypeStruct((B, nW, N, C), win.dtype),
        grid=(B,),   # >=2 parallel steps for B>=2 -> both v7x TensorCores busy
        in_specs=[
            pl.BlockSpec((1, nW, N, C), lambda b: (b, 0, 0, 0)),
            pl.BlockSpec((1, C), lambda b: (0, 0)),
            pl.BlockSpec((1, C), lambda b: (0, 0)),
            pl.BlockSpec((C, 3 * C), lambda b: (0, 0)),
            pl.BlockSpec((1, 3 * C), lambda b: (0, 0)),
            pl.BlockSpec((C, C), lambda b: (0, 0)),
            pl.BlockSpec((1, C), lambda b: (0, 0)),
            pl.BlockSpec((nH, nWb, N, N), lambda b: (0, 0, 0, 0)),
        ],
        out_specs=pl.BlockSpec((1, nW, N, C), lambda b: (b, 0, 0, 0)),
        compiler_params=pltpu.CompilerParams(dimension_semantics=("parallel",)),
    )(win, g1.reshape(1, C), b1.reshape(1, C),
      wqkv, bqkv.reshape(1, 3 * C), wproj, bproj.reshape(1, C), attn_bias)


def _row_tile(R):
    # Largest tile that divides R exactly while keeping >=2 grid steps
    # (v7x dual-TC); otherwise a single full-R block (VMEM is not a
    # constraint at these sizes).  Never drops trailing rows.
    for t in (1024, 512, 256, 128):
        if R % t == 0 and R // t >= 2:
            return t
    return R


def residual_ln_mlp(shortcut, attn_tokens, gamma, beta, w1, b1, w2, b2):
    R, C = shortcut.shape
    Hd = w1.shape[1]
    tile = _row_tile(R)
    return pl.pallas_call(
        res_ln_mlp_kernel,
        out_shape=jax.ShapeDtypeStruct((R, C), shortcut.dtype),
        grid=(R // tile,),
        in_specs=[
            pl.BlockSpec((tile, C), lambda i: (i, 0)),
            pl.BlockSpec((tile, C), lambda i: (i, 0)),
            pl.BlockSpec((1, C), lambda i: (0, 0)),
            pl.BlockSpec((1, C), lambda i: (0, 0)),
            pl.BlockSpec((C, Hd), lambda i: (0, 0)),
            pl.BlockSpec((1, Hd), lambda i: (0, 0)),
            pl.BlockSpec((Hd, C), lambda i: (0, 0)),
            pl.BlockSpec((1, C), lambda i: (0, 0)),
        ],
        out_specs=pl.BlockSpec((tile, C), lambda i: (i, 0)),
        compiler_params=pltpu.CompilerParams(dimension_semantics=("parallel",)),
    )(shortcut, attn_tokens, gamma.reshape(1, C), beta.reshape(1, C),
      w1, b1.reshape(1, Hd), w2, b2.reshape(1, C))


# ----------------------------------------------------------------------------- JAX glue
def window_partition(x, ws):
    B, H, W, C = x.shape
    x = x.reshape(B, H // ws, ws, W // ws, ws, C)
    return x.transpose(0, 1, 3, 2, 4, 5).reshape(-1, ws * ws, C)


def window_reverse(windows, ws, H, W, B):
    C = windows.shape[-1]
    x = windows.reshape(B, H // ws, W // ws, ws, ws, C)
    return x.transpose(0, 1, 3, 2, 4, 5).reshape(B, H, W, C)


def stl_block(x, x_size, p, ws, num_heads):
    H, W = x_size
    B, L, C = x.shape
    nW = (H // ws) * (W // ws)
    shortcut = x.reshape(B * L, C)

    # norm1 is applied inside the attention kernel (it commutes with the
    # roll / window-partition permutations below).
    xs = x.reshape(B, H, W, C)
    shift = p["shift"]
    if shift > 0:
        xs = jnp.roll(xs, shift=(-shift, -shift), axis=(1, 2))

    win = window_partition(xs, ws).reshape(B, nW, ws * ws, C)   # (B, nW, N, C)
    attn_win = window_attention(win, p["g1"], p["b1"],
                                p["wqkv"], p["bqkv"], p["wproj"], p["bproj"],
                                p["attn_bias"], num_heads)
    xs = window_reverse(attn_win.reshape(B * nW, ws * ws, C), ws, H, W, B)

    if shift > 0:
        xs = jnp.roll(xs, shift=(shift, shift), axis=(1, 2))

    attn_tokens = xs.reshape(B * L, C)
    out = residual_ln_mlp(shortcut, attn_tokens, p["g2"], p["b2"],
                          p["w1"], p["bfc1"], p["w2"], p["bfc2"])
    return out.reshape(B, L, C)


def multi_swin_layer(x, x_size, params, ws, num_heads):
    for p in params["blocks"]:
        x = stl_block(x, x_size, p, ws, num_heads)
    # downsample is None in this configuration -> identity
    return x


# ----------------------------------------------------------------------------- params
def relative_position_index(ws):
    coords = np.stack(np.meshgrid(np.arange(ws), np.arange(ws), indexing="ij"))
    cf = coords.reshape(2, -1)
    rel = cf[:, :, None] - cf[:, None, :]
    rel = rel.transpose(1, 2, 0).astype(np.int64)
    rel[:, :, 0] += ws - 1
    rel[:, :, 1] += ws - 1
    rel[:, :, 0] *= 2 * ws - 1
    return rel.sum(-1)                                    # (N, N)


def calc_attn_mask(H, W, ws, shift):
    img_mask = np.zeros((1, H, W, 1), dtype=np.float32)
    cnt = 0
    for hs in (slice(0, -ws), slice(-ws, -shift), slice(-shift, None)):
        for wsl in (slice(0, -ws), slice(-ws, -shift), slice(-shift, None)):
            img_mask[:, hs, wsl, :] = cnt
            cnt += 1
    mw = img_mask.reshape(1, H // ws, ws, W // ws, ws, 1) \
                 .transpose(0, 1, 3, 2, 4, 5).reshape(-1, ws * ws)
    diff = mw[:, None, :] - mw[:, :, None]
    return jnp.asarray(np.where(diff != 0, -100.0, 0.0).astype(np.float32))


def init_params(key, C, depth, num_heads, ws, mlp_ratio, H, W):
    N = ws * ws
    hidden = int(C * mlp_ratio)
    rel_idx = relative_position_index(ws)

    blocks = []
    for i in range(depth):
        key, *ks = jax.random.split(key, 12)
        shift = 0 if i % 2 == 0 else ws // 2
        table = 0.02 * jax.random.normal(ks[0], ((2 * ws - 1) ** 2, num_heads), jnp.float32)
        rel_bias = jnp.transpose(
            table[jnp.asarray(rel_idx.reshape(-1).astype(np.int32))]
            .reshape(N, N, num_heads), (2, 0, 1))                       # (nH, N, N)
        if shift > 0:
            mask = calc_attn_mask(H, W, ws, shift)                      # (nW, N, N)
            attn_bias = rel_bias[:, None, :, :] + mask[None]            # (nH, nW, N, N)
        else:
            attn_bias = rel_bias[:, None, :, :]                         # (nH, 1, N, N)
        blocks.append(dict(
            shift=shift,
            g1=jnp.ones((C,), jnp.float32), b1=jnp.zeros((C,), jnp.float32),
            g2=jnp.ones((C,), jnp.float32), b2=jnp.zeros((C,), jnp.float32),
            # MXU operand weights stored in bf16 (f32 accumulation in-kernel);
            # biases / LN params / bias tables stay f32.
            wqkv=(0.02 * jax.random.normal(ks[1], (C, 3 * C), jnp.float32)).astype(MATMUL_DTYPE),
            bqkv=0.02 * jax.random.normal(ks[2], (3 * C,), jnp.float32),   # qkv_bias=True
            wproj=(0.02 * jax.random.normal(ks[3], (C, C), jnp.float32)).astype(MATMUL_DTYPE),
            bproj=0.02 * jax.random.normal(ks[4], (C,), jnp.float32),
            w1=(0.02 * jax.random.normal(ks[5], (C, hidden), jnp.float32)).astype(MATMUL_DTYPE),
            bfc1=0.02 * jax.random.normal(ks[6], (hidden,), jnp.float32),
            w2=(0.02 * jax.random.normal(ks[7], (hidden, C), jnp.float32)).astype(MATMUL_DTYPE),
            bfc2=0.02 * jax.random.normal(ks[8], (C,), jnp.float32),
            attn_bias=attn_bias,
        ))
    return dict(blocks=blocks)


# ----------------------------------------------------------------------------- main
if __name__ == "__main__":
    key = jax.random.PRNGKey(0)
    B, H, W = 2, 16, 16
    C, depth, num_heads, ws = 32, 2, 4, 8
    mlp_ratio = 4.0

    kx, kp = jax.random.split(key)
    x = jax.random.normal(kx, (B, H * W, C), jnp.float32)      # (B, L, C) tokens
    params = init_params(kp, C, depth, num_heads, ws, mlp_ratio, H, W)

    out = multi_swin_layer(x, (H, W), params, ws, num_heads)
    out = jax.block_until_ready(out)
    assert out.shape == (B, H * W, C) and out.dtype == jnp.float32
    assert bool(jnp.all(jnp.isfinite(out)))
    print("KERNEL_OK")
</pallas_src>

<mosaic_0001>
module attributes {stable_mosaic.version = 11 : i64} {
  func.func @kernel(%arg0: i32, %arg1: memref<1x4x64x32xf32, #tpu.memory_space<vmem>>, %arg2: memref<1x32xf32, #tpu.memory_space<vmem>>, %arg3: memref<1x32xf32, #tpu.memory_space<vmem>>, %arg4: memref<32x96xbf16, #tpu.memory_space<vmem>>, %arg5: memref<1x96xf32, #tpu.memory_space<vmem>>, %arg6: memref<32x32xbf16, #tpu.memory_space<vmem>>, %arg7: memref<1x32xf32, #tpu.memory_space<vmem>>, %arg8: memref<4x1x64x64xf32, #tpu.memory_space<vmem>>, %arg9: memref<1x4x64x32xf32, #tpu.memory_space<vmem>>) attributes {dimension_semantics = [#tpu.dimension_semantics<parallel>], iteration_bounds = array<i64: 2>, scalar_prefetch = 0 : i64, scratch_operands = 0 : i64, tpu.core_type = #tpu.core_type<tc>, window_params = [{transform_indices = @transform_0, window_bounds = array<i64: 1, 4, 64, 32>}, {pipeline_mode = #tpu.pipeline_mode<synchronous>, transform_indices = @transform_1, window_bounds = array<i64: 1, 32>}, {pipeline_mode = #tpu.pipeline_mode<synchronous>, transform_indices = @transform_2, window_bounds = array<i64: 1, 32>}, {pipeline_mode = #tpu.pipeline_mode<synchronous>, transform_indices = @transform_3, window_bounds = array<i64: 32, 96>}, {pipeline_mode = #tpu.pipeline_mode<synchronous>, transform_indices = @transform_4, window_bounds = array<i64: 1, 96>}, {pipeline_mode = #tpu.pipeline_mode<synchronous>, transform_indices = @transform_5, window_bounds = array<i64: 32, 32>}, {pipeline_mode = #tpu.pipeline_mode<synchronous>, transform_indices = @transform_6, window_bounds = array<i64: 1, 32>}, {pipeline_mode = #tpu.pipeline_mode<synchronous>, transform_indices = @transform_7, window_bounds = array<i64: 4, 1, 64, 64>}, {transform_indices = @transform_8, window_bounds = array<i64: 1, 4, 64, 32>}]} {
    %c0 = arith.constant 0 : index
    %c0_0 = arith.constant 0 : index
    %c0_1 = arith.constant 0 : index
    %c0_2 = arith.constant 0 : index
    %0 = vector.load %arg1[%c0, %c0_0, %c0_1, %c0_2] : memref<1x4x64x32xf32, #tpu.memory_space<vmem>>, vector<1x4x64x32xf32>
    %1 = vector.shape_cast %0 : vector<1x4x64x32xf32> to vector<4x64x32xf32>
    %cst = arith.constant dense<0.000000e+00> : vector<4x64xf32>
    %2 = vector.multi_reduction <add>, %1, %cst [2] : vector<4x64x32xf32> to vector<4x64xf32>
    %3 = vector.shape_cast %2 : vector<4x64xf32> to vector<4x64x1xf32>
    %cst_3 = arith.constant 3.200000e+01 : f32
    %4 = vector.broadcast %cst_3 : f32 to vector<4x64x1xf32>
    %5 = arith.divf %3, %4 : vector<4x64x1xf32>
    %6 = vector.broadcast %5 : vector<4x64x1xf32> to vector<4x64x32xf32>
    %7 = arith.subf %1, %6 : vector<4x64x32xf32>
    %8 = arith.mulf %7, %7 : vector<4x64x32xf32>
    %cst_4 = arith.constant dense<0.000000e+00> : vector<4x64xf32>
    %9 = vector.multi_reduction <add>, %8, %cst_4 [2] : vector<4x64x32xf32> to vector<4x64xf32>
    %10 = vector.shape_cast %9 : vector<4x64xf32> to vector<4x64x1xf32>
    %cst_5 = arith.constant 3.200000e+01 : f32
    %11 = vector.broadcast %cst_5 : f32 to vector<4x64x1xf32>
    %12 = arith.divf %10, %11 : vector<4x64x1xf32>
    %cst_6 = arith.constant 9.99999974E-6 : f32
    %13 = vector.broadcast %cst_6 : f32 to vector<4x64x1xf32>
    %14 = arith.addf %12, %13 : vector<4x64x1xf32>
    %15 = math.rsqrt %14 : vector<4x64x1xf32>
    %16 = vector.broadcast %15 : vector<4x64x1xf32> to vector<4x64x32xf32>
    %17 = arith.mulf %7, %16 : vector<4x64x32xf32>
    %c0_7 = arith.constant 0 : index
    %c0_8 = arith.constant 0 : index
    %18 = vector.load %arg2[%c0_7, %c0_8] : memref<1x32xf32, #tpu.memory_space<vmem>>, vector<1x32xf32>
    %19 = vector.shape_cast %18 : vector<1x32xf32> to vector<1x1x32xf32>
    %20 = vector.broadcast %19 : vector<1x1x32xf32> to vector<4x64x32xf32>
    %21 = arith.mulf %17, %20 : vector<4x64x32xf32>
    %c0_9 = arith.constant 0 : index
    %c0_10 = arith.constant 0 : index
    %22 = vector.load %arg3[%c0_9, %c0_10] : memref<1x32xf32, #tpu.memory_space<vmem>>, vector<1x32xf32>
    %23 = vector.shape_cast %22 : vector<1x32xf32> to vector<1x1x32xf32>
    %24 = vector.broadcast %23 : vector<1x1x32xf32> to vector<4x64x32xf32>
    %25 = arith.addf %21, %24 : vector<4x64x32xf32>
    %26 = vector.shape_cast %25 : vector<4x64x32xf32> to vector<256x32xf32>
    %27 = arith.truncf %26 : vector<256x32xf32> to vector<256x32xbf16>
    %c0_11 = arith.constant 0 : index
    %c0_12 = arith.constant 0 : index
    %28 = vector.load %arg4[%c0_11, %c0_12] : memref<32x96xbf16, #tpu.memory_space<vmem>>, vector<32x96xbf16>
    %cst_13 = arith.constant dense<0.000000e+00> : vector<256x96xf32>
    %29 = tpu.matmul %27, %28, %cst_13 {dimension_numbers = #tpu.dot_dimension_numbers<[1], [0], [0], [1], [0, 0, 1, 1], [], []>} : vector<256x32xbf16>, vector<32x96xbf16>, vector<256x96xf32> -> vector<256x96xf32>
    %c0_14 = arith.constant 0 : index
    %c0_15 = arith.constant 0 : index
    %30 = vector.load %arg5[%c0_14, %c0_15] : memref<1x96xf32, #tpu.memory_space<vmem>>, vector<1x96xf32>
    %31 = vector.broadcast %30 : vector<1x96xf32> to vector<256x96xf32>
    %32 = arith.addf %29, %31 : vector<256x96xf32>
    %33 = vector.extract_strided_slice %32 {offsets = [0, 0], sizes = [256, 32], strides = [1, 1]} : vector<256x96xf32> to vector<256x32xf32>
    %34 = vector.shape_cast %33 : vector<256x32xf32> to vector<4x64x32xf32>
    %cst_16 = arith.constant 0.353553385 : f32
    %35 = vector.broadcast %cst_16 : f32 to vector<4x64x32xf32>
    %36 = arith.mulf %34, %35 : vector<4x64x32xf32>
    %37 = vector.extract_strided_slice %32 {offsets = [0, 32], sizes = [256, 32], strides = [1, 1]} : vector<256x96xf32> to vector<256x32xf32>
    %38 = vector.shape_cast %37 : vector<256x32xf32> to vector<4x64x32xf32>
    %39 = vector.extract_strided_slice %32 {offsets = [0, 64], sizes = [256, 32], strides = [1, 1]} : vector<256x96xf32> to vector<256x32xf32>
    %40 = vector.shape_cast %39 : vector<256x32xf32> to vector<4x64x32xf32>
    %41 = arith.truncf %36 : vector<4x64x32xf32> to vector<4x64x32xbf16>
    %42 = arith.truncf %38 : vector<4x64x32xf32> to vector<4x64x32xbf16>
    %43 = arith.truncf %40 : vector<4x64x32xf32> to vector<4x64x32xbf16>
    %44 = vector.extract_strided_slice %41 {offsets = [0, 0, 0], sizes = [4, 64, 8], strides = [1, 1, 1]} : vector<4x64x32xbf16> to vector<4x64x8xbf16>
    %45 = vector.extract_strided_slice %42 {offsets = [0, 0, 0], sizes = [4, 64, 8], strides = [1, 1, 1]} : vector<4x64x32xbf16> to vector<4x64x8xbf16>
    "tpu.trace_start"() <{level = 10 : i32, message = "wqd,wkd->wqk"}> : () -> ()
    %cst_17 = arith.constant dense<0.000000e+00> : vector<4x64x64xf32>
    %46 = tpu.matmul %44, %45, %cst_17 {dimension_numbers = #tpu.dot_dimension_numbers<[2], [2], [1], [1], [0, 0, 0, 1, 1, 1], [0], [0]>} : vector<4x64x8xbf16>, vector<4x64x8xbf16>, vector<4x64x64xf32> -> vector<4x64x64xf32>
    "tpu.trace_stop"() : () -> ()
    %c0_18 = arith.constant 0 : index
    %c0_19 = arith.constant 0 : index
    %c0_20 = arith.constant 0 : index
    %c0_21 = arith.constant 0 : index
    %47 = vector.load %arg8[%c0_18, %c0_19, %c0_20, %c0_21] : memref<4x1x64x64xf32, #tpu.memory_space<vmem>>, vector<1x1x64x64xf32>
    %48 = vector.shape_cast %47 : vector<1x1x64x64xf32> to vector<1x64x64xf32>
    %49 = vector.broadcast %48 : vector<1x64x64xf32> to vector<4x64x64xf32>
    %50 = arith.addf %46, %49 : vector<4x64x64xf32>
    %cst_22 = arith.constant dense<0xFF800000> : vector<4x64xf32>
    %51 = vector.multi_reduction <maximumf>, %50, %cst_22 [2] : vector<4x64x64xf32> to vector<4x64xf32>
    %52 = vector.shape_cast %51 : vector<4x64xf32> to vector<4x64x1xf32>
    %53 = vector.broadcast %52 : vector<4x64x1xf32> to vector<4x64x64xf32>
    %54 = arith.subf %50, %53 : vector<4x64x64xf32>
    %55 = math.exp %54 : vector<4x64x64xf32>
    %cst_23 = arith.constant dense<0.000000e+00> : vector<4x64xf32>
    %56 = vector.multi_reduction <add>, %55, %cst_23 [2] : vector<4x64x64xf32> to vector<4x64xf32>
    %57 = vector.shape_cast %56 : vector<4x64xf32> to vector<4x64x1xf32>
    %58 = tpu.reciprocal %57 {approx = true} : vector<4x64x1xf32> -> vector<4x64x1xf32>
    %59 = vector.broadcast %58 : vector<4x64x1xf32> to vector<4x64x64xf32>
    %60 = arith.mulf %55, %59 : vector<4x64x64xf32>
    %61 = arith.truncf %60 : vector<4x64x64xf32> to vector<4x64x64xbf16>
    %62 = vector.extract_strided_slice %43 {offsets = [0, 0, 0], sizes = [4, 64, 8], strides = [1, 1, 1]} : vector<4x64x32xbf16> to vector<4x64x8xbf16>
    "tpu.trace_start"() <{level = 10 : i32, message = "wqk,wkd->wqd"}> : () -> ()
    %cst_24 = arith.constant dense<0.000000e+00> : vector<4x64x8xf32>
    %63 = tpu.matmul %61, %62, %cst_24 {dimension_numbers = #tpu.dot_dimension_numbers<[2], [1], [1], [2], [0, 0, 0, 1, 1, 2], [0], [0]>} : vector<4x64x64xbf16>, vector<4x64x8xbf16>, vector<4x64x8xf32> -> vector<4x64x8xf32>
    "tpu.trace_stop"() : () -> ()
    %64 = vector.extract_strided_slice %41 {offsets = [0, 0, 8], sizes = [4, 64, 8], strides = [1, 1, 1]} : vector<4x64x32xbf16> to vector<4x64x8xbf16>
    %65 = vector.extract_strided_slice %42 {offsets = [0, 0, 8], sizes = [4, 64, 8], strides = [1, 1, 1]} : vector<4x64x32xbf16> to vector<4x64x8xbf16>
    "tpu.trace_start"() <{level = 10 : i32, message = "wqd,wkd->wqk"}> : () -> ()
    %cst_25 = arith.constant dense<0.000000e+00> : vector<4x64x64xf32>
    %66 = tpu.matmul %64, %65, %cst_25 {dimension_numbers = #tpu.dot_dimension_numbers<[2], [2], [1], [1], [0, 0, 0, 1, 1, 1], [0], [0]>} : vector<4x64x8xbf16>, vector<4x64x8xbf16>, vector<4x64x64xf32> -> vector<4x64x64xf32>
    "tpu.trace_stop"() : () -> ()
    %c1 = arith.constant 1 : index
    %c0_26 = arith.constant 0 : index
    %c0_27 = arith.constant 0 : index
    %c0_28 = arith.constant 0 : index
    %67 = vector.load %arg8[%c1, %c0_26, %c0_27, %c0_28] : memref<4x1x64x64xf32, #tpu.memory_space<vmem>>, vector<1x1x64x64xf32>
    %68 = vector.shape_cast %67 : vector<1x1x64x64xf32> to vector<1x64x64xf32>
    %69 = vector.broadcast %68 : vector<1x64x64xf32> to vector<4x64x64xf32>
    %70 = arith.addf %66, %69 : vector<4x64x64xf32>
    %cst_29 = arith.constant dense<0xFF800000> : vector<4x64xf32>
    %71 = vector.multi_reduction <maximumf>, %70, %cst_29 [2] : vector<4x64x64xf32> to vector<4x64xf32>
    %72 = vector.shape_cast %71 : vector<4x64xf32> to vector<4x64x1xf32>
    %73 = vector.broadcast %72 : vector<4x64x1xf32> to vector<4x64x64xf32>
    %74 = arith.subf %70, %73 : vector<4x64x64xf32>
    %75 = math.exp %74 : vector<4x64x64xf32>
    %cst_30 = arith.constant dense<0.000000e+00> : vector<4x64xf32>
    %76 = vector.multi_reduction <add>, %75, %cst_30 [2] : vector<4x64x64xf32> to vector<4x64xf32>
    %77 = vector.shape_cast %76 : vector<4x64xf32> to vector<4x64x1xf32>
    %78 = tpu.reciprocal %77 {approx = true} : vector<4x64x1xf32> -> vector<4x64x1xf32>
    %79 = vector.broadcast %78 : vector<4x64x1xf32> to vector<4x64x64xf32>
    %80 = arith.mulf %75, %79 : vector<4x64x64xf32>
    %81 = arith.truncf %80 : vector<4x64x64xf32> to vector<4x64x64xbf16>
    %82 = vector.extract_strided_slice %43 {offsets = [0, 0, 8], sizes = [4, 64, 8], strides = [1, 1, 1]} : vector<4x64x32xbf16> to vector<4x64x8xbf16>
    "tpu.trace_start"() <{level = 10 : i32, message = "wqk,wkd->wqd"}> : () -> ()
    %cst_31 = arith.constant dense<0.000000e+00> : vector<4x64x8xf32>
    %83 = tpu.matmul %81, %82, %cst_31 {dimension_numbers = #tpu.dot_dimension_numbers<[2], [1], [1], [2], [0, 0, 0, 1, 1, 2], [0], [0]>} : vector<4x64x64xbf16>, vector<4x64x8xbf16>, vector<4x64x8xf32> -> vector<4x64x8xf32>
    "tpu.trace_stop"() : () -> ()
    %84 = vector.extract_strided_slice %41 {offsets = [0, 0, 16], sizes = [4, 64, 8], strides = [1, 1, 1]} : vector<4x64x32xbf16> to vector<4x64x8xbf16>
    %85 = vector.extract_strided_slice %42 {offsets = [0, 0, 16], sizes = [4, 64, 8], strides = [1, 1, 1]} : vector<4x64x32xbf16> to vector<4x64x8xbf16>
    "tpu.trace_start"() <{level = 10 : i32, message = "wqd,wkd->wqk"}> : () -> ()
    %cst_32 = arith.constant dense<0.000000e+00> : vector<4x64x64xf32>
    %86 = tpu.matmul %84, %85, %cst_32 {dimension_numbers = #tpu.dot_dimension_numbers<[2], [2], [1], [1], [0, 0, 0, 1, 1, 1], [0], [0]>} : vector<4x64x8xbf16>, vector<4x64x8xbf16>, vector<4x64x64xf32> -> vector<4x64x64xf32>
    "tpu.trace_stop"() : () -> ()
    %c2 = arith.constant 2 : index
    %c0_33 = arith.constant 0 : index
    %c0_34 = arith.constant 0 : index
    %c0_35 = arith.constant 0 : index
    %87 = vector.load %arg8[%c2, %c0_33, %c0_34, %c0_35] : memref<4x1x64x64xf32, #tpu.memory_space<vmem>>, vector<1x1x64x64xf32>
    %88 = vector.shape_cast %87 : vector<1x1x64x64xf32> to vector<1x64x64xf32>
    %89 = vector.broadcast %88 : vector<1x64x64xf32> to vector<4x64x64xf32>
    %90 = arith.addf %86, %89 : vector<4x64x64xf32>
    %cst_36 = arith.constant dense<0xFF800000> : vector<4x64xf32>
    %91 = vector.multi_reduction <maximumf>, %90, %cst_36 [2] : vector<4x64x64xf32> to vector<4x64xf32>
    %92 = vector.shape_cast %91 : vector<4x64xf32> to vector<4x64x1xf32>
    %93 = vector.broadcast %92 : vector<4x64x1xf32> to vector<4x64x64xf32>
    %94 = arith.subf %90, %93 : vector<4x64x64xf32>
    %95 = math.exp %94 : vector<4x64x64xf32>
    %cst_37 = arith.constant dense<0.000000e+00> : vector<4x64xf32>
    %96 = vector.multi_reduction <add>, %95, %cst_37 [2] : vector<4x64x64xf32> to vector<4x64xf32>
    %97 = vector.shape_cast %96 : vector<4x64xf32> to vector<4x64x1xf32>
    %98 = tpu.reciprocal %97 {approx = true} : vector<4x64x1xf32> -> vector<4x64x1xf32>
    %99 = vector.broadcast %98 : vector<4x64x1xf32> to vector<4x64x64xf32>
    %100 = arith.mulf %95, %99 : vector<4x64x64xf32>
    %101 = arith.truncf %100 : vector<4x64x64xf32> to vector<4x64x64xbf16>
    %102 = vector.extract_strided_slice %43 {offsets = [0, 0, 16], sizes = [4, 64, 8], strides = [1, 1, 1]} : vector<4x64x32xbf16> to vector<4x64x8xbf16>
    "tpu.trace_start"() <{level = 10 : i32, message = "wqk,wkd->wqd"}> : () -> ()
    %cst_38 = arith.constant dense<0.000000e+00> : vector<4x64x8xf32>
    %103 = tpu.matmul %101, %102, %cst_38 {dimension_numbers = #tpu.dot_dimension_numbers<[2], [1], [1], [2], [0, 0, 0, 1, 1, 2], [0], [0]>} : vector<4x64x64xbf16>, vector<4x64x8xbf16>, vector<4x64x8xf32> -> vector<4x64x8xf32>
    "tpu.trace_stop"() : () -> ()
    %104 = vector.extract_strided_slice %41 {offsets = [0, 0, 24], sizes = [4, 64, 8], strides = [1, 1, 1]} : vector<4x64x32xbf16> to vector<4x64x8xbf16>
    %105 = vector.extract_strided_slice %42 {offsets = [0, 0, 24], sizes = [4, 64, 8], strides = [1, 1, 1]} : vector<4x64x32xbf16> to vector<4x64x8xbf16>
    "tpu.trace_start"() <{level = 10 : i32, message = "wqd,wkd->wqk"}> : () -> ()
    %cst_39 = arith.constant dense<0.000000e+00> : vector<4x64x64xf32>
    %106 = tpu.matmul %104, %105, %cst_39 {dimension_numbers = #tpu.dot_dimension_numbers<[2], [2], [1], [1], [0, 0, 0, 1, 1, 1], [0], [0]>} : vector<4x64x8xbf16>, vector<4x64x8xbf16>, vector<4x64x64xf32> -> vector<4x64x64xf32>
    "tpu.trace_stop"() : () -> ()
    %c3 = arith.constant 3 : index
    %c0_40 = arith.constant 0 : index
    %c0_41 = arith.constant 0 : index
    %c0_42 = arith.constant 0 : index
    %107 = vector.load %arg8[%c3, %c0_40, %c0_41, %c0_42] : memref<4x1x64x64xf32, #tpu.memory_space<vmem>>, vector<1x1x64x64xf32>
    %108 = vector.shape_cast %107 : vector<1x1x64x64xf32> to vector<1x64x64xf32>
    %109 = vector.broadcast %108 : vector<1x64x64xf32> to vector<4x64x64xf32>
    %110 = arith.addf %106, %109 : vector<4x64x64xf32>
    %cst_43 = arith.constant dense<0xFF800000> : vector<4x64xf32>
    %111 = vector.multi_reduction <maximumf>, %110, %cst_43 [2] : vector<4x64x64xf32> to vector<4x64xf32>
    %112 = vector.shape_cast %111 : vector<4x64xf32> to vector<4x64x1xf32>
    %113 = vector.broadcast %112 : vector<4x64x1xf32> to vector<4x64x64xf32>
    %114 = arith.subf %110, %113 : vector<4x64x64xf32>
    %115 = math.exp %114 : vector<4x64x64xf32>
    %cst_44 = arith.constant dense<0.000000e+00> : vector<4x64xf32>
    %116 = vector.multi_reduction <add>, %115, %cst_44 [2] : vector<4x64x64xf32> to vector<4x64xf32>
    %117 = vector.shape_cast %116 : vector<4x64xf32> to vector<4x64x1xf32>
    %118 = tpu.reciprocal %117 {approx = true} : vector<4x64x1xf32> -> vector<4x64x1xf32>
    %119 = vector.broadcast %118 : vector<4x64x1xf32> to vector<4x64x64xf32>
    %120 = arith.mulf %115, %119 : vector<4x64x64xf32>
    %121 = arith.truncf %120 : vector<4x64x64xf32> to vector<4x64x64xbf16>
    %122 = vector.extract_strided_slice %43 {offsets = [0, 0, 24], sizes = [4, 64, 8], strides = [1, 1, 1]} : vector<4x64x32xbf16> to vector<4x64x8xbf16>
    "tpu.trace_start"() <{level = 10 : i32, message = "wqk,wkd->wqd"}> : () -> ()
    %cst_45 = arith.constant dense<0.000000e+00> : vector<4x64x8xf32>
    %123 = tpu.matmul %121, %122, %cst_45 {dimension_numbers = #tpu.dot_dimension_numbers<[2], [1], [1], [2], [0, 0, 0, 1, 1, 2], [0], [0]>} : vector<4x64x64xbf16>, vector<4x64x8xbf16>, vector<4x64x8xf32> -> vector<4x64x8xf32>
    "tpu.trace_stop"() : () -> ()
    %124 = tpu.concatenate %63, %83, %103, %123 in 2 : vector<4x64x8xf32>, vector<4x64x8xf32>, vector<4x64x8xf32>, vector<4x64x8xf32> -> vector<4x64x32xf32>
    %125 = vector.shape_cast %124 : vector<4x64x32xf32> to vector<256x32xf32>
    %126 = arith.truncf %125 : vector<256x32xf32> to vector<256x32xbf16>
    %c0_46 = arith.constant 0 : index
    %c0_47 = arith.constant 0 : index
    %127 = vector.load %arg6[%c0_46, %c0_47] : memref<32x32xbf16, #tpu.memory_space<vmem>>, vector<32x32xbf16>
    %cst_48 = arith.constant dense<0.000000e+00> : vector<256x32xf32>
    %128 = tpu.matmul %126, %127, %cst_48 {dimension_numbers = #tpu.dot_dimension_numbers<[1], [0], [0], [1], [0, 0, 1, 1], [], []>} : vector<256x32xbf16>, vector<32x32xbf16>, vector<256x32xf32> -> vector<256x32xf32>
    %c0_49 = arith.constant 0 : index
    %c0_50 = arith.constant 0 : index
    %129 = vector.load %arg7[%c0_49, %c0_50] : memref<1x32xf32, #tpu.memory_space<vmem>>, vector<1x32xf32>
    %130 = vector.broadcast %129 : vector<1x32xf32> to vector<256x32xf32>
    %131 = arith.addf %128, %130 : vector<256x32xf32>
    %132 = vector.shape_cast %131 : vector<256x32xf32> to vector<4x64x32xf32>
    %c0_51 = arith.constant 0 : index
    %c0_52 = arith.constant 0 : index
    %c0_53 = arith.constant 0 : index
    %c0_54 = arith.constant 0 : index
    %133 = vector.load %arg9[%c0_51, %c0_52, %c0_53, %c0_54] : memref<1x4x64x32xf32, #tpu.memory_space<vmem>>, vector<1x4x64x32xf32>
    %134 = vector.shape_cast %133 : vector<1x4x64x32xf32> to vector<4x64x32xf32>
    %135 = vector.shape_cast %132 : vector<4x64x32xf32> to vector<1x4x64x32xf32>
    tpu.vector_store %arg9[%c0_51, %c0_52, %c0_53, %c0_54], %135 {strides = array<i32>} : memref<1x4x64x32xf32, #tpu.memory_space<vmem>>, vector<1x4x64x32xf32>,
    return
  }
  func.func @transform_0(%arg0: i32) -> (i32, i32, i32, i32) {
    %c0_i32 = arith.constant 0 : i32
    %c0_i32_0 = arith.constant 0 : i32
    %c0_i32_1 = arith.constant 0 : i32
    %c0_i32_2 = arith.constant 0 : i32
    return %arg0, %c0_i32, %c0_i32_0, %c0_i32_1 : i32, i32, i32, i32
  }
  func.func @transform_1(%arg0: i32) -> (i32, i32) {
    %c0_i32 = arith.constant 0 : i32
    %c0_i32_0 = arith.constant 0 : i32
    %c0_i32_1 = arith.constant 0 : i32
    return %c0_i32, %c0_i32_0 : i32, i32
  }
  func.func @transform_2(%arg0: i32) -> (i32, i32) {
    %c0_i32 = arith.constant 0 : i32
    %c0_i32_0 = arith.constant 0 : i32
    %c0_i32_1 = arith.constant 0 : i32
    return %c0_i32, %c0_i32_0 : i32, i32
  }
  func.func @transform_3(%arg0: i32) -> (i32, i32) {
    %c0_i32 = arith.constant 0 : i32
    %c0_i32_0 = arith.constant 0 : i32
    %c0_i32_1 = arith.constant 0 : i32
    return %c0_i32, %c0_i32_0 : i32, i32
  }
  func.func @transform_4(%arg0: i32) -> (i32, i32) {
    %c0_i32 = arith.constant 0 : i32
    %c0_i32_0 = arith.constant 0 : i32
    %c0_i32_1 = arith.constant 0 : i32
    return %c0_i32, %c0_i32_0 : i32, i32
  }
  func.func @transform_5(%arg0: i32) -> (i32, i32) {
    %c0_i32 = arith.constant 0 : i32
    %c0_i32_0 = arith.constant 0 : i32
    %c0_i32_1 = arith.constant 0 : i32
    return %c0_i32, %c0_i32_0 : i32, i32
  }
  func.func @transform_6(%arg0: i32) -> (i32, i32) {
    %c0_i32 = arith.constant 0 : i32
    %c0_i32_0 = arith.constant 0 : i32
    %c0_i32_1 = arith.constant 0 : i32
    return %c0_i32, %c0_i32_0 : i32, i32
  }
  func.func @transform_7(%arg0: i32) -> (i32, i32, i32, i32) {
    %c0_i32 = arith.constant 0 : i32
    %c0_i32_0 = arith.constant 0 : i32
    %c0_i32_1 = arith.constant 0 : i32
    %c0_i32_2 = arith.constant 0 : i32
    %c0_i32_3 = arith.constant 0 : i32
    return %c0_i32, %c0_i32_0, %c0_i32_1, %c0_i32_2 : i32, i32, i32, i32
  }
  func.func @transform_8(%arg0: i32) -> (i32, i32, i32, i32) {
    %c0_i32 = arith.constant 0 : i32
    %c0_i32_0 = arith.constant 0 : i32
    %c0_i32_1 = arith.constant 0 : i32
    %c0_i32_2 = arith.constant 0 : i32
    return %arg0, %c0_i32, %c0_i32_0, %c0_i32_1 : i32, i32, i32, i32
  }
}

</mosaic_0001>

<bundles_post_ra>
// kernel: tpu_custom_call.1
= control target key start
LH: loop header
LB: loop body
LE: loop exit
PB: predicated region body
PF: predicated region fallthrough
CT: control target
= control target key end

     0   :  { %s7252_s27 = smov 0   ;;  %s11741_s0 = inlined_call_operand.vmem [shape: f32[2,4,64,32], index: 0, kind: input, shape index: {}]   ;;  %s11742_s1 = inlined_call_operand.vmem [shape: f32[1,32], index: 1, kind: input, shape index: {}]   ;;  %s11743_s2 = inlined_call_operand.vmem [shape: f32[1,32], index: 2, kind: input, shape index: {}]   ;;  %s11744_s3 = inlined_call_operand.vmem [shape: bf16[32,96], index: 3, kind: input, shape index: {}]   ;;  %s11745_s4 = inlined_call_operand.vmem [shape: f32[1,96], index: 4, kind: input, shape index: {}]   ;;  %s11746_s5 = inlined_call_operand.vmem [shape: bf16[32,32], index: 5, kind: input, shape index: {}]   ;;  %s11747_s6 = inlined_call_operand.vmem [shape: f32[1,32], index: 6, kind: input, shape index: {}]   ;;  %s11748_s7 = inlined_call_operand.vmem [shape: f32[4,1,64,64], index: 7, kind: input, shape index: {}]   ;;  %s11749_s8 = inlined_call_operand.vmem [shape: f32[2,4,64,32], index: 8, kind: output, shape index: {}]  }
   0x1 LB: > { %s6107_s28 = sadd.s32 4294967295, %s7190_s27   ;;  %p6111_p0 = scmp.ge.s32.totalorder %s7190_s27, 1  ;;  %s7190_s27 = sphi %s7252_s27, %s18_s27  }
   0x2   : > { %p262_p1 = scmp.lt.s32.totalorder %s7190_s27, 3 }
   0x4   : > { %p263_p2 = pnand %p6111_p0, %p262_p1 }
   0x6   : > { %266 = sbr.rel (%p263_p2) target bundleno = 3819 (0xeeb), region = 52 }
   0xb   : > { %p296_p3 = scmp.lt.s32.totalorder %s6107_s28, 1  ;;  %vm339_vm0 = vcmask 261120   ;;  %v7192_v62 = vmov 32.0   ;;  %s7193_s21 = smov 96  }
   0xc   : > { %6601 = vrcp.f32 %v7192_v62  ;;  %s7194_s22 = smov 64   ;;  %s7195_s25 = smov 88  }
   0xd   : > { %s12257_s28 = smov (!%p296_p3, %s6107_s28), 1  ;;  %s7196_s9 = smov 120  }
   0xe   : > { %s6318_s29 = sshll.u32 %s12257_s28, 8  ;;  %s7198_s11 = smov 80  }
   0xf   : > { %s7268_s10 = scalar_lea.vmem %s11741_s0, %s6318_s29  ;;  %s7199_s12 = smov 112  }
  0x10   : > { %v7271_v0 = vld [vmem:[%s7268_s10 + $0x20] sm:$0xff]  ;;  %v7281_v4 = vld [vmem:[%s7268_s10 + $0x10] sm:$0xff]  ;;  %v7286_v6 = vld [vmem:[%s7268_s10 + $0x28] sm:$0xff]  ;;  %s7204_s14 = smov 8   ;;  %s7205_s15 = smov 24  }
  0x11   : > { %v7274_v1 = vld [vmem:[%s7268_s10] sm:$0xff]  ;;  %v352_v2 = vsel %vm339_vm0, %v7271_v0, 0.0  ;;  %v346_v5 = vsel %vm339_vm0, %v7281_v4, 0.0  ;;  %v7289_v7 = vld [vmem:[%s7268_s10 + $0x8] sm:$0xff]  ;;  %v7292_v8 = vld [vmem:[%s7268_s10 + $0x18] sm:$0xff]  ;;  %v355_v9 = vsel %vm339_vm0, %v7286_v6, 0.0 }
  0x12   : > { %v340_v3 = vsel %vm339_vm0, %v7274_v1, 0.0  ;;  %353 = vadd.xlane.f32.xlu2 %v352_v2  ;;  %347 = vadd.xlane.f32.xlu1 %v346_v5  ;;  %v343_v10 = vsel %vm339_vm0, %v7289_v7, 0.0  ;;  %v349_v11 = vsel %vm339_vm0, %v7292_v8, 0.0  ;;  %v7301_v12 = vld [vmem:[%s7268_s10 + $0x30] sm:$0xff]  ;;  %v7304_v13 = vld [vmem:[%s7268_s10 + $0x38] sm:$0xff]  ;;  %v7307_v14 = vld [vmem:[%s7268_s10 + $0x60] sm:$0xff]  ;;  %v6602_v63 = vpop.eup %6601 }
  0x13   : > { %341 = vadd.xlane.f32.xlu0 %v340_v3  ;;  %v358_v15 = vsel %vm339_vm0, %v7301_v12, 0.0  ;;  %v361_v16 = vsel %vm339_vm0, %v7304_v13, 0.0  ;;  %v376_v17 = vsel %vm339_vm0, %v7307_v14, 0.0  ;;  %v7316_v18 = vld [vmem:[%s7268_s10 + $0x68] sm:$0xff]  ;;  %v7322_v20 = vld [vmem:[%s7268_s10 + $0x70] sm:$0xff]  ;;  %v7331_v24 = vld [vmem:[%s7268_s10 + $0x40] sm:$0xff]  ;;  %vm441_vm1 = vweird.f32 %v6602_v63 }
  0x14   : > { %v7319_v19 = vld [vmem:[%s7268_s10 + $0x48] sm:$0xff]  ;;  %v379_v21 = vsel %vm339_vm0, %v7316_v18, 0.0  ;;  %v382_v23 = vsel %vm339_vm0, %v7322_v20, 0.0  ;;  %v7334_v25 = vld [vmem:[%s7268_s10 + $0x58] sm:$0xff]  ;;  %v7337_v26 = vld [vmem:[%s7268_s10 + $0xa0] sm:$0xff]  ;;  %v364_v27 = vsel %vm339_vm0, %v7331_v24, 0.0 }
  0x15   : > { %v367_v22 = vsel %vm339_vm0, %v7319_v19, 0.0  ;;  %v373_v28 = vsel %vm339_vm0, %v7334_v25, 0.0  ;;  %v400_v29 = vsel %vm339_vm0, %v7337_v26, 0.0  ;;  %v7346_v30 = vld [vmem:[%s7268_s10 + $0x78] sm:$0xff]  ;;  %v7349_v31 = vld [vmem:[%s7268_s10 + $0xc0] sm:$0xff]  ;;  %v7352_v32 = vld [vmem:[%s7268_s10 + $0xc8] sm:$0xff] }
  0x16   : > { %v385_v33 = vsel %vm339_vm0, %v7346_v30, 0.0  ;;  %v412_v34 = vsel %vm339_vm0, %v7349_v31, 0.0  ;;  %v415_v35 = vsel %vm339_vm0, %v7352_v32, 0.0  ;;  %v7361_v36 = vld [vmem:[%s7268_s10 + $0x50] sm:$0xff]  ;;  %v7367_v38 = vld [vmem:[%s7268_s10 + $0xb8] sm:$0xff]  ;;  %v7376_v42 = vld [vmem:[%s7268_s10 + $0xa8] sm:$0xff] }
  0x17   : > { %v7364_v37 = vld [vmem:[%s7268_s10 + $0xb0] sm:$0xff]  ;;  %v370_v39 = vsel %vm339_vm0, %v7361_v36, 0.0  ;;  %v409_v41 = vsel %vm339_vm0, %v7367_v38, 0.0  ;;  %v7379_v43 = vld [vmem:[%s7268_s10 + $0x88] sm:$0xff]  ;;  %v403_v45 = vsel %vm339_vm0, %v7376_v42, 0.0  ;;  %v7391_v48 = vld [vmem:[%s7268_s10 + $0x80] sm:$0xff] }
  0x18   : > { %v406_v40 = vsel %vm339_vm0, %v7364_v37, 0.0  ;;  %v7382_v44 = vld [vmem:[%s7268_s10 + $0xd0] sm:$0xff]  ;;  %v391_v46 = vsel %vm339_vm0, %v7379_v43, 0.0  ;;  %v7394_v49 = vld [vmem:[%s7268_s10 + $0xe0] sm:$0xff]  ;;  %v388_v51 = vsel %vm339_vm0, %v7391_v48, 0.0  ;;  %v7406_v54 = vld [vmem:[%s7268_s10 + $0xd8] sm:$0xff] }
  0x19   : > { %v418_v47 = vsel %vm339_vm0, %v7382_v44, 0.0  ;;  %v7397_v50 = vld [vmem:[%s7268_s10 + $0x90] sm:$0xff]  ;;  %v424_v52 = vsel %vm339_vm0, %v7394_v49, 0.0  ;;  %v7409_v55 = vld [vmem:[%s7268_s10 + $0xe8] sm:$0xff]  ;;  %v421_v56 = vsel %vm339_vm0, %v7406_v54, 0.0  ;;  %v7416_v58 = vld [vmem:[%s7268_s10 + $0x98] sm:$0xff] }
  0x1a   : > { %356 = vadd.xlane.f32.xlu2 %v355_v9  ;;  %350 = vadd.xlane.f32.xlu1 %v349_v11  ;;  %v394_v53 = vsel %vm339_vm0, %v7397_v50, 0.0  ;;  %v427_v57 = vsel %vm339_vm0, %v7409_v55, 0.0  ;;  %v397_v59 = vsel %vm339_vm0, %v7416_v58, 0.0  ;;  %v7421_v60 = vld [vmem:[%s7268_s10 + $0xf0] sm:$0xff]  ;;  %v437_v2 = vmul.f32 32.0, %v6602_v63  ;;  %s7206_s16 = smov 16  }
  0x1b   : > { %344 = vadd.xlane.f32.xlu0 %v343_v10  ;;  %v430_v61 = vsel %vm339_vm0, %v7421_v60, 0.0 }
  0x1c   : > { %v438_v3 = vsub.f32 1.0, %v437_v2 }
  0x1e   : > { %v439_v5 = vmul.f32 %v6602_v63, %v438_v3 }
  0x20   : > { %v440_v9 = vadd.f32 %v6602_v63, %v439_v5 }
  0x22   : > { %359 = vadd.xlane.f32.xlu2 %v358_v15  ;;  %377 = vadd.xlane.f32.xlu1 %v376_v17  ;;  %v7425_v10 = vsel %vm441_vm1, %v6602_v63, %v440_v9 }
  0x23   : > { %362 = vadd.xlane.f32.xlu0 %v361_v16 }
  0x2a   : > { %380 = vadd.xlane.f32.xlu2 %v379_v21  ;;  %383 = vadd.xlane.f32.xlu1 %v382_v23 }
  0x2b   : > { %368 = vadd.xlane.f32.xlu0 %v367_v22 }
  0x32   : > { %365 = vadd.xlane.f32.xlu2 %v364_v27  ;;  %401 = vadd.xlane.f32.xlu1 %v400_v29 }
  0x33   : > { %374 = vadd.xlane.f32.xlu0 %v373_v28 }
  0x3a   : > { %386 = vadd.xlane.f32.xlu2 %v385_v33  ;;  %416 = vadd.xlane.f32.xlu1 %v415_v35 }
  0x3b   : > { %413 = vadd.xlane.f32.xlu0 %v412_v34 }
  0x42   : > { %371 = vadd.xlane.f32.xlu2 %v370_v39  ;;  %410 = vadd.xlane.f32.xlu1 %v409_v41 }
  0x43   : > { %407 = vadd.xlane.f32.xlu0 %v406_v40 }
  0x4a   : > { %404 = vadd.xlane.f32.xlu2 %v403_v45  ;;  %419 = vadd.xlane.f32.xlu1 %v418_v47 }
  0x4b   : > { %392 = vadd.xlane.f32.xlu0 %v391_v46 }
  0x52   : > { %389 = vadd.xlane.f32.xlu2 %v388_v51  ;;  %395 = vadd.xlane.f32.xlu1 %v394_v53 }
  0x53   : > { %425 = vadd.xlane.f32.xlu0 %v424_v52 }
  0x5a   : > { %422 = vadd.xlane.f32.xlu2 %v421_v56  ;;  %428 = vadd.xlane.f32.xlu1 %v427_v57 }
  0x62   : > { %398 = vadd.xlane.f32.xlu2 %v397_v59 }
  0x6a   : > { %431 = vadd.xlane.f32.xlu2 %v430_v61 }
  0x85   : > { %v354_v11 = vpop.xlane.xlu2 %353  ;;  %v348_v17 = vpop.xlane.xlu1 %347 }
  0x86   : > { %v342_v15 = vpop.xlane.xlu0 %341  ;;  %v445_v21 = vmul.f32 %v7425_v10, %v348_v17  ;;  %v447_v40 = vmul.f32 %v7425_v10, %v354_v11 }
  0x87   : > { %v443_v16 = vmul.f32 %v7425_v10, %v342_v15 }
  0x88   : > { %v7433_v23 = vsub.f32 %v7281_v4, %v445_v21  ;;  %v7453_v47 = vsub.f32 %v7271_v0, %v447_v40 }
  0x89   : > { %v7430_v22 = vsub.f32 %v7274_v1, %v443_v16 }
  0x8a   : > { %v509_v39 = vmul.f32 %v7433_v23, %v7433_v23  ;;  %v511_v0 = vmul.f32 %v7453_v47, %v7453_v47 }
  0x8b   : > { %v507_v27 = vmul.f32 %v7430_v22, %v7430_v22 }
  0x8c   : > { %v545_v41 = vsel %vm339_vm0, %v509_v39, 0.0  ;;  %v551_v5 = vsel %vm339_vm0, %v511_v0, 0.0 }
  0x8d   : > { %v539_v28 = vsel %vm339_vm0, %v507_v27, 0.0  ;;  %v357_v29 = vpop.xlane.xlu2 %356  ;;  %v351_v35 = vpop.xlane.xlu1 %350 }
  0x8e   : > { %540 = vadd.xlane.f32.xlu0 %v539_v28  ;;  %v345_v33 = vpop.xlane.xlu0 %344  ;;  %v446_v1 = vmul.f32 %v7425_v10, %v351_v35  ;;  %v448_v61 = vmul.f32 %v7425_v10, %v357_v29 }
  0x8f   : > { %v444_v34 = vmul.f32 %v7425_v10, %v345_v33 }
  0x90   : > { %v7450_v46 = vsub.f32 %v7292_v8, %v446_v1 }
  0x91   : > { %v7444_v4 = vsub.f32 %v7289_v7, %v444_v34 }
  0x92   : > { %v510_v59 = vmul.f32 %v7450_v46, %v7450_v46 }
  0x93   : > { %v508_v45 = vmul.f32 %v7444_v4, %v7444_v4 }
  0x94   : > { %v548_v2 = vsel %vm339_vm0, %v510_v59, 0.0 }
  0x95   : > { %v542_v51 = vsel %vm339_vm0, %v508_v45, 0.0  ;;  %v360_v52 = vpop.xlane.xlu2 %359  ;;  %v378_v56 = vpop.xlane.xlu1 %377 }
  0x96   : > { %546 = vadd.xlane.f32.xlu0 %v545_v41  ;;  %543 = vadd.xlane.f32.xlu1 %v542_v51  ;;  %v363_v53 = vpop.xlane.xlu0 %362  ;;  %v449_v7 = vmul.f32 %v7425_v10, %v360_v52  ;;  %v455_v17 = vmul.f32 %v7425_v10, %v378_v56 }
  0x97   : > { %v450_v57 = vmul.f32 %v7425_v10, %v363_v53 }
  0x98   : > { %v7461_v8 = vsub.f32 %v7301_v12, %v449_v7  ;;  %v7475_v12 = vsub.f32 %v7286_v6, %v448_v61  ;;  %v7494_v34 = vsub.f32 %v7307_v14, %v455_v17 }
  0x99   : > { %v7469_v63 = vsub.f32 %v7304_v13, %v450_v57 }
  0x9a   : > { %v513_v62 = vmul.f32 %v7461_v8, %v7461_v8  ;;  %v512_v6 = vmul.f32 %v7475_v12, %v7475_v12  ;;  %v519_v45 = vmul.f32 %v7494_v34, %v7494_v34 }
  0x9b   : > { %v514_v13 = vmul.f32 %v7469_v63, %v7469_v63 }
  0x9c   : > { %v557_v3 = vsel %vm339_vm0, %v513_v62, 0.0  ;;  %v575_v7 = vsel %vm339_vm0, %v519_v45, 0.0 }
  0x9d   : > { %558 = vadd.xlane.f32.xlu2 %v557_v3  ;;  %v381_v9 = vpop.xlane.xlu2 %380  ;;  %v384_v16 = vpop.xlane.xlu1 %383  ;;  %v560_v33 = vsel %vm339_vm0, %v514_v13, 0.0 }
  0x9e   : > { %552 = vadd.xlane.f32.xlu0 %v551_v5  ;;  %v369_v11 = vpop.xlane.xlu0 %368  ;;  %v456_v15 = vmul.f32 %v7425_v10, %v381_v9  ;;  %549 = vadd.xlane.f32.xlu1 %v548_v2  ;;  %v457_v21 = vmul.f32 %v7425_v10, %v384_v16 }
  0x9f   : > { %v452_v14 = vmul.f32 %v7425_v10, %v369_v11 }
  0xa0   : > { %v7483_v27 = vsub.f32 %v7316_v18, %v456_v15  ;;  %v7490_v29 = vsub.f32 %v7322_v20, %v457_v21  ;;  %v554_v18 = vsel %vm339_vm0, %v512_v6, 0.0 }
  0xa1   : > { %v7512_v56 = vsub.f32 %v7319_v19, %v452_v14 }
  0xa2   : > { %v520_v28 = vmul.f32 %v7483_v27, %v7483_v27  ;;  %v521_v40 = vmul.f32 %v7490_v29, %v7490_v29 }
  0xa3   : > { %11849 = vst [vmem:[#allocation3_spill] sm:$0xff] %v7512_v56  ;;  %v516_v2 = vmul.f32 %v7512_v56, %v7512_v56 }
  0xa4   : > { %v578_v35 = vsel %vm339_vm0, %v520_v28, 0.0  ;;  %v581_v52 = vsel %vm339_vm0, %v521_v40, 0.0 }
  0xa5   : > { %579 = vadd.xlane.f32.xlu2 %v578_v35  ;;  %v366_v39 = vpop.xlane.xlu2 %365  ;;  %v402_v20 = vpop.xlane.xlu1 %401  ;;  %v566_v15 = vsel %vm339_vm0, %v516_v2, 0.0 }
  0xa6   : > { %561 = vadd.xlane.f32.xlu0 %v560_v33  ;;  %v451_v1 = vmul.f32 %v7425_v10, %v366_v39  ;;  %555 = vadd.xlane.f32.xlu1 %v554_v18  ;;  %v375_v41 = vpop.xlane.xlu0 %374  ;;  %v463_v62 = vmul.f32 %v7425_v10, %v402_v20 }
  0xa8   : > { %v7505_v51 = vsub.f32 %v7331_v24, %v451_v1  ;;  %v454_v24 = vmul.f32 %v7425_v10, %v375_v41  ;;  %v7529_v11 = vsub.f32 %v7337_v26, %v463_v62 }
  0xaa   : > { %11848 = vst [vmem:[#allocation2_spill] sm:$0xff] %v7505_v51  ;;  %v515_v53 = vmul.f32 %v7505_v51, %v7505_v51  ;;  %v7526_v9 = vsub.f32 %v7334_v25, %v454_v24  ;;  %v527_v26 = vmul.f32 %v7529_v11, %v7529_v11 }
  0xac   : > { %v563_v57 = vsel %vm339_vm0, %v515_v53, 0.0  ;;  %11850 = vst [vmem:[#allocation4_spill] sm:$0xff] %v7526_v9  ;;  %v599_v40 = vsel %vm339_vm0, %v527_v26, 0.0 }
  0xad   : > { %v387_v59 = vpop.xlane.xlu2 %386  ;;  %582 = vadd.xlane.f32.xlu2 %v581_v52  ;;  %v417_v61 = vpop.xlane.xlu1 %416 }
  0xae   : > { %564 = vadd.xlane.f32.xlu0 %v563_v57  ;;  %v458_v0 = vmul.f32 %v7425_v10, %v387_v59  ;;  %576 = vadd.xlane.f32.xlu1 %v575_v7  ;;  %v414_v19 = vpop.xlane.xlu0 %413  ;;  %v468_v25 = vmul.f32 %v7425_v10, %v417_v61 }
  0xaf   : > { %v467_v21 = vmul.f32 %v7425_v10, %v414_v19 }
  0xb0   : > { %v7521_v3 = vsub.f32 %v7346_v30, %v458_v0  ;;  %v518_v30 = vmul.f32 %v7526_v9, %v7526_v9  ;;  %v7550_v1 = vsub.f32 %v7352_v32, %v468_v25 }
  0xb1   : > { %v7547_v39 = vsub.f32 %v7349_v31, %v467_v21 }
  0xb2   : > { %v522_v5 = vmul.f32 %v7521_v3, %v7521_v3  ;;  %v572_v35 = vsel %vm339_vm0, %v518_v30, 0.0  ;;  %11852 = vst [vmem:[#allocation6_spill] sm:$0xff] %v7550_v1  ;;  %v532_v14 = vmul.f32 %v7550_v1, %v7550_v1 }
  0xb3   : > { %v531_v31 = vmul.f32 %v7547_v39, %v7547_v39 }
  0xb4   : > { %v584_v16 = vsel %vm339_vm0, %v522_v5, 0.0  ;;  %v614_v0 = vsel %vm339_vm0, %v532_v14, 0.0  ;;  %v7580_v5 = vld [vmem:[%s7268_s10 + $0xf8] sm:$0xff]  ;;  %s7197_s10 = smov 56  }
  0xb5   : > { %v372_v13 = vpop.xlane.xlu2 %371  ;;  %v411_v6 = vpop.xlane.xlu1 %410  ;;  %v611_v59 = vsel %vm339_vm0, %v531_v31, 0.0  ;;  %v433_v30 = vsel %vm339_vm0, %v7580_v5, 0.0 }
  0xb6   : > { %585 = vadd.xlane.f32.xlu0 %v584_v16  ;;  %v453_v17 = vmul.f32 %v7425_v10, %v372_v13  ;;  %567 = vadd.xlane.f32.xlu1 %v566_v15  ;;  %v408_v18 = vpop.xlane.xlu0 %407  ;;  %v466_v45 = vmul.f32 %v7425_v10, %v411_v6 }
  0xb7   : > { %v465_v32 = vmul.f32 %v7425_v10, %v408_v18 }
  0xb8   : > { %v7541_v28 = vsub.f32 %v7361_v36, %v453_v17  ;;  %v7567_v57 = vsub.f32 %v7367_v38, %v466_v45 }
  0xb9   : > { %v7572_v24 = vsub.f32 %v7364_v37, %v465_v32 }
  0xba   : > { %11851 = vst [vmem:[#allocation5_spill] sm:$0xff] %v7541_v28  ;;  %v517_v33 = vmul.f32 %v7541_v28, %v7541_v28  ;;  %v530_v38 = vmul.f32 %v7567_v57, %v7567_v57 }
  0xbb   : > { %11853 = vst [vmem:[#allocation7_spill] sm:$0xff] %v7567_v57  ;;  %v529_v37 = vmul.f32 %v7572_v24, %v7572_v24 }
  0xbc   : > { %v569_v20 = vsel %vm339_vm0, %v517_v33, 0.0  ;;  %11854 = vst [vmem:[#allocation8_spill] sm:$0xff] %v7572_v24  ;;  %v608_v13 = vsel %vm339_vm0, %v530_v38, 0.0 }
  0xbd   : > { %v405_v41 = vpop.xlane.xlu2 %404  ;;  %570 = vadd.xlane.f32.xlu2 %v569_v20  ;;  %v420_v53 = vpop.xlane.xlu1 %419  ;;  %v605_v6 = vsel %vm339_vm0, %v529_v37, 0.0 }
  0xbe   : > { %573 = vadd.xlane.f32.xlu0 %v572_v35  ;;  %v464_v36 = vmul.f32 %v7425_v10, %v405_v41  ;;  %600 = vadd.xlane.f32.xlu1 %v599_v40  ;;  %v393_v62 = vpop.xlane.xlu0 %392  ;;  %v469_v19 = vmul.f32 %v7425_v10, %v420_v53 }
  0xbf   : > { %v460_v15 = vmul.f32 %v7425_v10, %v393_v62 }
  0xc0   : > { %v7562_v52 = vsub.f32 %v7376_v42, %v464_v36  ;;  %v7590_v17 = vsub.f32 %v7382_v44, %v469_v19 }
  0xc1   : > { %v7596_v25 = vsub.f32 %v7379_v43, %v460_v15 }
  0xc2   : > { %v528_v7 = vmul.f32 %v7562_v52, %v7562_v52  ;;  %11856 = vst [vmem:[#allocation10_spill] sm:$0xff] %v7590_v17  ;;  %v533_v33 = vmul.f32 %v7590_v17, %v7590_v17 }
  0xc3   : > { %11857 = vst [vmem:[#allocation11_spill] sm:$0xff] %v7596_v25  ;;  %v524_v18 = vmul.f32 %v7596_v25, %v7596_v25 }
  0xc4   : > { %v602_v61 = vsel %vm339_vm0, %v528_v7, 0.0  ;;  %v617_v40 = vsel %vm339_vm0, %v533_v33, 0.0  ;;  %v6320_v33 = vld [vmem:[%s11744_s3] sm:$0xff] }
  0xc5   : > { %v390_v42 = vpop.xlane.xlu2 %389  ;;  %603 = vadd.xlane.f32.xlu2 %v602_v61  ;;  %v396_v21 = vpop.xlane.xlu1 %395  ;;  %v590_v36 = vsel %vm339_vm0, %v524_v18, 0.0 }
  0xc6   : > { %612 = vadd.xlane.f32.xlu0 %v611_v59  ;;  %v459_v2 = vmul.f32 %v7425_v10, %v390_v42  ;;  %615 = vadd.xlane.f32.xlu1 %v614_v0  ;;  %v461_v35 = vmul.f32 %v7425_v10, %v396_v21  ;;  %v426_v45 = vpop.xlane.xlu0 %425 }
  0xc7   : > { %v471_v53 = vmul.f32 %v7425_v10, %v426_v45 }
  0xc8   : > { %v7586_v16 = vsub.f32 %v7391_v48, %v459_v2  ;;  %v7612_v41 = vsub.f32 %v7397_v50, %v461_v35 }
  0xc9   : > { %v7629_v62 = vsub.f32 %v7394_v49, %v471_v53 }
  0xca   : > { %11855 = vst [vmem:[#allocation9_spill] sm:$0xff] %v7586_v16  ;;  %v523_v44 = vmul.f32 %v7586_v16, %v7586_v16  ;;  %v525_v50 = vmul.f32 %v7612_v41, %v7612_v41 }
  0xcb   : > { %11859 = vst [vmem:[#allocation13_spill] sm:$0xff] %v7612_v41  ;;  %v535_v37 = vmul.f32 %v7629_v62, %v7629_v62 }
  0xcc   : > { %v587_v20 = vsel %vm339_vm0, %v523_v44, 0.0  ;;  %11861 = vst [vmem:[#allocation15_spill] sm:$0xff] %v7629_v62  ;;  %v593_v2 = vsel %vm339_vm0, %v525_v50, 0.0 }
  0xcd   : > { %v423_v26 = vpop.xlane.xlu2 %422  ;;  %609 = vadd.xlane.f32.xlu2 %v608_v13  ;;  %v429_v31 = vpop.xlane.xlu1 %428  ;;  %v623_v13 = vsel %vm339_vm0, %v535_v37, 0.0 }
  0xce   : > { %434 = vadd.xlane.f32.xlu0 %v433_v30  ;;  %v470_v48 = vmul.f32 %v7425_v10, %v423_v26  ;;  %606 = vadd.xlane.f32.xlu1 %v605_v6  ;;  %v472_v7 = vmul.f32 %v7425_v10, %v429_v31 }
  0xd0   : > { %v7607_v43 = vsub.f32 %v7406_v54, %v470_v48  ;;  %v7632_v42 = vsub.f32 %v7409_v55, %v472_v7 }
  0xd2   : > { %11858 = vst [vmem:[#allocation12_spill] sm:$0xff] %v7607_v43  ;;  %v534_v54 = vmul.f32 %v7607_v43, %v7607_v43  ;;  %v536_v49 = vmul.f32 %v7632_v42, %v7632_v42 }
  0xd3   : > { %11862 = vst [vmem:[#allocation16_spill] sm:$0xff] %v7632_v42 }
  0xd4   : > { %v620_v61 = vsel %vm339_vm0, %v534_v54, 0.0  ;;  %v626_v30 = vsel %vm339_vm0, %v536_v49, 0.0 }
  0xd5   : > { %v399_v14 = vpop.xlane.xlu2 %398  ;;  %618 = vadd.xlane.f32.xlu2 %v617_v40 }
  0xd6   : > { %588 = vadd.xlane.f32.xlu0 %v587_v20  ;;  %v462_v32 = vmul.f32 %v7425_v10, %v399_v14  ;;  %591 = vadd.xlane.f32.xlu1 %v590_v36 }
  0xd8   : > { %v7623_v59 = vsub.f32 %v7416_v58, %v462_v32 }
  0xda   : > { %11860 = vst [vmem:[#allocation14_spill] sm:$0xff] %v7623_v59  ;;  %v526_v0 = vmul.f32 %v7623_v59, %v7623_v59 }
  0xdc   : > { %v596_v38 = vsel %vm339_vm0, %v526_v0, 0.0 }
  0xdd   : > { %v432_v19 = vpop.xlane.xlu2 %431  ;;  %597 = vadd.xlane.f32.xlu2 %v596_v38 }
  0xde   : > { %621 = vadd.xlane.f32.xlu0 %v620_v61  ;;  %v473_v58 = vmul.f32 %v7425_v10, %v432_v19  ;;  %594 = vadd.xlane.f32.xlu1 %v593_v2 }
  0xe0   : > { %v7642_v15 = vsub.f32 %v7421_v60, %v473_v58  ;;  %v6321_v60 = vld [vmem:[%s11744_s3 + $0x8] sm:$0xff] }
  0xe1   : > { %1213 = vmatpush.bf16.msra.mxu0 %v6321_v60  ;;  %6324 = vmatpush.bf16.msra.mxu1 %v6321_v60 }
  0xe2   : > { %11863 = vst [vmem:[#allocation17_spill] sm:$0xff] %v7642_v15  ;;  %v537_v55 = vmul.f32 %v7642_v15, %v7642_v15  ;;  %6325 = vmatpush.bf16.msra.mxu2 %v6321_v60  ;;  %6326 = vmatpush.bf16.msra.mxu3 %v6321_v60 }
  0xe4   : > { %v629_v21 = vsel %vm339_vm0, %v537_v55, 0.0 }
  0xe5   : > { %630 = vadd.xlane.f32.xlu2 %v629_v21  ;;  %1214 = vmatpush.bf16.msra.mxu0 %v6320_v33 }
  0xe6   : > { %624 = vadd.xlane.f32.xlu0 %v623_v13  ;;  %627 = vadd.xlane.f32.xlu1 %v626_v30 }
  0xe7   : > { %6327 = vmatpush.bf16.msra.mxu1 %v6320_v33  ;;  %6328 = vmatpush.bf16.msra.mxu2 %v6320_v33 }
  0xe8   : > { %6329 = vmatpush.bf16.msra.mxu3 %v6320_v33 }
 0x101   : > { %v541_v6 = vpop.xlane.xlu0 %540 }
 0x102   : > { %v635_v26 = vmul.f32 %v541_v6, %v7425_v10 }
 0x104   : > { %v667_v48 = vadd.f32 1e-05, %v635_v26 }
 0x106   : > { %6603 = vrsqrt.f32 %v667_v48  ;;  %vm705_vm3 = vweird.f32 %v667_v48 }
 0x109   : > { %v544_v44 = vpop.xlane.xlu1 %543  ;;  %v547_v35 = vpop.xlane.xlu0 %546 }
 0x10a   : > { %v636_v18 = vmul.f32 %v544_v44, %v7425_v10  ;;  %v637_v40 = vmul.f32 %v547_v35, %v7425_v10 }
 0x10c   : > { %v7658_v20 = vpop.eup %6603  ;;  %v668_v36 = vadd.f32 1e-05, %v636_v18  ;;  %v7660_v45 = vadd.f32 1e-05, %v637_v40 }
 0x10d   : > { %v700_v31 = vmul.f32 %v7658_v20, %v667_v48  ;;  %vm706_vm2 = vweird.f32 %v7658_v20 }
 0x10e   : > { %6605 = vrsqrt.f32 %v668_v36  ;;  %vm7704_vm4 = vmor %vm705_vm3, %vm706_vm2  ;;  %vm715_vm6 = vweird.f32 %v668_v36  ;;  %vm725_vm9 = vweird.f32 %v7660_v45 }
 0x10f   : > { %6607 = vrsqrt.f32 %v7660_v45  ;;  %v701_v14 = vmul.f32 %v7658_v20, %v700_v31 }
 0x110   : > { %v559_v32 = vpop.xlane.xlu2 %558 }
 0x111   : > { %v553_v54 = vpop.xlane.xlu0 %552  ;;  %v641_v53 = vmul.f32 %v559_v32, %v7425_v10  ;;  %v550_v7 = vpop.xlane.xlu1 %549  ;;  %v702_v2 = vmul.f32 0.5, %v701_v14 }
 0x112   : > { %v639_v50 = vmul.f32 %v553_v54, %v7425_v10  ;;  %v638_v0 = vmul.f32 %v550_v7, %v7425_v10 }
 0x113   : > { %v7670_v38 = vadd.f32 1e-05, %v641_v53  ;;  %v703_v30 = vsub.f32 1.5, %v702_v2 }
 0x114   : > { %v7668_v61 = vpop.eup %6605  ;;  %v7672_v19 = vadd.f32 1e-05, %v639_v50  ;;  %v7677_v49 = vadd.f32 1e-05, %v638_v0 }
 0x115   : > { %v7674_v58 = vpop.eup %6607  ;;  %v710_v37 = vmul.f32 %v7668_v61, %v668_v36  ;;  %6609 = vrsqrt.f32 %v7670_v38  ;;  %v704_v40 = vmul.f32 %v7658_v20, %v703_v30  ;;  %vm716_vm5 = vweird.f32 %v7668_v61 }
 0x116   : > { %v720_v13 = vmul.f32 %v7674_v58, %v7660_v45  ;;  %6611 = vrsqrt.f32 %v7677_v49  ;;  %vm7725_vm7 = vmor %vm715_vm6, %vm716_vm5  ;;  %vm726_vm8 = vweird.f32 %v7674_v58  ;;  %vm765_vm10 = vweird.f32 %v7670_v38 }
 0x117   : > { %v711_v55 = vmul.f32 %v7668_v61, %v710_v37  ;;  %6613 = vrsqrt.f32 %v7672_v19  ;;  %v708_v48 = vsel %vm7704_vm4, %v7658_v20, %v704_v40  ;;  %vm735_vm11 = vweird.f32 %v7677_v49  ;;  %vm7772_vm12 = vmor %vm725_vm9, %vm726_vm8 }
 0x118   : > { %v580_v6 = vpop.xlane.xlu2 %579  ;;  %v721_v44 = vmul.f32 %v7674_v58, %v720_v13  ;;  %v1019_v36 = vmul.f32 %v708_v48, %v7430_v22  ;;  %vm745_vm13 = vweird.f32 %v7672_v19 }
 0x119   : > { %v712_v21 = vmul.f32 0.5, %v711_v55  ;;  %v562_v26 = vpop.xlane.xlu0 %561  ;;  %v648_v60 = vmul.f32 %v580_v6, %v7425_v10  ;;  %v556_v33 = vpop.xlane.xlu1 %555 }
 0x11a   : > { %v640_v35 = vmul.f32 %v556_v33, %v7425_v10  ;;  %v642_v32 = vmul.f32 %v562_v26, %v7425_v10  ;;  %v722_v2 = vmul.f32 0.5, %v721_v44 }
 0x11b   : > { %v7689_v18 = vpop.eup %6609  ;;  %v713_v31 = vsub.f32 1.5, %v712_v21  ;;  %v7692_v14 = vadd.f32 1e-05, %v648_v60 }
 0x11c   : > { %v7695_v54 = vpop.eup %6611  ;;  %v760_v7 = vmul.f32 %v7689_v18, %v7670_v38  ;;  %v7709_v37 = vadd.f32 1e-05, %v640_v35  ;;  %v7716_v30 = vadd.f32 1e-05, %v642_v32  ;;  %v723_v40 = vsub.f32 1.5, %v722_v2 }
 0x11d   : > { %v7697_v53 = vpop.eup %6613  ;;  %v730_v50 = vmul.f32 %v7695_v54, %v7677_v49  ;;  %6615 = vrsqrt.f32 %v7692_v14  ;;  %v714_v55 = vmul.f32 %v7668_v61, %v713_v31  ;;  %v7735_v32 = vld [vmem:[%s11742_s1] ss:$0 sm:$0xff]  ;;  %vm736_vm14 = vweird.f32 %v7695_v54 }
 0x11e   : > { %v740_v21 = vmul.f32 %v7697_v53, %v7672_v19  ;;  %v761_v60 = vmul.f32 %v7689_v18, %v760_v7  ;;  %6617 = vrsqrt.f32 %v7709_v37  ;;  %vm766_vm15 = vweird.f32 %v7689_v18  ;;  %vm7803_vm1 = vmor %vm735_vm11, %vm736_vm14 }
 0x11f   : > { %v731_v13 = vmul.f32 %v7695_v54, %v730_v50  ;;  %v718_v50 = vsel %vm7725_vm7, %v7668_v61, %v714_v55  ;;  %6619 = vrsqrt.f32 %v7716_v30  ;;  %v1055_v61 = vmul.f32 %v7735_v32, %v1019_v36  ;;  %v7758_v55 = vld [vmem:[%s11743_s2] ss:$0 sm:$0xff]  ;;  %vm7823_vm4 = vmor %vm765_vm10, %vm766_vm15 }
 0x120   : > { %v583_v6 = vpop.xlane.xlu2 %582  ;;  %v762_v48 = vmul.f32 0.5, %v761_v60  ;;  %v1020_v20 = vmul.f32 %v718_v50, %v7444_v4  ;;  %vm746_vm2 = vweird.f32 %v7697_v53  ;;  %vm835_vm3 = vweird.f32 %v7692_v14 }
 0x121   : > { %v565_v26 = vpop.xlane.xlu0 %564  ;;  %v649_v33 = vmul.f32 %v583_v6, %v7425_v10  ;;  %v577_v44 = vpop.xlane.xlu1 %576  ;;  %v732_v0 = vmul.f32 0.5, %v731_v13  ;;  %v741_v6 = vmul.f32 %v7697_v53, %v740_v21  ;;  %v724_v13 = vmul.f32 %v7674_v58, %v723_v40  ;;  %vm7849_vm6 = vmor %vm745_vm13, %vm746_vm2 }
 0x122   : > { %v643_v35 = vmul.f32 %v565_v26, %v7425_v10  ;;  %v647_v31 = vmul.f32 %v577_v44, %v7425_v10  ;;  %v763_v36 = vsub.f32 1.5, %v762_v48  ;;  %v1056_v45 = vmul.f32 %v7735_v32, %v1020_v20 }
 0x123   : > { %v7737_v7 = vpop.eup %6615  ;;  %v7743_v2 = vadd.f32 1e-05, %v649_v33  ;;  %v733_v21 = vsub.f32 1.5, %v732_v0  ;;  %v742_v33 = vmul.f32 0.5, %v741_v6  ;;  %v1091_v0 = vadd.f32 %v7758_v55, %v1055_v61 }
 0x124   : > { %v830_v22 = vmul.f32 %v7737_v7, %v7692_v14  ;;  %v7749_v26 = vadd.f32 1e-05, %v647_v31  ;;  %v7751_v44 = vadd.f32 1e-05, %v643_v35  ;;  %v7762_v60 = vpop.eup %6617  ;;  %v728_v48 = vsel %vm7772_vm12, %v7674_v58, %v724_v13 }
 0x125   : > { %6621 = vrsqrt.f32 %v7743_v2  ;;  %v7767_v31 = vpop.eup %6619  ;;  %v734_v15 = vmul.f32 %v7695_v54, %v733_v21  ;;  %v743_v62 = vsub.f32 1.5, %v742_v33  ;;  %v750_v20 = vmul.f32 %v7762_v60, %v7709_v37 }
 0x126   : > { %v831_v35 = vmul.f32 %v7737_v7, %v830_v22  ;;  %6623 = vrsqrt.f32 %v7749_v26  ;;  %v770_v61 = vmul.f32 %v7767_v31, %v7716_v30  ;;  %v1092_v58 = vadd.f32 %v7758_v55, %v1056_v45 }
 0x127   : > { %6625 = vrsqrt.f32 %v7751_v44  ;;  %v738_v50 = vsel %vm7803_vm1, %v7695_v54, %v734_v15  ;;  %v751_v28 = vmul.f32 %v7762_v60, %v750_v20  ;;  %vm836_vm5 = vweird.f32 %v7737_v7 }
 0x128   : > { %v832_v59 = vmul.f32 0.5, %v831_v35  ;;  %v1123_v45 = vpack.c.bf16 %v1092_v58, %v1091_v0  ;;  %v771_v15 = vmul.f32 %v7767_v31, %v770_v61  ;;  %vm756_vm7 = vweird.f32 %v7762_v60  ;;  %vm7879_vm11 = vmor %vm835_vm3, %vm836_vm5 }
 0x129   : > { %v586_v4 = vpop.xlane.xlu0 %585  ;;  %v568_v40 = vpop.xlane.xlu1 %567  ;;  %vm776_vm8 = vweird.f32 %v7767_v31  ;;  %vm755_vm10 = vweird.f32 %v7709_v37  ;;  %vm775_vm12 = vweird.f32 %v7716_v30  ;;  %vm845_vm13 = vweird.f32 %v7743_v2 }
 0x12a   : > { %v644_v6 = vmul.f32 %v568_v40, %v7425_v10  ;;  %v650_v42 = vmul.f32 %v586_v4, %v7425_v10  ;;  %v7793_v40 = vmul.f32 %v7689_v18, %v763_v36  ;;  %v833_v9 = vsub.f32 1.5, %v832_v59  ;;  %6124 = vmatmul.msk.bf16.vlgmr.msra.gmra.mxu0 %vm339_vm0, %v1123_v45  ;;  %vm7946_vm3 = vmor %vm755_vm10, %vm756_vm7 }
 0x12b   : > { %v7780_v22 = vpop.eup %6621  ;;  %v752_v45 = vmul.f32 0.5, %v751_v28  ;;  %v772_v19 = vmul.f32 0.5, %v771_v15  ;;  %vm825_vm14 = vweird.f32 %v7749_v26  ;;  %vm785_vm2 = vweird.f32 %v7751_v44  ;;  %vm7961_vm5 = vmor %vm775_vm12, %vm776_vm8 }
 0x12c   : > { %v7797_v13 = vadd.f32 1e-05, %v644_v6  ;;  %v7799_v21 = vpop.eup %6623  ;;  %v840_v35 = vmul.f32 %v7780_v22, %v7743_v2  ;;  %v7811_v4 = vadd.f32 1e-05, %v650_v42  ;;  %v1021_v6 = vmul.f32 %v728_v48, %v7433_v23 }
 0x12d   : > { %v7813_v36 = vpop.eup %6625  ;;  %v820_v49 = vmul.f32 %v7799_v21, %v7749_v26  ;;  %v7828_v42 = vmul.f32 %v7697_v53, %v743_v62  ;;  %v1022_v48 = vmul.f32 %v738_v50, %v7450_v46  ;;  %v834_v50 = vmul.f32 %v7737_v7, %v833_v9 }
 0x12e   : > { %6627 = vrsqrt.f32 %v7797_v13  ;;  %v841_v62 = vmul.f32 %v7780_v22, %v840_v35  ;;  %v780_v0 = vmul.f32 %v7813_v36, %v7751_v44  ;;  %vm826_vm9 = vweird.f32 %v7799_v21 }
 0x12f   : > { %v821_v38 = vmul.f32 %v7799_v21, %v820_v49  ;;  %6629 = vrsqrt.f32 %v7811_v4  ;;  %v1058_v9 = vmul.f32 %v7735_v32, %v1022_v48  ;;  %v773_v14 = vsub.f32 1.5, %v772_v19  ;;  %vm7893_vm15 = vmor %vm825_vm14, %vm826_vm9 }
 0x130   : > { %v571_v54 = vpop.xlane.xlu2 %570  ;;  %v781_v23 = vmul.f32 %v7813_v36, %v780_v0  ;;  %v1057_v0 = vmul.f32 %v7735_v32, %v1021_v6  ;;  %v838_v6 = vsel %vm7879_vm11, %v7737_v7, %v834_v50  ;;  %vm846_vm1 = vweird.f32 %v7780_v22 }
 0x131   : > { %v574_v33 = vpop.xlane.xlu0 %573  ;;  %v601_v59 = vpop.xlane.xlu1 %600  ;;  %v822_v61 = vmul.f32 0.5, %v821_v38  ;;  %v645_v58 = vmul.f32 %v571_v54, %v7425_v10  ;;  %v1094_v57 = vadd.f32 %v7758_v55, %v1058_v9  ;;  %v7925_v9 = vmul.f32 %v7767_v31, %v773_v14  ;;  %vm7981_vm8 = vmor %vm845_vm13, %vm846_vm1 }
 0x132   : > { %v655_v35 = vmul.f32 %v601_v59, %v7425_v10  ;;  %v646_v49 = vmul.f32 %v574_v33, %v7425_v10  ;;  %v842_v33 = vmul.f32 0.5, %v841_v62  ;;  %v782_v17 = vmul.f32 0.5, %v781_v23 }
 0x133   : > { %v823_v38 = vsub.f32 1.5, %v822_v61  ;;  %v7864_v54 = vadd.f32 1e-05, %v645_v58  ;;  %v753_v61 = vsub.f32 1.5, %v752_v45  ;;  %v1032_v23 = vmul.f32 %v838_v6, %v7483_v27 }
 0x134   : > { %v7866_v59 = vadd.f32 1e-05, %v655_v35  ;;  %v7870_v46 = vadd.f32 1e-05, %v646_v49  ;;  %v7873_v28 = vpop.eup %6627  ;;  %v843_v43 = vsub.f32 1.5, %v842_v33  ;;  %vm786_vm7 = vweird.f32 %v7813_v36 }
 0x135   : > { %v824_v62 = vmul.f32 %v7799_v21, %v823_v38  ;;  %6631 = vrsqrt.f32 %v7864_v54  ;;  %v7889_v48 = vpop.eup %6629  ;;  %v790_v35 = vmul.f32 %v7873_v28, %v7797_v13  ;;  %v7916_v15 = vmul.f32 %v7762_v60, %v753_v61  ;;  %vm8011_vm12 = vmor %vm785_vm2, %vm786_vm7 }
 0x136   : > { %11876 = vst [vmem:[#allocation18_spill] sm:$0xff] %v7870_v46  ;;  %6633 = vrsqrt.f32 %v7866_v59  ;;  %v850_v19 = vmul.f32 %v7889_v48, %v7811_v4  ;;  %vm795_vm9 = vweird.f32 %v7797_v13  ;;  %vm855_vm10 = vweird.f32 %v7811_v4 }
 0x137   : > { %v828_v45 = vsel %vm7893_vm15, %v7799_v21, %v824_v62  ;;  %6635 = vrsqrt.f32 %v7870_v46  ;;  %v791_v25 = vmul.f32 %v7873_v28, %v790_v35  ;;  %vm796_vm11 = vweird.f32 %v7873_v28 }
 0x138   : > { %v604_v26 = vpop.xlane.xlu2 %603  ;;  %v1031_v21 = vmul.f32 %v828_v45, %v7494_v34  ;;  %v851_v62 = vmul.f32 %v7889_v48, %v850_v19  ;;  %v1093_v34 = vadd.f32 %v7758_v55, %v1057_v0  ;;  %vm856_vm13 = vweird.f32 %v7889_v48  ;;  %vm8053_vm1 = vmor %vm795_vm9, %vm796_vm11 }
 0x139   : > { %v613_v49 = vpop.xlane.xlu0 %612  ;;  %v616_v38 = vpop.xlane.xlu1 %615  ;;  %v656_v24 = vmul.f32 %v604_v26, %v7425_v10  ;;  %v783_v26 = vsub.f32 1.5, %v782_v17  ;;  %vm905_vm14 = vweird.f32 %v7866_v59  ;;  %vm8068_vm2 = vmor %vm855_vm10, %vm856_vm13  ;;  %v11895_v4 = vsel %vm7946_vm3, %v7762_v60, %v7916_v15 }
 0x13a   : > { %v660_v7 = vmul.f32 %v616_v38, %v7425_v10  ;;  %v659_v50 = vmul.f32 %v613_v49, %v7425_v10  ;;  %v792_v49 = vmul.f32 0.5, %v791_v25  ;;  %v1124_v6 = vpack.c.bf16 %v1094_v57, %v1093_v34 }
 0x13b   : > { %v7919_v58 = vadd.f32 1e-05, %v656_v24  ;;  %v7922_v33 = vpop.eup %6631  ;;  %v7935_v24 = vmul.f32 %v7780_v22, %v843_v43  ;;  %v1067_v17 = vmul.f32 %v7735_v32, %v1031_v21  ;;  %v852_v25 = vmul.f32 0.5, %v851_v62 }
 0x13c   : > { %v7930_v35 = vadd.f32 1e-05, %v660_v7  ;;  %v7932_v61 = vpop.eup %6633  ;;  %v7938_v27 = vadd.f32 1e-05, %v659_v50  ;;  %v1068_v57 = vmul.f32 %v7735_v32, %v1032_v23  ;;  %v800_v7 = vmul.f32 %v7922_v33, %v7864_v54  ;;  %6125 = vmatmul.msk.bf16.gmra.mxu0 %vm339_vm0, %v1124_v6 }
 0x13d   : > { %6637 = vrsqrt.f32 %v7919_v58  ;;  %v7940_v14 = vpop.eup %6635  ;;  %v900_v43 = vmul.f32 %v7932_v61, %v7866_v59  ;;  %v7994_v34 = vmul.f32 %v7813_v36, %v783_v26  ;;  %v793_v2 = vsub.f32 1.5, %v792_v49 }
 0x13e   : > { %v810_v30 = vmul.f32 %v7940_v14, %v7870_v46  ;;  %6639 = vrsqrt.f32 %v7930_v35  ;;  %v1103_v6 = vadd.f32 %v7758_v55, %v1067_v17  ;;  %v853_v16 = vsub.f32 1.5, %v852_v25 }
 0x13f   : > { %v901_v62 = vmul.f32 %v7932_v61, %v900_v43  ;;  %6641 = vrsqrt.f32 %v7938_v27  ;;  %v1104_v43 = vadd.f32 %v7758_v55, %v1068_v57  ;;  %v801_v51 = vmul.f32 %v7922_v33, %v800_v7 }
 0x140   : > { %v610_v19 = vpop.xlane.xlu2 %609  ;;  %v811_v23 = vmul.f32 %v7940_v14, %v810_v30  ;;  %vm906_vm15 = vweird.f32 %v7932_v61  ;;  %vm955_vm3 = vweird.f32 %v7930_v35  ;;  %vm945_vm9 = vweird.f32 %v7938_v27 }
 0x141   : > { %v607_v50 = vpop.xlane.xlu1 %606  ;;  %v435_v38 = vpop.xlane.xlu0 %434  ;;  %v658_v56 = vmul.f32 %v610_v19, %v7425_v10  ;;  %v902_v25 = vmul.f32 0.5, %v901_v62  ;;  %v1129_v57 = vpack.c.bf16 %v1104_v43, %v1103_v6  ;;  %v8033_v62 = vmul.f32 %v7889_v48, %v853_v16  ;;  %vm8121_vm10 = vmor %vm905_vm14, %vm906_vm15 }
 0x142   : > { %v657_v49 = vmul.f32 %v607_v50, %v7425_v10  ;;  %v8025_v50 = vmul.f32 %v7873_v28, %v793_v2  ;;  %v474_v6 = vmul.f32 %v7425_v10, %v435_v38  ;;  %v11890_v2 = vsel %vm7849_vm6, %v7697_v53, %v7828_v42 }
 0x143   : > { %v7997_v45 = vpop.eup %6637  ;;  %v8016_v19 = vadd.f32 1e-05, %v658_v56  ;;  %6130 = vmatmul.msk.bf16.vlgmr.msra.gmra.mxu1 %vm339_vm0, %v1129_v57  ;;  %v1023_v43 = vmul.f32 %v11890_v2, %v7453_v47  ;;  %v812_v16 = vmul.f32 0.5, %v811_v23  ;;  %v903_v47 = vsub.f32 1.5, %v902_v25 }
 0x144   : > { %v910_v26 = vmul.f32 %v7997_v45, %v7919_v58  ;;  %v8018_v7 = vpop.eup %6639  ;;  %11889 = vst [vmem:[#allocation19_spill] sm:$0xff] %v8025_v50  ;;  %v8028_v46 = vadd.f32 1e-05, %v657_v49  ;;  %v802_v49 = vmul.f32 0.5, %v801_v51  ;;  %vm915_vm6 = vweird.f32 %v7919_v58 }
 0x145   : > { %v8030_v1 = vpop.eup %6641  ;;  %v950_v56 = vmul.f32 %v8018_v7, %v7930_v35  ;;  %6643 = vrsqrt.f32 %v8016_v19  ;;  %v858_v23 = vsel %vm8068_vm2, %v7889_v48, %v8033_v62  ;;  %v8079_v25 = vsub.f32 %v7580_v5, %v474_v6 }
 0x146   : > { %v911_v44 = vmul.f32 %v7997_v45, %v910_v26  ;;  %v940_v30 = vmul.f32 %v8030_v1, %v7938_v27  ;;  %6645 = vrsqrt.f32 %v8028_v46  ;;  %v813_v2 = vsub.f32 1.5, %v812_v16 }
 0x147   : > { %v951_v51 = vmul.f32 %v8018_v7, %v950_v56  ;;  %v1024_v56 = vmul.f32 %v11895_v4, %v7475_v12  ;;  %v8091_v48 = vmul.f32 %v7932_v61, %v903_v47  ;;  %v538_v0 = vmul.f32 %v8079_v25, %v8079_v25 }
 0x148   : > { %v619_v26 = vpop.xlane.xlu2 %618  ;;  %v912_v42 = vmul.f32 0.5, %v911_v44  ;;  %v941_v38 = vmul.f32 %v8030_v1, %v940_v30  ;;  %v1059_v44 = vmul.f32 %v7735_v32, %v1023_v43  ;;  %v803_v30 = vsub.f32 1.5, %v802_v49 }
 0x149   : > { %v592_v57 = vpop.xlane.xlu1 %591  ;;  %v661_v53 = vmul.f32 %v619_v26, %v7425_v10  ;;  %v589_v13 = vpop.xlane.xlu0 %588  ;;  %v952_v5 = vmul.f32 0.5, %v951_v51  ;;  %v1060_v62 = vmul.f32 %v7735_v32, %v1024_v56  ;;  %v632_v16 = vsel %vm339_vm0, %v538_v0, 0.0 }
 0x14a   : > { %v652_v50 = vmul.f32 %v592_v57, %v7425_v10  ;;  %v913_v60 = vsub.f32 1.5, %v912_v42  ;;  %v942_v12 = vmul.f32 0.5, %v941_v38  ;;  %v1095_v26 = vadd.f32 %v7758_v55, %v1059_v44  ;;  %633 = vadd.xlane.f32.xlu0 %v632_v16 }
 0x14b   : > { %v8096_v15 = vadd.f32 1e-05, %v661_v53  ;;  %v8100_v43 = vpop.eup %6643  ;;  %v1096_v49 = vadd.f32 %v7758_v55, %v1060_v62  ;;  %v651_v57 = vmul.f32 %v589_v13, %v7425_v10  ;;  %v8110_v51 = vmul.f32 %v7922_v33, %v803_v30 }
 0x14c   : > { %v8098_v6 = vadd.f32 1e-05, %v652_v50  ;;  %v8107_v47 = vpop.eup %6645  ;;  %vm916_vm7 = vweird.f32 %v7997_v45  ;;  %v930_v50 = vmul.f32 %v8100_v43, %v8016_v19  ;;  %v8126_v42 = vmul.f32 %v7940_v14, %v813_v2 }
 0x14d   : > { %6647 = vrsqrt.f32 %v8096_v15  ;;  %v953_v38 = vsub.f32 1.5, %v952_v5  ;;  %v920_v4 = vmul.f32 %v8107_v47, %v8028_v46  ;;  %v1125_v56 = vpack.c.bf16 %v1096_v49, %v1095_v26  ;;  %vm8153_vm13 = vmor %vm915_vm6, %vm916_vm7 }
 0x14e   : > { %v908_v13 = vsel %vm8121_vm10, %v7932_v61, %v8091_v48  ;;  %vm956_vm11 = vweird.f32 %v8018_v7  ;;  %v943_v59 = vsub.f32 1.5, %v942_v12  ;;  %6649 = vrsqrt.f32 %v8098_v6 }
 0x14f   : > { %v8137_v2 = vmul.f32 %v7997_v45, %v913_v60  ;;  %v931_v5 = vmul.f32 %v8100_v43, %v930_v50  ;;  %6126 = vmatmul.msk.bf16.gmra.mxu0 %vm339_vm0, %v1125_v56  ;;  %v8141_v62 = vadd.f32 1e-05, %v651_v57  ;;  %v11898_v61 = vsel %vm7981_vm8, %v7780_v22, %v7935_v24  ;;  %vm8190_vm15 = vmor %vm955_vm3, %vm956_vm11 }
 0x150   : > { %v598_v44 = vpop.xlane.xlu2 %597  ;;  %v1033_v48 = vmul.f32 %v11898_v61, %v7490_v29  ;;  %vm946_vm14 = vweird.f32 %v8030_v1  ;;  %v1034_v60 = vmul.f32 %v858_v23, %v7521_v3  ;;  %v8162_v26 = vmul.f32 %v8018_v7, %v953_v38 }
 0x151   : > { %v595_v30 = vpop.xlane.xlu1 %594  ;;  %v654_v12 = vmul.f32 %v598_v44, %v7425_v10  ;;  %v921_v29 = vmul.f32 %v8107_v47, %v920_v4  ;;  %6651 = vrsqrt.f32 %v8141_v62  ;;  %v8170_v24 = vmul.f32 %v8030_v1, %v943_v59  ;;  %v622_v56 = vpop.xlane.xlu0 %621  ;;  %vm8206_vm2 = vmor %vm945_vm9, %vm946_vm14 }
 0x152   : > { %v653_v21 = vmul.f32 %v595_v30, %v7425_v10  ;;  %v1069_v22 = vmul.f32 %v7735_v32, %v1033_v48  ;;  %v1070_v3 = vmul.f32 %v7735_v32, %v1034_v60  ;;  %v918_v16 = vsel %vm8153_vm13, %v7997_v45, %v8137_v2 }
 0x153   : > { %v8167_v58 = vpop.eup %6647  ;;  %v8173_v23 = vadd.f32 1e-05, %v654_v12  ;;  %v932_v57 = vmul.f32 0.5, %v931_v5  ;;  %vm935_vm8 = vweird.f32 %v8016_v19  ;;  %vm936_vm6 = vweird.f32 %v8100_v43 }
 0x154   : > { %v8175_v49 = vadd.f32 1e-05, %v653_v21  ;;  %v960_v50 = vmul.f32 %v8167_v58, %v8096_v15  ;;  %v8184_v53 = vpop.eup %6649  ;;  %v1105_v45 = vadd.f32 %v7758_v55, %v1069_v22  ;;  %v1106_v4 = vadd.f32 %v7758_v55, %v1070_v3 }
 0x155   : > { %6653 = vrsqrt.f32 %v8173_v23  ;;  %v958_v44 = vsel %vm8190_vm15, %v8018_v7, %v8162_v26  ;;  %v922_v30 = vmul.f32 0.5, %v921_v29  ;;  %vm925_vm3 = vweird.f32 %v8028_v46  ;;  %v11924_v46 = vld [vmem:[#allocation9_spill] sm:$0xff] }
 0x156   : > { %v961_v59 = vmul.f32 %v8167_v58, %v960_v50  ;;  %v870_v2 = vmul.f32 %v8184_v53, %v8098_v6  ;;  %v948_v5 = vsel %vm8206_vm2, %v8030_v1, %v8170_v24  ;;  %vm926_vm7 = vweird.f32 %v8107_v47 }
 0x157   : > { %v1130_v27 = vpack.c.bf16 %v1106_v4, %v1105_v45  ;;  %6655 = vrsqrt.f32 %v8175_v49  ;;  %v8220_v61 = vpop.eup %6651  ;;  %v933_v48 = vsub.f32 1.5, %v932_v57  ;;  %vm965_vm9 = vweird.f32 %v8096_v15 }
 0x158   : > { %v871_v0 = vmul.f32 %v8184_v53, %v870_v2  ;;  %v662_v60 = vmul.f32 %v622_v56, %v7425_v10  ;;  %v962_v12 = vmul.f32 0.5, %v961_v59  ;;  %v860_v21 = vmul.f32 %v8220_v61, %v8141_v62 }
 0x159   : > { %6131 = vmatmul.msk.bf16.gmra.mxu1 %vm339_vm0, %v1130_v27  ;;  %v11905_v1 = vsel %vm7823_vm4, %v7689_v18, %v7793_v40  ;;  %v11906_v22 = vsel %vm7961_vm5, %v7767_v31, %v7925_v9  ;;  %v923_v3 = vsub.f32 1.5, %v922_v30  ;;  %vm875_vm10 = vweird.f32 %v8098_v6  ;;  %vm8262_vm5 = vmor %vm935_vm8, %vm936_vm6 }
 0x15a   : > { %v1025_v29 = vmul.f32 %v11905_v1, %v7461_v8  ;;  %v1026_v24 = vmul.f32 %v11906_v22, %v7469_v63  ;;  %v872_v57 = vmul.f32 0.5, %v871_v0  ;;  %v8241_v50 = vadd.f32 1e-05, %v662_v60  ;;  %v628_v60 = vpop.xlane.xlu1 %627  ;;  %vm8290_vm6 = vmor %vm925_vm3, %vm926_vm7 }
 0x15b   : > { %v8243_v45 = vpop.eup %6653  ;;  %v861_v41 = vmul.f32 %v8220_v61, %v860_v21  ;;  %v1039_v40 = vmul.f32 %v908_v13, %v7529_v11  ;;  %v8250_v37 = vmul.f32 %v8100_v43, %v933_v48  ;;  %vm865_vm4 = vweird.f32 %v8141_v62 }
 0x15c   : > { %v1061_v18 = vmul.f32 %v7735_v32, %v1025_v29  ;;  %v1062_v8 = vmul.f32 %v7735_v32, %v1026_v24  ;;  %v890_v63 = vmul.f32 %v8243_v45, %v8173_v23  ;;  %v1040_v31 = vmul.f32 %v918_v16, %v7562_v52 }
 0x15d   : > { %v8256_v9 = vpop.eup %6655  ;;  %v963_v11 = vsub.f32 1.5, %v962_v12  ;;  %vm966_vm11 = vweird.f32 %v8167_v58  ;;  %v862_v13 = vmul.f32 0.5, %v861_v41  ;;  %6657 = vrsqrt.f32 %v8241_v50  ;;  %v11922_v12 = vld [vmem:[#allocation19_spill] sm:$0xff] }
 0x15e   : > { %v8269_v56 = vmul.f32 %v8107_v47, %v923_v3  ;;  %v873_v52 = vsub.f32 1.5, %v872_v57  ;;  %v891_v16 = vmul.f32 %v8243_v45, %v890_v63  ;;  %v880_v35 = vmul.f32 %v8256_v9, %v8175_v49  ;;  %vm8304_vm8 = vmor %vm965_vm9, %vm966_vm11  ;;  %v11913_v57 = vld [vmem:[#allocation6_spill] sm:$0xff]  ;;  %v625_v63 = vpop.xlane.xlu0 %624 }
 0x15f   : > { %v863_v19 = vsub.f32 1.5, %v862_v13  ;;  %v1097_v30 = vadd.f32 %v7758_v55, %v1061_v18  ;;  %v1098_v59 = vadd.f32 %v7758_v55, %v1062_v8  ;;  %v1075_v2 = vmul.f32 %v7735_v32, %v1039_v40  ;;  %v11936_v18 = vld [vmem:[#allocation10_spill] sm:$0xff] }
 0x160   : > { %v938_v27 = vsel %vm8262_vm5, %v8100_v43, %v8250_v37  ;;  %vm876_vm13 = vweird.f32 %v8184_v53  ;;  %v881_v48 = vmul.f32 %v8256_v9, %v880_v35  ;;  %v1076_v0 = vmul.f32 %v7735_v32, %v1040_v31 }
 0x161   : > { %v8295_v21 = vmul.f32 %v8167_v58, %v963_v11  ;;  %vm866_vm2 = vweird.f32 %v8220_v61  ;;  %v1126_v1 = vpack.c.bf16 %v1098_v59, %v1097_v30  ;;  %v1043_v29 = vmul.f32 %v948_v5, %v7547_v39  ;;  %vm8322_vm3 = vmor %vm875_vm10, %vm876_vm13 }
 0x162   : > { %vm816_vm14 = vweird.f32 %v7940_v14  ;;  %v874_v22 = vmul.f32 %v8184_v53, %v873_v52  ;;  %v892_v24 = vmul.f32 0.5, %v891_v16  ;;  %v1112_v3 = vadd.f32 %v7758_v55, %v1076_v0  ;;  %vm8341_vm9 = vmor %vm865_vm4, %vm866_vm2 }
 0x163   : > { %v1044_v39 = vmul.f32 %v958_v44, %v11913_v57  ;;  %v8316_v5 = vpop.eup %6657  ;;  %v864_v41 = vmul.f32 %v8220_v61, %v863_v19  ;;  %vm895_vm7 = vweird.f32 %v8173_v23  ;;  %6127 = vmatmul.msk.bf16.gmra.mxu0 %vm339_vm0, %v1126_v1  ;;  %v1111_v38 = vadd.f32 %v7758_v55, %v1075_v2  ;;  %v11916_v44 = vld [vmem:[#allocation18_spill] sm:$0xff]  ;;  %v11926_v57 = vld [vmem:[#allocation8_spill] sm:$0xff] }
 0x164   : > { %v1079_v7 = vmul.f32 %v7735_v32, %v1043_v29  ;;  %v664_v26 = vmul.f32 %v628_v60, %v7425_v10  ;;  %vm815_vm15 = vweird.f32 %v11916_v44  ;;  %v928_v6 = vsel %vm8290_vm6, %v8107_v47, %v8269_v56  ;;  %v11921_v60 = vld [vmem:[#allocation3_spill] sm:$0xff] }
 0x165   : > { %vm896_vm10 = vweird.f32 %v8243_v45  ;;  %v882_v8 = vmul.f32 0.5, %v881_v48  ;;  %vm885_vm11 = vweird.f32 %v8175_v49  ;;  %v970_v40 = vmul.f32 %v8316_v5, %v8241_v50  ;;  %v11919_v48 = vld [vmem:[#allocation2_spill] sm:$0xff] }
 0x166   : > { %vm975_vm13 = vweird.f32 %v8241_v50  ;;  %v1133_v47 = vpack.c.bf16 %v1112_v3, %v1111_v38  ;;  %v1080_v31 = vmul.f32 %v7735_v32, %v1044_v39  ;;  %v1115_v62 = vadd.f32 %v7758_v55, %v1079_v7  ;;  %vm8431_vm5 = vmor %vm895_vm7, %vm896_vm10 }
 0x167   : > { %v968_v11 = vsel %vm8304_vm8, %v8167_v58, %v8295_v21  ;;  %v878_v13 = vsel %vm8322_vm3, %v8184_v53, %v874_v22  ;;  %v971_v56 = vmul.f32 %v8316_v5, %v970_v40  ;;  %v8360_v52 = vadd.f32 1e-05, %v664_v26  ;;  %vm8419_vm3 = vmor %vm815_vm15, %vm816_vm14 }
 0x168   : > { %v868_v16 = vsel %vm8341_vm9, %v8220_v61, %v864_v41  ;;  %v893_v35 = vsub.f32 1.5, %v892_v24  ;;  %6134 = vmatmul.msk.bf16.vlgmr.msra.gmra.mxu2 %vm339_vm0, %v1133_v47  ;;  %v1116_v19 = vadd.f32 %v7758_v55, %v1080_v31  ;;  %v663_v30 = vmul.f32 %v625_v63, %v7425_v10  ;;  %v11925_v24 = vld [vmem:[#allocation11_spill] sm:$0xff] }
 0x169   : > { %v883_v58 = vsub.f32 1.5, %v882_v8  ;;  %v972_v59 = vmul.f32 0.5, %v971_v56  ;;  %vm976_vm4 = vweird.f32 %v8316_v5  ;;  %6659 = vrsqrt.f32 %v8360_v52  ;;  %v11933_v41 = vld [vmem:[#allocation7_spill] sm:$0xff] }
 0x16a   : > { %v1135_v53 = vpack.c.bf16 %v1116_v19, %v1115_v62  ;;  %v8370_v2 = vadd.f32 1e-05, %v663_v30  ;;  %v11920_v61 = vsel %vm8011_vm12, %v7813_v36, %v7994_v34  ;;  %v11923_v21 = vsel %vm8053_vm1, %v7873_v28, %v11922_v12  ;;  %vm8390_vm12 = vmor %vm975_vm13, %vm976_vm4 }
 0x16b   : > { %v1027_v0 = vmul.f32 %v11920_v61, %v11919_v48  ;;  %v1028_v1 = vmul.f32 %v11923_v21, %v11921_v60  ;;  %v973_v29 = vsub.f32 1.5, %v972_v59  ;;  %v1035_v22 = vmul.f32 %v868_v16, %v11924_v46  ;;  %v11942_v48 = vld [vmem:[#allocation5_spill] sm:$0xff] }
 0x16c   : > { %v1036_v3 = vmul.f32 %v878_v13, %v11925_v24  ;;  %v1041_v39 = vmul.f32 %v928_v6, %v11926_v57  ;;  %vm886_vm8 = vweird.f32 %v8256_v9  ;;  %6136 = vmatmul.msk.bf16.vlgmr.msra.gmra.mxu3 %vm339_vm0, %v1135_v53  ;;  %6661 = vrsqrt.f32 %v8370_v2 }
 0x16d   : > { %v1063_v28 = vmul.f32 %v7735_v32, %v1027_v0  ;;  %v1064_v34 = vmul.f32 %v7735_v32, %v1028_v1  ;;  %vm11929_vm1 = vweird.f32 %v7922_v33  ;;  %vm11930_vm6 = vweird.f32 %v7864_v54  ;;  %vm8449_vm14 = vmor %vm885_vm11, %vm886_vm8  ;;  %v11944_v1 = vld [vmem:[#allocation13_spill] sm:$0xff] }
 0x16e   : > { %vm8402_vm2 = vmor %vm11930_vm6, %vm11929_vm1  ;;  %v974_v20 = vmul.f32 %v8316_v5, %v973_v29  ;;  %v1071_v50 = vmul.f32 %v7735_v32, %v1035_v22  ;;  %v1072_v15 = vmul.f32 %v7735_v32, %v1036_v3  ;;  %v1042_v38 = vmul.f32 %v938_v27, %v11933_v41  ;;  %v11945_v22 = vld [vmem:[#allocation14_spill] sm:$0xff] }
 0x16f   : > { %v894_v7 = vmul.f32 %v8243_v45, %v893_v35  ;;  %v1100_v26 = vadd.f32 %v7758_v55, %v1064_v34  ;;  %v1077_v6 = vmul.f32 %v7735_v32, %v1041_v39  ;;  %v1045_v4 = vmul.f32 %v968_v11, %v11936_v18  ;;  %v6660_v8 = vpop.eup %6659 }
 0x170   : > { %v884_v37 = vmul.f32 %v8256_v9, %v883_v58  ;;  %v978_v27 = vsel %vm8390_vm12, %v8316_v5, %v974_v20  ;;  %v1099_v44 = vadd.f32 %v7758_v55, %v1063_v28  ;;  %v1107_v40 = vadd.f32 %v7758_v55, %v1071_v50 }
 0x171   : > { %v808_v63 = vsel %vm8402_vm2, %v7922_v33, %v8110_v51  ;;  %v990_v47 = vmul.f32 %v6660_v8, %v8360_v52  ;;  %v1108_v5 = vadd.f32 %v7758_v55, %v1072_v15  ;;  %v818_v31 = vsel %vm8419_vm3, %v7940_v14, %v8126_v42  ;;  %v11941_v51 = vld [vmem:[#allocation12_spill] sm:$0xff] }
 0x172   : > { %v1127_v62 = vpack.c.bf16 %v1100_v26, %v1099_v44  ;;  %v1078_v33 = vmul.f32 %v7735_v32, %v1042_v38  ;;  %v1046_v11 = vmul.f32 %v978_v27, %v11941_v51  ;;  %v6662_v13 = vpop.eup %6661  ;;  %v1113_v16 = vadd.f32 %v7758_v55, %v1077_v6  ;;  %v11949_v6 = vld [vmem:[#allocation16_spill] sm:$0xff] }
 0x173   : > { %v991_v49 = vmul.f32 %v6660_v8, %v990_v47  ;;  %v1131_v56 = vpack.c.bf16 %v1108_v5, %v1107_v40  ;;  %v1081_v35 = vmul.f32 %v7735_v32, %v1045_v4  ;;  %v898_v19 = vsel %vm8431_vm5, %v8243_v45, %v894_v7  ;;  %v11948_v7 = vld [vmem:[#allocation15_spill] sm:$0xff]  ;;  %v8514_v5 = vld [vmem:[%s11745_s4] ss:$0 sm:$0xff] }
 0x174   : > { %v888_v14 = vsel %vm8449_vm14, %v8256_v9, %v884_v37  ;;  %v980_v42 = vmul.f32 %v6662_v13, %v8370_v2  ;;  %v1114_v30 = vadd.f32 %v7758_v55, %v1078_v33  ;;  %vm995_vm7 = vweird.f32 %v8360_v52  ;;  %6128 = vmatmul.msk.bf16.gmra.mxu0 %vm339_vm0, %v1127_v62  ;;  %v11943_v9 = vld [vmem:[#allocation4_spill] sm:$0xff] }
 0x175   : > { %v992_v58 = vmul.f32 0.5, %v991_v49  ;;  %vm996_vm15 = vweird.f32 %v6660_v8  ;;  %6132 = vmatmul.msk.bf16.gmra.mxu1 %vm339_vm0, %v1131_v56  ;;  %v1082_v59 = vmul.f32 %v7735_v32, %v1046_v11  ;;  %v1117_v45 = vadd.f32 %v7758_v55, %v1081_v35 }
 0x176   : > { %v981_v53 = vmul.f32 %v6662_v13, %v980_v42  ;;  %v1029_v61 = vmul.f32 %v808_v63, %v11942_v48  ;;  %v1030_v0 = vmul.f32 %v818_v31, %v11943_v9  ;;  %v1134_v12 = vpack.c.bf16 %v1114_v30, %v1113_v16  ;;  %vm8485_vm11 = vmor %vm995_vm7, %vm996_vm15  ;;  %v631_v63 = vpop.xlane.xlu2 %630 }
 0x177   : > { %v993_v60 = vsub.f32 1.5, %v992_v58  ;;  %v1118_v21 = vadd.f32 %v7758_v55, %v1082_v59  ;;  %v1037_v29 = vmul.f32 %v888_v14, %v11944_v1  ;;  %vm985_vm9 = vweird.f32 %v8370_v2 }
 0x178   : > { %v982_v46 = vmul.f32 0.5, %v981_v53  ;;  %vm986_vm10 = vweird.f32 %v6662_v13  ;;  %v1038_v24 = vmul.f32 %v898_v19, %v11945_v22  ;;  %6135 = vmatmul.msk.bf16.gmra.mxu2 %vm339_vm0, %v1134_v12  ;;  %v1065_v28 = vmul.f32 %v7735_v32, %v1029_v61 }
 0x179   : > { %v994_v3 = vmul.f32 %v6660_v8, %v993_v60  ;;  %v1136_v39 = vpack.c.bf16 %v1118_v21, %v1117_v45  ;;  %v1066_v34 = vmul.f32 %v7735_v32, %v1030_v0  ;;  %vm987_vm13 = vmor %vm985_vm9, %vm986_vm10  ;;  %v1073_v2 = vmul.f32 %v7735_v32, %v1037_v29 }
 0x17a   : > { %v983_v36 = vsub.f32 1.5, %v982_v46  ;;  %v1074_v17 = vmul.f32 %v7735_v32, %v1038_v24  ;;  %v1101_v15 = vadd.f32 %v7758_v55, %v1065_v28  ;;  %v665_v47 = vmul.f32 %v631_v63, %v7425_v10 }
 0x17b   : > { %v998_v52 = vsel %vm8485_vm11, %v6660_v8, %v994_v3  ;;  %v1102_v41 = vadd.f32 %v7758_v55, %v1066_v34  ;;  %v1109_v38 = vadd.f32 %v7758_v55, %v1073_v2  ;;  %v11952_v3 = vld [vmem:[#allocation17_spill] sm:$0xff]  ;;  %vm1448_vm3 = vcmask 64512  }
 0x17c   : > { %v984_v20 = vmul.f32 %v6662_v13, %v983_v36  ;;  %6137 = vmatmul.msk.bf16.gmra.mxu3 %vm339_vm0, %v1136_v39  ;;  %v1110_v54 = vadd.f32 %v7758_v55, %v1074_v17  ;;  %v1048_v18 = vmul.f32 %v998_v52, %v11949_v6  ;;  %v7179_v17 = vld [vmem:[%s11742_s1] ss:$0 sm:$0xff]  ;;  %vm1805_vm5 = vcmask 523264  }
 0x17d   : > { %v1128_v4 = vpack.c.bf16 %v1102_v41, %v1101_v15  ;;  %v7180_v41 = vld [vmem:[%s11743_s2] ss:$0 sm:$0xff]  ;;  %vm5781_vm14 = vcmask 130048   ;;  %vm5814_vm7 = vcmask 195584  }
 0x17e   : > { %v988_v50 = vsel %vm987_vm13, %v6662_v13, %v984_v20  ;;  %v1132_v43 = vpack.c.bf16 %v1110_v54, %v1109_v38  ;;  %v1084_v37 = vmul.f32 %v7735_v32, %v1048_v18 }
 0x17f   : > { %v1047_v26 = vmul.f32 %v988_v50, %v11948_v7 }
 0x180   : > { %v1120_v44 = vadd.f32 %v7758_v55, %v1084_v37 }
 0x181   : > { %v1083_v8 = vmul.f32 %v7735_v32, %v1047_v26  ;;  %v697_v32 = vadd.f32 1e-05, %v665_v47 }
 0x183   : > { %v1119_v27 = vadd.f32 %v7758_v55, %v1083_v8  ;;  %6663 = vrsqrt.f32 %v697_v32  ;;  %vm1005_vm4 = vweird.f32 %v697_v32 }
 0x184   : > { %6129 = vmatmul.msk.bf16.gmra.mxu0 %vm339_vm0, %v1128_v4 }
 0x185   : > { %6133 = vmatmul.msk.bf16.gmra.mxu1 %vm339_vm0, %v1132_v43  ;;  %v1137_v40 = vpack.c.bf16 %v1120_v44, %v1119_v27 }
 0x189   : > { %v6664_v49 = vpop.eup %6663 }
 0x18a   : > { %v1000_v16 = vmul.f32 %v6664_v49, %v697_v32  ;;  %vm1006_vm8 = vweird.f32 %v6664_v49 }
 0x18b   : > { %vm1007_vm12 = vmor %vm1005_vm4, %vm1006_vm8 }
 0x18c   : > { %6138 = vmatmul.msk.bf16.gmra.mxu3 %vm339_vm0, %v1137_v40  ;;  %v1001_v35 = vmul.f32 %v6664_v49, %v1000_v16 }
 0x18e   : > { %v1002_v58 = vmul.f32 0.5, %v1001_v35 }
 0x190   : > { %v1003_v53 = vsub.f32 1.5, %v1002_v58 }
 0x192   : > { %v1004_v0 = vmul.f32 %v6664_v49, %v1003_v53 }
 0x194   : > { %v1008_v29 = vsel %vm1007_vm12, %v6664_v49, %v1004_v0 }
 0x195   : > { %v1049_v57 = vmul.f32 %v1008_v29, %v11952_v3 }
 0x197   : > { %v1085_v52 = vmul.f32 %v7179_v17, %v1049_v57 }
 0x1a7   : > { %v1216_v23 = vpop.f32.mrf.mxu0 }
 0x1a8   : > { %v8517_v31 = vadd.f32 %v8514_v5, %v1216_v23 }
 0x1aa   : > { %v1360_v55 = vpack.c.bf16 %v8517_v31, %v8517_v31  ;;  %v1296_v6 = vmul.f32 0.35355338, %v8517_v31 }
 0x1ac   : > { %v1428_v11 = vunpack.c.l.b16 %v1360_v55  ;;  %v1328_v8 = vpack.c.bf16 %v1296_v6, %v1296_v6 }
 0x1ae   : > { %v1408_v27 = vunpack.c.l.b16 %v1328_v8 }
 0x1af   : > { %v1218_v62 = vpop.f32.mrf.mxu0 }
 0x1b0   : > { %v1219_v33 = vadd.f32 %v8514_v5, %v1218_v62 }
 0x1b2   : > { %v1361_v51 = vpack.c.bf16 %v1219_v33, %v1219_v33  ;;  %v1297_v54 = vmul.f32 0.35355338, %v1219_v33 }
 0x1b4   : > { %v1429_v13 = vunpack.c.l.b16 %v1361_v51  ;;  %v1329_v4 = vpack.c.bf16 %v1297_v54, %v1297_v54 }
 0x1b6   : > { %v8522_v56 = vpack.c.b16 %v1429_v13, %v1428_v11  ;;  %v1409_v37 = vunpack.c.l.b16 %v1329_v4 }
 0x1b8   : > { %11950 = vst [vmem:[#allocation6_spill] sm:$0xff] %v8522_v56  ;;  %1440 = vrot.lane.b32.xlu0 %v8522_v56, %s7193_s21  ;;  %v8555_v44 = vpack.c.b16 %v1409_v37, %v1408_v27 }
 0x1ba   : > { %11954 = vst [vmem:[#allocation3_spill] sm:$0xff] %v8555_v44 }
 0x1bd   : > { %v634_v19 = vpop.xlane.xlu0 %633 }
 0x1be   : > { %v666_v14 = vmul.f32 %v634_v19, %v7425_v10  ;;  %v1221_v19 = vpop.f32.mrf.mxu0 }
 0x1c0   : > { %v1246_v42 = vpop.f32.mrf.mxu1  ;;  %v698_v30 = vadd.f32 1e-05, %v666_v14 }
 0x1c1   : > { %v1247_v59 = vadd.f32 %v8514_v5, %v1246_v42 }
 0x1c2   : > { %6665 = vrsqrt.f32 %v698_v30  ;;  %vm1015_vm1 = vweird.f32 %v698_v30 }
 0x1c3   : > { %v1372_v9 = vpack.c.bf16 %v1247_v59, %v1247_v59  ;;  %v1308_v34 = vmul.f32 0.35355338, %v1247_v59 }
 0x1c5   : > { %v1534_v1 = vunpack.c.l.b16 %v1372_v9  ;;  %v1340_v15 = vpack.c.bf16 %v1308_v34, %v1308_v34 }
 0x1c7   : > { %v1514_v18 = vunpack.c.l.b16 %v1340_v15 }
 0x1c8   : > { %v1248_v45 = vpop.f32.mrf.mxu1  ;;  %v6666_v61 = vpop.eup %6665 }
 0x1c9   : > { %v1249_v48 = vadd.f32 %v8514_v5, %v1248_v45  ;;  %v1010_v60 = vmul.f32 %v6666_v61, %v698_v30  ;;  %vm1016_vm6 = vweird.f32 %v6666_v61 }
 0x1ca   : > { %vm1017_vm2 = vmor %vm1015_vm1, %vm1016_vm6 }
 0x1cb   : > { %v1373_v12 = vpack.c.bf16 %v1249_v48, %v1249_v48  ;;  %v1011_v21 = vmul.f32 %v6666_v61, %v1010_v60  ;;  %v1309_v36 = vmul.f32 0.35355338, %v1249_v48 }
 0x1cd   : > { %v1535_v10 = vunpack.c.l.b16 %v1373_v12  ;;  %v1012_v46 = vmul.f32 0.5, %v1011_v21  ;;  %v1341_v20 = vpack.c.bf16 %v1309_v36, %v1309_v36 }
 0x1cf   : > { %v8529_v22 = vpack.c.b16 %v1535_v10, %v1534_v1  ;;  %v1013_v24 = vsub.f32 1.5, %v1012_v46  ;;  %v1515_v7 = vunpack.c.l.b16 %v1341_v20  ;;  %v1223_v46 = vpop.f32.mrf.mxu0 }
 0x1d0   : > { %v1224_v57 = vadd.f32 %v8514_v5, %v1223_v46 }
 0x1d1   : > { %11951 = vst [vmem:[#allocation18_spill] sm:$0xff] %v8529_v22  ;;  %1546 = vrot.lane.b32.xlu2 %v8529_v22, %s7193_s21  ;;  %2287 = vrot.lane.b32.xlu1 %v8529_v22, %s7194_s22  ;;  %v1014_v39 = vmul.f32 %v6666_v61, %v1013_v24  ;;  %v8549_v43 = vpack.c.b16 %v1515_v7, %v1514_v18 }
 0x1d2   : > { %v1299_v4 = vmul.f32 0.35355338, %v1224_v57 }
 0x1d3   : > { %v1018_v28 = vsel %vm1017_vm2, %v6666_v61, %v1014_v39  ;;  %11953 = vst [vmem:[#allocation2_spill] sm:$0xff] %v8549_v43 }
 0x1d4   : > { %v1050_v2 = vmul.f32 %v1018_v28, %v8079_v25  ;;  %v1121_v25 = vadd.f32 %v7180_v41, %v1085_v52  ;;  %v1222_v28 = vadd.f32 %v8514_v5, %v1221_v19  ;;  %v1363_v52 = vpack.c.bf16 %v1224_v57, %v1224_v57 }
 0x1d6   : > { %v1086_v50 = vmul.f32 %v7179_v17, %v1050_v2  ;;  %v1251_v47 = vpop.f32.mrf.mxu1 }
 0x1d7   : > { %v1252_v60 = vadd.f32 %v8514_v5, %v1251_v47  ;;  %v1226_v18 = vpop.f32.mrf.mxu0  ;;  %v1331_v47 = vpack.c.bf16 %v1299_v4, %v1299_v4 }
 0x1d8   : > { %v1122_v38 = vadd.f32 %v7180_v41, %v1086_v50  ;;  %v1362_v41 = vpack.c.bf16 %v1222_v28, %v1222_v28 }
 0x1d9   : > { %2499 = vrot.lane.b32.xlu1 %v8522_v56, %s7195_s25  ;;  %2210 = vrot.lane.b32.xlu2 %v8522_v56, %s7194_s22  ;;  %v1374_v24 = vpack.c.bf16 %v1252_v60, %v1252_v60  ;;  %v1310_v19 = vmul.f32 0.35355338, %v1252_v60 }
 0x1da   : > { %v1138_v26 = vpack.c.bf16 %v1122_v38, %v1121_v25  ;;  %v1431_v38 = vunpack.c.l.b16 %v1363_v52 }
 0x1db   : > { %v1536_v34 = vunpack.c.l.b16 %v1374_v24 }
 0x1dc   : > { %6139 = vmatmul.msk.bf16.gmra.mxu3 %vm339_vm0, %v1138_v26  ;;  %v1430_v26 = vunpack.c.l.b16 %v1362_v41 }
 0x1de   : > { %v1253_v58 = vpop.f32.mrf.mxu1  ;;  %v8597_v8 = vpack.c.b16 %v1431_v38, %v1430_v26 }
 0x1df   : > { %v1254_v61 = vadd.f32 %v8514_v5, %v1253_v58 }
 0x1e0   : > { %11960 = vst [vmem:[#allocation10_spill] sm:$0xff] %v8597_v8 }
 0x1e1   : > { %2564 = vrot.lane.b32.xlu1 %v8549_v43, %s7196_s9  ;;  %2572 = vrot.lane.b32.xlu2 %v8529_v22, %s7195_s25  ;;  %v1375_v10 = vpack.c.bf16 %v1254_v61, %v1254_v61 }
 0x1e3   : > { %v1537_v39 = vunpack.c.l.b16 %v1375_v10 }
 0x1e5   : > { %v8585_v20 = vpack.c.b16 %v1537_v39, %v1536_v34 }
 0x1e7   : > { %11958 = vst [vmem:[#allocation8_spill] sm:$0xff] %v8585_v20 }
 0x1e9   : > { %2491 = vrot.lane.b32.xlu2 %v8555_v44, %s7196_s9 }
 0x1eb   : > { %v1266_v40 = vpop.f32.mrf.mxu2 }
 0x1ec   : > { %v1267_v63 = vadd.f32 %v8514_v5, %v1266_v40  ;;  %v1298_v40 = vmul.f32 0.35355338, %v1222_v28  ;;  %v1227_v28 = vadd.f32 %v8514_v5, %v1226_v18 }
 0x1ee   : > { %v1380_v32 = vpack.c.bf16 %v1267_v63, %v1267_v63  ;;  %v1316_v3 = vmul.f32 0.35355338, %v1267_v63 }
 0x1ef   : > { %v1276_v23 = vpop.f32.mrf.mxu3 }
 0x1f0   : > { %v1277_v62 = vadd.f32 %v8514_v5, %v1276_v23  ;;  %v1635_v51 = vunpack.c.l.b16 %v1380_v32  ;;  %v1348_v2 = vpack.c.bf16 %v1316_v3, %v1316_v3 }
 0x1f2   : > { %v1320_v13 = vmul.f32 0.35355338, %v1277_v62  ;;  %v1384_v49 = vpack.c.bf16 %v1277_v62, %v1277_v62  ;;  %v1615_v25 = vunpack.c.l.b16 %v1348_v2  ;;  %v1256_v23 = vpop.f32.mrf.mxu1  ;;  %v1330_v62 = vpack.c.bf16 %v1298_v40, %v1298_v40 }
 0x1f3   : > { %v1268_v31 = vpop.f32.mrf.mxu2  ;;  %v1257_v40 = vadd.f32 %v8514_v5, %v1256_v23 }
 0x1f4   : > { %v1269_v55 = vadd.f32 %v8514_v5, %v1268_v31  ;;  %v1352_v59 = vpack.c.bf16 %v1320_v13, %v1320_v13  ;;  %v1732_v53 = vunpack.c.l.b16 %v1384_v49 }
 0x1f6   : > { %v1381_v33 = vpack.c.bf16 %v1269_v55, %v1269_v55  ;;  %v1712_v12 = vunpack.c.l.b16 %v1352_v59  ;;  %v1317_v1 = vmul.f32 0.35355338, %v1269_v55 }
 0x1f7   : > { %v1278_v11 = vpop.f32.mrf.mxu3 }
 0x1f8   : > { %v1636_v16 = vunpack.c.l.b16 %v1381_v33  ;;  %v1279_v35 = vadd.f32 %v8514_v5, %v1278_v11  ;;  %v1349_v36 = vpack.c.bf16 %v1317_v1, %v1317_v1  ;;  %v1311_v11 = vmul.f32 0.35355338, %v1254_v61 }
 0x1fa   : > { %v8563_v14 = vpack.c.b16 %v1636_v16, %v1635_v51  ;;  %v1321_v42 = vmul.f32 0.35355338, %v1279_v35  ;;  %v1385_v30 = vpack.c.bf16 %v1279_v35, %v1279_v35  ;;  %v1616_v50 = vunpack.c.l.b16 %v1349_v36  ;;  %v1228_v16 = vpop.f32.mrf.mxu0 }
 0x1fb   : > { %v1271_v21 = vpop.f32.mrf.mxu2  ;;  %v1411_v51 = vunpack.c.l.b16 %v1331_v47  ;;  %v1410_v35 = vunpack.c.l.b16 %v1330_v62  ;;  %v1343_v58 = vpack.c.bf16 %v1311_v11, %v1311_v11  ;;  %v1229_v3 = vadd.f32 %v8514_v5, %v1228_v16 }
 0x1fc   : > { %11955 = vst [vmem:[#allocation19_spill] sm:$0xff] %v8563_v14  ;;  %v1353_v45 = vpack.c.bf16 %v1321_v42, %v1321_v42  ;;  %v1733_v48 = vunpack.c.l.b16 %v1385_v30  ;;  %2360 = vrot.lane.b32.xlu1 %v8563_v14, %s7194_s22  ;;  %1647 = vrot.lane.b32.xlu2 %v8563_v14, %s7193_s21  ;;  %v8591_v54 = vpack.c.b16 %v1616_v50, %v1615_v25 }
 0x1fd   : > { %v1272_v6 = vadd.f32 %v8514_v5, %v1271_v21  ;;  %v8613_v30 = vpack.c.b16 %v1411_v51, %v1410_v35  ;;  %v1365_v52 = vpack.c.bf16 %v1229_v3, %v1229_v3  ;;  %v1364_v25 = vpack.c.bf16 %v1227_v28, %v1227_v28 }
 0x1fe   : > { %v1713_v9 = vunpack.c.l.b16 %v1353_v45  ;;  %v8570_v0 = vpack.c.b16 %v1733_v48, %v1732_v53  ;;  %11959 = vst [vmem:[#allocation7_spill] sm:$0xff] %v8591_v54  ;;  %v1258_v45 = vpop.f32.mrf.mxu1  ;;  %v1342_v48 = vpack.c.bf16 %v1310_v19, %v1310_v19  ;;  %v1376_v51 = vpack.c.bf16 %v1257_v40, %v1257_v40 }
 0x1ff   : > { %v1281_v17 = vpop.f32.mrf.mxu3  ;;  %v1382_v63 = vpack.c.bf16 %v1272_v6, %v1272_v6  ;;  %11962 = vst [vmem:[#allocation5_spill] sm:$0xff] %v8613_v30  ;;  %v1318_v61 = vmul.f32 0.35355338, %v1272_v6  ;;  %v1259_v26 = vadd.f32 %v8514_v5, %v1258_v45  ;;  %v1301_v11 = vmul.f32 0.35355338, %v1229_v3 }
 0x200   : > { %11956 = vst [vmem:[#allocation9_spill] sm:$0xff] %v8570_v0  ;;  %2429 = vrot.lane.b32.xlu0 %v8570_v0, %s7194_s22  ;;  %v8575_v29 = vpack.c.b16 %v1713_v9, %v1712_v12  ;;  %v1282_v33 = vadd.f32 %v8514_v5, %v1281_v17  ;;  %v1517_v12 = vunpack.c.l.b16 %v1343_v58  ;;  %v1516_v1 = vunpack.c.l.b16 %v1342_v48 }
 0x201   : > { %v1637_v55 = vunpack.c.l.b16 %v1382_v63  ;;  %v1350_v46 = vpack.c.bf16 %v1318_v61, %v1318_v61  ;;  %v1300_v19 = vmul.f32 0.35355338, %v1227_v28  ;;  %v1333_v48 = vpack.c.bf16 %v1301_v11, %v1301_v11 }
 0x202   : > { %11957 = vst [vmem:[#allocation11_spill] sm:$0xff] %v8575_v29  ;;  %v1386_v42 = vpack.c.bf16 %v1282_v33, %v1282_v33  ;;  %v1231_v24 = vpop.f32.mrf.mxu0  ;;  %v8624_v57 = vpack.c.b16 %v1517_v12, %v1516_v1  ;;  %v1322_v2 = vmul.f32 0.35355338, %v1282_v33  ;;  %v1313_v3 = vmul.f32 0.35355338, %v1259_v26 }
 0x203   : > { %v1273_v15 = vpop.f32.mrf.mxu2  ;;  %v1617_v34 = vunpack.c.l.b16 %v1350_v46  ;;  %v1332_v12 = vpack.c.bf16 %v1300_v19, %v1300_v19  ;;  %v1413_v1 = vunpack.c.l.b16 %v1333_v48  ;;  %v8681_v28 = vadd.f32 %v8514_v5, %v1231_v24 }
 0x204   : > { %2698 = vrot.lane.b32.xlu1 %v8575_v29, %s7196_s9  ;;  %1744 = vrot.lane.b32.xlu2 %v8570_v0, %s7193_s21  ;;  %v1274_v7 = vadd.f32 %v8514_v5, %v1273_v15  ;;  %v1734_v9 = vunpack.c.l.b16 %v1386_v42  ;;  %11964 = vst [vmem:[#allocation13_spill] sm:$0xff] %v8624_v57  ;;  %v1354_v38 = vpack.c.bf16 %v1322_v2, %v1322_v2  ;;  %v1631_v42 = vunpack.c.l.b16 %v1376_v51 }
 0x205   : > { %v1366_v24 = vpack.c.bf16 %v8681_v28, %v8681_v28 }
 0x206   : > { %v1383_v37 = vpack.c.bf16 %v1274_v7, %v1274_v7  ;;  %v1319_v59 = vmul.f32 0.35355338, %v1274_v7  ;;  %v1261_v17 = vpop.f32.mrf.mxu1  ;;  %v1433_v7 = vunpack.c.l.b16 %v1365_v52  ;;  %v1714_v63 = vunpack.c.l.b16 %v1354_v38 }
 0x207   : > { %v1283_v27 = vpop.f32.mrf.mxu3  ;;  %v1262_v58 = vadd.f32 %v8514_v5, %v1261_v17 }
 0x208   : > { %2706 = vrot.lane.b32.xlu0 %v8570_v0, %s7195_s25  ;;  %v1638_v32 = vunpack.c.l.b16 %v1383_v37  ;;  %v1284_v31 = vadd.f32 %v8514_v5, %v1283_v27  ;;  %v1351_v21 = vpack.c.bf16 %v1319_v59, %v1319_v59  ;;  %v1432_v27 = vunpack.c.l.b16 %v1364_v25 }
 0x20a   : > { %v8607_v13 = vpack.c.b16 %v1638_v32, %v1637_v55  ;;  %v1387_v49 = vpack.c.bf16 %v1284_v31, %v1284_v31  ;;  %v1618_v39 = vunpack.c.l.b16 %v1351_v21  ;;  %v1323_v36 = vmul.f32 0.35355338, %v1284_v31  ;;  %v1233_v37 = vpop.f32.mrf.mxu0 }
 0x20b   : > { %v8647_v32 = vpack.c.b16 %v1433_v7, %v1432_v27  ;;  %v1377_v31 = vpack.c.bf16 %v1259_v26, %v1259_v26  ;;  %v1378_v21 = vpack.c.bf16 %v1262_v58, %v1262_v58  ;;  %v8678_v46 = vadd.f32 %v8514_v5, %v1233_v37 }
 0x20c   : > { %1548 = vrot.lane.b32.xlu1 %v8585_v20, %s7193_s21  ;;  %2641 = vrot.lane.b32.xlu2 %v8563_v14, %s7195_s25  ;;  %11961 = vst [vmem:[#allocation12_spill] sm:$0xff] %v8607_v13  ;;  %v1735_v53 = vunpack.c.l.b16 %v1387_v49  ;;  %v8629_v50 = vpack.c.b16 %v1618_v39, %v1617_v34  ;;  %v1355_v15 = vpack.c.bf16 %v1323_v36, %v1323_v36  ;;  %v1412_v36 = vunpack.c.l.b16 %v1332_v12 }
 0x20d   : > { %11966 = vst [vmem:[#allocation15_spill] sm:$0xff] %v8647_v32  ;;  %v1632_v49 = vunpack.c.l.b16 %v1377_v31  ;;  %v1312_v34 = vmul.f32 0.35355338, %v1257_v40  ;;  %v1633_v2 = vunpack.c.l.b16 %v1378_v21  ;;  %v1367_v52 = vpack.c.bf16 %v8678_v46, %v8678_v46 }
 0x20e   : > { %v8617_v10 = vpack.c.b16 %v1735_v53, %v1734_v9  ;;  %11965 = vst [vmem:[#allocation14_spill] sm:$0xff] %v8629_v50  ;;  %v1715_v6 = vunpack.c.l.b16 %v1355_v15  ;;  %v1263_v33 = vpop.f32.mrf.mxu1  ;;  %v8685_v17 = vpack.c.b16 %v1413_v1, %v1412_v36  ;;  %v1345_v15 = vpack.c.bf16 %v1313_v3, %v1313_v3 }
 0x20f   : > { %v1286_v60 = vpop.f32.mrf.mxu3  ;;  %v8660_v16 = vadd.f32 %v8514_v5, %v1263_v33  ;;  %v8667_v61 = vpack.c.b16 %v1632_v49, %v1631_v42  ;;  %v1344_v7 = vpack.c.bf16 %v1312_v34, %v1312_v34  ;;  %v1435_v26 = vunpack.c.l.b16 %v1367_v52 }
 0x210   : > { %2633 = vrot.lane.b32.xlu0 %v8591_v54, %s7196_s9  ;;  %11963 = vst [vmem:[#allocation4_spill] sm:$0xff] %v8617_v10  ;;  %v8643_v47 = vadd.f32 %v8514_v5, %v1286_v60  ;;  %v8649_v62 = vpack.c.b16 %v1715_v6, %v1714_v63  ;;  %v1612_v37 = vunpack.c.l.b16 %v1345_v15  ;;  %v1434_v27 = vunpack.c.l.b16 %v1366_v24 }
 0x211   : > { %11968 = vst [vmem:[#allocation17_spill] sm:$0xff] %v8667_v61  ;;  %v1379_v9 = vpack.c.bf16 %v8660_v16, %v8660_v16  ;;  %v1611_v63 = vunpack.c.l.b16 %v1344_v7  ;;  %v1315_v48 = vmul.f32 0.35355338, %v8660_v16  ;;  %v1314_v21 = vmul.f32 0.35355338, %v1262_v58 }
 0x212   : > { %11967 = vst [vmem:[#allocation16_spill] sm:$0xff] %v8649_v62  ;;  %v1388_v23 = vpack.c.bf16 %v8643_v47, %v8643_v47  ;;  %v1236_v45 = vpop.f32.mrf.mxu0  ;;  %v8703_v31 = vpack.c.b16 %v1435_v26, %v1434_v27 }
 0x213   : > { %v1634_v39 = vunpack.c.l.b16 %v1379_v9  ;;  %11970 = vst [vmem:[#allocation21_spill] sm:$0xff] %v8685_v17  ;;  %v1237_v40 = vadd.f32 %v8514_v5, %v1236_v45  ;;  %v8705_v33 = vpack.c.b16 %v1612_v37, %v1611_v63  ;;  %v1347_v3 = vpack.c.bf16 %v1315_v48, %v1315_v48 }
 0x214   : > { %2574 = vrot.lane.b32.xlu1 %v8585_v20, %s7195_s25  ;;  %1442 = vrot.lane.b32.xlu2 %v8597_v8, %s7193_s21  ;;  %v1736_v59 = vunpack.c.l.b16 %v1388_v23  ;;  %11971 = vst [vmem:[#allocation22_spill] sm:$0xff] %v8703_v31  ;;  %v1346_v34 = vpack.c.bf16 %v1314_v21, %v1314_v21  ;;  %v1324_v63 = vmul.f32 0.35355338, %v8643_v47 }
 0x215   : > { %11972 = vst [vmem:[#allocation23_spill] sm:$0xff] %v8705_v33  ;;  %v1368_v51 = vpack.c.bf16 %v1237_v40, %v1237_v40  ;;  %v1304_v12 = vmul.f32 0.35355338, %v1237_v40  ;;  %v1614_v16 = vunpack.c.l.b16 %v1347_v3 }
 0x216   : > { %v1356_v48 = vpack.c.bf16 %v1324_v63, %v1324_v63 }
 0x217   : > { %v1288_v41 = vpop.f32.mrf.mxu3  ;;  %v1530_v49 = vunpack.c.l.b16 %v1368_v51  ;;  %v1336_v36 = vpack.c.bf16 %v1304_v12, %v1304_v12 }
 0x218   : > { %2212 = vrot.lane.b32.xlu0 %v8597_v8, %s7194_s22  ;;  %v8637_v18 = vadd.f32 %v8514_v5, %v1288_v41  ;;  %v8689_v41 = vpack.c.b16 %v1634_v39, %v1633_v2 }
 0x219   : > { %v1510_v58 = vunpack.c.l.b16 %v1336_v36  ;;  %v1716_v36 = vunpack.c.l.b16 %v1356_v48 }
 0x21a   : > { %v1389_v55 = vpack.c.bf16 %v8637_v18, %v8637_v18  ;;  %v1238_v38 = vpop.f32.mrf.mxu0  ;;  %v1325_v37 = vmul.f32 0.35355338, %v8637_v18 }
 0x21b   : > { %v1239_v6 = vadd.f32 %v8514_v5, %v1238_v38  ;;  %v1613_v38 = vunpack.c.l.b16 %v1346_v34 }
 0x21c   : > { %1649 = vrot.lane.b32.xlu1 %v8607_v13, %s7193_s21  ;;  %2289 = vrot.lane.b32.xlu2 %v8585_v20, %s7194_s22  ;;  %v1737_v35 = vunpack.c.l.b16 %v1389_v55 }
 0x21d   : > { %v1369_v55 = vpack.c.bf16 %v1239_v6, %v1239_v6  ;;  %v1305_v45 = vmul.f32 0.35355338, %v1239_v6  ;;  %v8753_v6 = vpack.c.b16 %v1614_v16, %v1613_v38 }
 0x21e   : > { %v8671_v60 = vpack.c.b16 %v1737_v35, %v1736_v59 }
 0x21f   : > { %v1531_v11 = vunpack.c.l.b16 %v1369_v55  ;;  %v1337_v1 = vpack.c.bf16 %v1305_v45, %v1305_v45  ;;  %11976 = vst [vmem:[#allocation27_spill] sm:$0xff] %v8753_v6 }
 0x220   : > { %2493 = vrot.lane.b32.xlu0 %v8613_v30, %s7196_s9  ;;  %11969 = vst [vmem:[#allocation20_spill] sm:$0xff] %v8671_v60 }
 0x221   : > { %v8715_v35 = vpack.c.b16 %v1531_v11, %v1530_v49  ;;  %v1511_v2 = vunpack.c.l.b16 %v1337_v1  ;;  %v1357_v11 = vpack.c.bf16 %v1325_v37, %v1325_v37  ;;  %v1303_v37 = vmul.f32 0.35355338, %v8678_v46 }
 0x222   : > { %v1241_v7 = vpop.f32.mrf.mxu0 }
 0x223   : > { %v8751_v26 = vpack.c.b16 %v1511_v2, %v1510_v58  ;;  %v1717_v21 = vunpack.c.l.b16 %v1357_v11  ;;  %v8790_v38 = vadd.f32 %v8514_v5, %v1241_v7 }
 0x224   : > { %2431 = vrot.lane.b32.xlu1 %v8617_v10, %s7194_s22  ;;  %2501 = vrot.lane.b32.xlu2 %v8597_v8, %s7195_s25 }
 0x225   : > { %11975 = vst [vmem:[#allocation26_spill] sm:$0xff] %v8751_v26  ;;  %v8783_v2 = vpack.c.b16 %v1717_v21, %v1716_v36  ;;  %v1370_v11 = vpack.c.bf16 %v8790_v38, %v8790_v38  ;;  %v1306_v0 = vmul.f32 0.35355338, %v8790_v38 }
 0x227   : > { %11978 = vst [vmem:[#allocation29_spill] sm:$0xff] %v8783_v2 }
 0x228   : > { %2566 = vrot.lane.b32.xlu0 %v8624_v57, %s7196_s9 }
 0x22a   : > { %v8756_v27 = vpop.permute.xlu0 %1440 }
 0x22b   : > { %v8639_v4 = vpop.permute.xlu2 %1546 }
 0x22c   : > { %2635 = vrot.lane.b32.xlu1 %v8629_v50, %s7196_s9  ;;  %2708 = vrot.lane.b32.xlu2 %v8617_v10, %s7195_s25 }
 0x230   : > { %1746 = vrot.lane.b32.xlu0 %v8617_v10, %s7193_s21 }
 0x233   : > { %v8665_v53 = vpop.permute.xlu2 %2210 }
 0x234   : > { %2214 = vrot.lane.b32.xlu1 %v8647_v32, %s7194_s22  ;;  %2700 = vrot.lane.b32.xlu2 %v8649_v62, %s7196_s9 }
 0x238   : > { %2362 = vrot.lane.b32.xlu0 %v8607_v13, %s7194_s22 }
 0x23b   : > { %v8691_v25 = vpop.permute.xlu2 %2572 }
 0x23c   : > { %1748 = vrot.lane.b32.xlu1 %v8671_v60, %s7193_s21  ;;  %2356 = vrot.lane.b32.xlu2 %v8667_v61, %s7194_s22 }
 0x240   : > { %2643 = vrot.lane.b32.xlu0 %v8607_v13, %s7195_s25 }
 0x243   : > { %v8711_v23 = vpop.permute.xlu2 %2491  ;;  %v8717_v19 = vpop.permute.xlu1 %2287 }
 0x244   : > { %1645 = vrot.lane.b32.xlu1 %v8689_v41, %s7193_s21  ;;  %2495 = vrot.lane.b32.xlu2 %v8685_v17, %s7196_s9  ;;  %11973 = vst [vmem:[#allocation24_spill] sm:$0xff] %v8711_v23 }
 0x248   : > { %1444 = vrot.lane.b32.xlu0 %v8647_v32, %s7193_s21 }
 0x24b   : > { %v8727_v59 = vpop.permute.xlu1 %2499 }
 0x24c   : > { %2505 = vrot.lane.b32.xlu1 %v8703_v31, %s7195_s25  ;;  %2629 = vrot.lane.b32.xlu2 %v8705_v33, %s7196_s9 }
 0x250   : > { %1643 = vrot.lane.b32.xlu0 %v8667_v61, %s7193_s21 }
 0x253   : > { %v8742_v52 = vpop.permute.xlu1 %2564 }
 0x254   : > { %1542 = vrot.lane.b32.xlu1 %v8715_v35, %s7193_s21  ;;  %1446 = vrot.lane.b32.xlu2 %v8703_v31, %s7193_s21  ;;  %11974 = vst [vmem:[#allocation25_spill] sm:$0xff] %v8742_v52 }
 0x256   : > { %v8723_v42 = vpop.permute.xlu2 %1647 }
 0x258   : > { %2503 = vrot.lane.b32.xlu0 %v8647_v32, %s7195_s25 }
 0x25c   : > { %3173 = vrot.lane.b32.xlu1 %v8597_v8, %s7197_s10  ;;  %2216 = vrot.lane.b32.xlu2 %v8703_v31, %s7194_s22 }
 0x25e   : > { %v8734_v9 = vpop.permute.xlu2 %1744 }
 0x25f   : > { %v1291_v39 = vpop.f32.mrf.mxu3 }
 0x260   : > { %2637 = vrot.lane.b32.xlu0 %v8667_v61, %s7195_s25  ;;  %v8749_v24 = vadd.f32 %v8514_v5, %v1291_v39  ;;  %v1243_v39 = vpop.f32.mrf.mxu0 }
 0x261   : > { %v8781_v34 = vadd.f32 %v8514_v5, %v1243_v39 }
 0x262   : > { %v1390_v55 = vpack.c.bf16 %v8749_v24, %v8749_v24 }
 0x263   : > { %v1307_v10 = vmul.f32 0.35355338, %v8781_v34 }
 0x264   : > { %2568 = vrot.lane.b32.xlu1 %v8715_v35, %s7195_s25  ;;  %2639 = vrot.lane.b32.xlu2 %v8689_v41, %s7195_s25  ;;  %v1738_v47 = vunpack.c.l.b16 %v1390_v55  ;;  %v1302_v55 = vmul.f32 0.35355338, %v8681_v28 }
 0x266   : > { %v8744_v15 = vpop.permute.xlu2 %2641 }
 0x267   : > { %v1293_v40 = vpop.f32.mrf.mxu3 }
 0x268   : > { %2433 = vrot.lane.b32.xlu0 %v8671_v60, %s7194_s22  ;;  %v1294_v51 = vadd.f32 %v8514_v5, %v1293_v40  ;;  %v1371_v40 = vpack.c.bf16 %v8781_v34, %v8781_v34  ;;  %v1335_v5 = vpack.c.bf16 %v1303_v37, %v1303_v37 }
 0x26a   : > { %v1391_v45 = vpack.c.bf16 %v1294_v51, %v1294_v51  ;;  %v1533_v7 = vunpack.c.l.b16 %v1371_v40  ;;  %v1415_v28 = vunpack.c.l.b16 %v1335_v5  ;;  %v1327_v5 = vmul.f32 0.35355338, %v1294_v51 }
 0x26c   : > { %2560 = vrot.lane.b32.xlu1 %v8751_v26, %s7196_s9  ;;  %2631 = vrot.lane.b32.xlu2 %v8753_v6, %s7196_s9  ;;  %v1739_v12 = vunpack.c.l.b16 %v1391_v45 }
 0x26e   : > { %v8766_v49 = vpop.permute.xlu1 %2360  ;;  %v8768_v18 = vpop.permute.xlu2 %1442  ;;  %v8774_v3 = vpack.c.b16 %v1739_v12, %v1738_v47  ;;  %v1334_v47 = vpack.c.bf16 %v1302_v55, %v1302_v55  ;;  %v1532_v12 = vunpack.c.l.b16 %v1370_v11  ;;  %v1569_v11 = vsel %vm1448_vm3, %v8639_v4, 0 }
 0x270   : > { %2710 = vrot.lane.b32.xlu0 %v8671_v60, %s7195_s25  ;;  %11977 = vst [vmem:[#allocation28_spill] sm:$0xff] %v8774_v3  ;;  %v8811_v21 = vpack.c.b16 %v1533_v7, %v1532_v12  ;;  %v1414_v36 = vunpack.c.l.b16 %v1334_v47  ;;  %v1339_v60 = vpack.c.bf16 %v1307_v10, %v1307_v10 }
 0x272   : > { %v8772_v1 = vpop.permute.xlu0 %2429  ;;  %11981 = vst [vmem:[#allocation32_spill] sm:$0xff] %v8811_v21  ;;  %v8819_v37 = vpack.c.b16 %v1415_v28, %v1414_v36 }
 0x274   : > { %3464 = vrot.lane.b32.xlu1 %v8647_v32, %s7198_s11  ;;  %1750 = vrot.lane.b32.xlu2 %v8774_v3, %s7193_s21  ;;  %11983 = vst [vmem:[#allocation34_spill] sm:$0xff] %v8819_v37 }
 0x276   : > { %v8785_v16 = vpop.permute.xlu1 %2698  ;;  %v8787_v58 = vpop.permute.xlu2 %2289 }
 0x277   : > { %11979 = vst [vmem:[#allocation30_spill] sm:$0xff] %v8785_v16  ;;  %v1338_v16 = vpack.c.bf16 %v1306_v0, %v1306_v0 }
 0x278   : > { %2702 = vrot.lane.b32.xlu0 %v8783_v2, %s7196_s9 }
 0x279   : > { %v1512_v34 = vunpack.c.l.b16 %v1338_v16 }
 0x27a   : > { %v8797_v63 = vpop.permute.xlu0 %2706 }
 0x27b   : > { %11980 = vst [vmem:[#allocation31_spill] sm:$0xff] %v8797_v63 }
 0x27c   : > { %3250 = vrot.lane.b32.xlu1 %v8585_v20, %s7197_s10  ;;  %2712 = vrot.lane.b32.xlu2 %v8774_v3, %s7195_s25 }
 0x27e   : > { %v1549_v45 = vpop.permute.xlu1 %1548  ;;  %v8806_v46 = vpop.permute.xlu2 %2501 }
 0x27f   : > { %v1572_v48 = vsel %vm1448_vm3, %v1549_v45, 0  ;;  %v1326_v45 = vmul.f32 0.35355338, %v8749_v24 }
 0x280   : > { %2358 = vrot.lane.b32.xlu0 %v8689_v41, %s7194_s22  ;;  %1578 = vmatpush.bf16.xpose.msrb.mxu2 %v1572_v48  ;;  %v1359_v48 = vpack.c.bf16 %v1327_v5, %v1327_v5 }
 0x281   : > { %v1358_v28 = vpack.c.bf16 %v1326_v45, %v1326_v45  ;;  %v1670_v45 = vsel %vm1448_vm3, %v8723_v42, 0 }
 0x282   : > { %v8813_v39 = vpop.permute.xlu0 %2633  ;;  %v1719_v51 = vunpack.c.l.b16 %v1359_v48 }
 0x283   : > { %11982 = vst [vmem:[#allocation33_spill] sm:$0xff] %v8813_v39  ;;  %v1718_v24 = vunpack.c.l.b16 %v1358_v28 }
 0x284   : > { %3246 = vrot.lane.b32.xlu1 %v8811_v21, %s7197_s10  ;;  %2283 = vrot.lane.b32.xlu2 %v8715_v35, %s7194_s22 }
 0x286   : > { %v8821_v40 = vpop.permute.xlu1 %2574  ;;  %v8823_v55 = vpop.permute.xlu2 %2708 }
 0x287   : > { %11984 = vst [vmem:[#allocation35_spill] sm:$0xff] %v8823_v55 }
 0x288   : > { %2497 = vrot.lane.b32.xlu0 %v8819_v37, %s7196_s9  ;;  %1579 = vmatpush.bf16.xpose.msrb.mxu2 %v1569_v11  ;;  %v8847_v11 = vpack.c.b16 %v1719_v51, %v1718_v24 }
 0x28a   : > { %v8829_v7 = vpop.permute.xlu0 %2212  ;;  %11987 = vst [vmem:[#allocation38_spill] sm:$0xff] %v8847_v11 }
 0x28c   : > { %3244 = vrot.lane.b32.xlu1 %v8715_v35, %s7197_s10  ;;  %3177 = vrot.lane.b32.xlu2 %v8703_v31, %s7197_s10 }
 0x28e   : > { %v1650_v47 = vpop.permute.xlu1 %1649  ;;  %v8836_v12 = vpop.permute.xlu2 %2700 }
 0x28f   : > { %11985 = vst [vmem:[#allocation36_spill] sm:$0xff] %v8836_v12  ;;  %v1673_v4 = vsel %vm1448_vm3, %v1650_v47, 0 }
 0x290   : > { %2435 = vrot.lane.b32.xlu0 %v8774_v3, %s7194_s22  ;;  %1679 = vmatpush.bf16.xpose.msrb.mxu3 %v1673_v4 }
 0x292   : > { %v8841_v36 = vpop.permute.xlu0 %2493 }
 0x293   : > { %11986 = vst [vmem:[#allocation37_spill] sm:$0xff] %v8841_v36 }
 0x294   : > { %3535 = vrot.lane.b32.xlu1 %v8585_v20, %s7198_s11  ;;  %3466 = vrot.lane.b32.xlu2 %v8703_v31, %s7198_s11 }
 0x296   : > { %v8849_v5 = vpop.permute.xlu1 %2431  ;;  %v8851_v47 = vpop.permute.xlu2 %2356 }
 0x298   : > { %2704 = vrot.lane.b32.xlu0 %v8847_v11, %s7196_s9  ;;  %1680 = vmatpush.bf16.xpose.msrb.mxu3 %v1670_v45 }
 0x29a   : > { %v8857_v48 = vpop.permute.xlu0 %2566 }
 0x29b   : > { %11988 = vst [vmem:[#allocation39_spill] sm:$0xff] %v8857_v48 }
 0x29c   : > { %3248 = vrot.lane.b32.xlu2 %v8529_v22, %s7197_s10 }
 0x29e   : > { %v8861_v4 = vpop.permute.xlu1 %2635  ;;  %v8863_v28 = vpop.permute.xlu2 %2495 }
 0x29f   : > { %11989 = vst [vmem:[#allocation40_spill] sm:$0xff] %v8861_v4 }
 0x2a0   : > { %11990 = vst [vmem:[#allocation41_spill] sm:$0xff] %v8863_v28  ;;  %3175 = vrot.lane.b32.xlu0 %v8647_v32, %s7197_s10 }
 0x2a2   : > { %v1747_v51 = vpop.permute.xlu0 %1746 }
 0x2a4   : > { %3452 = vrot.lane.b32.xlu2 %v8555_v44, %s7199_s12 }
 0x2a6   : > { %v8869_v42 = vpop.permute.xlu1 %2214  ;;  %v8871_v24 = vpop.permute.xlu2 %2629 }
 0x2a7   : > { %11991 = vst [vmem:[#allocation42_spill] sm:$0xff] %v8871_v24 }
 0x2a8   : > { %1544 = vrot.lane.b32.xlu0 %v8811_v21, %s7193_s21  ;;  %s7201_s21 = smov 72  }
 0x2aa   : > { %v2363_v45 = vpop.permute.xlu0 %2362 }
 0x2ac   : > { %3454 = vrot.lane.b32.xlu2 %v8613_v30, %s7199_s12 }
 0x2ae   : > { %v1749_v20 = vpop.permute.xlu1 %1748  ;;  %v1447_v31 = vpop.permute.xlu2 %1446 }
 0x2af   : > { %v1471_v32 = vsel %vm1448_vm3, %v1447_v31, 0  ;;  %v1513_v31 = vunpack.c.l.b16 %v1339_v60 }
 0x2b0   : > { %2285 = vrot.lane.b32.xlu0 %v8811_v21, %s7194_s22  ;;  %1477 = vmatpush.bf16.xpose.msrb.mxu1 %v1471_v32 }
 0x2b1   : > { %v8890_v28 = vpack.c.b16 %v1513_v31, %v1512_v34  ;;  %v1771_v31 = vsel %vm1448_vm3, %v1749_v20, 0  ;;  %v1768_v34 = vsel %vm1448_vm3, %v1747_v51, 0 }
 0x2b2   : > { %v8881_v3 = vpop.permute.xlu0 %2643 }
 0x2b3   : > { %11992 = vst [vmem:[#allocation43_spill] sm:$0xff] %v8890_v28 }
 0x2b6   : > { %v1646_v4 = vpop.permute.xlu1 %1645  ;;  %v8884_v39 = vpop.permute.xlu2 %2216 }
 0x2b7   : > { %v1667_v12 = vsel %vm1448_vm3, %v1646_v4, 0  ;;  %v1465_v4 = vsel %vm1448_vm3, %v8768_v18, 0 }
 0x2b8   : > { %2570 = vrot.lane.b32.xlu0 %v8811_v21, %s7195_s25  ;;  %1681 = vmatpush.bf16.xpose.msrb.mxu3 %v1667_v12  ;;  %v1462_v12 = vsel %vm1448_vm3, %v8756_v27, 0  ;;  %s11537_s25 = scalar_lea.vmem %s11749_s8, %s6318_s29 }
 0x2ba   : > { %v1445_v24 = vpop.permute.xlu0 %1444 }
 0x2bb   : > { %v1468_v32 = vsel %vm1448_vm3, %v1445_v24, 0 }
 0x2bc   : > { %1478 = vmatpush.bf16.xpose.msrb.mxu1 %v1468_v32 }
 0x2be   : > { %v8892_v38 = vpop.permute.xlu2 %2639 }
 0x2c0   : > { %2562 = vrot.lane.b32.xlu0 %v8890_v28, %s7196_s9  ;;  %s7202_s9 = smov 104  }
 0x2c2   : > { %v1644_v10 = vpop.permute.xlu0 %1643 }
 0x2c3   : > { %v1664_v0 = vsel %vm1448_vm3, %v1644_v10, 0 }
 0x2c4   : > { %1682 = vmatpush.bf16.xpose.msrb.mxu3 %v1664_v0  ;;  %1479 = vmatpush.bf16.xpose.msrb.mxu1 %v1465_v4  ;;  %v1765_v0 = vsel %vm1448_vm3, %v8734_v9, 0 }
 0x2c6   : > { %v8900_v60 = vpop.permute.xlu2 %2631 }
 0x2c7   : > { %11993 = vst [vmem:[#allocation44_spill] sm:$0xff] %v8900_v60 }
 0x2c8   : > { %3171 = vrot.lane.b32.xlu0 %v8522_v56, %s7197_s10 }
 0x2ca   : > { %v8905_v16 = vpop.permute.xlu0 %2503 }
 0x2cb   : > { %6148 = vmatmul.msk.bf16.vlgmr.msrb.gmra.mxu3 %vm1448_vm3, %v8705_v33 }
 0x2cc   : > { %2311 = vmatpush.bf16.msra.mxu3 %v8787_v58  ;;  %1480 = vmatpush.bf16.xpose.msrb.mxu1 %v1462_v12 }
 0x2ce   : > { %v1751_v18 = vpop.permute.xlu2 %1750 }
 0x2cf   : > { %v1774_v24 = vsel %vm1448_vm3, %v1751_v18, 0 }
 0x2d0   : > { %2312 = vmatpush.bf16.msra.mxu3 %v8717_v19  ;;  %3462 = vrot.lane.b32.xlu0 %v8597_v8, %s7198_s11 }
 0x2d2   : > { %v8914_v58 = vpop.permute.xlu0 %2637 }
 0x2d3   : > { %6140 = vmatmul.msk.bf16.vlgmr.msrb.gmra.mxu1 %vm1448_vm3, %v8555_v44 }
 0x2d4   : > { %1780 = vmatpush.bf16.xpose.msra.mxu1 %v1774_v24 }
 0x2d6   : > { %v8918_v19 = vpop.permute.xlu2 %2712 }
 0x2d8   : > { %3460 = vrot.lane.b32.xlu0 %v8522_v56, %s7198_s11 }
 0x2da   : > { %v8923_v27 = vpop.permute.xlu0 %2433 }
 0x2db   : > { %6149 = vmatmul.msk.bf16.gmra.mxu3 %vm1448_vm3, %v8753_v6 }
 0x2dc   : > { %1781 = vmatpush.bf16.xpose.msra.mxu1 %v1771_v31  ;;  %v2598_v31 = vsel %vm1448_vm3, %v8821_v40, 0 }
 0x2de   : > { %v2284_v32 = vpop.permute.xlu2 %2283 }
 0x2e0   : > { %3323 = vrot.lane.b32.xlu0 %v8607_v13, %s7197_s10 }
 0x2e2   : > { %v8930_v10 = vpop.permute.xlu0 %2710 }
 0x2e3   : > { %11994 = vst [vmem:[#allocation45_spill] sm:$0xff] %v8930_v10  ;;  %6141 = vmatmul.msk.bf16.gmra.mxu1 %vm1448_vm3, %v8613_v30 }
 0x2e4   : > { %1782 = vmatpush.bf16.xpose.msra.mxu1 %v1768_v34 }
 0x2e6   : > { %v8934_v20 = vpop.permute.xlu2 %3177 }
 0x2e7   : > { %11995 = vst [vmem:[#allocation46_spill] sm:$0xff] %v8934_v20  ;;  %3199 = vmatpush.bf16.msrb.mxu0 %v8934_v20 }
 0x2e8   : > { %3456 = vrot.lane.b32.xlu0 %v8685_v17, %s7199_s12 }
 0x2ea   : > { %v8941_v51 = vpop.permute.xlu0 %2702 }
 0x2eb   : > { %11996 = vst [vmem:[#allocation47_spill] sm:$0xff] %v8941_v51  ;;  %6150 = vmatmul.msk.bf16.gmra.mxu3 %vm1448_vm3, %v8591_v54 }
 0x2ec   : > { %1783 = vmatpush.bf16.xpose.msra.mxu1 %v1765_v0 }
 0x2f0   : > { %3321 = vrot.lane.b32.xlu0 %v8563_v14, %s7197_s10 }
 0x2f2   : > { %v2359_v4 = vpop.permute.xlu0 %2358 }
 0x2f3   : > { %6142 = vmatmul.msk.bf16.gmra.mxu1 %vm1448_vm3, %v8685_v17 }
 0x2f4   : > { %2384 = vmatpush.bf16.msrb.mxu1 %v2363_v45  ;;  %v2506_v45 = vpop.permute.xlu1 %2505 }
 0x2f8   : > { %2385 = vmatpush.bf16.msrb.mxu1 %v8766_v49 }
 0x2fa   : > { %v8951_v9 = vpop.permute.xlu0 %2497 }
 0x2fb   : > { %11997 = vst [vmem:[#allocation48_spill] sm:$0xff] %v8951_v9  ;;  %6151 = vmatmul.msk.bf16.gmra.mxu3 %vm1448_vm3, %v8629_v50 }
 0x2fc   : > { %2386 = vmatpush.bf16.msrb.mxu1 %v2359_v4  ;;  %v1543_v18 = vpop.permute.xlu1 %1542  ;;  %v2595_v4 = vsel %vm1448_vm3, %v8691_v25, 0 }
 0x2fd   : > { %v1563_v40 = vsel %vm1448_vm3, %v1543_v18, 0  ;;  %v2526_v18 = vsel %vm1448_vm3, %v8905_v16, 0  ;;  %v3467_v16 = vpop.permute.xlu2 %3466 }
 0x300   : > { %2387 = vmatpush.bf16.msrb.mxu1 %v8851_v47 }
 0x302   : > { %v2436_v12 = vpop.permute.xlu0 %2435 }
 0x303   : > { %6143 = vmatmul.msk.bf16.gmra.mxu1 %vm1448_vm3, %v8819_v37 }
 0x304   : > { %v8966_v47 = vpop.permute.xlu1 %3173 }
 0x305   : > { %12000 = vst [vmem:[#allocation51_spill] sm:$0xff] %v8966_v47  ;;  %v9143_v48 = vpop.permute.xlu2 %3248 }
 0x30a   : > { %v8957_v49 = vpop.permute.xlu0 %2704 }
 0x30b   : > { %11998 = vst [vmem:[#allocation49_spill] sm:$0xff] %v8957_v49 }
 0x30c   : > { %v2569_v25 = vpop.permute.xlu1 %2568 }
 0x312   : > { %v8959_v24 = vpop.permute.xlu0 %3175 }
 0x313   : > { %11999 = vst [vmem:[#allocation50_spill] sm:$0xff] %v8959_v24  ;;  %3200 = vmatpush.bf16.msrb.mxu0 %v8959_v24  ;;  %6152 = vmatmul.msk.bf16.vlgmr.msra.gmra.mxu1 %vm1448_vm3, %v8575_v29 }
 0x314   : > { %2604 = vmatpush.bf16.xpose.msra.mxu1 %v2598_v31  ;;  %v2529_v31 = vsel %vm1448_vm3, %v2506_v45, 0  ;;  %v3490_v45 = vsel %vm1448_vm3, %v3467_v16, 0 }
 0x317   : > { %3201 = vmatpush.bf16.msrb.mxu0 %v8966_v47 }
 0x31a   : > { %v1545_v34 = vpop.permute.xlu0 %1544 }
 0x31b   : > { %v1566_v0 = vsel %vm1448_vm3, %v1545_v34, 0 }
 0x31c   : > { %1580 = vmatpush.bf16.xpose.msrb.mxu2 %v1566_v0  ;;  %2605 = vmatpush.bf16.xpose.msra.mxu1 %v2595_v4 }
 0x322   : > { %v2286_v44 = vpop.permute.xlu0 %2285 }
 0x323   : > { %2313 = vmatpush.bf16.msra.mxu3 %v2286_v44  ;;  %6153 = vmatmul.msk.bf16.gmra.mxu1 %vm1448_vm3, %v8649_v62 }
 0x324   : > { %1581 = vmatpush.bf16.xpose.msrb.mxu2 %v1563_v40 }
 0x327   : > { %2314 = vmatpush.bf16.msra.mxu3 %v2284_v32  ;;  %v8990_v32 = vpop.permute.xlu1 %2560 }
 0x328   : > { %12002 = vst [vmem:[#allocation53_spill] sm:$0xff] %v8990_v32 }
 0x32a   : > { %v2571_v34 = vpop.permute.xlu0 %2570 }
 0x32b   : > { %2535 = vmatpush.bf16.xpose.msrb.mxu3 %v2529_v31  ;;  %6144 = vmatmul.msk.bf16.vlgmr.msrb.gmra.mxu2 %vm1448_vm3, %v8751_v26  ;;  %v2592_v44 = vsel %vm1448_vm3, %v2571_v34, 0 }
 0x32c   : > { %2238 = vmatpush.bf16.msra.mxu2 %v8884_v39  ;;  %2606 = vmatpush.bf16.xpose.msra.mxu1 %v2592_v44 }
 0x330   : > { %2239 = vmatpush.bf16.msra.mxu2 %v8869_v42  ;;  %v2589_v42 = vsel %vm1448_vm3, %v2569_v25, 0 }
 0x332   : > { %v8985_v39 = vpop.permute.xlu0 %2562 }
 0x333   : > { %2536 = vmatpush.bf16.xpose.msrb.mxu3 %v2526_v18  ;;  %12001 = vst [vmem:[#allocation52_spill] sm:$0xff] %v8985_v39  ;;  %6154 = vmatmul.msk.bf16.gmra.mxu1 %vm1448_vm3, %v8783_v2 }
 0x334   : > { %2240 = vmatpush.bf16.msra.mxu2 %v8829_v7  ;;  %2607 = vmatpush.bf16.xpose.msra.mxu1 %v2589_v42  ;;  %v2523_v7 = vsel %vm1448_vm3, %v8806_v46, 0  ;;  %v3465_v46 = vpop.permute.xlu1 %3464  ;;  %v9030_v42 = vld [vmem:[%s11748_s7 + $0x8] sm:$0xff] }
 0x338   : > { %2241 = vmatpush.bf16.msra.mxu2 %v8665_v53 }
 0x33a   : > { %v8996_v53 = vpop.permute.xlu0 %3171 }
 0x33b   : > { %2537 = vmatpush.bf16.xpose.msrb.mxu3 %v2523_v7  ;;  %12003 = vst [vmem:[#allocation54_spill] sm:$0xff] %v8996_v53  ;;  %6145 = vmatmul.msk.bf16.gmra.mxu2 %vm1448_vm3, %v8890_v28 }
 0x33c   : > { %2457 = vmatpush.bf16.msrb.mxu2 %v2436_v12  ;;  %3202 = vmatpush.bf16.msrb.mxu0 %v8996_v53  ;;  %v3487_v12 = vsel %vm1448_vm3, %v3465_v46, 0  ;;  %v9109_v54 = vpop.permute.xlu1 %3250 }
 0x340   : > { %2458 = vmatpush.bf16.msrb.mxu2 %v8923_v27  ;;  %3496 = vmatpush.bf16.xpose.msra.mxu0 %v3490_v45  ;;  %v2520_v27 = vsel %vm1448_vm3, %v8727_v59, 0 }
 0x343   : > { %2538 = vmatpush.bf16.xpose.msrb.mxu3 %v2520_v27  ;;  %6155 = vmatmul.msk.bf16.gmra.mxu1 %vm1448_vm3, %v8847_v11 }
 0x344   : > { %2459 = vmatpush.bf16.msrb.mxu2 %v8849_v5  ;;  %v3463_v5 = vpop.permute.xlu0 %3462  ;;  %v9141_v36 = vpop.permute.xlu1 %3246 }
 0x345   : > { %v3484_v0 = vsel %vm1448_vm3, %v3463_v5, 0  ;;  %v9047_v5 = vld [vmem:[%s11748_s7 + $0x10] sm:$0xff] }
 0x348   : > { %2460 = vmatpush.bf16.msrb.mxu2 %v8772_v1  ;;  %3497 = vmatpush.bf16.xpose.msra.mxu0 %v3487_v12  ;;  %v9014_v1 = vld [vmem:[%s11748_s7] sm:$0xff] }
 0x34b   : > { %6146 = vmatmul.msk.bf16.gmra.mxu2 %vm1448_vm3, %v8549_v43 }
 0x34c   : > { %v3461_v40 = vpop.permute.xlu0 %3460 }
 0x34d   : > { %v3481_v25 = vsel %vm1448_vm3, %v3461_v40, 0 }
 0x34e   : > { %v1684_v59 = vpop.f32.mrf.mxu3 }
 0x34f   : > { %v9017_v4 = vadd.f32 %v1684_v59, %v9014_v1 }
 0x350   : > { %3498 = vmatpush.bf16.xpose.msra.mxu0 %v3484_v0  ;;  %v1482_v31 = vpop.f32.mrf.mxu1 }
 0x351   : > { %v9020_v34 = vadd.f32 %v1482_v31, %v9014_v1  ;;  %v1854_v44 = vsel %vm1805_vm5, %v9017_v4, -inf }
 0x352   : > { %1855 = vmax.xlane.f32.xlu0 %v1854_v44 }
 0x353   : > { %v1806_v18 = vsel %vm1805_vm5, %v9020_v34, -inf }
 0x354   : > { %1807 = vmax.xlane.f32.xlu1 %v1806_v18  ;;  %v9062_v18 = vld [vmem:[%s11748_s7 + $0x18] sm:$0xff]  ;;  %v9119_v49 = vpop.permute.xlu0 %3323 }
 0x355   : > { %12004 = vst [vmem:[#allocation55_spill] sm:$0xff] %v9119_v49 }
 0x356   : > { %v1686_v7 = vpop.f32.mrf.mxu3 }
 0x357   : > { %v9033_v16 = vadd.f32 %v1686_v7, %v9030_v42 }
 0x358   : > { %3499 = vmatpush.bf16.xpose.msra.mxu0 %v3481_v25  ;;  %v1484_v45 = vpop.f32.mrf.mxu1 }
 0x359   : > { %v9036_v27 = vadd.f32 %v1484_v45, %v9030_v42  ;;  %v1857_v46 = vsel %vm1805_vm5, %v9033_v16, -inf }
 0x35a   : > { %1858 = vmax.xlane.f32.xlu2 %v1857_v46 }
 0x35b   : > { %6147 = vmatmul.msk.bf16.gmra.mxu2 %vm1448_vm3, %v8624_v57  ;;  %v1809_v12 = vsel %vm1805_vm5, %v9036_v27, -inf }
 0x35c   : > { %1810 = vmax.xlane.f32.xlu0 %v1809_v12 }
 0x35e   : > { %v1689_v0 = vpop.f32.mrf.mxu3 }
 0x35f   : > { %v9050_v59 = vadd.f32 %v1689_v0, %v9047_v5 }
 0x360   : > { %v1487_v40 = vpop.f32.mrf.mxu1 }
 0x361   : > { %v9053_v31 = vadd.f32 %v1487_v40, %v9047_v5  ;;  %v1860_v44 = vsel %vm1805_vm5, %v9050_v59, -inf }
 0x362   : > { %1861 = vmax.xlane.f32.xlu1 %v1860_v44  ;;  %v9077_v44 = vld [vmem:[%s11748_s7 + $0x20] sm:$0xff] }
 0x363   : > { %v1812_v25 = vsel %vm1805_vm5, %v9053_v31, -inf }
 0x364   : > { %1813 = vmax.xlane.f32.xlu2 %v1812_v25 }
 0x366   : > { %v1691_v7 = vpop.f32.mrf.mxu3 }
 0x367   : > { %v9065_v45 = vadd.f32 %v1691_v7, %v9062_v18 }
 0x368   : > { %v1489_v46 = vpop.f32.mrf.mxu1 }
 0x369   : > { %v9068_v12 = vadd.f32 %v1489_v46, %v9062_v18  ;;  %v1863_v0 = vsel %vm1805_vm5, %v9065_v45, -inf }
 0x36a   : > { %1864 = vmax.xlane.f32.xlu0 %v1863_v0 }
 0x36b   : > { %v1815_v40 = vsel %vm1805_vm5, %v9068_v12, -inf }
 0x36c   : > { %1816 = vmax.xlane.f32.xlu1 %v1815_v40 }
 0x36e   : > { %v1694_v50 = vpop.f32.mrf.mxu3 }
 0x370   : > { %v1492_v25 = vpop.f32.mrf.mxu1 }
 0x371   : > { %v9080_v7 = vadd.f32 %v1492_v25, %v9077_v44  ;;  %v9090_v25 = vadd.f32 %v1694_v50, %v9077_v44 }
 0x373   : > { %v1818_v46 = vsel %vm1805_vm5, %v9080_v7, -inf }
 0x374   : > { %1819 = vmax.xlane.f32.xlu0 %v1818_v46 }
 0x376   : > { %v1696_v46 = vpop.f32.mrf.mxu3 }
 0x378   : > { %v1494_v17 = vpop.f32.mrf.mxu1 }
 0x37e   : > { %v1699_v51 = vpop.f32.mrf.mxu3 }
 0x380   : > { %v1497_v30 = vpop.f32.mrf.mxu1 }
 0x386   : > { %v1701_v23 = vpop.f32.mrf.mxu3 }
 0x388   : > { %v1499_v0 = vpop.f32.mrf.mxu1 }
 0x390   : > { %v1785_v2 = vpop.f32.mrf.mxu1 }
 0x398   : > { %v9092_v11 = vpop.f32.mrf.mxu1 }
 0x3a0   : > { %v9117_v43 = vpop.f32.mrf.mxu1 }
 0x3ae   : > { %v1583_v8 = vpop.f32.mrf.mxu2 }
 0x3af   : > { %v9085_v40 = vadd.f32 %v1583_v8, %v9014_v1  ;;  %v1866_v8 = vsel %vm1805_vm5, %v9090_v25, -inf }
 0x3b1   : > { %v1830_v6 = vsel %vm1805_vm5, %v9085_v40, -inf }
 0x3b2   : > { %1831 = vmax.xlane.f32.xlu2 %v1830_v6  ;;  %v9104_v6 = vld [vmem:[%s11748_s7 + $0x28] sm:$0xff] }
 0x3b3   : > { %v9107_v50 = vadd.f32 %v1696_v46, %v9104_v6 }
 0x3b5   : > { %v1869_v46 = vsel %vm1805_vm5, %v9107_v50, -inf }
 0x3b6   : > { %v1585_v56 = vpop.f32.mrf.mxu2 }
 0x3b7   : > { %v9095_v62 = vadd.f32 %v1585_v56, %v9030_v42  ;;  %v9112_v56 = vadd.f32 %v1494_v17, %v9104_v6  ;;  %v9128_v17 = vld [vmem:[%s11748_s7 + $0x30] sm:$0xff] }
 0x3b8   : > { %v9136_v60 = vadd.f32 %v1497_v30, %v9128_v17  ;;  %v9151_v30 = vpop.permute.xlu0 %3456 }
 0x3b9   : > { %v1833_v29 = vsel %vm1805_vm5, %v9095_v62, -inf  ;;  %12005 = vst [vmem:[#allocation56_spill] sm:$0xff] %v9151_v30  ;;  %v9171_v30 = vpop.permute.xlu1 %3244 }
 0x3ba   : > { %1834 = vmax.xlane.f32.xlu1 %v1833_v29  ;;  %1867 = vmax.xlane.f32.xlu2 %v1866_v8  ;;  %v9133_v8 = vadd.f32 %v1699_v51, %v9128_v17 }
 0x3be   : > { %v1588_v57 = vpop.f32.mrf.mxu2 }
 0x3bf   : > { %v9115_v33 = vadd.f32 %v1588_v57, %v9047_v5  ;;  %v1821_v57 = vsel %vm1805_vm5, %v9112_v56, -inf }
 0x3c0   : > { %v9177_v24 = vpop.permute.xlu0 %3321 }
 0x3c1   : > { %v1836_v29 = vsel %vm1805_vm5, %v9115_v33, -inf  ;;  %12007 = vst [vmem:[#allocation58_spill] sm:$0xff] %v9177_v24 }
 0x3c2   : > { %1837 = vmax.xlane.f32.xlu0 %v1836_v29  ;;  %1870 = vmax.xlane.f32.xlu1 %v1869_v46  ;;  %v1872_v29 = vsel %vm1805_vm5, %v9133_v8, -inf  ;;  %v1824_v46 = vsel %vm1805_vm5, %v9136_v60, -inf }
 0x3c3   : > { %1822 = vmax.xlane.f32.xlu2 %v1821_v57  ;;  %v1792_v57 = vpop.f32.mrf.mxu1 }
 0x3c6   : > { %v1590_v49 = vpop.f32.mrf.mxu2 }
 0x3c7   : > { %v9139_v9 = vadd.f32 %v1590_v49, %v9062_v18  ;;  %v9156_v49 = vld [vmem:[%s11748_s7 + $0x38] sm:$0xff] }
 0x3c8   : > { %v9159_v52 = vadd.f32 %v1499_v0, %v9156_v49  ;;  %v9162_v53 = vadd.f32 %v1701_v23, %v9156_v49 }
 0x3c9   : > { %v1839_v51 = vsel %vm1805_vm5, %v9139_v9, -inf }
 0x3ca   : > { %1873 = vmax.xlane.f32.xlu0 %v1872_v29  ;;  %1825 = vmax.xlane.f32.xlu1 %v1824_v46  ;;  %v1827_v29 = vsel %vm1805_vm5, %v9159_v52, -inf  ;;  %v1875_v0 = vsel %vm1805_vm5, %v9162_v53, -inf }
 0x3cb   : > { %1840 = vmax.xlane.f32.xlu2 %v1839_v51  ;;  %v9175_v51 = vpop.permute.xlu2 %3452  ;;  %v1795_v23 = vpop.f32.mrf.mxu1 }
 0x3cc   : > { %12006 = vst [vmem:[#allocation57_spill] sm:$0xff] %v9175_v51  ;;  %v9189_v51 = vpop.permute.xlu1 %3535 }
 0x3cd   : > { %12008 = vst [vmem:[#allocation59_spill] sm:$0xff] %v9189_v51 }
 0x3ce   : > { %v1593_v47 = vpop.f32.mrf.mxu2 }
 0x3cf   : > { %v9165_v39 = vadd.f32 %v1593_v47, %v9077_v44  ;;  %v9180_v47 = vadd.f32 %v1785_v2, %v9014_v1  ;;  %v9195_v2 = vadd.f32 %v9092_v11, %v9030_v42  ;;  %v1856_v1 = vpop.xlane.xlu0 %1855 }
 0x3d0   : > { %v1918_v55 = vsub.f32 %v9017_v4, %v1856_v1 }
 0x3d1   : > { %v1842_v46 = vsel %vm1805_vm5, %v9165_v39, -inf }
 0x3d2   : > { %1828 = vmax.xlane.f32.xlu0 %v1827_v29  ;;  %1843 = vmax.xlane.f32.xlu1 %v1842_v46  ;;  %v1878_v46 = vsel %vm1805_vm5, %v9180_v47, -inf }
 0x3d3   : > { %1876 = vmax.xlane.f32.xlu2 %v1875_v0  ;;  %v9191_v0 = vpop.permute.xlu2 %3454  ;;  %v1797_v24 = vpop.f32.mrf.mxu1 }
 0x3d4   : > { %12009 = vst [vmem:[#allocation60_spill] sm:$0xff] %v9191_v0  ;;  %v1966_v0 = vmul.f32 1.442695, %v1918_v55  ;;  %v9206_v11 = vadd.f32 %v1797_v24, %v9104_v6  ;;  %v1808_v42 = vpop.xlane.xlu1 %1807 }
 0x3d6   : > { %v1595_v20 = vpop.f32.mrf.mxu2  ;;  %6667 = vpow2.f32 %v1966_v0  ;;  %v1893_v55 = vsel %vm1805_vm5, %v9206_v11, -inf }
 0x3d7   : > { %v9183_v32 = vadd.f32 %v1595_v20, %v9104_v6  ;;  %v1811_v14 = vpop.xlane.xlu0 %1810  ;;  %v9223_v6 = vadd.f32 %v1795_v23, %v9077_v44 }
 0x3d9   : > { %v1845_v29 = vsel %vm1805_vm5, %v9183_v32, -inf }
 0x3da   : > { %1846 = vmax.xlane.f32.xlu0 %v1845_v29  ;;  %1879 = vmax.xlane.f32.xlu1 %v1878_v46  ;;  %v1881_v29 = vsel %vm1805_vm5, %v9195_v2, -inf }
 0x3db   : > { %v1859_v51 = vpop.xlane.xlu2 %1858  ;;  %v1800_v10 = vpop.f32.mrf.mxu1 }
 0x3dc   : > { %v9225_v0 = vpop.eup %6667 }
 0x3dd   : > { %v2046_v44 = vsel %vm1805_vm5, %v9225_v0, 0.0 }
 0x3de   : > { %v1598_v20 = vpop.f32.mrf.mxu2 }
 0x3df   : > { %v9198_v63 = vadd.f32 %v1598_v20, %v9128_v17  ;;  %v9210_v20 = vadd.f32 %v9117_v43, %v9047_v5 }
 0x3e1   : > { %v1848_v46 = vsel %vm1805_vm5, %v9198_v63, -inf  ;;  %v1884_v43 = vsel %vm1805_vm5, %v9210_v20, -inf }
 0x3e2   : > { %1882 = vmax.xlane.f32.xlu0 %v1881_v29  ;;  %1849 = vmax.xlane.f32.xlu2 %v1848_v46  ;;  %v1919_v29 = vsub.f32 %v9033_v16, %v1859_v51  ;;  %v1862_v46 = vpop.xlane.xlu1 %1861  ;;  %v9228_v16 = vadd.f32 %v1792_v57, %v9062_v18  ;;  %v1865_v51 = vpop.xlane.xlu0 %1864 }
 0x3e3   : > { %v1802_v23 = vpop.f32.mrf.mxu1 }
 0x3e4   : > { %v1968_v5 = vmul.f32 1.442695, %v1919_v29  ;;  %v1890_v29 = vsel %vm1805_vm5, %v9223_v6, -inf  ;;  %v1887_v18 = vsel %vm1805_vm5, %v9228_v16, -inf }
 0x3e6   : > { %v1600_v4 = vpop.f32.mrf.mxu2  ;;  %6669 = vpow2.f32 %v1968_v5  ;;  %v9245_v5 = vadd.f32 %v1800_v10, %v9128_v17 }
 0x3e7   : > { %v9213_v1 = vadd.f32 %v1600_v4, %v9156_v49  ;;  %v1902_v4 = vsub.f32 %v9020_v34, %v1808_v42  ;;  %v9240_v42 = vadd.f32 %v1802_v23, %v9156_v49 }
 0x3e8   : > { %v1896_v10 = vsel %vm1805_vm5, %v9245_v5, -inf }
 0x3e9   : > { %v1851_v24 = vsel %vm1805_vm5, %v9213_v1, -inf  ;;  %v1934_v57 = vmul.f32 1.442695, %v1902_v4 }
 0x3ea   : > { %1894 = vmax.xlane.f32.xlu0 %v1893_v55  ;;  %1852 = vmax.xlane.f32.xlu1 %v1851_v24  ;;  %v1920_v55 = vsub.f32 %v9050_v59, %v1862_v46  ;;  %v1921_v24 = vsub.f32 %v9065_v45, %v1865_v51  ;;  %v1817_v45 = vpop.xlane.xlu1 %1816  ;;  %v1820_v46 = vpop.xlane.xlu0 %1819  ;;  %v1903_v51 = vsub.f32 %v9036_v27, %v1811_v14 }
 0x3eb   : > { %1885 = vmax.xlane.f32.xlu2 %v1884_v43  ;;  %6671 = vpow2.f32 %v1934_v57  ;;  %v1906_v4 = vsub.f32 %v9080_v7, %v1820_v46 }
 0x3ec   : > { %v1970_v34 = vmul.f32 1.442695, %v1920_v55  ;;  %v1972_v59 = vmul.f32 1.442695, %v1921_v24  ;;  %v9242_v43 = vpop.eup %6669  ;;  %v1899_v55 = vsel %vm1805_vm5, %v9240_v42, -inf }
 0x3ed   : > { %v2049_v49 = vsel %vm1805_vm5, %v9242_v43, 0.0  ;;  %v1936_v17 = vmul.f32 1.442695, %v1903_v51  ;;  %v1942_v24 = vmul.f32 1.442695, %v1906_v4 }
 0x3ee   : > { %6673 = vpow2.f32 %v1970_v34 }
 0x3ef   : > { %6675 = vpow2.f32 %v1972_v59 }
 0x3f0   : > { %6677 = vpow2.f32 %v1936_v17 }
 0x3f1   : > { %v9256_v27 = vpop.eup %6671 }
 0x3f2   : > { %1891 = vmax.xlane.f32.xlu1 %v1890_v29  ;;  %2047 = vadd.xlane.f32.xlu0 %v2046_v44  ;;  %v1905_v29 = vsub.f32 %v9068_v12, %v1817_v45  ;;  %v1814_v12 = vpop.xlane.xlu2 %1813  ;;  %v1998_v57 = vsel %vm1805_vm5, %v9256_v27, 0.0 }
 0x3f3   : > { %1888 = vmax.xlane.f32.xlu2 %v1887_v18  ;;  %v1904_v23 = vsub.f32 %v9053_v31, %v1814_v12 }
 0x3f4   : > { %v1940_v14 = vmul.f32 1.442695, %v1905_v29  ;;  %v9258_v44 = vpop.eup %6673 }
 0x3f5   : > { %v9260_v7 = vpop.eup %6675  ;;  %v2052_v18 = vsel %vm1805_vm5, %v9258_v44, 0.0  ;;  %v1938_v59 = vmul.f32 1.442695, %v1904_v23 }
 0x3f6   : > { %6679 = vpow2.f32 %v1940_v14  ;;  %v2055_v34 = vsel %vm1805_vm5, %v9260_v7, 0.0  ;;  %v9269_v45 = vpop.eup %6677 }
 0x3f7   : > { %6681 = vpow2.f32 %v1942_v24  ;;  %v2001_v29 = vsel %vm1805_vm5, %v9269_v45, 0.0 }
 0x3f8   : > { %6683 = vpow2.f32 %v1938_v59 }
 0x3fa   : > { %2050 = vadd.xlane.f32.xlu1 %v2049_v49  ;;  %1900 = vmax.xlane.f32.xlu0 %v1899_v55 }
 0x3fb   : > { %1897 = vmax.xlane.f32.xlu2 %v1896_v10 }
 0x3fc   : > { %v9271_v46 = vpop.eup %6679 }
 0x3fd   : > { %v9273_v31 = vpop.eup %6681  ;;  %v2007_v51 = vsel %vm1805_vm5, %v9271_v46, 0.0 }
 0x3fe   : > { %v2010_v4 = vsel %vm1805_vm5, %v9273_v31, 0.0  ;;  %v9281_v49 = vpop.eup %6683 }
 0x3ff   : > { %v2004_v55 = vsel %vm1805_vm5, %v9281_v49, 0.0 }
 0x402   : > { %2053 = vadd.xlane.f32.xlu1 %v2052_v18  ;;  %1999 = vadd.xlane.f32.xlu0 %v1998_v57 }
 0x403   : > { %2056 = vadd.xlane.f32.xlu2 %v2055_v34 }
 0x40a   : > { %2008 = vadd.xlane.f32.xlu0 %v2007_v51  ;;  %2002 = vadd.xlane.f32.xlu1 %v2001_v29 }
 0x40b   : > { %2011 = vadd.xlane.f32.xlu2 %v2010_v4 }
 0x412   : > { %2005 = vadd.xlane.f32.xlu1 %v2004_v55 }
 0x425   : > { %v1832_v10 = vpop.xlane.xlu2 %1831 }
 0x426   : > { %v1910_v17 = vsub.f32 %v9085_v40, %v1832_v10 }
 0x428   : > { %v1950_v14 = vmul.f32 1.442695, %v1910_v17 }
 0x42a   : > { %6685 = vpow2.f32 %v1950_v14 }
 0x42d   : > { %v1835_v12 = vpop.xlane.xlu1 %1834  ;;  %v1868_v24 = vpop.xlane.xlu2 %1867 }
 0x42e   : > { %v1911_v23 = vsub.f32 %v9095_v62, %v1835_v12  ;;  %v1922_v18 = vsub.f32 %v9090_v25, %v1868_v24 }
 0x430   : > { %v9288_v57 = vpop.eup %6685  ;;  %v1952_v34 = vmul.f32 1.442695, %v1911_v23  ;;  %v1974_v59 = vmul.f32 1.442695, %v1922_v18 }
 0x431   : > { %v2022_v51 = vsel %vm1805_vm5, %v9288_v57, 0.0 }
 0x432   : > { %6687 = vpow2.f32 %v1952_v34  ;;  %2023 = vadd.xlane.f32.xlu1 %v2022_v51 }
 0x433   : > { %6689 = vpow2.f32 %v1974_v59 }
 0x435   : > { %v1871_v29 = vpop.xlane.xlu1 %1870  ;;  %v1838_v40 = vpop.xlane.xlu0 %1837 }
 0x436   : > { %v1923_v4 = vsub.f32 %v9107_v50, %v1871_v29  ;;  %v1823_v55 = vpop.xlane.xlu2 %1822  ;;  %v1912_v10 = vsub.f32 %v9115_v33, %v1838_v40 }
 0x437   : > { %v1907_v12 = vsub.f32 %v9112_v56, %v1823_v55 }
 0x438   : > { %v9294_v62 = vpop.eup %6687  ;;  %v1976_v25 = vmul.f32 1.442695, %v1923_v4  ;;  %v1954_v17 = vmul.f32 1.442695, %v1912_v10 }
 0x439   : > { %v9296_v14 = vpop.eup %6689  ;;  %v2025_v24 = vsel %vm1805_vm5, %v9294_v62, 0.0  ;;  %v1944_v50 = vmul.f32 1.442695, %v1907_v12 }
 0x43a   : > { %6691 = vpow2.f32 %v1976_v25  ;;  %2026 = vadd.xlane.f32.xlu0 %v2025_v24  ;;  %v2058_v23 = vsel %vm1805_vm5, %v9296_v14, 0.0 }
 0x43b   : > { %2059 = vadd.xlane.f32.xlu1 %v2058_v23  ;;  %6693 = vpow2.f32 %v1954_v17 }
 0x43c   : > { %6695 = vpow2.f32 %v1944_v50 }
 0x43d   : > { %v1826_v33 = vpop.xlane.xlu1 %1825  ;;  %v1874_v18 = vpop.xlane.xlu0 %1873 }
 0x43e   : > { %v1908_v34 = vsub.f32 %v9136_v60, %v1826_v33  ;;  %v1841_v59 = vpop.xlane.xlu2 %1840  ;;  %v1924_v51 = vsub.f32 %v9133_v8, %v1874_v18 }
 0x43f   : > { %v1913_v10 = vsub.f32 %v9139_v9, %v1841_v59 }
 0x440   : > { %v9305_v29 = vpop.eup %6691  ;;  %v1946_v56 = vmul.f32 1.442695, %v1908_v34  ;;  %v1978_v40 = vmul.f32 1.442695, %v1924_v51 }
 0x441   : > { %v2061_v4 = vsel %vm1805_vm5, %v9305_v29, 0.0  ;;  %v9309_v55 = vpop.eup %6693  ;;  %v1956_v17 = vmul.f32 1.442695, %v1913_v10 }
 0x442   : > { %6697 = vpow2.f32 %v1946_v56  ;;  %v2028_v60 = vsel %vm1805_vm5, %v9309_v55, 0.0  ;;  %v9315_v23 = vpop.eup %6695 }
 0x443   : > { %2062 = vadd.xlane.f32.xlu1 %v2061_v4  ;;  %6699 = vpow2.f32 %v1978_v40  ;;  %2029 = vadd.xlane.f32.xlu2 %v2028_v60 }
 0x444   : > { %6701 = vpow2.f32 %v1956_v17 }
 0x445   : > { %v1844_v8 = vpop.xlane.xlu1 %1843  ;;  %v1829_v25 = vpop.xlane.xlu0 %1828 }
 0x446   : > { %v1877_v12 = vpop.xlane.xlu2 %1876  ;;  %v1909_v24 = vsub.f32 %v9159_v52, %v1829_v25  ;;  %v1914_v9 = vsub.f32 %v9165_v39, %v1844_v8  ;;  %v2013_v52 = vsel %vm1805_vm5, %v9315_v23, 0.0 }
 0x447   : > { %v1925_v50 = vsub.f32 %v9162_v53, %v1877_v12 }
 0x448   : > { %v9318_v33 = vpop.eup %6697  ;;  %v1948_v18 = vmul.f32 1.442695, %v1909_v24  ;;  %v1958_v56 = vmul.f32 1.442695, %v1914_v9 }
 0x449   : > { %v1980_v34 = vmul.f32 1.442695, %v1925_v50  ;;  %v2016_v59 = vsel %vm1805_vm5, %v9318_v33, 0.0  ;;  %v9323_v51 = vpop.eup %6699 }
 0x44a   : > { %v2064_v53 = vsel %vm1805_vm5, %v9323_v51, 0.0  ;;  %v9331_v60 = vpop.eup %6701 }
 0x44b   : > { %6703 = vpow2.f32 %v1980_v34  ;;  %2017 = vadd.xlane.f32.xlu1 %v2016_v59  ;;  %2014 = vadd.xlane.f32.xlu2 %v2013_v52  ;;  %v2031_v50 = vsel %vm1805_vm5, %v9331_v60, 0.0 }
 0x44c   : > { %6705 = vpow2.f32 %v1948_v18  ;;  %2065 = vadd.xlane.f32.xlu0 %v2064_v53 }
 0x44d   : > { %v1880_v39 = vpop.xlane.xlu1 %1879  ;;  %v1847_v40 = vpop.xlane.xlu0 %1846  ;;  %6707 = vpow2.f32 %v1958_v56 }
 0x44e   : > { %v1926_v4 = vsub.f32 %v9180_v47, %v1880_v39  ;;  %v1915_v10 = vsub.f32 %v9183_v32, %v1847_v40 }
 0x450   : > { %v1982_v8 = vmul.f32 1.442695, %v1926_v4  ;;  %v1960_v25 = vmul.f32 1.442695, %v1915_v10 }
 0x451   : > { %v9333_v17 = vpop.eup %6703 }
 0x452   : > { %v9335_v12 = vpop.eup %6705  ;;  %6709 = vpow2.f32 %v1982_v8  ;;  %v2067_v24 = vsel %vm1805_vm5, %v9333_v17, 0.0 }
 0x453   : > { %6711 = vpow2.f32 %v1960_v25  ;;  %v2019_v32 = vsel %vm1805_vm5, %v9335_v12, 0.0  ;;  %2068 = vadd.xlane.f32.xlu2 %v2067_v24  ;;  %v9345_v59 = vpop.eup %6707 }
 0x454   : > { %2032 = vadd.xlane.f32.xlu0 %v2031_v50  ;;  %2020 = vadd.xlane.f32.xlu1 %v2019_v32 }
 0x455   : > { %v1850_v47 = vpop.xlane.xlu2 %1849  ;;  %v1883_v18 = vpop.xlane.xlu0 %1882 }
 0x456   : > { %v1916_v9 = vsub.f32 %v9198_v63, %v1850_v47  ;;  %v1927_v34 = vsub.f32 %v9195_v2, %v1883_v18  ;;  %v2034_v63 = vsel %vm1805_vm5, %v9345_v59, 0.0 }
 0x458   : > { %v9347_v52 = vpop.eup %6709  ;;  %v1962_v53 = vmul.f32 1.442695, %v1916_v9  ;;  %v1984_v56 = vmul.f32 1.442695, %v1927_v34 }
 0x459   : > { %v9349_v39 = vpop.eup %6711  ;;  %v2070_v40 = vsel %vm1805_vm5, %v9347_v52, 0.0 }
 0x45a   : > { %6713 = vpow2.f32 %v1962_v53  ;;  %v2037_v4 = vsel %vm1805_vm5, %v9349_v39, 0.0 }
 0x45b   : > { %6715 = vpow2.f32 %v1984_v56  ;;  %2035 = vadd.xlane.f32.xlu2 %v2034_v63 }
 0x45c   : > { %2071 = vadd.xlane.f32.xlu0 %v2070_v40  ;;  %2038 = vadd.xlane.f32.xlu1 %v2037_v4 }
 0x45d   : > { %v1853_v2 = vpop.xlane.xlu1 %1852  ;;  %v1895_v10 = vpop.xlane.xlu0 %1894 }
 0x45e   : > { %v1917_v8 = vsub.f32 %v9213_v1, %v1853_v2  ;;  %v1886_v25 = vpop.xlane.xlu2 %1885 }
 0x45f   : > { %v1928_v24 = vsub.f32 %v9210_v20, %v1886_v25 }
 0x460   : > { %v9359_v50 = vpop.eup %6713  ;;  %v1964_v32 = vmul.f32 1.442695, %v1917_v8  ;;  %v1931_v8 = vsub.f32 %v9206_v11, %v1895_v10 }
 0x461   : > { %v9361_v47 = vpop.eup %6715  ;;  %v1986_v18 = vmul.f32 1.442695, %v1928_v24  ;;  %v2040_v9 = vsel %vm1805_vm5, %v9359_v50, 0.0 }
 0x462   : > { %6717 = vpow2.f32 %v1964_v32  ;;  %v2073_v34 = vsel %vm1805_vm5, %v9361_v47, 0.0  ;;  %v1992_v32 = vmul.f32 1.442695, %v1931_v8 }
 0x463   : > { %6719 = vpow2.f32 %v1986_v18  ;;  %2041 = vadd.xlane.f32.xlu2 %v2040_v9 }
 0x464   : > { %2074 = vadd.xlane.f32.xlu1 %v2073_v34 }
 0x465   : > { %v1892_v1 = vpop.xlane.xlu1 %1891  ;;  %v2048_v53 = vpop.xlane.xlu0 %2047 }
 0x466   : > { %v1930_v20 = vsub.f32 %v9223_v6, %v1892_v1  ;;  %v1889_v56 = vpop.xlane.xlu2 %1888  ;;  %6721 = vrcp.f32 %v2048_v53 }
 0x467   : > { %v1929_v40 = vsub.f32 %v9228_v16, %v1889_v56 }
 0x468   : > { %v9369_v4 = vpop.eup %6717  ;;  %v1990_v63 = vmul.f32 1.442695, %v1930_v20 }
 0x469   : > { %v9371_v2 = vpop.eup %6719  ;;  %v1988_v25 = vmul.f32 1.442695, %v1929_v40  ;;  %v2043_v24 = vsel %vm1805_vm5, %v9369_v4, 0.0 }
 0x46a   : > { %6723 = vpow2.f32 %v1990_v63  ;;  %2044 = vadd.xlane.f32.xlu0 %v2043_v24  ;;  %v2076_v6 = vsel %vm1805_vm5, %v9371_v2, 0.0 }
 0x46b   : > { %6725 = vpow2.f32 %v1988_v25 }
 0x46c   : > { %2077 = vadd.xlane.f32.xlu1 %v2076_v6  ;;  %v6722_v9 = vpop.eup %6721 }
 0x46d   : > { %v2051_v16 = vpop.xlane.xlu1 %2050  ;;  %v1901_v18 = vpop.xlane.xlu0 %1900  ;;  %v2142_v20 = vmul.f32 %v6722_v9, %v9225_v0 }
 0x46e   : > { %6727 = vrcp.f32 %v2051_v16  ;;  %v9378_v34 = vpop.xlane.xlu2 %1897  ;;  %v1933_v11 = vsub.f32 %v9240_v42, %v1901_v18 }
 0x46f   : > { %6729 = vpow2.f32 %v1992_v32  ;;  %v2174_v8 = vpack.c.bf16 %v2142_v20, %v2142_v20 }
 0x470   : > { %v9381_v10 = vpop.eup %6723  ;;  %v1996_v1 = vmul.f32 1.442695, %v1933_v11 }
 0x471   : > { %v9383_v53 = vpop.eup %6725  ;;  %v2082_v56 = vsel %vm1805_vm5, %v9381_v10, 0.0  ;;  %v2344_v18 = vunpack.c.l.b16 %v2174_v8 }
 0x472   : > { %6731 = vpow2.f32 %v1996_v1  ;;  %v2079_v40 = vsel %vm1805_vm5, %v9383_v53, 0.0  ;;  %2083 = vadd.xlane.f32.xlu0 %v2082_v56 }
 0x473   : > { %2080 = vadd.xlane.f32.xlu2 %v2079_v40 }
 0x474   : > { %v6728_v63 = vpop.eup %6727 }
 0x475   : > { %v2143_v42 = vmul.f32 %v6728_v63, %v9242_v43  ;;  %v2054_v25 = vpop.xlane.xlu1 %2053  ;;  %v2000_v24 = vpop.xlane.xlu0 %1999 }
 0x476   : > { %6733 = vrcp.f32 %v2054_v25  ;;  %v2057_v6 = vpop.xlane.xlu2 %2056  ;;  %v9391_v32 = vpop.eup %6729 }
 0x477   : > { %v2175_v0 = vpack.c.bf16 %v2143_v42, %v2143_v42  ;;  %6735 = vrcp.f32 %v2057_v6  ;;  %v2085_v1 = vsel %vm1805_vm5, %v9391_v32, 0.0 }
 0x478   : > { %v9393_v16 = vpop.eup %6731  ;;  %6737 = vrcp.f32 %v2000_v24 }
 0x479   : > { %v2345_v9 = vunpack.c.l.b16 %v2175_v0  ;;  %v2091_v11 = vsel %vm1805_vm5, %v9393_v16, 0.0 }
 0x47a   : > { %2092 = vadd.xlane.f32.xlu1 %v2091_v11 }
 0x47b   : > { %v2352_v43 = vpack.c.b16 %v2345_v9, %v2344_v18  ;;  %2086 = vadd.xlane.f32.xlu2 %v2085_v1 }
 0x47c   : > { %v6734_v20 = vpop.eup %6733 }
 0x47d   : > { %v6736_v56 = vpop.eup %6735  ;;  %v2003_v40 = vpop.xlane.xlu1 %2002  ;;  %6164 = vmatmul.msk.bf16.vlgmr.msrb.gmra.mxu1 %vm1805_vm5, %v2352_v43  ;;  %v2144_v8 = vmul.f32 %v6734_v20, %v9258_v44 }
 0x47e   : > { %v6738_v63 = vpop.eup %6737  ;;  %6739 = vrcp.f32 %v2003_v40  ;;  %3272 = vmatpush.bf16.msrb.mxu1 %v9109_v54  ;;  %v2145_v42 = vmul.f32 %v6736_v56, %v9260_v7  ;;  %v2009_v11 = vpop.xlane.xlu0 %2008 }
 0x47f   : > { %v2126_v25 = vmul.f32 %v6738_v63, %v9256_v27  ;;  %v2176_v24 = vpack.c.bf16 %v2144_v8, %v2144_v8 }
 0x480   : > { %v2177_v6 = vpack.c.bf16 %v2145_v42, %v2145_v42 }
 0x481   : > { %v2158_v18 = vpack.c.bf16 %v2126_v25, %v2126_v25  ;;  %v2346_v44 = vunpack.c.l.b16 %v2176_v24  ;;  %v1932_v24 = vsub.f32 %v9245_v5, %v9378_v34 }
 0x482   : > { %3273 = vmatpush.bf16.msrb.mxu1 %v9143_v48  ;;  %v2347_v7 = vunpack.c.l.b16 %v2177_v6 }
 0x483   : > { %v2198_v27 = vunpack.c.l.b16 %v2158_v18 }
 0x484   : > { %v6740_v0 = vpop.eup %6739  ;;  %v2353_v20 = vpack.c.b16 %v2347_v7, %v2346_v44 }
 0x485   : > { %v2127_v9 = vmul.f32 %v6740_v0, %v9269_v45  ;;  %v2006_v1 = vpop.xlane.xlu1 %2005  ;;  %v2667_v45 = vsel %vm1448_vm3, %v8881_v3, 0  ;;  %v2664_v3 = vsel %vm1448_vm3, %v8744_v15, 0  ;;  %v1994_v15 = vmul.f32 1.442695, %v1932_v24  ;;  %v12010_v24 = vld [vmem:[#allocation45_spill] sm:$0xff] }
 0x486   : > { %6741 = vrcp.f32 %v2006_v1  ;;  %3274 = vmatpush.bf16.msrb.mxu1 %v9141_v36  ;;  %3533 = vrot.lane.b32.xlu0 %v8529_v22, %s7198_s11  ;;  %v2658_v0 = vsel %vm1448_vm3, %v8914_v58, 0 }
 0x487   : > { %v2159_v54 = vpack.c.bf16 %v2127_v9, %v2127_v9  ;;  %6743 = vrcp.f32 %v2009_v11  ;;  %v2012_v9 = vpop.xlane.xlu2 %2011 }
 0x488   : > { %6745 = vpow2.f32 %v1994_v15 }
 0x489   : > { %v2199_v48 = vunpack.c.l.b16 %v2159_v54 }
 0x48a   : > { %3275 = vmatpush.bf16.msrb.mxu1 %v9171_v30 }
 0x48b   : > { %v2206_v43 = vpack.c.b16 %v2199_v48, %v2198_v27 }
 0x48c   : > { %v6742_v56 = vpop.eup %6741 }
 0x48d   : > { %6156 = vmatmul.msk.bf16.vlgmr.msra.gmra.mxu2 %vm1805_vm5, %v2206_v43  ;;  %6165 = vmatmul.msk.bf16.gmra.mxu1 %vm1805_vm5, %v2353_v20  ;;  %v6744_v36 = vpop.eup %6743  ;;  %v2128_v40 = vmul.f32 %v6742_v56, %v9281_v49  ;;  %v2661_v49 = vsel %vm1448_vm3, %v8892_v38, 0 }
 0x48e   : > { %2673 = vmatpush.bf16.xpose.msra.mxu2 %v2667_v45  ;;  %v2129_v63 = vmul.f32 %v6744_v36, %v9271_v46  ;;  %v9439_v38 = vpop.eup %6745 }
 0x48f   : > { %v2160_v30 = vpack.c.bf16 %v2128_v40, %v2128_v40  ;;  %v2088_v11 = vsel %vm1805_vm5, %v9439_v38, 0.0 }
 0x490   : > { %v2161_v8 = vpack.c.bf16 %v2129_v63, %v2129_v63 }
 0x491   : > { %v2200_v42 = vunpack.c.l.b16 %v2160_v30 }
 0x492   : > { %v2201_v25 = vunpack.c.l.b16 %v2161_v8 }
 0x493   : > { %3319 = vrot.lane.b32.xlu2 %v8689_v41, %s7197_s10  ;;  %3458 = vrot.lane.b32.xlu1 %v8819_v37, %s7199_s12 }
 0x494   : > { %v2207_v46 = vpack.c.b16 %v2201_v25, %v2200_v42 }
 0x496   : > { %2674 = vmatpush.bf16.xpose.msra.mxu2 %v2664_v3 }
 0x49b   : > { %3317 = vrot.lane.b32.xlu2 %v8667_v61, %s7197_s10  ;;  %3521 = vrot.lane.b32.xlu1 %v8751_v26, %s7199_s12 }
 0x49d   : > { %6157 = vmatmul.msk.bf16.gmra.mxu2 %vm1805_vm5, %v2207_v46 }
 0x49e   : > { %2675 = vmatpush.bf16.xpose.msra.mxu2 %v2661_v49 }
 0x4a3   : > { %3529 = vrot.lane.b32.xlu2 %v8715_v35, %s7198_s11  ;;  %3523 = vrot.lane.b32.xlu1 %v8890_v28, %s7199_s12 }
 0x4a5   : > { %v2024_v6 = vpop.xlane.xlu1 %2023 }
 0x4a6   : > { %2676 = vmatpush.bf16.xpose.msra.mxu2 %v2658_v0  ;;  %6747 = vrcp.f32 %v2024_v6 }
 0x4ab   : > { %3604 = vrot.lane.b32.xlu2 %v8607_v13, %s7198_s11 }
 0x4ac   : > { %v6748_v34 = vpop.eup %6747 }
 0x4ad   : > { %v2027_v5 = vpop.xlane.xlu0 %2026  ;;  %v2134_v1 = vmul.f32 %v6748_v34, %v9288_v57  ;;  %v2736_v57 = vsel %vm1448_vm3, %v8918_v19, 0 }
 0x4ae   : > { %v2060_v18 = vpop.xlane.xlu1 %2059  ;;  %6749 = vrcp.f32 %v2027_v5 }
 0x4af   : > { %6751 = vrcp.f32 %v2060_v18  ;;  %v2166_v54 = vpack.c.bf16 %v2134_v1, %v2134_v1 }
 0x4b0   : > { %2089 = vadd.xlane.f32.xlu0 %v2088_v11 }
 0x4b1   : > { %v2271_v20 = vunpack.c.l.b16 %v2166_v54 }
 0x4b4   : > { %v6750_v58 = vpop.eup %6749 }
 0x4b5   : > { %v2135_v44 = vmul.f32 %v6750_v58, %v9294_v62  ;;  %v6752_v27 = vpop.eup %6751 }
 0x4b6   : > { %v2063_v7 = vpop.xlane.xlu1 %2062  ;;  %v2030_v43 = vpop.xlane.xlu2 %2029  ;;  %v2146_v45 = vmul.f32 %v6752_v27, %v9296_v14 }
 0x4b7   : > { %v2167_v48 = vpack.c.bf16 %v2135_v44, %v2135_v44  ;;  %6753 = vrcp.f32 %v2063_v7  ;;  %v12011_v44 = vld [vmem:[#allocation19_spill] sm:$0xff] }
 0x4b8   : > { %6755 = vrcp.f32 %v2012_v9  ;;  %v2178_v63 = vpack.c.bf16 %v2146_v45, %v2146_v45 }
 0x4b9   : > { %v2272_v56 = vunpack.c.l.b16 %v2167_v48 }
 0x4ba   : > { %v2348_v46 = vunpack.c.l.b16 %v2178_v63 }
 0x4bb   : > { %v2279_v36 = vpack.c.b16 %v2272_v56, %v2271_v20 }
 0x4bd   : > { %v6754_v40 = vpop.eup %6753  ;;  %6160 = vmatmul.msk.bf16.vlgmr.msra.gmra.mxu3 %vm1805_vm5, %v2279_v36 }
 0x4be   : > { %v2147_v62 = vmul.f32 %v6754_v40, %v9305_v29  ;;  %v2018_v30 = vpop.xlane.xlu1 %2017  ;;  %2742 = vmatpush.bf16.xpose.msra.mxu3 %v2736_v57  ;;  %v2015_v3 = vpop.xlane.xlu2 %2014  ;;  %v2733_v29 = vsel %vm1448_vm3, %v12010_v24, 0 }
 0x4bf   : > { %v2066_v8 = vpop.xlane.xlu0 %2065  ;;  %v6756_v42 = vpop.eup %6755  ;;  %6757 = vrcp.f32 %v2015_v3 }
 0x4c0   : > { %v2179_v25 = vpack.c.bf16 %v2147_v62, %v2147_v62  ;;  %6759 = vrcp.f32 %v2066_v8  ;;  %v2130_v49 = vmul.f32 %v6756_v42, %v9273_v31 }
 0x4c1   : > { %6761 = vrcp.f32 %v2030_v43 }
 0x4c2   : > { %v2349_v14 = vunpack.c.l.b16 %v2179_v25  ;;  %6763 = vrcp.f32 %v2018_v30  ;;  %v2162_v34 = vpack.c.bf16 %v2130_v49, %v2130_v49 }
 0x4c4   : > { %3531 = vrot.lane.b32.xlu0 %v8811_v21, %s7198_s11  ;;  %v2354_v19 = vpack.c.b16 %v2349_v14, %v2348_v46  ;;  %v2202_v58 = vunpack.c.l.b16 %v2162_v34  ;;  %v12013_v46 = vld [vmem:[#allocation31_spill] sm:$0xff] }
 0x4c5   : > { %v6758_v15 = vpop.eup %6757 }
 0x4c6   : > { %6166 = vmatmul.msk.bf16.gmra.mxu1 %vm1805_vm5, %v2354_v19  ;;  %2743 = vmatpush.bf16.xpose.msra.mxu3 %v2733_v29  ;;  %v2069_v6 = vpop.xlane.xlu2 %2068  ;;  %v2131_v5 = vmul.f32 %v6758_v15, %v9315_v23  ;;  %v6760_v18 = vpop.eup %6759  ;;  %v12012_v23 = vld [vmem:[#allocation35_spill] sm:$0xff] }
 0x4c7   : > { %v2033_v0 = vpop.xlane.xlu0 %2032  ;;  %6765 = vrcp.f32 %v2069_v6  ;;  %v2021_v31 = vpop.xlane.xlu1 %2020  ;;  %v2148_v1 = vmul.f32 %v6760_v18, %v9323_v51  ;;  %v2730_v43 = vsel %vm1448_vm3, %v12012_v23, 0 }
 0x4c8   : > { %v6762_v9 = vpop.eup %6761  ;;  %6767 = vrcp.f32 %v2021_v31  ;;  %v2163_v11 = vpack.c.bf16 %v2131_v5, %v2131_v5 }
 0x4c9   : > { %6769 = vrcp.f32 %v2033_v0  ;;  %v2136_v7 = vmul.f32 %v6762_v9, %v9309_v55  ;;  %v6764_v27 = vpop.eup %6763  ;;  %v2180_v45 = vpack.c.bf16 %v2148_v1, %v2148_v1 }
 0x4ca   : > { %v2203_v54 = vunpack.c.l.b16 %v2163_v11  ;;  %v2132_v25 = vmul.f32 %v6764_v27, %v9318_v33 }
 0x4cb   : > { %v2168_v63 = vpack.c.bf16 %v2136_v7, %v2136_v7  ;;  %v2350_v8 = vunpack.c.l.b16 %v2180_v45 }
 0x4cc   : > { %3602 = vrot.lane.b32.xlu0 %v12011_v44, %s7198_s11  ;;  %v2208_v48 = vpack.c.b16 %v2203_v54, %v2202_v58 }
 0x4cd   : > { %v6766_v20 = vpop.eup %6765  ;;  %v2273_v14 = vunpack.c.l.b16 %v2168_v63 }
 0x4ce   : > { %2744 = vmatpush.bf16.xpose.msra.mxu3 %v2730_v43  ;;  %v6768_v56 = vpop.eup %6767  ;;  %v2149_v36 = vmul.f32 %v6766_v20, %v9333_v17  ;;  %v2036_v40 = vpop.xlane.xlu2 %2035  ;;  %6158 = vmatmul.msk.bf16.gmra.mxu2 %vm1805_vm5, %v2208_v48  ;;  %v2727_v17 = vsel %vm1448_vm3, %v12013_v46, 0  ;;  %v12016_v46 = vld [vmem:[#allocation46_spill] sm:$0xff] }
 0x4cf   : > { %v6770_v51 = vpop.eup %6769  ;;  %v2039_v57 = vpop.xlane.xlu1 %2038  ;;  %6771 = vrcp.f32 %v2036_v40  ;;  %v2133_v30 = vmul.f32 %v6768_v56, %v9335_v12 }
 0x4d0   : > { %v2181_v62 = vpack.c.bf16 %v2149_v36, %v2149_v36  ;;  %v2137_v55 = vmul.f32 %v6770_v51, %v9331_v60  ;;  %6773 = vrcp.f32 %v2039_v57  ;;  %v2072_v15 = vpop.xlane.xlu0 %2071  ;;  %v2164_v60 = vpack.c.bf16 %v2132_v25, %v2132_v25  ;;  %v12015_v51 = vld [vmem:[#allocation53_spill] sm:$0xff] }
 0x4d1   : > { %v2165_v24 = vpack.c.bf16 %v2133_v30, %v2133_v30 }
 0x4d2   : > { %v2169_v3 = vpack.c.bf16 %v2137_v55, %v2137_v55  ;;  %v2351_v42 = vunpack.c.l.b16 %v2181_v62  ;;  %v2204_v5 = vunpack.c.l.b16 %v2164_v60 }
 0x4d3   : > { %v2205_v33 = vunpack.c.l.b16 %v2165_v24  ;;  %v12017_v24 = vld [vmem:[#allocation50_spill] sm:$0xff] }
 0x4d4   : > { %v2274_v49 = vunpack.c.l.b16 %v2169_v3  ;;  %v2355_v19 = vpack.c.b16 %v2351_v42, %v2350_v8 }
 0x4d5   : > { %v6772_v29 = vpop.eup %6771  ;;  %v2209_v31 = vpack.c.b16 %v2205_v33, %v2204_v5  ;;  %v12020_v5 = vld [vmem:[#allocation54_spill] sm:$0xff] }
 0x4d6   : > { %2745 = vmatpush.bf16.xpose.msra.mxu3 %v2727_v17  ;;  %v2280_v6 = vpack.c.b16 %v2274_v49, %v2273_v14  ;;  %6167 = vmatmul.msk.bf16.gmra.mxu1 %vm1805_vm5, %v2355_v19  ;;  %v6774_v12 = vpop.eup %6773  ;;  %v2138_v34 = vmul.f32 %v6772_v29, %v9345_v59  ;;  %v2042_v9 = vpop.xlane.xlu2 %2041 }
 0x4d7   : > { %v2075_v0 = vpop.xlane.xlu1 %2074  ;;  %v2139_v18 = vmul.f32 %v6774_v12, %v9349_v39  ;;  %v12014_v39 = vld [vmem:[#allocation59_spill] sm:$0xff] }
 0x4d8   : > { %6775 = vrcp.f32 %v2075_v0  ;;  %6161 = vmatmul.msk.bf16.gmra.mxu3 %vm1805_vm5, %v2280_v6  ;;  %v2170_v58 = vpack.c.bf16 %v2138_v34, %v2138_v34  ;;  %v3559_v56 = vsel %vm1448_vm3, %v12014_v39, 0  ;;  %v12018_v6 = vld [vmem:[#allocation52_spill] sm:$0xff]  ;;  %v12019_v12 = vld [vmem:[#allocation51_spill] sm:$0xff] }
 0x4d9   : > { %6777 = vrcp.f32 %v2072_v15  ;;  %v2171_v54 = vpack.c.bf16 %v2139_v18, %v2139_v18 }
 0x4da   : > { %v2275_v23 = vunpack.c.l.b16 %v2170_v58 }
 0x4db   : > { %v2276_v43 = vunpack.c.l.b16 %v2171_v54  ;;  %v12021_v54 = vld [vmem:[#allocation25_spill] sm:$0xff] }
 0x4dd   : > { %v2045_v1 = vpop.xlane.xlu0 %2044  ;;  %v2281_v40 = vpack.c.b16 %v2276_v43, %v2275_v23  ;;  %v12023_v43 = vld [vmem:[#allocation39_spill] sm:$0xff] }
 0x4de   : > { %v6776_v11 = vpop.eup %6775  ;;  %6159 = vmatmul.msk.bf16.gmra.mxu2 %vm1805_vm5, %v2209_v31  ;;  %6779 = vrcp.f32 %v2045_v1 }
 0x4df   : > { %v6778_v7 = vpop.eup %6777  ;;  %v2151_v27 = vmul.f32 %v6776_v11, %v9361_v47  ;;  %6781 = vrcp.f32 %v2042_v9  ;;  %v2078_v36 = vpop.xlane.xlu1 %2077 }
 0x4e0   : > { %v2150_v48 = vmul.f32 %v6778_v7, %v9347_v52  ;;  %v12022_v7 = vld [vmem:[#allocation24_spill] sm:$0xff] }
 0x4e1   : > { %v2183_v59 = vpack.c.bf16 %v2151_v27, %v2151_v27 }
 0x4e2   : > { %v2182_v45 = vpack.c.bf16 %v2150_v48, %v2150_v48 }
 0x4e3   : > { %v2418_v47 = vunpack.c.l.b16 %v2183_v59  ;;  %v12024_v59 = vld [vmem:[#allocation37_spill] sm:$0xff] }
 0x4e4   : > { %v6780_v57 = vpop.eup %6779  ;;  %v2417_v63 = vunpack.c.l.b16 %v2182_v45 }
 0x4e5   : > { %v6782_v52 = vpop.eup %6781  ;;  %v2141_v62 = vmul.f32 %v6780_v57, %v9369_v4  ;;  %v2084_v25 = vpop.xlane.xlu0 %2083 }
 0x4e6   : > { %v2081_v20 = vpop.xlane.xlu2 %2080  ;;  %6184 = vmatmul.msk.bf16.vlgmr.msra.gmra.mxu1 %vm1448_vm3, %v12015_v51  ;;  %v2425_v55 = vpack.c.b16 %v2418_v47, %v2417_v63  ;;  %v2140_v30 = vmul.f32 %v6782_v52, %v9359_v50 }
 0x4e7   : > { %6783 = vrcp.f32 %v2081_v20  ;;  %3565 = vmatpush.bf16.xpose.msra.mxu1 %v3559_v56  ;;  %v2173_v8 = vpack.c.bf16 %v2141_v62, %v2141_v62 }
 0x4e8   : > { %6162 = vmatmul.msk.bf16.gmra.mxu3 %vm1805_vm5, %v2281_v40  ;;  %6785 = vrcp.f32 %v2078_v36  ;;  %v2172_v17 = vpack.c.bf16 %v2140_v30, %v2140_v30  ;;  %v12027_v40 = vld [vmem:[#allocation41_spill] sm:$0xff] }
 0x4e9   : > { %v2278_v49 = vunpack.c.l.b16 %v2173_v8 }
 0x4ea   : > { %v2277_v29 = vunpack.c.l.b16 %v2172_v17 }
 0x4ec   : > { %v2282_v50 = vpack.c.b16 %v2278_v49, %v2277_v29  ;;  %v12037_v29 = vld [vmem:[#allocation58_spill] sm:$0xff] }
 0x4ed   : > { %v6784_v3 = vpop.eup %6783 }
 0x4ee   : > { %6168 = vmatmul.msk.bf16.vlgmr.msrb.gmra.mxu2 %vm1805_vm5, %v2425_v55  ;;  %v6786_v42 = vpop.eup %6785  ;;  %v2153_v14 = vmul.f32 %v6784_v3, %v9383_v53  ;;  %v2087_v4 = vpop.xlane.xlu2 %2086 }
 0x4ef   : > { %6330 = vmatpush.bf16.msrb.mxu2 %v12016_v46  ;;  %v2152_v19 = vmul.f32 %v6786_v42, %v9371_v2  ;;  %6787 = vrcp.f32 %v2087_v4  ;;  %v12031_v46 = vld [vmem:[#allocation48_spill] sm:$0xff]  ;;  %v12036_v4 = vld [vmem:[#allocation55_spill] sm:$0xff] }
 0x4f0   : > { %v2185_v15 = vpack.c.bf16 %v2153_v14, %v2153_v14  ;;  %6789 = vrcp.f32 %v2084_v25 }
 0x4f1   : > { %v2184_v60 = vpack.c.bf16 %v2152_v19, %v2152_v19 }
 0x4f2   : > { %v2420_v33 = vunpack.c.l.b16 %v2185_v15  ;;  %v12038_v15 = vld [vmem:[#allocation30_spill] sm:$0xff] }
 0x4f3   : > { %6331 = vmatpush.bf16.msrb.mxu2 %v12017_v24  ;;  %v2419_v2 = vunpack.c.l.b16 %v2184_v60  ;;  %v12035_v24 = vld [vmem:[#allocation42_spill] sm:$0xff] }
 0x4f5   : > { %v2426_v34 = vpack.c.b16 %v2420_v33, %v2419_v2  ;;  %v6788_v18 = vpop.eup %6787  ;;  %v12046_v2 = vld [vmem:[#allocation36_spill] sm:$0xff] }
 0x4f6   : > { %6185 = vmatmul.msk.bf16.gmra.mxu1 %vm1448_vm3, %v12018_v6  ;;  %v6790_v31 = vpop.eup %6789  ;;  %v2155_v9 = vmul.f32 %v6788_v18, %v9391_v32  ;;  %v3320_v36 = vpop.permute.xlu2 %3319 }
 0x4f7   : > { %6332 = vmatpush.bf16.msrb.mxu2 %v12019_v12  ;;  %v2154_v11 = vmul.f32 %v6790_v31, %v9381_v10  ;;  %v2093_v10 = vpop.xlane.xlu1 %2092  ;;  %v9563_v31 = vld [vmem:[%s11748_s7 + $0x40] sm:$0xff] }
 0x4f8   : > { %v3534_v0 = vpop.permute.xlu0 %3533  ;;  %6163 = vmatmul.msk.bf16.gmra.mxu3 %vm1805_vm5, %v2282_v50  ;;  %v2187_v1 = vpack.c.bf16 %v2155_v9, %v2155_v9  ;;  %6791 = vrcp.f32 %v2093_v10  ;;  %v12050_v9 = vld [vmem:[#allocation33_spill] sm:$0xff] }
 0x4f9   : > { %v3556_v53 = vsel %vm1448_vm3, %v3534_v0, 0  ;;  %v2186_v58 = vpack.c.bf16 %v2154_v11, %v2154_v11  ;;  %v12043_v0 = vld [vmem:[#allocation44_spill] sm:$0xff] }
 0x4fa   : > { %3566 = vmatpush.bf16.xpose.msra.mxu1 %v3556_v53  ;;  %v2422_v27 = vunpack.c.l.b16 %v2187_v1  ;;  %v9507_v32 = vpop.f32.mrf.mxu1 }
 0x4fb   : > { %6333 = vmatpush.bf16.msrb.mxu2 %v12020_v5  ;;  %v2421_v48 = vunpack.c.l.b16 %v2186_v58  ;;  %12025 = vst [vmem:[#allocation45_spill] sm:$0xff] %v9507_v32 }
 0x4fd   : > { %v2427_v23 = vpack.c.b16 %v2422_v27, %v2421_v48  ;;  %v12053_v27 = vld [vmem:[#allocation47_spill] sm:$0xff] }
 0x4fe   : > { %6169 = vmatmul.msk.bf16.gmra.mxu2 %vm1805_vm5, %v2426_v34  ;;  %v6792_v39 = vpop.eup %6791  ;;  %v3318_v8 = vpop.permute.xlu2 %3317  ;;  %v9581_v48 = vld [vmem:[%s11748_s7 + $0x48] sm:$0xff] }
 0x4ff   : > { %v2157_v56 = vmul.f32 %v6792_v39, %v9393_v16  ;;  %v9595_v39 = vld [vmem:[%s11748_s7 + $0x50] sm:$0xff] }
 0x501   : > { %v2189_v57 = vpack.c.bf16 %v2157_v56, %v2157_v56  ;;  %v12056_v56 = vld [vmem:[#allocation40_spill] sm:$0xff] }
 0x502   : > { %v9510_v45 = vpop.f32.mrf.mxu1 }
 0x503   : > { %12026 = vst [vmem:[#allocation19_spill] sm:$0xff] %v9510_v45  ;;  %v2424_v55 = vunpack.c.l.b16 %v2189_v57 }
 0x506   : > { %6186 = vmatmul.msk.bf16.gmra.mxu1 %vm1448_vm3, %v12021_v54  ;;  %v3530_v17 = vpop.permute.xlu2 %3529 }
 0x507   : > { %v3550_v14 = vsel %vm1448_vm3, %v3530_v17, 0 }
 0x508   : > { %6180 = vmatmul.msk.bf16.vlgmr.msrb.gmra.mxu3 %vm1448_vm3, %v12022_v7 }
 0x50a   : > { %v9517_v30 = vpop.f32.mrf.mxu1 }
 0x50b   : > { %12029 = vst [vmem:[#allocation31_spill] sm:$0xff] %v9517_v30 }
 0x50e   : > { %6170 = vmatmul.msk.bf16.gmra.mxu2 %vm1805_vm5, %v2427_v23 }
 0x510   : > { %v9515_v52 = vpop.f32.mrf.mxu2 }
 0x511   : > { %12028 = vst [vmem:[#allocation35_spill] sm:$0xff] %v9515_v52 }
 0x516   : > { %6187 = vmatmul.msk.bf16.gmra.mxu1 %vm1448_vm3, %v12023_v43 }
 0x518   : > { %6181 = vmatmul.msk.bf16.gmra.mxu3 %vm1448_vm3, %v12024_v59  ;;  %v9520_v42 = vpop.f32.mrf.mxu2 }
 0x519   : > { %12030 = vst [vmem:[#allocation59_spill] sm:$0xff] %v9520_v42 }
 0x520   : > { %v9528_v49 = vpop.f32.mrf.mxu2 }
 0x521   : > { %12033 = vst [vmem:[#allocation46_spill] sm:$0xff] %v9528_v49 }
 0x523   : > { %v2090_v20 = vpop.xlane.xlu0 %2089 }
 0x524   : > { %6793 = vrcp.f32 %v2090_v20 }
 0x528   : > { %6182 = vmatmul.msk.bf16.gmra.mxu3 %vm1448_vm3, %v12027_v40  ;;  %v9540_v6 = vpop.f32.mrf.mxu2 }
 0x529   : > { %12040 = vst [vmem:[#allocation51_spill] sm:$0xff] %v9540_v6 }
 0x52a   : > { %v6794_v51 = vpop.eup %6793 }
 0x52b   : > { %v2156_v47 = vmul.f32 %v6794_v51, %v9439_v38  ;;  %v9525_v38 = vpop.f32.mrf.mxu1 }
 0x52c   : > { %12032 = vst [vmem:[#allocation53_spill] sm:$0xff] %v9525_v38 }
 0x52d   : > { %v2188_v63 = vpack.c.bf16 %v2156_v47, %v2156_v47  ;;  %v12058_v47 = vld [vmem:[#allocation49_spill] sm:$0xff] }
 0x52f   : > { %v2423_v62 = vunpack.c.l.b16 %v2188_v63  ;;  %v9611_v63 = vld [vmem:[%s11748_s7 + $0x58] sm:$0xff] }
 0x531   : > { %v2428_v3 = vpack.c.b16 %v2424_v55, %v2423_v62 }
 0x533   : > { %6171 = vmatmul.msk.bf16.gmra.mxu2 %vm1805_vm5, %v2428_v3 }
 0x536   : > { %v3532_v16 = vpop.permute.xlu0 %3531 }
 0x537   : > { %v3553_v25 = vsel %vm1448_vm3, %v3532_v16, 0 }
 0x538   : > { %3567 = vmatpush.bf16.xpose.msra.mxu1 %v3553_v25  ;;  %6183 = vmatmul.msk.bf16.gmra.mxu3 %vm1448_vm3, %v12031_v46  ;;  %v9625_v25 = vld [vmem:[%s11748_s7 + $0x60] sm:$0xff] }
 0x540   : > { %3568 = vmatpush.bf16.xpose.msra.mxu1 %v3550_v14  ;;  %v9538_v50 = vpop.f32.mrf.mxu3 }
 0x541   : > { %12039 = vst [vmem:[#allocation52_spill] sm:$0xff] %v9538_v50 }
 0x543   : > { %v9530_v19 = vpop.f32.mrf.mxu1  ;;  %6188 = vmatmul.msk.bf16.vlgmr.msra.gmra.mxu2 %vm1448_vm3, %v12035_v24 }
 0x544   : > { %12034 = vst [vmem:[#allocation50_spill] sm:$0xff] %v9530_v19  ;;  %3345 = vmatpush.bf16.msra.mxu2 %v12036_v4 }
 0x548   : > { %3346 = vmatpush.bf16.msra.mxu2 %v12037_v29  ;;  %6192 = vmatmul.msk.bf16.vlgmr.msra.gmra.mxu3 %vm1448_vm3, %v12038_v15  ;;  %v9548_v53 = vpop.f32.mrf.mxu3  ;;  %v9639_v29 = vld [vmem:[%s11748_s7 + $0x68] sm:$0xff] }
 0x549   : > { %12044 = vst [vmem:[#allocation24_spill] sm:$0xff] %v9548_v53 }
 0x54b   : > { %v9542_v60 = vpop.f32.mrf.mxu1 }
 0x54c   : > { %12041 = vst [vmem:[#allocation54_spill] sm:$0xff] %v9542_v60  ;;  %3347 = vmatpush.bf16.msra.mxu2 %v3320_v36 }
 0x550   : > { %3348 = vmatpush.bf16.msra.mxu2 %v3318_v8 }
 0x551   : > { %v9544_v12 = vpop.f32.mrf.mxu2 }
 0x552   : > { %12042 = vst [vmem:[#allocation25_spill] sm:$0xff] %v9544_v12 }
 0x553   : > { %6189 = vmatmul.msk.bf16.gmra.mxu2 %vm1448_vm3, %v12043_v0  ;;  %v9550_v33 = vpop.f32.mrf.mxu1 }
 0x554   : > { %12045 = vst [vmem:[#allocation39_spill] sm:$0xff] %v9550_v33 }
 0x558   : > { %6193 = vmatmul.msk.bf16.gmra.mxu3 %vm1448_vm3, %v12046_v2 }
 0x559   : > { %v9558_v18 = vpop.f32.mrf.mxu2 }
 0x55a   : > { %12049 = vst [vmem:[#allocation48_spill] sm:$0xff] %v9558_v18 }
 0x55b   : > { %v9554_v5 = vpop.f32.mrf.mxu3  ;;  %v9556_v34 = vpop.f32.mrf.mxu1 }
 0x55c   : > { %12047 = vst [vmem:[#allocation37_spill] sm:$0xff] %v9554_v5 }
 0x55d   : > { %12048 = vst [vmem:[#allocation41_spill] sm:$0xff] %v9556_v34 }
 0x561   : > { %v9572_v54 = vpop.f32.mrf.mxu2 }
 0x562   : > { %12052 = vst [vmem:[#allocation55_spill] sm:$0xff] %v9572_v54 }
 0x563   : > { %6190 = vmatmul.msk.bf16.gmra.mxu2 %vm1448_vm3, %v12050_v9  ;;  %v9567_v11 = vpop.f32.mrf.mxu3  ;;  %v2609_v1 = vpop.f32.mrf.mxu1 }
 0x564   : > { %12051 = vst [vmem:[#allocation42_spill] sm:$0xff] %v9567_v11  ;;  %v9570_v58 = vadd.f32 %v9563_v31, %v2609_v1 }
 0x566   : > { %v2791_v7 = vsel %vm1805_vm5, %v9570_v58, -inf }
 0x567   : > { %2792 = vmax.xlane.f32.xlu2 %v2791_v7 }
 0x568   : > { %6194 = vmatmul.msk.bf16.gmra.mxu3 %vm1448_vm3, %v12053_v27 }
 0x569   : > { %v9590_v20 = vpop.f32.mrf.mxu2 }
 0x56a   : > { %12055 = vst [vmem:[#allocation30_spill] sm:$0xff] %v9590_v20 }
 0x56b   : > { %v9583_v23 = vpop.f32.mrf.mxu3  ;;  %v2611_v43 = vpop.f32.mrf.mxu1 }
 0x56c   : > { %12054 = vst [vmem:[#allocation58_spill] sm:$0xff] %v9583_v23  ;;  %v9586_v59 = vadd.f32 %v9581_v48, %v2611_v43  ;;  %v9656_v43 = vld [vmem:[%s11748_s7 + $0x70] sm:$0xff] }
 0x56e   : > { %v2794_v10 = vsel %vm1805_vm5, %v9586_v59, -inf }
 0x56f   : > { %2795 = vmax.xlane.f32.xlu1 %v2794_v10 }
 0x571   : > { %v9613_v62 = vpop.f32.mrf.mxu2 }
 0x572   : > { %12059 = vst [vmem:[#allocation36_spill] sm:$0xff] %v9613_v62 }
 0x573   : > { %6191 = vmatmul.msk.bf16.gmra.mxu2 %vm1448_vm3, %v12056_v56  ;;  %v9599_v36 = vpop.f32.mrf.mxu3  ;;  %v2614_v40 = vpop.f32.mrf.mxu1 }
 0x574   : > { %12057 = vst [vmem:[#allocation44_spill] sm:$0xff] %v9599_v36  ;;  %v9602_v51 = vadd.f32 %v9595_v39, %v2614_v40 }
 0x576   : > { %v2797_v57 = vsel %vm1805_vm5, %v9602_v51, -inf }
 0x577   : > { %2798 = vmax.xlane.f32.xlu1 %v2797_v57 }
 0x578   : > { %6195 = vmatmul.msk.bf16.gmra.mxu3 %vm1448_vm3, %v12058_v47 }
 0x579   : > { %v9632_v24 = vpop.f32.mrf.mxu2 }
 0x57a   : > { %12062 = vst [vmem:[#allocation40_spill] sm:$0xff] %v9632_v24 }
 0x57b   : > { %v9615_v55 = vpop.f32.mrf.mxu3  ;;  %v2616_v3 = vpop.f32.mrf.mxu1 }
 0x57c   : > { %12060 = vst [vmem:[#allocation33_spill] sm:$0xff] %v9615_v55  ;;  %v9618_v8 = vadd.f32 %v9611_v63, %v2616_v3 }
 0x57e   : > { %v2800_v16 = vsel %vm1805_vm5, %v9618_v8, -inf }
 0x57f   : > { %2801 = vmax.xlane.f32.xlu2 %v2800_v16 }
 0x581   : > { %v9651_v27 = vpop.f32.mrf.mxu2 }
 0x582   : > { %12063 = vst [vmem:[#allocation49_spill] sm:$0xff] %v9651_v27 }
 0x583   : > { %v9627_v46 = vpop.f32.mrf.mxu3  ;;  %v2619_v17 = vpop.f32.mrf.mxu1 }
 0x584   : > { %12061 = vst [vmem:[#allocation47_spill] sm:$0xff] %v9627_v46  ;;  %v9630_v14 = vadd.f32 %v9625_v25, %v2619_v17 }
 0x586   : > { %v2803_v4 = vsel %vm1805_vm5, %v9630_v14, -inf }
 0x587   : > { %2804 = vmax.xlane.f32.xlu1 %v2803_v4 }
 0x589   : > { %v9668_v16 = vpop.f32.mrf.mxu2 }
 0x58a   : > { %12064 = vst [vmem:[#allocation61_spill] sm:$0xff] %v9668_v16 }
 0x58b   : > { %v2540_v15 = vpop.f32.mrf.mxu3  ;;  %v2621_v0 = vpop.f32.mrf.mxu1 }
 0x58c   : > { %v9642_v2 = vadd.f32 %v9563_v31, %v2540_v15  ;;  %v9645_v9 = vadd.f32 %v9639_v29, %v2621_v0  ;;  %v9678_v0 = vld [vmem:[%s11748_s7 + $0x78] sm:$0xff] }
 0x58e   : > { %v2806_v1 = vsel %vm1805_vm5, %v9645_v9, -inf  ;;  %v2767_v7 = vsel %vm1805_vm5, %v9642_v2, -inf }
 0x58f   : > { %2807 = vmax.xlane.f32.xlu2 %v2806_v1  ;;  %2768 = vmax.xlane.f32.xlu1 %v2767_v7 }
 0x593   : > { %v2542_v10 = vpop.f32.mrf.mxu3  ;;  %v2624_v56 = vpop.f32.mrf.mxu1 }
 0x594   : > { %v9659_v40 = vadd.f32 %v9581_v48, %v2542_v10  ;;  %v9662_v57 = vadd.f32 %v9656_v43, %v2624_v56  ;;  %v9683_v10 = vpop.f32.mrf.mxu2 }
 0x595   : > { %12065 = vst [vmem:[#allocation62_spill] sm:$0xff] %v9683_v10 }
 0x596   : > { %v2770_v47 = vsel %vm1805_vm5, %v9659_v40, -inf  ;;  %v2809_v3 = vsel %vm1805_vm5, %v9662_v57, -inf }
 0x597   : > { %2771 = vmax.xlane.f32.xlu2 %v2770_v47  ;;  %2810 = vmax.xlane.f32.xlu1 %v2809_v3 }
 0x59b   : > { %v2545_v17 = vpop.f32.mrf.mxu3  ;;  %v2626_v1 = vpop.f32.mrf.mxu1 }
 0x59c   : > { %v9671_v4 = vadd.f32 %v9595_v39, %v2545_v17  ;;  %v9681_v7 = vadd.f32 %v9678_v0, %v2626_v1  ;;  %v9695_v1 = vpop.f32.mrf.mxu2 }
 0x59d   : > { %12066 = vst [vmem:[#allocation63_spill] sm:$0xff] %v9695_v1 }
 0x59e   : > { %v2773_v15 = vsel %vm1805_vm5, %v9671_v4, -inf  ;;  %v2812_v3 = vsel %vm1805_vm5, %v9681_v7, -inf }
 0x59f   : > { %2774 = vmax.xlane.f32.xlu0 %v2773_v15 }
 0x5a3   : > { %v2547_v56 = vpop.f32.mrf.mxu3 }
 0x5a4   : > { %v9686_v47 = vadd.f32 %v9611_v63, %v2547_v56 }
 0x5a6   : > { %v2776_v17 = vsel %vm1805_vm5, %v9686_v47, -inf }
 0x5a7   : > { %2813 = vmax.xlane.f32.xlu0 %v2812_v3  ;;  %2777 = vmax.xlane.f32.xlu1 %v2776_v17 }
 0x5ab   : > { %v2550_v27 = vpop.f32.mrf.mxu3 }
 0x5ac   : > { %v9693_v15 = vadd.f32 %v9625_v25, %v2550_v27 }
 0x5ae   : > { %v2779_v10 = vsel %vm1805_vm5, %v9693_v15, -inf }
 0x5af   : > { %2780 = vmax.xlane.f32.xlu2 %v2779_v10 }
 0x5b3   : > { %v2552_v56 = vpop.f32.mrf.mxu3 }
 0x5b4   : > { %v9700_v16 = vadd.f32 %v9639_v29, %v2552_v56  ;;  %v9713_v56 = vpop.permute.xlu1 %3458 }
 0x5b6   : > { %v9702_v62 = vpop.f32.mrf.mxu2  ;;  %v2782_v3 = vsel %vm1805_vm5, %v9700_v16, -inf }
 0x5b7   : > { %12067 = vst [vmem:[#allocation64_spill] sm:$0xff] %v9702_v62  ;;  %2783 = vmax.xlane.f32.xlu0 %v2782_v3 }
 0x5bb   : > { %v2555_v17 = vpop.f32.mrf.mxu3 }
 0x5bc   : > { %v9707_v27 = vadd.f32 %v9656_v43, %v2555_v17 }
 0x5be   : > { %v9709_v24 = vpop.f32.mrf.mxu2  ;;  %v2785_v1 = vsel %vm1805_vm5, %v9707_v27, -inf }
 0x5bf   : > { %12068 = vst [vmem:[#allocation65_spill] sm:$0xff] %v9709_v24  ;;  %2786 = vmax.xlane.f32.xlu2 %v2785_v1  ;;  %v9726_v1 = vpop.permute.xlu1 %3521 }
 0x5c3   : > { %v2557_v10 = vpop.f32.mrf.mxu3 }
 0x5c4   : > { %v9721_v17 = vadd.f32 %v9678_v0, %v2557_v10 }
 0x5c6   : > { %v2678_v33 = vpop.f32.mrf.mxu2 }
 0x5c7   : > { %v9716_v62 = vadd.f32 %v9563_v31, %v2678_v33  ;;  %v2788_v33 = vsel %vm1805_vm5, %v9721_v17, -inf  ;;  %v9742_v45 = vpop.permute.xlu1 %3523 }
 0x5c9   : > { %v2815_v3 = vsel %vm1805_vm5, %v9716_v62, -inf }
 0x5ca   : > { %2816 = vmax.xlane.f32.xlu0 %v2815_v3 }
 0x5cb   : > { %v2747_v34 = vpop.f32.mrf.mxu3 }
 0x5ce   : > { %v2680_v24 = vpop.f32.mrf.mxu2 }
 0x5cf   : > { %v9724_v19 = vadd.f32 %v9581_v48, %v2680_v24 }
 0x5d1   : > { %v2818_v60 = vsel %vm1805_vm5, %v9724_v19, -inf }
 0x5d2   : > { %2819 = vmax.xlane.f32.xlu2 %v2818_v60  ;;  %2789 = vmax.xlane.f32.xlu0 %v2788_v33  ;;  %v9744_v60 = vpop.permute.xlu2 %3604  ;;  %v9747_v33 = vadd.f32 %v9563_v31, %v2747_v34 }
 0x5d3   : > { %v2749_v30 = vpop.f32.mrf.mxu3 }
 0x5d4   : > { %v9733_v3 = vadd.f32 %v9581_v48, %v2749_v30 }
 0x5d6   : > { %v2683_v10 = vpop.f32.mrf.mxu2  ;;  %v2842_v38 = vsel %vm1805_vm5, %v9733_v3, -inf }
 0x5d7   : > { %v9738_v24 = vadd.f32 %v9595_v39, %v2683_v10  ;;  %2843 = vmax.xlane.f32.xlu1 %v2842_v38  ;;  %v2839_v38 = vsel %vm1805_vm5, %v9747_v33, -inf }
 0x5d9   : > { %v2821_v32 = vsel %vm1805_vm5, %v9738_v24, -inf }
 0x5da   : > { %2822 = vmax.xlane.f32.xlu0 %v2821_v32  ;;  %v2793_v46 = vpop.xlane.xlu2 %2792 }
 0x5db   : > { %v2752_v55 = vpop.f32.mrf.mxu3 }
 0x5dc   : > { %v9758_v34 = vadd.f32 %v9595_v39, %v2752_v55 }
 0x5de   : > { %v2685_v30 = vpop.f32.mrf.mxu2 }
 0x5df   : > { %v9750_v48 = vadd.f32 %v9611_v63, %v2685_v30  ;;  %v2871_v30 = vsub.f32 %v9570_v58, %v2793_v46 }
 0x5e1   : > { %v2824_v10 = vsel %vm1805_vm5, %v9750_v48, -inf }
 0x5e2   : > { %2825 = vmax.xlane.f32.xlu2 %v2824_v10  ;;  %2840 = vmax.xlane.f32.xlu0 %v2839_v38  ;;  %v2796_v32 = vpop.xlane.xlu1 %2795  ;;  %v2845_v10 = vsel %vm1805_vm5, %v9758_v34, -inf }
 0x5e3   : > { %v2872_v23 = vsub.f32 %v9586_v59, %v2796_v32  ;;  %v2754_v38 = vpop.f32.mrf.mxu3  ;;  %v2911_v59 = vmul.f32 1.442695, %v2871_v30 }
 0x5e4   : > { %v9770_v55 = vadd.f32 %v9611_v63, %v2754_v38 }
 0x5e5   : > { %v2913_v31 = vmul.f32 1.442695, %v2872_v23 }
 0x5e6   : > { %v2688_v36 = vpop.f32.mrf.mxu2 }
 0x5e7   : > { %v9762_v5 = vadd.f32 %v9625_v25, %v2688_v36  ;;  %6795 = vpow2.f32 %v2913_v31 }
 0x5e8   : > { %6797 = vpow2.f32 %v2911_v59 }
 0x5e9   : > { %v2827_v11 = vsel %vm1805_vm5, %v9762_v5, -inf }
 0x5ea   : > { %2828 = vmax.xlane.f32.xlu1 %v2827_v11  ;;  %2846 = vmax.xlane.f32.xlu0 %v2845_v10  ;;  %v2799_v39 = vpop.xlane.xlu1 %2798  ;;  %v2848_v11 = vsel %vm1805_vm5, %v9770_v55, -inf }
 0x5eb   : > { %v2873_v23 = vsub.f32 %v9602_v51, %v2799_v39 }
 0x5ed   : > { %v9772_v58 = vpop.eup %6795  ;;  %v2915_v36 = vmul.f32 1.442695, %v2873_v23 }
 0x5ee   : > { %v2690_v46 = vpop.f32.mrf.mxu2  ;;  %v2986_v31 = vsel %vm1805_vm5, %v9772_v58, 0.0  ;;  %v9783_v63 = vpop.eup %6797 }
 0x5ef   : > { %v9775_v32 = vadd.f32 %v9639_v29, %v2690_v46  ;;  %6799 = vpow2.f32 %v2915_v36  ;;  %2987 = vadd.xlane.f32.xlu2 %v2986_v31  ;;  %v2983_v23 = vsel %vm1805_vm5, %v9783_v63, 0.0  ;;  %v2757_v36 = vpop.f32.mrf.mxu3 }
 0x5f1   : > { %v2830_v51 = vsel %vm1805_vm5, %v9775_v32, -inf }
 0x5f2   : > { %2849 = vmax.xlane.f32.xlu1 %v2848_v11  ;;  %2831 = vmax.xlane.f32.xlu0 %v2830_v51  ;;  %v2802_v46 = vpop.xlane.xlu2 %2801  ;;  %v9798_v51 = vadd.f32 %v9625_v25, %v2757_v36  ;;  %v9812_v36 = vpop.permute.xlu0 %3602 }
 0x5f5   : > { %v9785_v30 = vpop.eup %6799 }
 0x5f6   : > { %v2693_v10 = vpop.f32.mrf.mxu2  ;;  %v2989_v59 = vsel %vm1805_vm5, %v9785_v30, 0.0 }
 0x5f7   : > { %v9788_v38 = vadd.f32 %v9656_v43, %v2693_v10  ;;  %2990 = vadd.xlane.f32.xlu2 %v2989_v59  ;;  %v2851_v59 = vsel %vm1805_vm5, %v9798_v51, -inf }
 0x5f9   : > { %v2833_v39 = vsel %vm1805_vm5, %v9788_v38, -inf }
 0x5fa   : > { %2834 = vmax.xlane.f32.xlu1 %v2833_v39  ;;  %2984 = vadd.xlane.f32.xlu0 %v2983_v23  ;;  %v2805_v31 = vpop.xlane.xlu1 %2804  ;;  %v2874_v23 = vsub.f32 %v9618_v8, %v2802_v46 }
 0x5fb   : > { %v2875_v11 = vsub.f32 %v9630_v14, %v2805_v31  ;;  %v2759_v31 = vpop.f32.mrf.mxu3 }
 0x5fc   : > { %v9816_v12 = vadd.f32 %v9639_v29, %v2759_v31 }
 0x5fd   : > { %v2919_v10 = vmul.f32 1.442695, %v2875_v11  ;;  %v2917_v11 = vmul.f32 1.442695, %v2874_v23 }
 0x5fe   : > { %v2695_v50 = vpop.f32.mrf.mxu2  ;;  %v2854_v18 = vsel %vm1805_vm5, %v9816_v12, -inf }
 0x5ff   : > { %6801 = vpow2.f32 %v2919_v10  ;;  %v9803_v20 = vadd.f32 %v9678_v0, %v2695_v50 }
 0x600   : > { %6803 = vpow2.f32 %v2917_v11 }
 0x601   : > { %v2836_v14 = vsel %vm1805_vm5, %v9803_v20, -inf }
 0x602   : > { %2852 = vmax.xlane.f32.xlu0 %v2851_v59  ;;  %v2808_v53 = vpop.xlane.xlu2 %2807  ;;  %v2769_v54 = vpop.xlane.xlu1 %2768 }
 0x605   : > { %v9805_v39 = vpop.eup %6801 }
 0x606   : > { %v2995_v25 = vsel %vm1805_vm5, %v9805_v39, 0.0 }
 0x607   : > { %2996 = vadd.xlane.f32.xlu1 %v2995_v25  ;;  %v2863_v25 = vsub.f32 %v9642_v2, %v2769_v54  ;;  %v2876_v2 = vsub.f32 %v9645_v9, %v2808_v53 }
 0x609   : > { %v2895_v23 = vmul.f32 1.442695, %v2863_v25  ;;  %v2921_v11 = vmul.f32 1.442695, %v2876_v2 }
 0x60a   : > { %2837 = vmax.xlane.f32.xlu0 %v2836_v14  ;;  %v2772_v10 = vpop.xlane.xlu2 %2771  ;;  %v2811_v59 = vpop.xlane.xlu1 %2810 }
 0x60b   : > { %v2864_v50 = vsub.f32 %v9659_v40, %v2772_v10  ;;  %v2877_v46 = vsub.f32 %v9662_v57, %v2811_v59  ;;  %v9823_v40 = vpop.eup %6803 }
 0x60d   : > { %v2897_v8 = vmul.f32 1.442695, %v2864_v50  ;;  %v2923_v49 = vmul.f32 1.442695, %v2877_v46 }
 0x60f   : > { %6805 = vpow2.f32 %v2897_v8 }
 0x610   : > { %6807 = vpow2.f32 %v2923_v49 }
 0x611   : > { %6809 = vpow2.f32 %v2895_v23 }
 0x612   : > { %2855 = vmax.xlane.f32.xlu0 %v2854_v18  ;;  %v2775_v14 = vpop.xlane.xlu0 %2774  ;;  %v2992_v18 = vsel %vm1805_vm5, %v9823_v40, 0.0 }
 0x613   : > { %v2865_v6 = vsub.f32 %v9671_v4, %v2775_v14 }
 0x615   : > { %v9825_v29 = vpop.eup %6805  ;;  %v2899_v31 = vmul.f32 1.442695, %v2865_v6 }
 0x616   : > { %v2962_v54 = vsel %vm1805_vm5, %v9825_v29, 0.0  ;;  %v9832_v4 = vpop.eup %6807 }
 0x617   : > { %6811 = vpow2.f32 %v2899_v31  ;;  %2963 = vadd.xlane.f32.xlu1 %v2962_v54  ;;  %v9835_v6 = vpop.eup %6809  ;;  %v3001_v8 = vsel %vm1805_vm5, %v9832_v4, 0.0 }
 0x618   : > { %6813 = vpow2.f32 %v2921_v11 }
 0x61a   : > { %2993 = vadd.xlane.f32.xlu0 %v2992_v18  ;;  %v2814_v57 = vpop.xlane.xlu0 %2813  ;;  %v2778_v10 = vpop.xlane.xlu1 %2777 }
 0x61b   : > { %v2878_v49 = vsub.f32 %v9681_v7, %v2814_v57  ;;  %v2866_v53 = vsub.f32 %v9686_v47, %v2778_v10  ;;  %v2959_v7 = vsel %vm1805_vm5, %v9835_v6, 0.0 }
 0x61d   : > { %v9837_v59 = vpop.eup %6811  ;;  %v2925_v50 = vmul.f32 1.442695, %v2878_v49  ;;  %v2901_v46 = vmul.f32 1.442695, %v2866_v53 }
 0x61e   : > { %v2965_v9 = vsel %vm1805_vm5, %v9837_v59, 0.0  ;;  %v9846_v23 = vpop.eup %6813 }
 0x61f   : > { %2966 = vadd.xlane.f32.xlu2 %v2965_v9  ;;  %3002 = vadd.xlane.f32.xlu1 %v3001_v8  ;;  %6815 = vpow2.f32 %v2925_v50  ;;  %v2998_v54 = vsel %vm1805_vm5, %v9846_v23, 0.0 }
 0x620   : > { %6817 = vpow2.f32 %v2901_v46 }
 0x622   : > { %2960 = vadd.xlane.f32.xlu0 %v2959_v7  ;;  %v2781_v25 = vpop.xlane.xlu2 %2780 }
 0x623   : > { %v2867_v47 = vsub.f32 %v9693_v15, %v2781_v25 }
 0x625   : > { %v9848_v14 = vpop.eup %6815  ;;  %v2903_v2 = vmul.f32 1.442695, %v2867_v47 }
 0x626   : > { %v3004_v31 = vsel %vm1805_vm5, %v9848_v14, 0.0  ;;  %v9856_v11 = vpop.eup %6817 }
 0x627   : > { %3005 = vadd.xlane.f32.xlu1 %v3004_v31  ;;  %6819 = vpow2.f32 %v2903_v2  ;;  %v2968_v15 = vsel %vm1805_vm5, %v9856_v11, 0.0 }
 0x62a   : > { %2999 = vadd.xlane.f32.xlu0 %v2998_v54  ;;  %v2784_v18 = vpop.xlane.xlu0 %2783 }
 0x62b   : > { %v2868_v57 = vsub.f32 %v9700_v16, %v2784_v18 }
 0x62d   : > { %v2905_v10 = vmul.f32 1.442695, %v2868_v57  ;;  %v9861_v53 = vpop.eup %6819 }
 0x62e   : > { %v2971_v7 = vsel %vm1805_vm5, %v9861_v53, 0.0 }
 0x62f   : > { %6821 = vpow2.f32 %v2905_v10  ;;  %2969 = vadd.xlane.f32.xlu1 %v2968_v15 }
 0x632   : > { %v2787_v49 = vpop.xlane.xlu2 %2786 }
 0x633   : > { %v2869_v50 = vsub.f32 %v9707_v27, %v2787_v49  ;;  %v2762_v27 = vpop.f32.mrf.mxu3 }
 0x635   : > { %v9863_v9 = vpop.eup %6821  ;;  %v2907_v8 = vmul.f32 1.442695, %v2869_v50 }
 0x636   : > { %v2974_v16 = vsel %vm1805_vm5, %v9863_v9, 0.0 }
 0x637   : > { %6823 = vpow2.f32 %v2907_v8  ;;  %2975 = vadd.xlane.f32.xlu0 %v2974_v16  ;;  %2972 = vadd.xlane.f32.xlu1 %v2971_v7 }
 0x63b   : > { %v2764_v8 = vpop.f32.mrf.mxu3 }
 0x63c   : > { %v9881_v16 = vadd.f32 %v9678_v0, %v2764_v8 }
 0x63d   : > { %v2817_v46 = vpop.xlane.xlu0 %2816  ;;  %v9869_v25 = vpop.eup %6823 }
 0x63e   : > { %v2879_v47 = vsub.f32 %v9716_v62, %v2817_v46  ;;  %v2977_v54 = vsel %vm1805_vm5, %v9869_v25, 0.0 }
 0x63f   : > { %2978 = vadd.xlane.f32.xlu1 %v2977_v54 }
 0x640   : > { %v2927_v31 = vmul.f32 1.442695, %v2879_v47 }
 0x642   : > { %6825 = vpow2.f32 %v2927_v31 }
 0x645   : > { %v2820_v2 = vpop.xlane.xlu2 %2819  ;;  %v2790_v18 = vpop.xlane.xlu0 %2789 }
 0x646   : > { %v2880_v57 = vsub.f32 %v9724_v19, %v2820_v2  ;;  %v2870_v10 = vsub.f32 %v9721_v17, %v2790_v18  ;;  %v2860_v18 = vsel %vm1805_vm5, %v9881_v16, -inf }
 0x648   : > { %v9876_v15 = vpop.eup %6825  ;;  %v2929_v49 = vmul.f32 1.442695, %v2880_v57  ;;  %v2909_v50 = vmul.f32 1.442695, %v2870_v10  ;;  %v9896_v57 = vadd.f32 %v9656_v43, %v2762_v27 }
 0x649   : > { %v3007_v62 = vsel %vm1805_vm5, %v9876_v15, 0.0 }
 0x64a   : > { %6827 = vpow2.f32 %v2929_v49  ;;  %3008 = vadd.xlane.f32.xlu2 %v3007_v62  ;;  %v2844_v7 = vpop.xlane.xlu1 %2843 }
 0x64b   : > { %6829 = vpow2.f32 %v2909_v50  ;;  %v2888_v17 = vsub.f32 %v9733_v3, %v2844_v7  ;;  %v2857_v7 = vsel %vm1805_vm5, %v9896_v57, -inf }
 0x64d   : > { %v2823_v46 = vpop.xlane.xlu0 %2822 }
 0x64e   : > { %v2881_v19 = vsub.f32 %v9738_v24, %v2823_v46  ;;  %v2945_v24 = vmul.f32 1.442695, %v2888_v17 }
 0x650   : > { %v9884_v47 = vpop.eup %6827  ;;  %v2931_v31 = vmul.f32 1.442695, %v2881_v19 }
 0x651   : > { %v9887_v54 = vpop.eup %6829  ;;  %v3010_v2 = vsel %vm1805_vm5, %v9884_v47, 0.0 }
 0x652   : > { %6831 = vpow2.f32 %v2931_v31  ;;  %3011 = vadd.xlane.f32.xlu1 %v3010_v2  ;;  %2861 = vmax.xlane.f32.xlu2 %v2860_v18  ;;  %v2980_v0 = vsel %vm1805_vm5, %v9887_v54, 0.0 }
 0x653   : > { %2981 = vadd.xlane.f32.xlu0 %v2980_v0  ;;  %6833 = vpow2.f32 %v2945_v24 }
 0x655   : > { %v2841_v3 = vpop.xlane.xlu0 %2840  ;;  %v2826_v10 = vpop.xlane.xlu2 %2825 }
 0x656   : > { %v2887_v49 = vsub.f32 %v9747_v33, %v2841_v3  ;;  %v2882_v8 = vsub.f32 %v9750_v48, %v2826_v10 }
 0x658   : > { %v9899_v50 = vpop.eup %6831  ;;  %v2943_v62 = vmul.f32 1.442695, %v2887_v49  ;;  %v2933_v43 = vmul.f32 1.442695, %v2882_v8 }
 0x659   : > { %v3013_v46 = vsel %vm1805_vm5, %v9899_v50, 0.0  ;;  %v9908_v33 = vpop.eup %6833 }
 0x65a   : > { %2858 = vmax.xlane.f32.xlu1 %v2857_v7  ;;  %3014 = vadd.xlane.f32.xlu2 %v3013_v46  ;;  %6835 = vpow2.f32 %v2943_v62  ;;  %v3034_v48 = vsel %vm1805_vm5, %v9908_v33, 0.0 }
 0x65b   : > { %6837 = vpow2.f32 %v2933_v43 }
 0x65d   : > { %v2829_v27 = vpop.xlane.xlu1 %2828  ;;  %v9906_v19 = vpop.xlane.xlu0 %2846 }
 0x65e   : > { %v2883_v17 = vsub.f32 %v9762_v5, %v2829_v27 }
 0x660   : > { %v2935_v31 = vmul.f32 1.442695, %v2883_v17  ;;  %v9911_v2 = vpop.eup %6835 }
 0x661   : > { %v3031_v18 = vsel %vm1805_vm5, %v9911_v2, 0.0  ;;  %v9920_v5 = vpop.eup %6837 }
 0x662   : > { %6839 = vpow2.f32 %v2935_v31  ;;  %3035 = vadd.xlane.f32.xlu1 %v3034_v48  ;;  %3032 = vadd.xlane.f32.xlu0 %v3031_v18  ;;  %v2988_v0 = vpop.xlane.xlu2 %2987  ;;  %v3016_v7 = vsel %vm1805_vm5, %v9920_v5, 0.0 }
 0x663   : > { %6841 = vrcp.f32 %v2988_v0 }
 0x665   : > { %v9917_v24 = vpop.xlane.xlu1 %2849  ;;  %v2832_v3 = vpop.xlane.xlu0 %2831 }
 0x666   : > { %v2884_v10 = vsub.f32 %v9775_v32, %v2832_v3 }
 0x668   : > { %v9922_v49 = vpop.eup %6839  ;;  %v2937_v62 = vmul.f32 1.442695, %v2884_v10 }
 0x669   : > { %v3019_v8 = vsel %vm1805_vm5, %v9922_v49, 0.0  ;;  %v6842_v27 = vpop.eup %6841 }
 0x66a   : > { %3020 = vadd.xlane.f32.xlu2 %v3019_v8  ;;  %6843 = vpow2.f32 %v2937_v62  ;;  %3017 = vadd.xlane.f32.xlu0 %v3016_v7  ;;  %v3096_v48 = vmul.f32 %v6842_v27, %v9772_v58 }
 0x66c   : > { %v3128_v3 = vpack.c.bf16 %v3096_v48, %v3096_v48 }
 0x66d   : > { %v2835_v46 = vpop.xlane.xlu1 %2834  ;;  %v2985_v43 = vpop.xlane.xlu0 %2984 }
 0x66e   : > { %v2885_v32 = vsub.f32 %v9788_v38, %v2835_v46  ;;  %6845 = vrcp.f32 %v2985_v43  ;;  %v3233_v38 = vunpack.c.l.b16 %v3128_v3  ;;  %v12071_v3 = vld [vmem:[#allocation9_spill] sm:$0xff] }
 0x670   : > { %v2939_v17 = vmul.f32 1.442695, %v2885_v32  ;;  %v9929_v31 = vpop.eup %6843 }
 0x671   : > { %v3022_v18 = vsel %vm1805_vm5, %v9929_v31, 0.0 }
 0x672   : > { %6847 = vpow2.f32 %v2939_v17  ;;  %3023 = vadd.xlane.f32.xlu0 %v3022_v18  ;;  %v2991_v17 = vpop.xlane.xlu2 %2990  ;;  %v12070_v18 = vld [vmem:[#allocation2_spill] sm:$0xff] }
 0x673   : > { %6849 = vrcp.f32 %v2991_v17 }
 0x674   : > { %v6846_v0 = vpop.eup %6845 }
 0x675   : > { %v3095_v10 = vmul.f32 %v6846_v0, %v9783_v63  ;;  %v9935_v62 = vpop.xlane.xlu0 %2852  ;;  %v12069_v63 = vld [vmem:[#allocation20_spill] sm:$0xff] }
 0x677   : > { %v3127_v8 = vpack.c.bf16 %v3095_v10, %v3095_v10 }
 0x678   : > { %v9937_v7 = vpop.eup %6847 }
 0x679   : > { %v3232_v46 = vunpack.c.l.b16 %v3127_v8  ;;  %v3025_v43 = vsel %vm1805_vm5, %v9937_v7, 0.0  ;;  %v6850_v8 = vpop.eup %6849 }
 0x67a   : > { %3026 = vadd.xlane.f32.xlu2 %v3025_v43  ;;  %v2997_v32 = vpop.xlane.xlu1 %2996 }
 0x67b   : > { %v3240_v58 = vpack.c.b16 %v3233_v38, %v3232_v46  ;;  %3600 = vrot.lane.b32.xlu1 %v8689_v41, %s7198_s11  ;;  %v3097_v38 = vmul.f32 %v6850_v8, %v9785_v30  ;;  %v12072_v46 = vld [vmem:[#allocation28_spill] sm:$0xff]  ;;  %v12074_v8 = vld [vmem:[#allocation13_spill] sm:$0xff] }
 0x67d   : > { %6200 = vmatmul.msk.bf16.vlgmr.msrb.gmra.mxu1 %vm1805_vm5, %v3240_v58  ;;  %v2838_v27 = vpop.xlane.xlu0 %2837  ;;  %v12073_v58 = vld [vmem:[#allocation23_spill] sm:$0xff]  ;;  %v3129_v42 = vpack.c.bf16 %v3097_v38, %v3097_v38 }
 0x683   : > { %3394 = vrot.lane.b32.xlu1 %v12069_v63, %s7197_s10 }
 0x685   : > { %v9946_v48 = vpop.xlane.xlu0 %2855 }
 0x686   : > { %3525 = vrot.lane.b32.xlu0 %v12070_v18, %s7199_s12 }
 0x68a   : > { %v2964_v0 = vpop.xlane.xlu1 %2963 }
 0x68b   : > { %3390 = vrot.lane.b32.xlu1 %v12071_v3, %s7197_s10 }
 0x68d   : > { %v2994_v10 = vpop.xlane.xlu0 %2993 }
 0x68e   : > { %6851 = vrcp.f32 %v2994_v10  ;;  %v3234_v10 = vunpack.c.l.b16 %v3129_v42 }
 0x68f   : > { %6853 = vrcp.f32 %v2964_v0 }
 0x692   : > { %3396 = vrot.lane.b32.xlu2 %v12072_v46, %s7197_s10  ;;  %v3003_v43 = vpop.xlane.xlu1 %3002 }
 0x693   : > { %3590 = vrot.lane.b32.xlu1 %v12073_v58, %s7199_s12 }
 0x694   : > { %v6852_v52 = vpop.eup %6851 }
 0x695   : > { %v3098_v17 = vmul.f32 %v6852_v52, %v9823_v40  ;;  %v2961_v18 = vpop.xlane.xlu0 %2960  ;;  %v6854_v28 = vpop.eup %6853 }
 0x696   : > { %6855 = vrcp.f32 %v2961_v18  ;;  %v3088_v0 = vmul.f32 %v6854_v28, %v9825_v29  ;;  %v2967_v52 = vpop.xlane.xlu2 %2966 }
 0x697   : > { %v3130_v26 = vpack.c.bf16 %v3098_v17, %v3098_v17  ;;  %6857 = vrcp.f32 %v2997_v32 }
 0x698   : > { %v3120_v37 = vpack.c.bf16 %v3088_v0, %v3088_v0 }
 0x699   : > { %v3235_v30 = vunpack.c.l.b16 %v3130_v26  ;;  %v2886_v26 = vsub.f32 %v9803_v20, %v2838_v27 }
 0x69a   : > { %3598 = vrot.lane.b32.xlu2 %v8667_v61, %s7198_s11  ;;  %v3006_v38 = vpop.xlane.xlu1 %3005  ;;  %v3160_v17 = vunpack.c.l.b16 %v3120_v37 }
 0x69b   : > { %3527 = vrot.lane.b32.xlu1 %v12074_v8, %s7199_s12  ;;  %v3241_v58 = vpack.c.b16 %v3235_v30, %v3234_v10  ;;  %v2941_v10 = vmul.f32 1.442695, %v2886_v26 }
 0x69c   : > { %v6856_v13 = vpop.eup %6855 }
 0x69d   : > { %v3087_v40 = vmul.f32 %v6856_v13, %v9835_v6  ;;  %6201 = vmatmul.msk.bf16.gmra.mxu1 %vm1805_vm5, %v3241_v58  ;;  %v3000_v32 = vpop.xlane.xlu0 %2999  ;;  %v6858_v18 = vpop.eup %6857 }
 0x69e   : > { %6859 = vrcp.f32 %v3000_v32  ;;  %v3099_v42 = vmul.f32 %v6858_v18, %v9805_v39 }
 0x69f   : > { %v3119_v28 = vpack.c.bf16 %v3087_v40, %v3087_v40  ;;  %6861 = vrcp.f32 %v2967_v52 }
 0x6a0   : > { %v3131_v61 = vpack.c.bf16 %v3099_v42, %v3099_v42  ;;  %v2889_v42 = vsub.f32 %v9758_v34, %v9906_v19 }
 0x6a1   : > { %v3159_v29 = vunpack.c.l.b16 %v3119_v28 }
 0x6a2   : > { %v2970_v0 = vpop.xlane.xlu1 %2969  ;;  %v3236_v27 = vunpack.c.l.b16 %v3131_v61 }
 0x6a3   : > { %v3167_v30 = vpack.c.b16 %v3160_v17, %v3159_v29  ;;  %6863 = vrcp.f32 %v2970_v0 }
 0x6a4   : > { %v6860_v8 = vpop.eup %6859  ;;  %6865 = vrcp.f32 %v3006_v38 }
 0x6a5   : > { %v3100_v13 = vmul.f32 %v6860_v8, %v9846_v23  ;;  %6196 = vmatmul.msk.bf16.vlgmr.msrb.gmra.mxu0 %vm1805_vm5, %v3167_v30  ;;  %v6862_v6 = vpop.eup %6861  ;;  %6867 = vpow2.f32 %v2941_v10 }
 0x6a6   : > { %6869 = vrcp.f32 %v3003_v43  ;;  %v3089_v39 = vmul.f32 %v6862_v6, %v9837_v59 }
 0x6a7   : > { %v3132_v20 = vpack.c.bf16 %v3100_v13, %v3100_v13 }
 0x6a8   : > { %v3121_v38 = vpack.c.bf16 %v3089_v39, %v3089_v39  ;;  %v2892_v39 = vsub.f32 %v9816_v12, %v9946_v48 }
 0x6a9   : > { %v3237_v58 = vunpack.c.l.b16 %v3132_v20  ;;  %v6864_v37 = vpop.eup %6863  ;;  %v2947_v20 = vmul.f32 1.442695, %v2889_v42 }
 0x6aa   : > { %v2976_v52 = vpop.xlane.xlu0 %2975  ;;  %v6866_v32 = vpop.eup %6865  ;;  %v3090_v23 = vmul.f32 %v6864_v37, %v9856_v11  ;;  %v3161_v11 = vunpack.c.l.b16 %v3121_v38  ;;  %v12075_v38 = vld [vmem:[#allocation4_spill] sm:$0xff] }
 0x6ab   : > { %v3242_v40 = vpack.c.b16 %v3237_v58, %v3236_v27  ;;  %6871 = vrcp.f32 %v2976_v52  ;;  %v2973_v18 = vpop.xlane.xlu1 %2972  ;;  %v9971_v8 = vpop.eup %6867  ;;  %v3102_v61 = vmul.f32 %v6866_v32, %v9848_v14  ;;  %v2891_v14 = vsub.f32 %v9798_v51, %v9935_v62 }
 0x6ac   : > { %6873 = vrcp.f32 %v2973_v18  ;;  %v6870_v26 = vpop.eup %6869  ;;  %v3122_v43 = vpack.c.bf16 %v3090_v23, %v3090_v23  ;;  %v3028_v59 = vsel %vm1805_vm5, %v9971_v8, 0.0  ;;  %v3628_v51 = vsel %vm1448_vm3, %v9744_v60, 0 }
 0x6ad   : > { %6202 = vmatmul.msk.bf16.gmra.mxu1 %vm1805_vm5, %v3242_v40  ;;  %v3101_v29 = vmul.f32 %v6870_v26, %v9832_v4  ;;  %v3134_v30 = vpack.c.bf16 %v3102_v61, %v3102_v61  ;;  %v2951_v19 = vmul.f32 1.442695, %v2891_v14  ;;  %6875 = vpow2.f32 %v2947_v20 }
 0x6ae   : > { %v3162_v28 = vunpack.c.l.b16 %v3122_v43  ;;  %v3625_v60 = vsel %vm1448_vm3, %v9812_v36, 0 }
 0x6af   : > { %v3133_v27 = vpack.c.bf16 %v3101_v29, %v3101_v29  ;;  %v3239_v4 = vunpack.c.l.b16 %v3134_v30  ;;  %6877 = vpow2.f32 %v2951_v19 }
 0x6b0   : > { %3029 = vadd.xlane.f32.xlu0 %v3028_v59  ;;  %v3168_v13 = vpack.c.b16 %v3162_v28, %v3161_v11  ;;  %v12076_v59 = vld [vmem:[#allocation57_spill] sm:$0xff] }
 0x6b1   : > { %v6872_v17 = vpop.eup %6871 }
 0x6b2   : > { %v6874_v10 = vpop.eup %6873  ;;  %v3092_v0 = vmul.f32 %v6872_v17, %v9863_v9  ;;  %v3238_v9 = vunpack.c.l.b16 %v3133_v27 }
 0x6b3   : > { %v3091_v6 = vmul.f32 %v6874_v10, %v9861_v53  ;;  %v2953_v53 = vmul.f32 1.442695, %v2892_v39  ;;  %v2979_v62 = vpop.xlane.xlu1 %2978  ;;  %v9991_v18 = vpop.eup %6875 }
 0x6b4   : > { %v3124_v58 = vpack.c.bf16 %v3092_v0, %v3092_v0  ;;  %v3243_v32 = vpack.c.b16 %v3239_v4, %v3238_v9  ;;  %v3037_v48 = vsel %vm1805_vm5, %v9991_v18, 0.0  ;;  %v2890_v9 = vsub.f32 %v9770_v55, %v9917_v24 }
 0x6b5   : > { %6197 = vmatmul.msk.bf16.gmra.mxu0 %vm1805_vm5, %v3168_v13  ;;  %v3123_v34 = vpack.c.bf16 %v3091_v6, %v3091_v6  ;;  %6879 = vpow2.f32 %v2953_v53  ;;  %v9993_v12 = vpop.eup %6877 }
 0x6b6   : > { %v3164_v37 = vunpack.c.l.b16 %v3124_v58  ;;  %6881 = vrcp.f32 %v2979_v62  ;;  %v3043_v43 = vsel %vm1805_vm5, %v9993_v12, 0.0 }
 0x6b7   : > { %v3163_v52 = vunpack.c.l.b16 %v3123_v34 }
 0x6b9   : > { %v3169_v40 = vpack.c.b16 %v3164_v37, %v3163_v52 }
 0x6bb   : > { %6198 = vmatmul.msk.bf16.vlgmr.msrb.gmra.mxu2 %vm1805_vm5, %v3169_v40  ;;  %v10003_v61 = vpop.eup %6879 }
 0x6bc   : > { %3634 = vmatpush.bf16.xpose.msrb.mxu2 %v3628_v51  ;;  %v6882_v42 = vpop.eup %6881  ;;  %v3046_v36 = vsel %vm1805_vm5, %v10003_v61, 0.0 }
 0x6bd   : > { %6203 = vmatmul.msk.bf16.gmra.mxu1 %vm1805_vm5, %v3243_v32  ;;  %v3009_v23 = vpop.xlane.xlu2 %3008  ;;  %v3093_v29 = vmul.f32 %v6882_v42, %v9869_v25 }
 0x6bf   : > { %v3125_v30 = vpack.c.bf16 %v3093_v29, %v3093_v29 }
 0x6c1   : > { %v3165_v20 = vunpack.c.l.b16 %v3125_v30 }
 0x6c3   : > { %3038 = vadd.xlane.f32.xlu2 %v3037_v48  ;;  %v2949_v48 = vmul.f32 1.442695, %v2890_v9  ;;  %v12083_v9 = vld [vmem:[#allocation6_spill] sm:$0xff] }
 0x6c4   : > { %3635 = vmatpush.bf16.xpose.msrb.mxu2 %v3625_v60  ;;  %3392 = vrot.lane.b32.xlu0 %v12075_v38, %s7197_s10  ;;  %s7200_s10 = smov 48  }
 0x6c5   : > { %v3012_v26 = vpop.xlane.xlu1 %3011  ;;  %3044 = vadd.xlane.f32.xlu1 %v3043_v43  ;;  %6220 = vmatmul.msk.bf16.vlgmr.msra.gmra.mxu0 %vm1448_vm3, %v12076_v59  ;;  %v2862_v17 = vpop.xlane.xlu2 %2861  ;;  %v12080_v59 = vld [vmem:[#allocation11_spill] sm:$0xff] }
 0x6c6   : > { %v2982_v28 = vpop.xlane.xlu0 %2981  ;;  %v2894_v14 = vsub.f32 %v9881_v16, %v2862_v17 }
 0x6c7   : > { %6883 = vrcp.f32 %v2982_v28 }
 0x6c8   : > { %6885 = vrcp.f32 %v3012_v26  ;;  %v2957_v58 = vmul.f32 1.442695, %v2894_v14  ;;  %v12079_v26 = vld [vmem:[#allocation56_spill] sm:$0xff] }
 0x6c9   : > { %6887 = vrcp.f32 %v3009_v23  ;;  %v12081_v14 = vld [vmem:[#allocation16_spill] sm:$0xff] }
 0x6cb   : > { %3047 = vadd.xlane.f32.xlu2 %v3046_v36 }
 0x6cd   : > { %v6884_v11 = vpop.eup %6883  ;;  %v2859_v10 = vpop.xlane.xlu1 %2858  ;;  %6224 = vmatmul.msk.bf16.vlgmr.msra.gmra.mxu1 %vm1448_vm3, %v9726_v1  ;;  %v12077_v1 = vld [vmem:[#allocation60_spill] sm:$0xff] }
 0x6ce   : > { %v3094_v0 = vmul.f32 %v6884_v11, %v9887_v54  ;;  %v2893_v13 = vsub.f32 %v9896_v57, %v2859_v10  ;;  %v6886_v4 = vpop.eup %6885  ;;  %v3015_v40 = vpop.xlane.xlu2 %3014 }
 0x6cf   : > { %v6888_v57 = vpop.eup %6887  ;;  %v3104_v16 = vmul.f32 %v6886_v4, %v9884_v47  ;;  %v12078_v47 = vld [vmem:[#allocation7_spill] sm:$0xff] }
 0x6d0   : > { %v3126_v6 = vpack.c.bf16 %v3094_v0, %v3094_v0  ;;  %v2955_v25 = vmul.f32 1.442695, %v2893_v13  ;;  %v3103_v37 = vmul.f32 %v6888_v57, %v9876_v15 }
 0x6d1   : > { %v3136_v52 = vpack.c.bf16 %v3104_v16, %v3104_v16 }
 0x6d2   : > { %6889 = vpow2.f32 %v2955_v25  ;;  %v3166_v27 = vunpack.c.l.b16 %v3126_v6  ;;  %v3135_v51 = vpack.c.bf16 %v3103_v37, %v3103_v37 }
 0x6d3   : > { %6891 = vpow2.f32 %v2957_v58  ;;  %v3306_v62 = vunpack.c.l.b16 %v3136_v52 }
 0x6d4   : > { %v3170_v34 = vpack.c.b16 %v3166_v27, %v3165_v20  ;;  %v3305_v23 = vunpack.c.l.b16 %v3135_v51  ;;  %v12085_v51 = vld [vmem:[#allocation27_spill] sm:$0xff] }
 0x6d5   : > { %6221 = vmatmul.msk.bf16.gmra.mxu0 %vm1448_vm3, %v12077_v1  ;;  %v10018_v54 = vpop.xlane.xlu0 %3032 }
 0x6d6   : > { %6199 = vmatmul.msk.bf16.gmra.mxu2 %vm1805_vm5, %v3170_v34  ;;  %v3313_v55 = vpack.c.b16 %v3306_v62, %v3305_v23  ;;  %v12082_v34 = vld [vmem:[#allocation15_spill] sm:$0xff] }
 0x6d8   : > { %v10020_v19 = vpop.eup %6889 }
 0x6d9   : > { %v3049_v39 = vsel %vm1805_vm5, %v10020_v19, 0.0  ;;  %v10030_v32 = vpop.eup %6891 }
 0x6da   : > { %3050 = vadd.xlane.f32.xlu2 %v3049_v39  ;;  %v3052_v15 = vsel %vm1805_vm5, %v10030_v32, 0.0 }
 0x6dd   : > { %6225 = vmatmul.msk.bf16.gmra.mxu1 %vm1448_vm3, %v9742_v45  ;;  %v3018_v53 = vpop.xlane.xlu0 %3017  ;;  %v10036_v45 = vpop.xlane.xlu1 %3035 }
 0x6de   : > { %6893 = vrcp.f32 %v3018_v53  ;;  %3594 = vrot.lane.b32.xlu1 %v12078_v47, %s7199_s12  ;;  %v3021_v60 = vpop.xlane.xlu2 %3020 }
 0x6df   : > { %6895 = vrcp.f32 %v3015_v40  ;;  %v12084_v40 = vld [vmem:[#allocation38_spill] sm:$0xff] }
 0x6e0   : > { %6897 = vpow2.f32 %v2949_v48 }
 0x6e2   : > { %3053 = vadd.xlane.f32.xlu2 %v3052_v15  ;;  %v12087_v15 = vld [vmem:[#allocation22_spill] sm:$0xff] }
 0x6e4   : > { %v6894_v24 = vpop.eup %6893 }
 0x6e5   : > { %6222 = vmatmul.msk.bf16.gmra.mxu0 %vm1448_vm3, %v12079_v26  ;;  %v6896_v43 = vpop.eup %6895  ;;  %v3106_v28 = vmul.f32 %v6894_v24, %v9920_v5  ;;  %v3024_v11 = vpop.xlane.xlu0 %3023  ;;  %v12089_v24 = vld [vmem:[#allocation10_spill] sm:$0xff] }
 0x6e6   : > { %6204 = vmatmul.msk.bf16.vlgmr.msra.gmra.mxu2 %vm1805_vm5, %v3313_v55  ;;  %3659 = vrot.lane.b32.xlu1 %v12080_v59, %s7199_s12  ;;  %v3105_v42 = vmul.f32 %v6896_v43, %v9899_v50  ;;  %v10045_v29 = vpop.eup %6897  ;;  %6899 = vrcp.f32 %v3024_v11 }
 0x6e7   : > { %v3138_v36 = vpack.c.bf16 %v3106_v28, %v3106_v28  ;;  %v3040_v0 = vsel %vm1805_vm5, %v10045_v29, 0.0  ;;  %6901 = vrcp.f32 %v3021_v60  ;;  %v12090_v60 = vld [vmem:[#allocation14_spill] sm:$0xff] }
 0x6e8   : > { %v3137_v30 = vpack.c.bf16 %v3105_v42, %v3105_v42 }
 0x6e9   : > { %v3308_v5 = vunpack.c.l.b16 %v3138_v36 }
 0x6ea   : > { %v3307_v50 = vunpack.c.l.b16 %v3137_v30 }
 0x6ec   : > { %v3314_v6 = vpack.c.b16 %v3308_v5, %v3307_v50  ;;  %v6900_v25 = vpop.eup %6899 }
 0x6ed   : > { %v3601_v17 = vpop.permute.xlu1 %3600  ;;  %v3027_v10 = vpop.xlane.xlu2 %3026  ;;  %v3108_v4 = vmul.f32 %v6900_v25, %v9929_v31 }
 0x6ee   : > { %v3622_v13 = vsel %vm1448_vm3, %v3601_v17, 0  ;;  %3661 = vrot.lane.b32.xlu1 %v12081_v14, %s7199_s12  ;;  %3041 = vadd.xlane.f32.xlu0 %v3040_v0  ;;  %v6902_v58 = vpop.eup %6901  ;;  %6903 = vrcp.f32 %v3027_v10  ;;  %v12096_v0 = vld [vmem:[#allocation29_spill] sm:$0xff] }
 0x6ef   : > { %3636 = vmatpush.bf16.xpose.msrb.mxu2 %v3622_v13  ;;  %v3107_v57 = vmul.f32 %v6902_v58, %v9922_v49  ;;  %v3140_v16 = vpack.c.bf16 %v3108_v4, %v3108_v4 }
 0x6f1   : > { %v3139_v37 = vpack.c.bf16 %v3107_v57, %v3107_v57  ;;  %v3310_v31 = vunpack.c.l.b16 %v3140_v16 }
 0x6f3   : > { %v3309_v49 = vunpack.c.l.b16 %v3139_v37 }
 0x6f4   : > { %v6904_v36 = vpop.eup %6903 }
 0x6f5   : > { %v3395_v20 = vpop.permute.xlu1 %3394  ;;  %v3397_v27 = vpop.permute.xlu2 %3396  ;;  %6223 = vmatmul.msk.bf16.gmra.mxu0 %vm1448_vm3, %v9713_v56  ;;  %v3315_v53 = vpack.c.b16 %v3310_v31, %v3309_v49  ;;  %v3109_v11 = vmul.f32 %v6904_v36, %v9937_v7  ;;  %v10118_v31 = vld [vmem:[%s11748_s7 + $0x80] sm:$0xff] }
 0x6f6   : > { %6205 = vmatmul.msk.bf16.gmra.mxu2 %vm1805_vm5, %v3314_v6  ;;  %3418 = vmatpush.bf16.msrb.mxu3 %v3397_v27 }
 0x6f7   : > { %4136 = vrot.lane.b32.xlu1 %v12082_v34, %s7200_s10  ;;  %v3141_v13 = vpack.c.bf16 %v3109_v11, %v3109_v11 }
 0x6f8   : > { %v3526_v1 = vpop.permute.xlu0 %3525 }
 0x6f9   : > { %6226 = vmatmul.msk.bf16.gmra.mxu1 %vm1448_vm3, %v3526_v1 }
 0x6fa   : > { %3671 = vrot.lane.b32.xlu2 %v12069_v63, %s7198_s11  ;;  %3419 = vmatpush.bf16.msrb.mxu3 %v3395_v20  ;;  %v10070_v48 = vpop.f32.mrf.mxu1  ;;  %v3311_v20 = vunpack.c.l.b16 %v3141_v13 }
 0x6fb   : > { %12086 = vst [vmem:[#allocation20_spill] sm:$0xff] %v10070_v48 }
 0x6fd   : > { %v3391_v39 = vpop.permute.xlu1 %3390  ;;  %v3599_v56 = vpop.permute.xlu2 %3598 }
 0x6fe   : > { %v3619_v52 = vsel %vm1448_vm3, %v3599_v56, 0 }
 0x6ff   : > { %4132 = vrot.lane.b32.xlu1 %v12083_v9, %s7200_s10  ;;  %3637 = vmatpush.bf16.xpose.msrb.mxu2 %v3619_v52 }
 0x702   : > { %3665 = vrot.lane.b32.xlu2 %v12084_v40, %s7199_s12  ;;  %3592 = vrot.lane.b32.xlu0 %v12085_v51, %s7199_s12  ;;  %v10077_v55 = vpop.f32.mrf.mxu1 }
 0x703   : > { %12088 = vst [vmem:[#allocation9_spill] sm:$0xff] %v10077_v55 }
 0x705   : > { %v3591_v62 = vpop.permute.xlu1 %3590 }
 0x706   : > { %6206 = vmatmul.msk.bf16.gmra.mxu2 %vm1805_vm5, %v3315_v53 }
 0x70a   : > { %4138 = vrot.lane.b32.xlu2 %v12087_v15, %s7200_s10  ;;  %3673 = vrot.lane.b32.xlu0 %v12072_v46, %s7198_s11 }
 0x70d   : > { %v3528_v23 = vpop.permute.xlu1 %3527 }
 0x70e   : > { %6227 = vmatmul.msk.bf16.gmra.mxu1 %vm1448_vm3, %v3528_v23 }
 0x712   : > { %4134 = vrot.lane.b32.xlu2 %v12089_v24, %s7200_s10  ;;  %3596 = vrot.lane.b32.xlu0 %v12090_v60, %s7199_s12 }
 0x71a   : > { %v10083_v26 = vpop.f32.mrf.mxu1  ;;  %3669 = vrot.lane.b32.xlu0 %v12075_v38, %s7198_s11 }
 0x71b   : > { %12091 = vst [vmem:[#allocation28_spill] sm:$0xff] %v10083_v26 }
 0x722   : > { %v10087_v43 = vpop.f32.mrf.mxu0  ;;  %v10089_v28 = vpop.f32.mrf.mxu1  ;;  %3667 = vrot.lane.b32.xlu0 %v12071_v3, %s7198_s11 }
 0x723   : > { %12092 = vst [vmem:[#allocation4_spill] sm:$0xff] %v10087_v43  ;;  %v3030_v42 = vpop.xlane.xlu0 %3029 }
 0x724   : > { %12093 = vst [vmem:[#allocation57_spill] sm:$0xff] %v10089_v28  ;;  %6905 = vrcp.f32 %v3030_v42 }
 0x725   : > { %6907 = vrcp.f32 %v10036_v45 }
 0x726   : > { %6909 = vrcp.f32 %v10018_v54 }
 0x72a   : > { %v10096_v17 = vpop.f32.mrf.mxu0  ;;  %v10098_v30 = vpop.f32.mrf.mxu1  ;;  %3663 = vrot.lane.b32.xlu0 %v12096_v0, %s7199_s12 }
 0x72b   : > { %12094 = vst [vmem:[#allocation60_spill] sm:$0xff] %v10096_v17  ;;  %v6906_v10 = vpop.eup %6905 }
 0x72c   : > { %12095 = vst [vmem:[#allocation7_spill] sm:$0xff] %v10098_v30  ;;  %v3110_v5 = vmul.f32 %v6906_v10, %v9971_v8  ;;  %v6908_v50 = vpop.eup %6907 }
 0x72d   : > { %v6910_v6 = vpop.eup %6909  ;;  %v3112_v54 = vmul.f32 %v6908_v50, %v9908_v33 }
 0x72e   : > { %v3142_v25 = vpack.c.bf16 %v3110_v5, %v3110_v5  ;;  %v3111_v7 = vmul.f32 %v6910_v6, %v9911_v2 }
 0x72f   : > { %v3144_v1 = vpack.c.bf16 %v3112_v54, %v3112_v54 }
 0x730   : > { %v3312_v45 = vunpack.c.l.b16 %v3142_v25  ;;  %v3143_v57 = vpack.c.bf16 %v3111_v7, %v3111_v7  ;;  %v10145_v25 = vld [vmem:[%s11748_s7 + $0x88] sm:$0xff] }
 0x731   : > { %v3379_v8 = vunpack.c.l.b16 %v3144_v1 }
 0x732   : > { %v10105_v27 = vpop.f32.mrf.mxu0  ;;  %v10107_v58 = vpop.f32.mrf.mxu1  ;;  %v3316_v4 = vpack.c.b16 %v3312_v45, %v3311_v20  ;;  %v3378_v56 = vunpack.c.l.b16 %v3143_v57 }
 0x733   : > { %12097 = vst [vmem:[#allocation56_spill] sm:$0xff] %v10105_v27 }
 0x734   : > { %12098 = vst [vmem:[#allocation11_spill] sm:$0xff] %v10107_v58  ;;  %6207 = vmatmul.msk.bf16.gmra.mxu2 %vm1805_vm5, %v3316_v4  ;;  %v3386_v2 = vpack.c.b16 %v3379_v8, %v3378_v56  ;;  %v10167_v56 = vld [vmem:[%s11748_s7 + $0x98] sm:$0xff] }
 0x736   : > { %v3393_v16 = vpop.permute.xlu0 %3392  ;;  %v3039_v33 = vpop.xlane.xlu2 %3038 }
 0x737   : > { %3420 = vmatpush.bf16.msrb.mxu3 %v3393_v16  ;;  %6911 = vrcp.f32 %v3039_v33 }
 0x738   : > { %v3045_v36 = vpop.xlane.xlu1 %3044 }
 0x73a   : > { %v10110_v37 = vpop.f32.mrf.mxu0  ;;  %v10112_v52 = vpop.f32.mrf.mxu1 }
 0x73b   : > { %12099 = vst [vmem:[#allocation16_spill] sm:$0xff] %v10110_v37  ;;  %3421 = vmatpush.bf16.msrb.mxu3 %v3391_v39 }
 0x73c   : > { %12100 = vst [vmem:[#allocation38_spill] sm:$0xff] %v10112_v52 }
 0x73e   : > { %6208 = vmatmul.msk.bf16.vlgmr.msrb.gmra.mxu3 %vm1805_vm5, %v3386_v2  ;;  %v3048_v42 = vpop.xlane.xlu2 %3047  ;;  %v10159_v16 = vpop.f32.mrf.mxu2 }
 0x73f   : > { %12102 = vst [vmem:[#allocation14_spill] sm:$0xff] %v10159_v16 }
 0x742   : > { %v10120_v49 = vpop.f32.mrf.mxu1  ;;  %v3501_v53 = vpop.f32.mrf.mxu0 }
 0x743   : > { %12101 = vst [vmem:[#allocation27_spill] sm:$0xff] %v10120_v49  ;;  %v10123_v23 = vadd.f32 %v10118_v31, %v3501_v53 }
 0x744   : > { %6228 = vmatmul.msk.bf16.vlgmr.msrb.gmra.mxu2 %vm1448_vm3, %v3591_v62  ;;  %v10140_v62 = vld [vmem:[%s11748_s7 + $0x90] sm:$0xff] }
 0x745   : > { %v3728_v39 = vsel %vm1805_vm5, %v10123_v23, -inf }
 0x746   : > { %3729 = vmax.xlane.f32.xlu2 %v3728_v39 }
 0x74a   : > { %v3570_v11 = vpop.f32.mrf.mxu1  ;;  %v3503_v10 = vpop.f32.mrf.mxu0 }
 0x74b   : > { %v10129_v13 = vadd.f32 %v10118_v31, %v3570_v11  ;;  %v10162_v8 = vadd.f32 %v10145_v25, %v3503_v10 }
 0x74d   : > { %v10131_v5 = vpop.xlane.xlu2 %3050  ;;  %v3752_v50 = vsel %vm1805_vm5, %v10129_v13, -inf }
 0x74e   : > { %3753 = vmax.xlane.f32.xlu2 %v3752_v50 }
 0x750   : > { %v10135_v6 = vpop.permute.xlu1 %3594 }
 0x752   : > { %v3572_v20 = vpop.f32.mrf.mxu1  ;;  %v3506_v45 = vpop.f32.mrf.mxu0 }
 0x753   : > { %v10148_v54 = vadd.f32 %v10145_v25, %v3572_v20  ;;  %v10151_v7 = vadd.f32 %v10140_v62, %v3506_v45  ;;  %v3731_v20 = vsel %vm1805_vm5, %v10162_v8, -inf  ;;  %v10180_v45 = vpop.f32.mrf.mxu2 }
 0x754   : > { %12103 = vst [vmem:[#allocation66_spill] sm:$0xff] %v10180_v45 }
 0x755   : > { %v10153_v4 = vpop.xlane.xlu2 %3053  ;;  %v3755_v1 = vsel %vm1805_vm5, %v10148_v54, -inf  ;;  %v3734_v57 = vsel %vm1805_vm5, %v10151_v7, -inf }
 0x756   : > { %3756 = vmax.xlane.f32.xlu0 %v3755_v1  ;;  %3735 = vmax.xlane.f32.xlu1 %v3734_v57  ;;  %v10188_v57 = vld [vmem:[%s11748_s7 + $0xa0] sm:$0xff] }
 0x758   : > { %v10169_v2 = vpop.permute.xlu1 %3659 }
 0x75a   : > { %v3508_v53 = vpop.f32.mrf.mxu0  ;;  %v3575_v11 = vpop.f32.mrf.mxu1 }
 0x75b   : > { %v10172_v39 = vadd.f32 %v10167_v56, %v3508_v53  ;;  %v10183_v1 = vadd.f32 %v10140_v62, %v3575_v11  ;;  %v6912_v53 = vpop.eup %6911  ;;  %v10202_v48 = vpop.f32.mrf.mxu2 }
 0x75c   : > { %v3113_v28 = vmul.f32 %v6912_v53, %v9991_v18  ;;  %12104 = vst [vmem:[#allocation67_spill] sm:$0xff] %v10202_v48 }
 0x75d   : > { %v10174_v50 = vpop.permute.xlu2 %3671  ;;  %v3737_v10 = vsel %vm1805_vm5, %v10172_v39, -inf  ;;  %v3758_v11 = vsel %vm1805_vm5, %v10183_v1, -inf }
 0x75e   : > { %3732 = vmax.xlane.f32.xlu0 %v3731_v20  ;;  %3738 = vmax.xlane.f32.xlu2 %v3737_v10  ;;  %v3145_v58 = vpack.c.bf16 %v3113_v28, %v3113_v28 }
 0x760   : > { %v10193_v52 = vpop.permute.xlu1 %3661  ;;  %v3380_v53 = vunpack.c.l.b16 %v3145_v58 }
 0x761   : > { %v3042_v33 = vpop.xlane.xlu0 %3041 }
 0x762   : > { %6913 = vrcp.f32 %v3042_v33  ;;  %v3511_v49 = vpop.f32.mrf.mxu0  ;;  %v3577_v26 = vpop.f32.mrf.mxu1 }
 0x763   : > { %v10191_v20 = vadd.f32 %v10188_v57, %v3511_v49  ;;  %v10205_v49 = vadd.f32 %v10167_v56, %v3577_v26  ;;  %6915 = vrcp.f32 %v3048_v42 }
 0x764   : > { %6917 = vrcp.f32 %v3045_v36 }
 0x765   : > { %v10195_v10 = vpop.permute.xlu2 %3665  ;;  %v3740_v55 = vsel %vm1805_vm5, %v10191_v20, -inf  ;;  %v3761_v18 = vsel %vm1805_vm5, %v10205_v49, -inf  ;;  %6919 = vrcp.f32 %v10153_v4 }
 0x766   : > { %3759 = vmax.xlane.f32.xlu0 %v3758_v11  ;;  %3741 = vmax.xlane.f32.xlu2 %v3740_v55  ;;  %6921 = vrcp.f32 %v10131_v5 }
 0x768   : > { %v6914_v33 = vpop.eup %6913 }
 0x769   : > { %v3114_v30 = vmul.f32 %v6914_v33, %v10045_v29  ;;  %v4137_v11 = vpop.permute.xlu1 %4136  ;;  %v6916_v28 = vpop.eup %6915 }
 0x76a   : > { %v6918_v29 = vpop.eup %6917  ;;  %v3116_v42 = vmul.f32 %v6916_v28, %v10003_v61 }
 0x76b   : > { %v3146_v37 = vpack.c.bf16 %v3114_v30, %v3114_v30  ;;  %v10213_v30 = vpop.f32.mrf.mxu2  ;;  %v3115_v58 = vmul.f32 %v6918_v29, %v9993_v12 }
 0x76c   : > { %12105 = vst [vmem:[#allocation68_spill] sm:$0xff] %v10213_v30  ;;  %v3148_v33 = vpack.c.bf16 %v3116_v42, %v3116_v42  ;;  %v10231_v42 = vld [vmem:[%s11748_s7 + $0xa8] sm:$0xff] }
 0x76d   : > { %v4139_v27 = vpop.permute.xlu2 %4138  ;;  %v3381_v55 = vunpack.c.l.b16 %v3146_v37 }
 0x76e   : > { %4160 = vmatpush.bf16.msrb.mxu0 %v4139_v27  ;;  %3762 = vmax.xlane.f32.xlu0 %v3761_v18  ;;  %v3383_v61 = vunpack.c.l.b16 %v3148_v33  ;;  %v3513_v33 = vpop.f32.mrf.mxu0 }
 0x76f   : > { %4425 = vrot.lane.b32.xlu1 %v12082_v34, %s7201_s21  ;;  %v3387_v26 = vpack.c.b16 %v3381_v55, %v3380_v53  ;;  %v3147_v55 = vpack.c.bf16 %v3115_v58, %v3115_v58  ;;  %v6920_v58 = vpop.eup %6919 }
 0x771   : > { %6209 = vmatmul.msk.bf16.gmra.mxu3 %vm1805_vm5, %v3387_v26  ;;  %v4133_v53 = vpop.permute.xlu1 %4132  ;;  %v3382_v29 = vunpack.c.l.b16 %v3147_v55 }
 0x772   : > { %4161 = vmatpush.bf16.msrb.mxu0 %v4137_v11 }
 0x773   : > { %v10225_v12 = vpop.f32.mrf.mxu2  ;;  %v3388_v4 = vpack.c.b16 %v3383_v61, %v3382_v29  ;;  %v3694_v61 = vsel %vm1448_vm3, %v10174_v50, 0 }
 0x774   : > { %v3593_v36 = vpop.permute.xlu0 %3592  ;;  %12106 = vst [vmem:[#allocation69_spill] sm:$0xff] %v10225_v12 }
 0x775   : > { %v4135_v27 = vpop.permute.xlu2 %4134  ;;  %6229 = vmatmul.msk.bf16.gmra.mxu2 %vm1448_vm3, %v3593_v36 }
 0x776   : > { %4162 = vmatpush.bf16.msrb.mxu0 %v4135_v27  ;;  %v3580_v37 = vpop.f32.mrf.mxu1 }
 0x777   : > { %v10219_v18 = vadd.f32 %v10188_v57, %v3580_v37  ;;  %v6922_v37 = vpop.eup %6921 }
 0x779   : > { %v3764_v11 = vsel %vm1805_vm5, %v10219_v18, -inf }
 0x77a   : > { %4163 = vmatpush.bf16.msrb.mxu0 %v4133_v53  ;;  %3765 = vmax.xlane.f32.xlu2 %v3764_v11  ;;  %v3118_v53 = vmul.f32 %v6920_v58, %v10030_v32  ;;  %v3117_v11 = vmul.f32 %v6922_v37, %v10020_v19  ;;  %v3516_v58 = vpop.f32.mrf.mxu0 }
 0x77c   : > { %v3674_v26 = vpop.permute.xlu0 %3673  ;;  %v3149_v29 = vpack.c.bf16 %v3117_v11, %v3117_v11 }
 0x77d   : > { %v3697_v28 = vsel %vm1448_vm3, %v3674_v26, 0  ;;  %v10245_v26 = vpop.f32.mrf.mxu2 }
 0x77e   : > { %v3582_v36 = vpop.f32.mrf.mxu1  ;;  %3703 = vmatpush.bf16.xpose.msra.mxu3 %v3697_v28  ;;  %12107 = vst [vmem:[#allocation70_spill] sm:$0xff] %v10245_v26  ;;  %v3150_v28 = vpack.c.bf16 %v3118_v53, %v3118_v53  ;;  %v3384_v37 = vunpack.c.l.b16 %v3149_v29  ;;  %v10272_v29 = vadd.f32 %v10231_v42, %v3513_v33 }
 0x77f   : > { %v10234_v27 = vadd.f32 %v10231_v42, %v3582_v36  ;;  %v10250_v36 = vld [vmem:[%s11748_s7 + $0xb0] sm:$0xff] }
 0x780   : > { %v3385_v19 = vunpack.c.l.b16 %v3150_v28 }
 0x781   : > { %6210 = vmatmul.msk.bf16.gmra.mxu3 %vm1805_vm5, %v3388_v4  ;;  %v3767_v5 = vsel %vm1805_vm5, %v10234_v27, -inf }
 0x782   : > { %3768 = vmax.xlane.f32.xlu0 %v3767_v5  ;;  %v3389_v53 = vpack.c.b16 %v3385_v19, %v3384_v37  ;;  %v3743_v37 = vsel %vm1805_vm5, %v10272_v29, -inf }
 0x784   : > { %v3597_v55 = vpop.permute.xlu0 %3596 }
 0x785   : > { %6230 = vmatmul.msk.bf16.gmra.mxu2 %vm1448_vm3, %v10135_v6  ;;  %v10258_v11 = vpop.f32.mrf.mxu2 }
 0x786   : > { %3704 = vmatpush.bf16.xpose.msra.mxu3 %v3694_v61  ;;  %12108 = vst [vmem:[#allocation71_spill] sm:$0xff] %v10258_v11  ;;  %v10264_v61 = vld [vmem:[%s11748_s7 + $0xb8] sm:$0xff] }
 0x78b   : > { %v3585_v32 = vpop.f32.mrf.mxu1 }
 0x78c   : > { %v10253_v4 = vadd.f32 %v10250_v36, %v3585_v32  ;;  %v3670_v6 = vpop.permute.xlu0 %3669 }
 0x78d   : > { %v3691_v5 = vsel %vm1448_vm3, %v3670_v6, 0  ;;  %v10283_v33 = vpop.f32.mrf.mxu2 }
 0x78e   : > { %v3770_v50 = vsel %vm1805_vm5, %v10253_v4, -inf  ;;  %3705 = vmatpush.bf16.xpose.msra.mxu3 %v3691_v5  ;;  %12109 = vst [vmem:[#allocation72_spill] sm:$0xff] %v10283_v33 }
 0x78f   : > { %3771 = vmax.xlane.f32.xlu0 %v3770_v50  ;;  %v3518_v50 = vpop.f32.mrf.mxu0 }
 0x791   : > { %6211 = vmatmul.msk.bf16.gmra.mxu3 %vm1805_vm5, %v3389_v53  ;;  %v10281_v53 = vadd.f32 %v10264_v61, %v3518_v50  ;;  %v12113_v50 = vld [vmem:[#allocation8_spill] sm:$0xff] }
 0x792   : > { %4427 = vrot.lane.b32.xlu2 %v12087_v15, %s7201_s21 }
 0x793   : > { %v3587_v28 = vpop.f32.mrf.mxu1 }
 0x794   : > { %v10269_v32 = vadd.f32 %v10264_v61, %v3587_v28  ;;  %v3668_v19 = vpop.permute.xlu0 %3667  ;;  %v10286_v28 = vadd.f32 %v10250_v36, %v3516_v58 }
 0x795   : > { %6231 = vmatmul.msk.bf16.gmra.mxu2 %vm1448_vm3, %v3597_v55  ;;  %v3688_v6 = vsel %vm1448_vm3, %v3668_v19, 0  ;;  %v3749_v55 = vsel %vm1805_vm5, %v10281_v53, -inf }
 0x796   : > { %v3773_v5 = vsel %vm1805_vm5, %v10269_v32, -inf  ;;  %3706 = vmatpush.bf16.xpose.msra.mxu3 %v3688_v6  ;;  %v3746_v19 = vsel %vm1805_vm5, %v10286_v28, -inf  ;;  %v10294_v6 = vpop.f32.mrf.mxu2 }
 0x797   : > { %3774 = vmax.xlane.f32.xlu0 %v3773_v5  ;;  %12110 = vst [vmem:[#allocation73_spill] sm:$0xff] %v10294_v6 }
 0x799   : > { %3744 = vmax.xlane.f32.xlu1 %v3743_v37 }
 0x79e   : > { %v10296_v5 = vpop.f32.mrf.mxu2 }
 0x79f   : > { %3750 = vmax.xlane.f32.xlu0 %v3749_v55  ;;  %12111 = vst [vmem:[#allocation74_spill] sm:$0xff] %v10296_v5 }
 0x7a1   : > { %3747 = vmax.xlane.f32.xlu1 %v3746_v19  ;;  %6232 = vmatmul.msk.bf16.vlgmr.msra.gmra.mxu3 %vm1448_vm3, %v10169_v2  ;;  %v3664_v2 = vpop.permute.xlu0 %3663 }
 0x7b1   : > { %6233 = vmatmul.msk.bf16.gmra.mxu3 %vm1448_vm3, %v10193_v52 }
 0x7b3   : > { %4423 = vrot.lane.b32.xlu0 %v12089_v24, %s7201_s21 }
 0x7b7   : > { %v10302_v58 = vpop.f32.mrf.mxu2 }
 0x7b8   : > { %12112 = vst [vmem:[#allocation75_spill] sm:$0xff] %v10302_v58 }
 0x7b9   : > { %v3730_v52 = vpop.xlane.xlu2 %3729 }
 0x7ba   : > { %4207 = vrot.lane.b32.xlu1 %v8811_v21, %s7200_s10  ;;  %v3824_v11 = vsub.f32 %v10123_v23, %v3730_v52 }
 0x7bb   : > { %4211 = vrot.lane.b32.xlu0 %v12113_v50, %s7200_s10 }
 0x7bc   : > { %v3856_v12 = vmul.f32 1.442695, %v3824_v11 }
 0x7bf   : > { %v10308_v37 = vpop.f32.mrf.mxu2 }
 0x7c0   : > { %12114 = vst [vmem:[#allocation76_spill] sm:$0xff] %v10308_v37 }
 0x7c1   : > { %6234 = vmatmul.msk.bf16.gmra.mxu3 %vm1448_vm3, %v3664_v2  ;;  %v3754_v5 = vpop.xlane.xlu2 %3753 }
 0x7c2   : > { %v3832_v37 = vsub.f32 %v10129_v13, %v3754_v5 }
 0x7c3   : > { %4209 = vrot.lane.b32.xlu0 %v8529_v22, %s7200_s10 }
 0x7c4   : > { %v3872_v33 = vmul.f32 1.442695, %v3832_v37 }
 0x7c6   : > { %6923 = vpow2.f32 %v3872_v33 }
 0x7c7   : > { %v3639_v55 = vpop.f32.mrf.mxu2  ;;  %6925 = vpow2.f32 %v3856_v12 }
 0x7c8   : > { %v10330_v5 = vadd.f32 %v10118_v31, %v3639_v55 }
 0x7c9   : > { %v10321_v2 = vpop.xlane.xlu0 %3756 }
 0x7cf   : > { %v3641_v19 = vpop.f32.mrf.mxu2 }
 0x7d0   : > { %v10314_v58 = vadd.f32 %v10145_v25, %v3641_v19  ;;  %v10324_v19 = vpop.eup %6923 }
 0x7d1   : > { %6235 = vmatmul.msk.bf16.gmra.mxu3 %vm1448_vm3, %v10195_v10  ;;  %v3739_v26 = vpop.xlane.xlu2 %3738  ;;  %v3733_v30 = vpop.xlane.xlu0 %3732  ;;  %v3944_v48 = vsel %vm1805_vm5, %v10324_v19, 0.0 }
 0x7d2   : > { %v3779_v6 = vsel %vm1805_vm5, %v10314_v58, -inf  ;;  %v3825_v10 = vsub.f32 %v10162_v8, %v3733_v30  ;;  %v10332_v37 = vpop.eup %6925  ;;  %v3827_v23 = vsub.f32 %v10172_v39, %v3739_v26  ;;  %v3776_v30 = vsel %vm1805_vm5, %v10330_v5, -inf  ;;  %v3736_v26 = vpop.xlane.xlu1 %3735 }
 0x7d3   : > { %3780 = vmax.xlane.f32.xlu2 %v3779_v6  ;;  %v3920_v8 = vsel %vm1805_vm5, %v10332_v37, 0.0 }
 0x7d4   : > { %v3858_v6 = vmul.f32 1.442695, %v3825_v10  ;;  %v3862_v12 = vmul.f32 1.442695, %v3827_v23 }
 0x7d6   : > { %6927 = vpow2.f32 %v3858_v6 }
 0x7d7   : > { %6929 = vpow2.f32 %v3862_v12 }
 0x7d9   : > { %v3742_v13 = vpop.xlane.xlu2 %3741  ;;  %v3760_v11 = vpop.xlane.xlu0 %3759 }
 0x7da   : > { %v3834_v39 = vsub.f32 %v10183_v1, %v3760_v11 }
 0x7dc   : > { %v10343_v33 = vpop.eup %6927  ;;  %v3876_v10 = vmul.f32 1.442695, %v3834_v39 }
 0x7dd   : > { %v3923_v52 = vsel %vm1805_vm5, %v10343_v33, 0.0 }
 0x7de   : > { %6931 = vpow2.f32 %v3876_v10 }
 0x7e1   : > { %v4426_v12 = vpop.permute.xlu1 %4425 }
 0x7e2   : > { %v4448_v11 = vsel %vm1448_vm3, %v4426_v12, 0 }
 0x7e4   : > { %3945 = vadd.xlane.f32.xlu1 %v3944_v48 }
 0x7eb   : > { %4421 = vrot.lane.b32.xlu2 %v12083_v9, %s7201_s21 }
 0x7ec   : > { %3921 = vadd.xlane.f32.xlu1 %v3920_v8  ;;  %v10349_v8 = vpop.eup %6929 }
 0x7ed   : > { %3777 = vmax.xlane.f32.xlu0 %v3776_v30  ;;  %v10341_v48 = vpop.xlane.xlu2 %3765  ;;  %v10351_v30 = vpop.xlane.xlu0 %3762  ;;  %v3929_v1 = vsel %vm1805_vm5, %v10349_v8, 0.0 }
 0x7f4   : > { %3924 = vadd.xlane.f32.xlu1 %v3923_v52  ;;  %v10358_v52 = vpop.eup %6931 }
 0x7f5   : > { %v4428_v55 = vpop.permute.xlu2 %4427  ;;  %v3769_v39 = vpop.xlane.xlu0 %3768  ;;  %v3950_v10 = vsel %vm1805_vm5, %v10358_v52, 0.0 }
 0x7f6   : > { %v4451_v6 = vsel %vm1448_vm3, %v4428_v55, 0  ;;  %v3837_v12 = vsub.f32 %v10234_v27, %v3769_v39 }
 0x7f7   : > { %4457 = vmatpush.bf16.xpose.msra.mxu0 %v4451_v6  ;;  %v3828_v6 = vsub.f32 %v10191_v20, %v3742_v13 }
 0x7f8   : > { %v10353_v23 = vpop.f32.mrf.mxu2 }
 0x7f9   : > { %v3864_v45 = vmul.f32 1.442695, %v3828_v6 }
 0x7fb   : > { %6933 = vpow2.f32 %v3864_v45 }
 0x7fc   : > { %3930 = vadd.xlane.f32.xlu1 %v3929_v1 }
 0x7ff   : > { %4458 = vmatpush.bf16.xpose.msra.mxu0 %v4448_v11  ;;  %v3882_v11 = vmul.f32 1.442695, %v3837_v12 }
 0x800   : > { %v3646_v55 = vpop.f32.mrf.mxu2 }
 0x801   : > { %4205 = vrot.lane.b32.xlu0 %v8715_v35, %s7200_s10  ;;  %v10366_v43 = vpop.eup %6933  ;;  %6935 = vpow2.f32 %v3882_v11 }
 0x802   : > { %v3772_v16 = vpop.xlane.xlu0 %3771  ;;  %v3932_v13 = vsel %vm1805_vm5, %v10366_v43, 0.0 }
 0x803   : > { %v3838_v11 = vsub.f32 %v10253_v4, %v3772_v16 }
 0x804   : > { %3951 = vadd.xlane.f32.xlu1 %v3950_v10 }
 0x807   : > { %v10376_v10 = vpop.eup %6935 }
 0x808   : > { %v3649_v17 = vpop.f32.mrf.mxu2 }
 0x80a   : > { %v3775_v20 = vpop.xlane.xlu0 %3774 }
 0x80b   : > { %v3839_v16 = vsub.f32 %v10269_v32, %v3775_v20 }
 0x80c   : > { %v3745_v1 = vpop.xlane.xlu1 %3744 }
 0x80d   : > { %v3829_v32 = vsub.f32 %v10272_v29, %v3745_v1 }
 0x810   : > { %v3651_v34 = vpop.f32.mrf.mxu2 }
 0x811   : > { %v10369_v9 = vadd.f32 %v10231_v42, %v3651_v34  ;;  %v3833_v34 = vsub.f32 %v10148_v54, %v10321_v2 }
 0x812   : > { %v3751_v15 = vpop.xlane.xlu0 %3750 }
 0x813   : > { %v3791_v6 = vsel %vm1805_vm5, %v10369_v9, -inf  ;;  %v3874_v24 = vmul.f32 1.442695, %v3833_v34  ;;  %v3886_v34 = vmul.f32 1.442695, %v3839_v16 }
 0x814   : > { %3933 = vadd.xlane.f32.xlu2 %v3932_v13  ;;  %v3748_v45 = vpop.xlane.xlu1 %3747  ;;  %3792 = vmax.xlane.f32.xlu1 %v3791_v6  ;;  %v3959_v13 = vsel %vm1805_vm5, %v10376_v10, 0.0  ;;  %v3884_v6 = vmul.f32 1.442695, %v3838_v11  ;;  %v3836_v11 = vsub.f32 %v10219_v18, %v10341_v48  ;;  %v10414_v18 = vadd.f32 %v10188_v57, %v3649_v17 }
 0x815   : > { %v3830_v27 = vsub.f32 %v10286_v28, %v3748_v45  ;;  %v3826_v28 = vsub.f32 %v10151_v7, %v3736_v26  ;;  %v3866_v48 = vmul.f32 1.442695, %v3829_v32 }
 0x817   : > { %v3868_v39 = vmul.f32 1.442695, %v3830_v27  ;;  %v3860_v27 = vmul.f32 1.442695, %v3826_v28 }
 0x818   : > { %v10380_v12 = vpop.f32.mrf.mxu2 }
 0x819   : > { %6937 = vpow2.f32 %v3868_v39  ;;  %v10397_v39 = vadd.f32 %v10167_v56, %v3646_v55 }
 0x81a   : > { %6939 = vpow2.f32 %v3874_v24 }
 0x81b   : > { %6941 = vpow2.f32 %v3884_v6  ;;  %v3785_v55 = vsel %vm1805_vm5, %v10397_v39, -inf  ;;  %v3880_v6 = vmul.f32 1.442695, %v3836_v11 }
 0x81c   : > { %3960 = vadd.xlane.f32.xlu1 %v3959_v13  ;;  %6943 = vpow2.f32 %v3860_v27 }
 0x81d   : > { %6945 = vpow2.f32 %v3886_v34  ;;  %v3831_v34 = vsub.f32 %v10281_v53, %v3751_v15  ;;  %v3835_v15 = vsub.f32 %v10205_v49, %v10351_v30 }
 0x81e   : > { %6947 = vpow2.f32 %v3880_v6  ;;  %v10439_v6 = vadd.f32 %v10140_v62, %v10353_v23 }
 0x81f   : > { %v10385_v0 = vpop.eup %6937  ;;  %6949 = vpow2.f32 %v3866_v48  ;;  %v3878_v48 = vmul.f32 1.442695, %v3835_v15 }
 0x820   : > { %v3656_v45 = vpop.f32.mrf.mxu2  ;;  %v3938_v54 = vsel %vm1805_vm5, %v10385_v0, 0.0  ;;  %v10400_v26 = vpop.eup %6939  ;;  %v3782_v53 = vsel %vm1805_vm5, %v10439_v6, -inf }
 0x821   : > { %v10391_v2 = vadd.f32 %v10264_v61, %v3656_v45  ;;  %3939 = vadd.xlane.f32.xlu2 %v3938_v54  ;;  %v10404_v13 = vpop.eup %6941  ;;  %v3947_v20 = vsel %vm1805_vm5, %v10400_v26, 0.0  ;;  %v3788_v54 = vsel %vm1805_vm5, %v10414_v18, -inf }
 0x822   : > { %v3962_v28 = vsel %vm1805_vm5, %v10404_v13, 0.0  ;;  %v10416_v29 = vpop.eup %6943 }
 0x823   : > { %v3797_v4 = vsel %vm1805_vm5, %v10391_v2, -inf  ;;  %v10418_v1 = vpop.eup %6945  ;;  %v3926_v16 = vsel %vm1805_vm5, %v10416_v29, 0.0 }
 0x824   : > { %3798 = vmax.xlane.f32.xlu1 %v3797_v4  ;;  %v3965_v17 = vsel %vm1805_vm5, %v10418_v1, 0.0  ;;  %v10426_v4 = vpop.f32.mrf.mxu3  ;;  %v10428_v27 = vpop.eup %6947 }
 0x825   : > { %v4424_v24 = vpop.permute.xlu0 %4423  ;;  %12115 = vst [vmem:[#allocation77_spill] sm:$0xff] %v10426_v4  ;;  %v3956_v11 = vsel %vm1805_vm5, %v10428_v27, 0.0 }
 0x826   : > { %v4445_v7 = vsel %vm1448_vm3, %v4424_v24, 0 }
 0x827   : > { %4459 = vmatpush.bf16.xpose.msra.mxu0 %v4445_v7  ;;  %v10430_v7 = vpop.eup %6949 }
 0x829   : > { %3786 = vmax.xlane.f32.xlu2 %v3785_v55  ;;  %v3935_v55 = vsel %vm1805_vm5, %v10430_v7, 0.0 }
 0x82b   : > { %3948 = vadd.xlane.f32.xlu0 %v3947_v20  ;;  %v3870_v20 = vmul.f32 1.442695, %v3831_v34 }
 0x82c   : > { %3963 = vadd.xlane.f32.xlu1 %v3962_v28  ;;  %v4208_v32 = vpop.permute.xlu1 %4207  ;;  %v10441_v28 = vpop.f32.mrf.mxu3 }
 0x82d   : > { %v4212_v45 = vpop.permute.xlu0 %4211  ;;  %12116 = vst [vmem:[#allocation78_spill] sm:$0xff] %v10441_v28  ;;  %6951 = vpow2.f32 %v3870_v20 }
 0x82e   : > { %4233 = vmatpush.bf16.msrb.mxu1 %v4212_v45  ;;  %6953 = vpow2.f32 %v3878_v48 }
 0x831   : > { %3789 = vmax.xlane.f32.xlu2 %v3788_v54 }
 0x833   : > { %3927 = vadd.xlane.f32.xlu0 %v3926_v16  ;;  %v10447_v54 = vpop.eup %6951 }
 0x834   : > { %3966 = vadd.xlane.f32.xlu1 %v3965_v17  ;;  %v10449_v16 = vpop.f32.mrf.mxu3  ;;  %v3941_v62 = vsel %vm1805_vm5, %v10447_v54, 0.0  ;;  %v10455_v49 = vpop.eup %6953 }
 0x835   : > { %v4210_v24 = vpop.permute.xlu0 %4209  ;;  %12117 = vst [vmem:[#allocation79_spill] sm:$0xff] %v10449_v16  ;;  %v3953_v34 = vsel %vm1805_vm5, %v10455_v49, 0.0 }
 0x836   : > { %4234 = vmatpush.bf16.msrb.mxu1 %v4210_v24  ;;  %v12119_v24 = vld [vmem:[#allocation5_spill] sm:$0xff] }
 0x839   : > { %3957 = vadd.xlane.f32.xlu2 %v3956_v11 }
 0x83a   : > { %4235 = vmatpush.bf16.msrb.mxu1 %v4208_v32  ;;  %v12120_v32 = vld [vmem:[#allocation21_spill] sm:$0xff] }
 0x83b   : > { %3936 = vadd.xlane.f32.xlu0 %v3935_v55 }
 0x83c   : > { %v10458_v17 = vpop.f32.mrf.mxu3 }
 0x83d   : > { %12118 = vst [vmem:[#allocation80_spill] sm:$0xff] %v10458_v17 }
 0x843   : > { %3783 = vmax.xlane.f32.xlu0 %v3782_v53  ;;  %v12123_v53 = vld [vmem:[#allocation3_spill] sm:$0xff] }
 0x844   : > { %v10468_v55 = vpop.f32.mrf.mxu3 }
 0x845   : > { %12121 = vst [vmem:[#allocation5_spill] sm:$0xff] %v10468_v55 }
 0x846   : > { %v3781_v45 = vpop.xlane.xlu2 %3780 }
 0x84b   : > { %3942 = vadd.xlane.f32.xlu0 %v3941_v62 }
 0x84c   : > { %v10472_v15 = vpop.f32.mrf.mxu3 }
 0x84d   : > { %4496 = vrot.lane.b32.xlu1 %v12113_v50, %s7201_s21  ;;  %12122 = vst [vmem:[#allocation21_spill] sm:$0xff] %v10472_v15 }
 0x84e   : > { %v4422_v23 = vpop.permute.xlu2 %4421 }
 0x84f   : > { %v4442_v30 = vsel %vm1448_vm3, %v4422_v23, 0 }
 0x850   : > { %4460 = vmatpush.bf16.xpose.msra.mxu0 %v4442_v30 }
 0x851   : > { %4415 = vrot.lane.b32.xlu2 %v12119_v24, %s7202_s9  ;;  %v12124_v24 = vld [vmem:[#allocation34_spill] sm:$0xff] }
 0x853   : > { %3954 = vadd.xlane.f32.xlu0 %v3953_v34 }
 0x855   : > { %4494 = vrot.lane.b32.xlu1 %v8529_v22, %s7201_s21 }
 0x857   : > { %v3946_v11 = vpop.xlane.xlu1 %3945 }
 0x859   : > { %4417 = vrot.lane.b32.xlu2 %v12120_v32, %s7202_s9  ;;  %v10481_v32 = vpop.f32.mrf.mxu3 }
 0x85a   : > { %12125 = vst [vmem:[#allocation3_spill] sm:$0xff] %v10481_v32 }
 0x85d   : > { %4282 = vrot.lane.b32.xlu1 %v12011_v44, %s7200_s10 }
 0x85f   : > { %v3922_v20 = vpop.xlane.xlu1 %3921 }
 0x860   : > { %6955 = vrcp.f32 %v3922_v20  ;;  %v3778_v23 = vpop.xlane.xlu0 %3777 }
 0x861   : > { %v3840_v55 = vsub.f32 %v10330_v5, %v3778_v23 }
 0x865   : > { %4280 = vrot.lane.b32.xlu1 %v8689_v41, %s7200_s10 }
 0x866   : > { %v6956_v62 = vpop.eup %6955 }
 0x867   : > { %4413 = vrot.lane.b32.xlu0 %v12123_v53, %s7202_s9  ;;  %v3925_v48 = vpop.xlane.xlu1 %3924  ;;  %v4048_v30 = vmul.f32 %v6956_v62, %v10332_v37  ;;  %v12126_v37 = vld [vmem:[#allocation17_spill] sm:$0xff]  ;;  %v10488_v62 = vpop.f32.mrf.mxu3 }
 0x868   : > { %6957 = vrcp.f32 %v3925_v48  ;;  %v3888_v48 = vmul.f32 1.442695, %v3840_v55  ;;  %12127 = vst [vmem:[#allocation34_spill] sm:$0xff] %v10488_v62 }
 0x869   : > { %v4080_v20 = vpack.c.bf16 %v4048_v30, %v4048_v30 }
 0x86a   : > { %6959 = vpow2.f32 %v3888_v48 }
 0x86b   : > { %v4120_v53 = vunpack.c.l.b16 %v4080_v20 }
 0x86d   : > { %4419 = vrot.lane.b32.xlu1 %v12124_v24, %s7202_s9 }
 0x86e   : > { %v6958_v34 = vpop.eup %6957 }
 0x86f   : > { %v4049_v15 = vmul.f32 %v6958_v34, %v10343_v33  ;;  %v3931_v30 = vpop.xlane.xlu1 %3930  ;;  %v3708_v33 = vpop.f32.mrf.mxu3 }
 0x870   : > { %v10490_v24 = vpop.eup %6959 }
 0x871   : > { %v4081_v17 = vpack.c.bf16 %v4049_v15, %v4049_v15  ;;  %v3968_v5 = vsel %vm1805_vm5, %v10490_v24, 0.0  ;;  %v10504_v15 = vadd.f32 %v10250_v36, %v10380_v12 }
 0x873   : > { %v4206_v16 = vpop.permute.xlu0 %4205  ;;  %v4121_v28 = vunpack.c.l.b16 %v4081_v17 }
 0x874   : > { %4236 = vmatpush.bf16.msrb.mxu1 %v4206_v16  ;;  %v10495_v16 = vadd.f32 %v10118_v31, %v3708_v33  ;;  %v3794_v31 = vsel %vm1805_vm5, %v10504_v15, -inf }
 0x875   : > { %v4128_v4 = vpack.c.b16 %v4121_v28, %v4120_v53  ;;  %4278 = vrot.lane.b32.xlu1 %v12126_v37, %s7200_s10  ;;  %v3841_v28 = vsub.f32 %v10314_v58, %v3781_v45 }
 0x877   : > { %6236 = vmatmul.msk.bf16.vlgmr.msrb.gmra.mxu0 %vm1805_vm5, %v4128_v4  ;;  %v10498_v17 = vpop.xlane.xlu1 %3951  ;;  %v3800_v4 = vsel %vm1805_vm5, %v10495_v16, -inf  ;;  %v3890_v55 = vmul.f32 1.442695, %v3841_v28  ;;  %v10523_v32 = vpop.f32.mrf.mxu3 }
 0x879   : > { %6961 = vpow2.f32 %v3890_v55 }
 0x87a   : > { %6963 = vrcp.f32 %v3946_v11 }
 0x87f   : > { %v10510_v34 = vpop.eup %6961  ;;  %v10533_v50 = vpop.f32.mrf.mxu3 }
 0x880   : > { %v3971_v58 = vsel %vm1805_vm5, %v10510_v34, 0.0  ;;  %v6964_v53 = vpop.eup %6963 }
 0x881   : > { %v4056_v12 = vmul.f32 %v6964_v53, %v10324_v19 }
 0x882   : > { %3969 = vadd.xlane.f32.xlu2 %v3968_v5 }
 0x883   : > { %v4088_v28 = vpack.c.bf16 %v4056_v12, %v4056_v12 }
 0x887   : > { %v10506_v23 = vpop.xlane.xlu1 %3792  ;;  %v3934_v48 = vpop.xlane.xlu2 %3933 }
 0x88a   : > { %3801 = vmax.xlane.f32.xlu2 %v3800_v4 }
 0x88f   : > { %v10514_v45 = vpop.xlane.xlu1 %3960 }
 0x891   : > { %3795 = vmax.xlane.f32.xlu0 %v3794_v31 }
 0x894   : > { %v3940_v62 = vpop.xlane.xlu2 %3939 }
 0x897   : > { %v10519_v5 = vpop.xlane.xlu1 %3798 }
 0x899   : > { %3972 = vadd.xlane.f32.xlu0 %v3971_v58  ;;  %v4193_v58 = vunpack.c.l.b16 %v4088_v28 }
 0x89e   : > { %v3949_v20 = vpop.xlane.xlu0 %3948 }
 0x89f   : > { %6965 = vrcp.f32 %v3949_v20  ;;  %v10527_v12 = vpop.xlane.xlu1 %3963 }
 0x8a0   : > { %6967 = vrcp.f32 %v3931_v30 }
 0x8a2   : > { %4492 = vrot.lane.b32.xlu2 %v8811_v21, %s7201_s21  ;;  %v12128_v21 = vld [vmem:[#allocation12_spill] sm:$0xff] }
 0x8a5   : > { %v6966_v33 = vpop.eup %6965 }
 0x8a6   : > { %v4057_v4 = vmul.f32 %v6966_v33, %v10400_v26  ;;  %v3928_v11 = vpop.xlane.xlu0 %3927  ;;  %v6968_v55 = vpop.eup %6967 }
 0x8a7   : > { %6969 = vrcp.f32 %v3928_v11  ;;  %v4051_v20 = vmul.f32 %v6968_v55, %v10349_v8 }
 0x8a8   : > { %v4089_v31 = vpack.c.bf16 %v4057_v4, %v4057_v4 }
 0x8a9   : > { %v4083_v22 = vpack.c.bf16 %v4051_v20, %v4051_v20 }
 0x8aa   : > { %v4194_v30 = vunpack.c.l.b16 %v4089_v31  ;;  %v3787_v31 = vpop.xlane.xlu2 %3786 }
 0x8ab   : > { %v4123_v4 = vunpack.c.l.b16 %v4083_v22  ;;  %v3843_v22 = vsub.f32 %v10397_v39, %v3787_v31 }
 0x8ac   : > { %v4201_v19 = vpack.c.b16 %v4194_v30, %v4193_v58 }
 0x8ad   : > { %v6970_v53 = vpop.eup %6969  ;;  %4284 = vrot.lane.b32.xlu0 %v12128_v21, %s7200_s10 }
 0x8ae   : > { %v4050_v26 = vmul.f32 %v6970_v53, %v10416_v29  ;;  %6240 = vmatmul.msk.bf16.vlgmr.msrb.gmra.mxu1 %vm1805_vm5, %v4201_v19  ;;  %v3937_v33 = vpop.xlane.xlu0 %3936  ;;  %v10535_v29 = vpop.xlane.xlu1 %3966 }
 0x8af   : > { %6971 = vrcp.f32 %v3937_v33 }
 0x8b0   : > { %v4082_v28 = vpack.c.bf16 %v4050_v26, %v4050_v26  ;;  %6973 = vrcp.f32 %v3934_v48 }
 0x8b2   : > { %v4122_v8 = vunpack.c.l.b16 %v4082_v28  ;;  %v3894_v28 = vmul.f32 1.442695, %v3843_v22 }
 0x8b4   : > { %v4129_v11 = vpack.c.b16 %v4123_v4, %v4122_v8  ;;  %v3790_v4 = vpop.xlane.xlu2 %3789 }
 0x8b5   : > { %v6972_v55 = vpop.eup %6971 }
 0x8b6   : > { %6237 = vmatmul.msk.bf16.gmra.mxu0 %vm1805_vm5, %v4129_v11  ;;  %v3784_v58 = vpop.xlane.xlu0 %3783  ;;  %v6974_v30 = vpop.eup %6973  ;;  %v4053_v19 = vmul.f32 %v6972_v55, %v10430_v7 }
 0x8b7   : > { %v3842_v20 = vsub.f32 %v10439_v6, %v3784_v58  ;;  %v4052_v48 = vmul.f32 %v6974_v30, %v10366_v43  ;;  %v3715_v55 = vpop.f32.mrf.mxu3  ;;  %v3844_v43 = vsub.f32 %v10414_v18, %v3790_v4 }
 0x8b8   : > { %v4085_v26 = vpack.c.bf16 %v4053_v19, %v4053_v19 }
 0x8b9   : > { %v3892_v53 = vmul.f32 1.442695, %v3842_v20  ;;  %v4084_v33 = vpack.c.bf16 %v4052_v48, %v4052_v48 }
 0x8ba   : > { %v4125_v11 = vunpack.c.l.b16 %v4085_v26 }
 0x8bb   : > { %6975 = vpow2.f32 %v3892_v53  ;;  %v4124_v31 = vunpack.c.l.b16 %v4084_v33  ;;  %v3896_v53 = vmul.f32 1.442695, %v3844_v43 }
 0x8bd   : > { %v4130_v30 = vpack.c.b16 %v4125_v11, %v4124_v31 }
 0x8be   : > { %v3943_v8 = vpop.xlane.xlu0 %3942 }
 0x8bf   : > { %6977 = vrcp.f32 %v3943_v8  ;;  %v4497_v6 = vpop.permute.xlu1 %4496  ;;  %v3845_v8 = vsub.f32 %v10369_v9, %v10506_v23  ;;  %v10568_v23 = vadd.f32 %v10145_v25, %v10523_v32 }
 0x8c0   : > { %6979 = vrcp.f32 %v10498_v17  ;;  %v4520_v7 = vsel %vm1448_vm3, %v4497_v6, 0  ;;  %v10548_v17 = vadd.f32 %v10167_v56, %v3715_v55 }
 0x8c1   : > { %v10541_v58 = vpop.eup %6975  ;;  %6981 = vrcp.f32 %v3940_v62  ;;  %4526 = vmatpush.bf16.xpose.msra.mxu1 %v4520_v7  ;;  %v3898_v43 = vmul.f32 1.442695, %v3845_v8  ;;  %v3803_v25 = vsel %vm1805_vm5, %v10568_v23, -inf }
 0x8c2   : > { %6983 = vpow2.f32 %v3894_v28  ;;  %v3974_v39 = vsel %vm1805_vm5, %v10541_v58, 0.0  ;;  %v3809_v28 = vsel %vm1805_vm5, %v10548_v17, -inf }
 0x8c3   : > { %3975 = vadd.xlane.f32.xlu1 %v3974_v39 }
 0x8c5   : > { %v6978_v20 = vpop.eup %6977 }
 0x8c6   : > { %v6980_v19 = vpop.eup %6979  ;;  %6238 = vmatmul.msk.bf16.gmra.mxu0 %vm1805_vm5, %v4130_v30  ;;  %v3955_v62 = vpop.xlane.xlu0 %3954  ;;  %v4055_v18 = vmul.f32 %v6978_v20, %v10447_v54 }
 0x8c7   : > { %v6982_v48 = vpop.eup %6981  ;;  %6985 = vrcp.f32 %v3955_v62  ;;  %v4495_v26 = vpop.permute.xlu1 %4494  ;;  %v4058_v56 = vmul.f32 %v6980_v19, %v10358_v52 }
 0x8c8   : > { %v10551_v22 = vpop.eup %6983  ;;  %v4517_v33 = vsel %vm1448_vm3, %v4495_v26, 0  ;;  %v4054_v4 = vmul.f32 %v6982_v48, %v10385_v0  ;;  %6987 = vpow2.f32 %v3896_v53  ;;  %v3958_v54 = vpop.xlane.xlu2 %3957  ;;  %v4087_v11 = vpack.c.bf16 %v4055_v18, %v4055_v18 }
 0x8c9   : > { %4527 = vmatpush.bf16.xpose.msra.mxu1 %v4517_v33  ;;  %v3977_v6 = vsel %vm1805_vm5, %v10551_v22, 0.0  ;;  %v4090_v55 = vpack.c.bf16 %v4058_v56, %v4058_v56  ;;  %6989 = vrcp.f32 %v3958_v54 }
 0x8ca   : > { %v4086_v39 = vpack.c.bf16 %v4054_v4, %v4054_v4  ;;  %v4127_v0 = vunpack.c.l.b16 %v4087_v11  ;;  %6991 = vrcp.f32 %v10514_v45  ;;  %v12129_v11 = vld [vmem:[#allocation26_spill] sm:$0xff] }
 0x8cb   : > { %3810 = vmax.xlane.f32.xlu1 %v3809_v28  ;;  %3978 = vadd.xlane.f32.xlu2 %v3977_v6  ;;  %6993 = vpow2.f32 %v3898_v43  ;;  %v4195_v20 = vunpack.c.l.b16 %v4090_v55  ;;  %v3718_v28 = vpop.f32.mrf.mxu3 }
 0x8cc   : > { %v4126_v30 = vunpack.c.l.b16 %v4086_v39  ;;  %v10584_v4 = vadd.f32 %v10188_v57, %v3718_v28  ;;  %6995 = vrcp.f32 %v10535_v29 }
 0x8cd   : > { %v6986_v7 = vpop.eup %6985  ;;  %6997 = vrcp.f32 %v10527_v12 }
 0x8ce   : > { %v4059_v52 = vmul.f32 %v6986_v7, %v10455_v49  ;;  %v10564_v31 = vpop.eup %6987  ;;  %v4131_v49 = vpack.c.b16 %v4127_v0, %v4126_v30 }
 0x8cf   : > { %v3980_v53 = vsel %vm1805_vm5, %v10564_v31, 0.0  ;;  %v6990_v48 = vpop.eup %6989 }
 0x8d0   : > { %v4091_v9 = vpack.c.bf16 %v4059_v52, %v4059_v52  ;;  %v6992_v32 = vpop.eup %6991  ;;  %v4060_v18 = vmul.f32 %v6990_v48, %v10428_v27  ;;  %v3812_v27 = vsel %vm1805_vm5, %v10584_v4, -inf }
 0x8d1   : > { %v10577_v45 = vpop.eup %6993  ;;  %v4061_v26 = vmul.f32 %v6992_v32, %v10376_v10  ;;  %v4416_v10 = vpop.permute.xlu2 %4415 }
 0x8d2   : > { %v4196_v19 = vunpack.c.l.b16 %v4091_v9  ;;  %v3983_v33 = vsel %vm1805_vm5, %v10577_v45, 0.0  ;;  %v4092_v56 = vpack.c.bf16 %v4060_v18, %v4060_v18  ;;  %v6996_v55 = vpop.eup %6995 }
 0x8d3   : > { %3981 = vadd.xlane.f32.xlu2 %v3980_v53  ;;  %v4093_v8 = vpack.c.bf16 %v4061_v26, %v4061_v26  ;;  %v6998_v57 = vpop.eup %6997  ;;  %v4063_v29 = vmul.f32 %v6996_v55, %v10418_v1  ;;  %v3720_v53 = vpop.f32.mrf.mxu3 }
 0x8d4   : > { %v4202_v62 = vpack.c.b16 %v4196_v19, %v4195_v20  ;;  %v4197_v6 = vunpack.c.l.b16 %v4092_v56  ;;  %v4062_v12 = vmul.f32 %v6998_v57, %v10404_v13  ;;  %v4283_v13 = vpop.permute.xlu1 %4282  ;;  %v10607_v18 = vadd.f32 %v10231_v42, %v3720_v53 }
 0x8d5   : > { %v4198_v54 = vunpack.c.l.b16 %v4093_v8  ;;  %v4095_v39 = vpack.c.bf16 %v4063_v29, %v4063_v29 }
 0x8d6   : > { %6239 = vmatmul.msk.bf16.gmra.mxu0 %vm1805_vm5, %v4131_v49  ;;  %6241 = vmatmul.msk.bf16.gmra.mxu1 %vm1805_vm5, %v4202_v62  ;;  %v4094_v52 = vpack.c.bf16 %v4062_v12, %v4062_v12  ;;  %v12130_v49 = vld [vmem:[#allocation43_spill] sm:$0xff]  ;;  %v3815_v56 = vsel %vm1805_vm5, %v10607_v18, -inf }
 0x8d7   : > { %3804 = vmax.xlane.f32.xlu0 %v3803_v25  ;;  %v4203_v7 = vpack.c.b16 %v4198_v54, %v4197_v6  ;;  %v4200_v0 = vunpack.c.l.b16 %v4095_v39  ;;  %v7181_v54 = vld [vmem:[%s11748_s7 + $0x90] sm:$0xff] }
 0x8d8   : > { %v4199_v30 = vunpack.c.l.b16 %v4094_v52 }
 0x8d9   : > { %v4414_v43 = vpop.permute.xlu0 %4413  ;;  %v4418_v9 = vpop.permute.xlu2 %4417 }
 0x8da   : > { %v4204_v20 = vpack.c.b16 %v4200_v0, %v4199_v30 }
 0x8db   : > { %3984 = vadd.xlane.f32.xlu2 %v3983_v33  ;;  %v3723_v62 = vpop.f32.mrf.mxu3 }
 0x8dc   : > { %v4281_v26 = vpop.permute.xlu1 %4280 }
 0x8e3   : > { %3813 = vmax.xlane.f32.xlu2 %v3812_v27  ;;  %v3725_v8 = vpop.f32.mrf.mxu3  ;;  %v10617_v27 = vadd.f32 %v7181_v54, %v10533_v50 }
 0x8e4   : > { %4482 = vrot.lane.b32.xlu1 %v12129_v11, %s7202_s9  ;;  %v4420_v11 = vpop.permute.xlu1 %4419 }
 0x8e6   : > { %6242 = vmatmul.msk.bf16.gmra.mxu1 %vm1805_vm5, %v4203_v7  ;;  %6260 = vmatmul.msk.bf16.vlgmr.msra.gmra.mxu0 %vm1448_vm3, %v4414_v43 }
 0x8eb   : > { %4490 = vrot.lane.b32.xlu0 %v8715_v35, %s7201_s21 }
 0x8f5   : > { %v3970_v19 = vpop.xlane.xlu2 %3969 }
 0x8f6   : > { %6243 = vmatmul.msk.bf16.gmra.mxu1 %vm1805_vm5, %v4204_v20  ;;  %6261 = vmatmul.msk.bf16.gmra.mxu0 %vm1448_vm3, %v4416_v10  ;;  %v10620_v10 = vadd.f32 %v10264_v61, %v3725_v8 }
 0x8f8   : > { %v3821_v55 = vsel %vm1805_vm5, %v10620_v10, -inf }
 0x8fb   : > { %4484 = vrot.lane.b32.xlu2 %v12130_v49, %s7202_s9  ;;  %v4279_v49 = vpop.permute.xlu1 %4278 }
 0x8fd   : > { %v3802_v1 = vpop.xlane.xlu2 %3801 }
 0x8fe   : > { %v3848_v28 = vsub.f32 %v10495_v16, %v3802_v1  ;;  %v3847_v16 = vsub.f32 %v10391_v2, %v10519_v5 }
 0x900   : > { %v3904_v42 = vmul.f32 1.442695, %v3848_v28  ;;  %v3902_v50 = vmul.f32 1.442695, %v3847_v16 }
 0x903   : > { %4563 = vrot.lane.b32.xlu2 %v12011_v44, %s7201_s21 }
 0x904   : > { %v3796_v32 = vpop.xlane.xlu0 %3795 }
 0x905   : > { %v4493_v48 = vpop.permute.xlu2 %4492  ;;  %v3846_v33 = vsub.f32 %v10504_v15, %v3796_v32  ;;  %v3806_v15 = vsel %vm1805_vm5, %v10617_v27, -inf }
 0x906   : > { %6262 = vmatmul.msk.bf16.gmra.mxu0 %vm1448_vm3, %v4418_v9  ;;  %v4514_v25 = vsel %vm1448_vm3, %v4493_v48, 0 }
 0x907   : > { %4528 = vmatpush.bf16.xpose.msra.mxu1 %v4514_v25  ;;  %v3900_v6 = vmul.f32 1.442695, %v3846_v33 }
 0x909   : > { %6999 = vpow2.f32 %v3900_v6 }
 0x90a   : > { %7001 = vpow2.f32 %v3904_v42 }
 0x90c   : > { %v3973_v7 = vpop.xlane.xlu0 %3972 }
 0x90d   : > { %7003 = vrcp.f32 %v3973_v7 }
 0x90e   : > { %3816 = vmax.xlane.f32.xlu1 %v3815_v56  ;;  %7005 = vrcp.f32 %v3970_v19  ;;  %v10644_v19 = vadd.f32 %v10250_v36, %v3723_v62 }
 0x90f   : > { %v10629_v61 = vpop.eup %6999  ;;  %7007 = vpow2.f32 %v3902_v50 }
 0x910   : > { %v10631_v43 = vpop.eup %7001  ;;  %v3986_v2 = vsel %vm1805_vm5, %v10629_v61, 0.0 }
 0x911   : > { %v3992_v5 = vsel %vm1805_vm5, %v10631_v43, 0.0 }
 0x913   : > { %v7004_v57 = vpop.eup %7003 }
 0x914   : > { %v7006_v12 = vpop.eup %7005  ;;  %v4065_v52 = vmul.f32 %v7004_v57, %v10510_v34  ;;  %v3818_v34 = vsel %vm1805_vm5, %v10644_v19, -inf }
 0x915   : > { %3807 = vmax.xlane.f32.xlu0 %v3806_v15  ;;  %v10637_v39 = vpop.eup %7007  ;;  %v4064_v9 = vmul.f32 %v7006_v12, %v10490_v24  ;;  %v12132_v15 = vld [vmem:[#allocation13_spill] sm:$0xff] }
 0x916   : > { %3822 = vmax.xlane.f32.xlu1 %v3821_v55  ;;  %6263 = vmatmul.msk.bf16.gmra.mxu0 %vm1448_vm3, %v4420_v11  ;;  %v3989_v0 = vsel %vm1805_vm5, %v10637_v39, 0.0  ;;  %v4097_v30 = vpack.c.bf16 %v4065_v52, %v4065_v52  ;;  %v10679_v52 = vpop.f32.mrf.mxu0 }
 0x917   : > { %v4096_v20 = vpack.c.bf16 %v4064_v9, %v4064_v9 }
 0x918   : > { %v4267_v53 = vunpack.c.l.b16 %v4097_v30 }
 0x919   : > { %v4266_v1 = vunpack.c.l.b16 %v4096_v20 }
 0x91b   : > { %v4274_v24 = vpack.c.b16 %v4267_v53, %v4266_v1 }
 0x91d   : > { %3987 = vadd.xlane.f32.xlu0 %v3986_v2 }
 0x91e   : > { %3993 = vadd.xlane.f32.xlu1 %v3992_v5 }
 0x91f   : > { %v4285_v29 = vpop.permute.xlu0 %4284 }
 0x920   : > { %4306 = vmatpush.bf16.msra.mxu2 %v4285_v29 }
 0x924   : > { %4307 = vmatpush.bf16.msra.mxu2 %v4283_v13 }
 0x925   : > { %3990 = vadd.xlane.f32.xlu0 %v3989_v0 }
 0x928   : > { %4308 = vmatpush.bf16.msra.mxu2 %v4281_v26  ;;  %v12131_v26 = vld [vmem:[#allocation2_spill] sm:$0xff] }
 0x92b   : > { %v10646_v48 = vpop.f32.mrf.mxu1 }
 0x92c   : > { %4309 = vmatpush.bf16.msra.mxu2 %v4279_v49  ;;  %3819 = vmax.xlane.f32.xlu2 %v3818_v34 }
 0x92f   : > { %6244 = vmatmul.msk.bf16.vlgmr.msra.gmra.mxu2 %vm1805_vm5, %v4274_v24 }
 0x933   : > { %v10651_v13 = vpop.f32.mrf.mxu1 }
 0x936   : > { %v3976_v62 = vpop.xlane.xlu1 %3975 }
 0x937   : > { %4561 = vrot.lane.b32.xlu1 %v8689_v41, %s7201_s21  ;;  %7009 = vrcp.f32 %v3976_v62 }
 0x939   : > { %4565 = vrot.lane.b32.xlu0 %v12128_v21, %s7201_s21 }
 0x93d   : > { %v7010_v32 = vpop.eup %7009 }
 0x93e   : > { %v3979_v25 = vpop.xlane.xlu2 %3978  ;;  %v4066_v33 = vmul.f32 %v7010_v32, %v10541_v58 }
 0x93f   : > { %4355 = vrot.lane.b32.xlu1 %v12069_v63, %s7200_s10  ;;  %7011 = vrcp.f32 %v3979_v25 }
 0x940   : > { %v4098_v56 = vpack.c.bf16 %v4066_v33, %v4066_v33 }
 0x941   : > { %4486 = vrot.lane.b32.xlu0 %v12131_v26, %s7202_s9 }
 0x942   : > { %v4268_v42 = vunpack.c.l.b16 %v4098_v56 }
 0x944   : > { %4357 = vrot.lane.b32.xlu2 %v12072_v46, %s7200_s10 }
 0x945   : > { %v7012_v28 = vpop.eup %7011 }
 0x946   : > { %v4067_v8 = vmul.f32 %v7012_v28, %v10551_v22  ;;  %v3982_v6 = vpop.xlane.xlu2 %3981 }
 0x947   : > { %4559 = vrot.lane.b32.xlu1 %v12126_v37, %s7201_s21  ;;  %7013 = vrcp.f32 %v3982_v6 }
 0x948   : > { %v4099_v54 = vpack.c.bf16 %v4067_v8, %v4067_v8 }
 0x94a   : > { %v4269_v16 = vunpack.c.l.b16 %v4099_v54  ;;  %v3805_v50 = vpop.xlane.xlu0 %3804 }
 0x94b   : > { %v3849_v29 = vsub.f32 %v10568_v23, %v3805_v50 }
 0x94c   : > { %4488 = vrot.lane.b32.xlu2 %v12132_v15, %s7202_s9  ;;  %v4275_v11 = vpack.c.b16 %v4269_v16, %v4268_v42 }
 0x94d   : > { %v7014_v7 = vpop.eup %7013  ;;  %v3906_v53 = vmul.f32 1.442695, %v3849_v29 }
 0x94e   : > { %v3985_v58 = vpop.xlane.xlu2 %3984  ;;  %6245 = vmatmul.msk.bf16.gmra.mxu2 %vm1805_vm5, %v4275_v11  ;;  %v4068_v22 = vmul.f32 %v7014_v7, %v10564_v31  ;;  %v3811_v31 = vpop.xlane.xlu1 %3810  ;;  %v12137_v11 = vld [vmem:[#allocation23_spill] sm:$0xff] }
 0x94f   : > { %4351 = vrot.lane.b32.xlu1 %v12071_v3, %s7200_s10  ;;  %7015 = vrcp.f32 %v3985_v58  ;;  %v3851_v25 = vsub.f32 %v10548_v17, %v3811_v31 }
 0x950   : > { %v4100_v5 = vpack.c.bf16 %v4068_v22, %v4068_v22  ;;  %7017 = vpow2.f32 %v3906_v53 }
 0x951   : > { %v3910_v26 = vmul.f32 1.442695, %v3851_v25 }
 0x952   : > { %v4270_v0 = vunpack.c.l.b16 %v4100_v5 }
 0x953   : > { %v10675_v55 = vpop.f32.mrf.mxu1  ;;  %7019 = vpow2.f32 %v3910_v26 }
 0x954   : > { %12133 = vst [vmem:[#allocation17_spill] sm:$0xff] %v10675_v55 }
 0x955   : > { %v7016_v2 = vpop.eup %7015 }
 0x956   : > { %v4069_v57 = vmul.f32 %v7016_v2, %v10577_v45  ;;  %v10689_v45 = vpop.f32.mrf.mxu0  ;;  %v4483_v24 = vpop.permute.xlu1 %4482 }
 0x957   : > { %v10692_v62 = vpop.eup %7017  ;;  %v3814_v33 = vpop.xlane.xlu2 %3813 }
 0x958   : > { %v4101_v12 = vpack.c.bf16 %v4069_v57, %v4069_v57  ;;  %v3995_v32 = vsel %vm1805_vm5, %v10692_v62, 0.0 }
 0x959   : > { %v10703_v6 = vpop.eup %7019 }
 0x95a   : > { %v4271_v30 = vunpack.c.l.b16 %v4101_v12  ;;  %v4001_v17 = vsel %vm1805_vm5, %v10703_v6, 0.0 }
 0x95b   : > { %v10681_v9 = vpop.f32.mrf.mxu1 }
 0x95c   : > { %12134 = vst [vmem:[#allocation12_spill] sm:$0xff] %v10681_v9  ;;  %v4276_v1 = vpack.c.b16 %v4271_v30, %v4270_v0 }
 0x95d   : > { %v4491_v49 = vpop.permute.xlu0 %4490 }
 0x95e   : > { %v4511_v34 = vsel %vm1448_vm3, %v4491_v49, 0  ;;  %6246 = vmatmul.msk.bf16.gmra.mxu2 %vm1805_vm5, %v4276_v1  ;;  %v10699_v56 = vpop.f32.mrf.mxu0 }
 0x95f   : > { %4529 = vmatpush.bf16.xpose.msra.mxu1 %v4511_v34  ;;  %v4485_v54 = vpop.permute.xlu2 %4484 }
 0x963   : > { %v10687_v23 = vpop.f32.mrf.mxu1 }
 0x964   : > { %12135 = vst [vmem:[#allocation26_spill] sm:$0xff] %v10687_v23 }
 0x966   : > { %6264 = vmatmul.msk.bf16.vlgmr.msra.gmra.mxu1 %vm1448_vm3, %v4483_v24  ;;  %v10705_v42 = vpop.f32.mrf.mxu0  ;;  %v3852_v24 = vsub.f32 %v10584_v4, %v3814_v33 }
 0x96b   : > { %v10697_v28 = vpop.f32.mrf.mxu1  ;;  %3996 = vadd.xlane.f32.xlu0 %v3995_v32 }
 0x96c   : > { %12136 = vst [vmem:[#allocation43_spill] sm:$0xff] %v10697_v28 }
 0x96e   : > { %v10712_v16 = vpop.f32.mrf.mxu0 }
 0x976   : > { %6265 = vmatmul.msk.bf16.gmra.mxu1 %vm1448_vm3, %v4485_v54  ;;  %v10717_v22 = vpop.f32.mrf.mxu0 }
 0x979   : > { %4002 = vadd.xlane.f32.xlu1 %v4001_v17 }
 0x97e   : > { %v10724_v12 = vpop.f32.mrf.mxu0 }
 0x97f   : > { %4353 = vrot.lane.b32.xlu0 %v12075_v38, %s7200_s10 }
 0x981   : > { %v3817_v15 = vpop.xlane.xlu1 %3816 }
 0x982   : > { %v3853_v50 = vsub.f32 %v10607_v18, %v3817_v15  ;;  %v4564_v18 = vpop.permute.xlu2 %4563 }
 0x984   : > { %v3914_v5 = vmul.f32 1.442695, %v3853_v50 }
 0x986   : > { %v10735_v1 = vpop.f32.mrf.mxu0 }
 0x987   : > { %4551 = vrot.lane.b32.xlu0 %v12137_v11, %s7202_s9 }
 0x988   : > { %v3808_v58 = vpop.xlane.xlu0 %3807 }
 0x989   : > { %v3850_v7 = vsub.f32 %v10617_v27, %v3808_v58  ;;  %v3823_v0 = vpop.xlane.xlu1 %3822 }
 0x98a   : > { %v3855_v11 = vsub.f32 %v10620_v10, %v3823_v0 }
 0x98b   : > { %v3908_v2 = vmul.f32 1.442695, %v3850_v7 }
 0x98c   : > { %v3918_v33 = vmul.f32 1.442695, %v3855_v11 }
 0x98d   : > { %7021 = vpow2.f32 %v3908_v2 }
 0x98e   : > { %7023 = vpow2.f32 %v3914_v5 }
 0x990   : > { %v3988_v57 = vpop.xlane.xlu0 %3987 }
 0x991   : > { %7025 = vrcp.f32 %v3988_v57  ;;  %v10739_v54 = vpop.xlane.xlu1 %3993 }
 0x992   : > { %4553 = vrot.lane.b32.xlu1 %v12085_v51, %s7202_s9 }
 0x993   : > { %v10722_v29 = vpop.eup %7021 }
 0x994   : > { %v3998_v27 = vsel %vm1805_vm5, %v10722_v29, 0.0  ;;  %v10728_v30 = vpop.eup %7023 }
 0x995   : > { %3999 = vadd.xlane.f32.xlu2 %v3998_v27  ;;  %v4007_v49 = vsel %vm1805_vm5, %v10728_v30, 0.0 }
 0x997   : > { %v7026_v53 = vpop.eup %7025 }
 0x998   : > { %v3991_v31 = vpop.xlane.xlu0 %3990  ;;  %v4070_v51 = vmul.f32 %v7026_v53, %v10629_v61  ;;  %v3912_v61 = vmul.f32 1.442695, %v3852_v24 }
 0x999   : > { %7027 = vrcp.f32 %v3991_v31 }
 0x99a   : > { %4632 = vrot.lane.b32.xlu1 %v12069_v63, %s7201_s21  ;;  %v4102_v25 = vpack.c.bf16 %v4070_v51, %v4070_v51 }
 0x99c   : > { %v4272_v50 = vunpack.c.l.b16 %v4102_v25  ;;  %v4586_v25 = vsel %vm1448_vm3, %v4564_v18, 0 }
 0x99d   : > { %4008 = vadd.xlane.f32.xlu2 %v4007_v49 }
 0x99f   : > { %v7028_v34 = vpop.eup %7027  ;;  %v3820_v26 = vpop.xlane.xlu2 %3819 }
 0x9a0   : > { %v4071_v32 = vmul.f32 %v7028_v34, %v10637_v39  ;;  %v3854_v17 = vsub.f32 %v10644_v19, %v3820_v26  ;;  %v10745_v39 = vpop.f32.mrf.mxu0 }
 0x9a2   : > { %v4103_v15 = vpack.c.bf16 %v4071_v32, %v4071_v32  ;;  %4557 = vrot.lane.b32.xlu1 %v12090_v60, %s7202_s9  ;;  %v3916_v58 = vmul.f32 1.442695, %v3854_v17 }
 0x9a4   : > { %v4273_v7 = vunpack.c.l.b16 %v4103_v15  ;;  %7029 = vpow2.f32 %v3916_v58 }
 0x9a5   : > { %7031 = vpow2.f32 %v3912_v61 }
 0x9a6   : > { %v4277_v4 = vpack.c.b16 %v4273_v7, %v4272_v50  ;;  %7033 = vpow2.f32 %v3918_v33  ;;  %v10787_v50 = vld [vmem:[%s11748_s7 + $0xd0] sm:$0xff] }
 0x9a7   : > { %v4358_v2 = vpop.permute.xlu2 %4357 }
 0x9a8   : > { %6247 = vmatmul.msk.bf16.gmra.mxu2 %vm1805_vm5, %v4277_v4  ;;  %4379 = vmatpush.bf16.msrb.mxu3 %v4358_v2  ;;  %v4464_v51 = vpop.f32.mrf.mxu0 }
 0x9a9   : > { %v4562_v19 = vpop.permute.xlu1 %4561 }
 0x9aa   : > { %4628 = vrot.lane.b32.xlu1 %v12071_v3, %s7201_s21  ;;  %v10750_v60 = vpop.eup %7029 }
 0x9ab   : > { %v4566_v10 = vpop.permute.xlu0 %4565  ;;  %v4010_v57 = vsel %vm1805_vm5, %v10750_v60, 0.0  ;;  %v10755_v27 = vpop.eup %7031 }
 0x9ac   : > { %v4589_v5 = vsel %vm1448_vm3, %v4566_v10, 0  ;;  %4011 = vadd.xlane.f32.xlu2 %v4010_v57  ;;  %v4004_v0 = vsel %vm1805_vm5, %v10755_v27, 0.0  ;;  %v10759_v31 = vpop.eup %7033  ;;  %v10801_v10 = vld [vmem:[%s11748_s7 + $0xe8] sm:$0xff] }
 0x9ad   : > { %4595 = vmatpush.bf16.xpose.msrb.mxu2 %v4589_v5  ;;  %v4013_v24 = vsel %vm1805_vm5, %v10759_v31, 0.0 }
 0x9af   : > { %v4489_v61 = vpop.permute.xlu2 %4488 }
 0x9b0   : > { %v4467_v17 = vpop.f32.mrf.mxu0 }
 0x9b1   : > { %v4356_v53 = vpop.permute.xlu1 %4355  ;;  %4005 = vadd.xlane.f32.xlu0 %v4004_v0  ;;  %v10790_v4 = vadd.f32 %v10787_v50, %v4467_v17 }
 0x9b2   : > { %4620 = vrot.lane.b32.xlu1 %v12080_v59, %s7202_s9  ;;  %v10763_v49 = vpop.f32.mrf.mxu2  ;;  %4380 = vmatpush.bf16.msrb.mxu3 %v4356_v53  ;;  %v4583_v59 = vsel %vm1448_vm3, %v4562_v19, 0 }
 0x9b3   : > { %12138 = vst [vmem:[#allocation2_spill] sm:$0xff] %v10763_v49  ;;  %v4487_v34 = vpop.permute.xlu0 %4486  ;;  %v4695_v19 = vsel %vm1805_vm5, %v10790_v4, -inf }
 0x9b4   : > { %6266 = vmatmul.msk.bf16.gmra.mxu1 %vm1448_vm3, %v4487_v34  ;;  %4014 = vadd.xlane.f32.xlu2 %v4013_v24  ;;  %v10814_v34 = vld [vmem:[%s11748_s7 + $0xf0] sm:$0xff] }
 0x9b5   : > { %4596 = vmatpush.bf16.xpose.msrb.mxu2 %v4586_v25 }
 0x9b8   : > { %v4469_v18 = vpop.f32.mrf.mxu0 }
 0x9b9   : > { %v4560_v15 = vpop.permute.xlu1 %4559 }
 0x9ba   : > { %v10769_v32 = vpop.f32.mrf.mxu2  ;;  %v4580_v11 = vsel %vm1448_vm3, %v4560_v15, 0 }
 0x9bb   : > { %12139 = vst [vmem:[#allocation13_spill] sm:$0xff] %v10769_v32 }
 0x9bd   : > { %4597 = vmatpush.bf16.xpose.msrb.mxu2 %v4583_v59 }
 0x9c0   : > { %v4472_v58 = vpop.f32.mrf.mxu0 }
 0x9c1   : > { %v4352_v8 = vpop.permute.xlu1 %4351 }
 0x9c4   : > { %6267 = vmatmul.msk.bf16.gmra.mxu1 %vm1448_vm3, %v4489_v61 }
 0x9c5   : > { %4555 = vrot.lane.b32.xlu0 %v12078_v47, %s7202_s9  ;;  %4598 = vmatpush.bf16.xpose.msrb.mxu2 %v4580_v11 }
 0x9c8   : > { %v4474_v47 = vpop.f32.mrf.mxu0 }
 0x9c9   : > { %v10804_v5 = vadd.f32 %v10801_v10, %v4474_v47 }
 0x9cb   : > { %v4704_v53 = vsel %vm1805_vm5, %v10804_v5, -inf }
 0x9cc   : > { %4634 = vrot.lane.b32.xlu2 %v12072_v46, %s7201_s21 }
 0x9cd   : > { %4630 = vrot.lane.b32.xlu0 %v12075_v38, %s7201_s21 }
 0x9d0   : > { %v4477_v24 = vpop.f32.mrf.mxu0 }
 0x9d1   : > { %v10782_v7 = vpop.f32.mrf.mxu2  ;;  %v10817_v25 = vadd.f32 %v10814_v34, %v4477_v24 }
 0x9d2   : > { %12140 = vst [vmem:[#allocation23_spill] sm:$0xff] %v10782_v7 }
 0x9d9   : > { %v10792_v33 = vpop.f32.mrf.mxu2 }
 0x9da   : > { %12141 = vst [vmem:[#allocation81_spill] sm:$0xff] %v10792_v33 }
 0x9dc   : > { %4696 = vmax.xlane.f32.xlu1 %v4695_v19  ;;  %v10830_v19 = vld [vmem:[%s11748_s7 + $0xc8] sm:$0xff] }
 0x9de   : > { %v3997_v57 = vpop.xlane.xlu0 %3996 }
 0x9df   : > { %7035 = vrcp.f32 %v3997_v57  ;;  %v10835_v57 = vld [vmem:[%s11748_s7 + $0xc0] sm:$0xff] }
 0x9e0   : > { %7037 = vrcp.f32 %v10739_v54  ;;  %v4707_v54 = vsel %vm1805_vm5, %v10817_v25, -inf }
 0x9e1   : > { %v10806_v0 = vpop.f32.mrf.mxu2 }
 0x9e2   : > { %12142 = vst [vmem:[#allocation82_spill] sm:$0xff] %v10806_v0 }
 0x9e4   : > { %4705 = vmax.xlane.f32.xlu1 %v4704_v53  ;;  %v10838_v53 = vadd.f32 %v10830_v19, %v4464_v51  ;;  %v10851_v51 = vld [vmem:[%s11748_s7 + $0xd8] sm:$0xff] }
 0x9e5   : > { %v7036_v17 = vpop.eup %7035 }
 0x9e6   : > { %v7038_v59 = vpop.eup %7037  ;;  %v4073_v61 = vmul.f32 %v7036_v17, %v10692_v62  ;;  %v4692_v20 = vsel %vm1805_vm5, %v10838_v53, -inf }
 0x9e7   : > { %v4072_v47 = vmul.f32 %v7038_v59, %v10631_v43 }
 0x9e8   : > { %v4105_v62 = vpack.c.bf16 %v4073_v61, %v4073_v61 }
 0x9e9   : > { %v10819_v15 = vpop.f32.mrf.mxu2  ;;  %v4104_v24 = vpack.c.bf16 %v4072_v47, %v4072_v47 }
 0x9ea   : > { %12143 = vst [vmem:[#allocation83_spill] sm:$0xff] %v10819_v15  ;;  %v4340_v43 = vunpack.c.l.b16 %v4105_v62  ;;  %v10855_v62 = vadd.f32 %v10851_v51, %v4469_v18 }
 0x9eb   : > { %v4339_v59 = vunpack.c.l.b16 %v4104_v24 }
 0x9ec   : > { %4708 = vmax.xlane.f32.xlu1 %v4707_v54  ;;  %v10842_v54 = vadd.f32 %v10835_v57, %v10745_v39  ;;  %v4003_v24 = vpop.xlane.xlu1 %4002 }
 0x9ed   : > { %v4347_v47 = vpack.c.b16 %v4340_v43, %v4339_v59  ;;  %7039 = vrcp.f32 %v4003_v24 }
 0x9ee   : > { %v4689_v61 = vsel %vm1805_vm5, %v10842_v54, -inf }
 0x9f1   : > { %v4354_v17 = vpop.permute.xlu0 %4353 }
 0x9f2   : > { %4381 = vmatpush.bf16.msrb.mxu3 %v4354_v17 }
 0x9f3   : > { %v7040_v59 = vpop.eup %7039 }
 0x9f5   : > { %4693 = vmax.xlane.f32.xlu2 %v4692_v20  ;;  %v4698_v20 = vsel %vm1805_vm5, %v10855_v62, -inf }
 0x9f6   : > { %4382 = vmatpush.bf16.msrb.mxu3 %v4352_v8  ;;  %v10863_v8 = vld [vmem:[%s11748_s7 + $0xe0] sm:$0xff] }
 0x9f7   : > { %4690 = vmax.xlane.f32.xlu0 %v4689_v61  ;;  %v10866_v17 = vadd.f32 %v10863_v8, %v4472_v58 }
 0x9f9   : > { %6248 = vmatmul.msk.bf16.vlgmr.msrb.gmra.mxu3 %vm1805_vm5, %v4347_v47  ;;  %v4552_v39 = vpop.permute.xlu0 %4551  ;;  %v4701_v18 = vsel %vm1805_vm5, %v10866_v17, -inf  ;;  %v4075_v47 = vmul.f32 %v7040_v59, %v10703_v6 }
 0x9fa   : > { %6268 = vmatmul.msk.bf16.vlgmr.msrb.gmra.mxu2 %vm1448_vm3, %v4552_v39 }
 0x9fb   : > { %v4107_v39 = vpack.c.bf16 %v4075_v47, %v4075_v47 }
 0x9fd   : > { %v4342_v11 = vunpack.c.l.b16 %v4107_v39  ;;  %v4479_v39 = vpop.f32.mrf.mxu0 }
 0x9ff   : > { %4699 = vmax.xlane.f32.xlu0 %v4698_v20 }
 0xa04   : > { %v4554_v61 = vpop.permute.xlu1 %4553 }
 0xa05   : > { %4626 = vrot.lane.b32.xlu1 %v12084_v40, %s7202_s9 }
 0xa07   : > { %4702 = vmax.xlane.f32.xlu0 %v4701_v18 }
 0xa08   : > { %v4000_v43 = vpop.xlane.xlu2 %3999 }
 0xa09   : > { %7041 = vrcp.f32 %v4000_v43  ;;  %v12144_v43 = vld [vmem:[#allocation29_spill] sm:$0xff] }
 0xa0a   : > { %6269 = vmatmul.msk.bf16.gmra.mxu2 %vm1448_vm3, %v4554_v61 }
 0xa0d   : > { %4622 = vrot.lane.b32.xlu2 %v12081_v14, %s7202_s9 }
 0xa0f   : > { %v7042_v58 = vpop.eup %7041 }
 0xa10   : > { %v4074_v20 = vmul.f32 %v7042_v58, %v10722_v29  ;;  %v4009_v18 = vpop.xlane.xlu2 %4008 }
 0xa11   : > { %7043 = vrcp.f32 %v4009_v18 }
 0xa12   : > { %v4106_v40 = vpack.c.bf16 %v4074_v20, %v4074_v20 }
 0xa14   : > { %v4341_v24 = vunpack.c.l.b16 %v4106_v40 }
 0xa16   : > { %v4348_v2 = vpack.c.b16 %v4342_v11, %v4341_v24 }
 0xa17   : > { %v7044_v59 = vpop.eup %7043 }
 0xa18   : > { %6249 = vmatmul.msk.bf16.gmra.mxu3 %vm1805_vm5, %v4348_v2  ;;  %v4077_v14 = vmul.f32 %v7044_v59, %v10728_v30  ;;  %v10885_v2 = vld [vmem:[%s11748_s7 + $0xf8] sm:$0xff] }
 0xa19   : > { %v10889_v30 = vadd.f32 %v10885_v2, %v4479_v39 }
 0xa1a   : > { %v4109_v29 = vpack.c.bf16 %v4077_v14, %v4077_v14 }
 0xa1b   : > { %4624 = vrot.lane.b32.xlu0 %v12144_v43, %s7202_s9  ;;  %v4633_v43 = vpop.permute.xlu1 %4632  ;;  %s7203_s9 = smov 40  }
 0xa1c   : > { %v4344_v20 = vunpack.c.l.b16 %v4109_v29  ;;  %v4655_v29 = vsel %vm1448_vm3, %v4633_v43, 0 }
 0xa1f   : > { %v4012_v61 = vpop.xlane.xlu2 %4011 }
 0xa23   : > { %v4558_v39 = vpop.permute.xlu1 %4557 }
 0xa24   : > { %v4006_v6 = vpop.xlane.xlu0 %4005 }
 0xa25   : > { %7045 = vrcp.f32 %v4006_v6 }
 0xa27   : > { %v4015_v47 = vpop.xlane.xlu2 %4014 }
 0xa28   : > { %7047 = vrcp.f32 %v4015_v47 }
 0xa29   : > { %7049 = vrcp.f32 %v4012_v61  ;;  %v4710_v61 = vsel %vm1805_vm5, %v10889_v30, -inf }
 0xa2b   : > { %v7046_v26 = vpop.eup %7045 }
 0xa2c   : > { %v4076_v58 = vmul.f32 %v7046_v26, %v10755_v27 }
 0xa2e   : > { %v4108_v11 = vpack.c.bf16 %v4076_v58, %v4076_v58  ;;  %v7048_v26 = vpop.eup %7047  ;;  %v10898_v58 = vpop.f32.mrf.mxu1 }
 0xa2f   : > { %v4635_v24 = vpop.permute.xlu2 %4634  ;;  %v7050_v6 = vpop.eup %7049  ;;  %v4079_v59 = vmul.f32 %v7048_v26, %v10759_v31 }
 0xa30   : > { %v4343_v40 = vunpack.c.l.b16 %v4108_v11  ;;  %v4658_v18 = vsel %vm1448_vm3, %v4635_v24, 0  ;;  %v4078_v47 = vmul.f32 %v7050_v6, %v10750_v60  ;;  %v4629_v60 = vpop.permute.xlu1 %4628 }
 0xa31   : > { %4664 = vmatpush.bf16.xpose.msra.mxu3 %v4658_v18  ;;  %v4111_v11 = vpack.c.bf16 %v4079_v59, %v4079_v59  ;;  %v4649_v43 = vsel %vm1448_vm3, %v4629_v60, 0  ;;  %v12145_v59 = vld [vmem:[#allocation22_spill] sm:$0xff] }
 0xa32   : > { %v4349_v27 = vpack.c.b16 %v4344_v20, %v4343_v40  ;;  %v4110_v20 = vpack.c.bf16 %v4078_v47, %v4078_v47  ;;  %v12146_v47 = vld [vmem:[#allocation10_spill] sm:$0xff] }
 0xa33   : > { %v4346_v40 = vunpack.c.l.b16 %v4111_v11 }
 0xa34   : > { %6250 = vmatmul.msk.bf16.gmra.mxu3 %vm1805_vm5, %v4349_v27  ;;  %v4345_v31 = vunpack.c.l.b16 %v4110_v20 }
 0xa36   : > { %4711 = vmax.xlane.f32.xlu2 %v4710_v61  ;;  %v4350_v27 = vpack.c.b16 %v4346_v40, %v4345_v31  ;;  %v10901_v26 = vpop.f32.mrf.mxu1 }
 0xa37   : > { %v4556_v14 = vpop.permute.xlu0 %4555 }
 0xa38   : > { %6270 = vmatmul.msk.bf16.gmra.mxu2 %vm1448_vm3, %v4556_v14  ;;  %v4621_v61 = vpop.permute.xlu1 %4620 }
 0xa39   : > { %4665 = vmatpush.bf16.xpose.msra.mxu3 %v4655_v29  ;;  %v12147_v29 = vld [vmem:[#allocation6_spill] sm:$0xff] }
 0xa3e   : > { %v4531_v6 = vpop.f32.mrf.mxu1 }
 0xa3f   : > { %v4631_v24 = vpop.permute.xlu0 %4630 }
 0xa40   : > { %v4652_v18 = vsel %vm1448_vm3, %v4631_v24, 0 }
 0xa41   : > { %4666 = vmatpush.bf16.xpose.msra.mxu3 %v4652_v18 }
 0xa44   : > { %6251 = vmatmul.msk.bf16.gmra.mxu3 %vm1805_vm5, %v4350_v27 }
 0xa46   : > { %v10909_v14 = vpop.f32.mrf.mxu1 }
 0xa48   : > { %6271 = vmatmul.msk.bf16.gmra.mxu2 %vm1448_vm3, %v4558_v39 }
 0xa49   : > { %4667 = vmatpush.bf16.xpose.msra.mxu3 %v4649_v43 }
 0xa4e   : > { %5099 = vrot.lane.b32.xlu2 %v12145_v59, %s7203_s9  ;;  %v4536_v11 = vpop.f32.mrf.mxu1 }
 0xa4f   : > { %v4697_v39 = vpop.xlane.xlu1 %4696 }
 0xa50   : > { %v4787_v36 = vsub.f32 %v10790_v4, %v4697_v39 }
 0xa54   : > { %6272 = vmatmul.msk.bf16.vlgmr.msra.gmra.mxu3 %vm1448_vm3, %v4621_v61 }
 0xa56   : > { %5095 = vrot.lane.b32.xlu2 %v12146_v47, %s7203_s9  ;;  %v4538_v40 = vpop.f32.mrf.mxu1 }
 0xa57   : > { %v4706_v43 = vpop.xlane.xlu1 %4705 }
 0xa5e   : > { %5093 = vrot.lane.b32.xlu2 %v12147_v29, %s7203_s9  ;;  %v10917_v61 = vpop.f32.mrf.mxu1 }
 0xa68   : > { %v4694_v20 = vpop.xlane.xlu2 %4693 }
 0xa69   : > { %v4786_v24 = vsub.f32 %v10838_v53, %v4694_v20 }
 0xa6a   : > { %v4691_v31 = vpop.xlane.xlu0 %4690 }
 0xa6b   : > { %v4785_v18 = vsub.f32 %v10842_v54, %v4691_v31  ;;  %v4819_v27 = vmul.f32 1.442695, %v4786_v24  ;;  %v4821_v24 = vmul.f32 1.442695, %v4787_v36  ;;  %v10931_v31 = vadd.f32 %v10835_v57, %v4531_v6 }
 0xa6d   : > { %v4817_v60 = vmul.f32 1.442695, %v4785_v18  ;;  %7051 = vpow2.f32 %v4819_v27  ;;  %v4709_v27 = vpop.xlane.xlu1 %4708  ;;  %v4713_v39 = vsel %vm1805_vm5, %v10931_v31, -inf }
 0xa6f   : > { %7053 = vpow2.f32 %v4817_v60  ;;  %v4543_v60 = vpop.f32.mrf.mxu1 }
 0xa70   : > { %v4623_v59 = vpop.permute.xlu2 %4622  ;;  %7055 = vpow2.f32 %v4821_v24 }
 0xa71   : > { %6273 = vmatmul.msk.bf16.gmra.mxu3 %vm1448_vm3, %v4623_v59 }
 0xa72   : > { %v4700_v47 = vpop.xlane.xlu0 %4699 }
 0xa73   : > { %v10920_v29 = vpop.eup %7051  ;;  %v4788_v54 = vsub.f32 %v10855_v62, %v4700_v47  ;;  %v4791_v62 = vsub.f32 %v10817_v25, %v4709_v27  ;;  %v12150_v27 = vld [vmem:[#allocation15_spill] sm:$0xff] }
 0xa74   : > { %v4884_v53 = vsel %vm1805_vm5, %v10920_v29, 0.0 }
 0xa75   : > { %v10923_v23 = vpop.eup %7053  ;;  %4885 = vadd.xlane.f32.xlu1 %v4884_v53  ;;  %v4823_v18 = vmul.f32 1.442695, %v4788_v54  ;;  %v4829_v47 = vmul.f32 1.442695, %v4791_v62 }
 0xa76   : > { %v4881_v20 = vsel %vm1805_vm5, %v10923_v23, 0.0  ;;  %v10938_v59 = vpop.eup %7055 }
 0xa77   : > { %4882 = vadd.xlane.f32.xlu0 %v4881_v20  ;;  %7057 = vpow2.f32 %v4823_v18  ;;  %v4887_v20 = vsel %vm1805_vm5, %v10938_v59, 0.0  ;;  %v4546_v24 = vpop.f32.mrf.mxu1  ;;  %v10951_v18 = vadd.f32 %v10787_v50, %v4536_v11 }
 0xa78   : > { %7059 = vpow2.f32 %v4829_v47 }
 0xa79   : > { %v4719_v54 = vsel %vm1805_vm5, %v10951_v18, -inf }
 0xa7a   : > { %v4703_v53 = vpop.xlane.xlu0 %4702 }
 0xa7b   : > { %v4789_v62 = vsub.f32 %v10866_v17, %v4703_v53  ;;  %v4790_v17 = vsub.f32 %v10804_v5, %v4706_v43 }
 0xa7c   : > { %v10933_v4 = vpop.f32.mrf.mxu3 }
 0xa7d   : > { %12148 = vst [vmem:[#allocation29_spill] sm:$0xff] %v10933_v4  ;;  %4714 = vmax.xlane.f32.xlu1 %v4713_v39  ;;  %v10940_v36 = vpop.eup %7057  ;;  %v4825_v11 = vmul.f32 1.442695, %v4789_v62 }
 0xa7e   : > { %v4890_v25 = vsel %vm1805_vm5, %v10940_v36, 0.0  ;;  %v10955_v39 = vpop.eup %7059 }
 0xa7f   : > { %v4899_v47 = vsel %vm1805_vm5, %v10955_v39, 0.0  ;;  %7061 = vpow2.f32 %v4825_v11  ;;  %v11001_v11 = vadd.f32 %v10814_v34, %v4546_v24 }
 0xa84   : > { %v10942_v6 = vpop.f32.mrf.mxu3 }
 0xa85   : > { %12149 = vst [vmem:[#allocation22_spill] sm:$0xff] %v10942_v6  ;;  %4888 = vadd.xlane.f32.xlu1 %v4887_v20  ;;  %v4548_v20 = vpop.f32.mrf.mxu1  ;;  %v10974_v62 = vpop.eup %7061 }
 0xa87   : > { %4891 = vadd.xlane.f32.xlu2 %v4890_v25  ;;  %v10964_v25 = vadd.f32 %v10851_v51, %v4538_v40  ;;  %v4627_v40 = vpop.permute.xlu1 %4626 }
 0xa89   : > { %v4722_v53 = vsel %vm1805_vm5, %v10964_v25, -inf }
 0xa8b   : > { %5097 = vrot.lane.b32.xlu0 %v12150_v27, %s7203_s9  ;;  %v10967_v27 = vadd.f32 %v10885_v2, %v4548_v20  ;;  %v4893_v20 = vsel %vm1805_vm5, %v10974_v62, 0.0 }
 0xa8d   : > { %v4625_v4 = vpop.permute.xlu0 %4624  ;;  %4720 = vmax.xlane.f32.xlu1 %v4719_v54  ;;  %v4827_v54 = vmul.f32 1.442695, %v4790_v17 }
 0xa8e   : > { %6274 = vmatmul.msk.bf16.gmra.mxu3 %vm1448_vm3, %v4625_v4  ;;  %v4734_v4 = vsel %vm1805_vm5, %v10967_v27, -inf }
 0xa8f   : > { %4900 = vadd.xlane.f32.xlu2 %v4899_v47  ;;  %7063 = vpow2.f32 %v4827_v54 }
 0xa95   : > { %4723 = vmax.xlane.f32.xlu1 %v4722_v53  ;;  %v10981_v5 = vpop.eup %7063  ;;  %v10990_v53 = vadd.f32 %v10801_v10, %v4543_v60 }
 0xa96   : > { %v4896_v17 = vsel %vm1805_vm5, %v10981_v5, 0.0 }
 0xa97   : > { %4735 = vmax.xlane.f32.xlu2 %v4734_v4  ;;  %v4728_v54 = vsel %vm1805_vm5, %v10990_v53, -inf }
 0xa9b   : > { %v10976_v47 = vpop.f32.mrf.mxu3 }
 0xa9c   : > { %12151 = vst [vmem:[#allocation10_spill] sm:$0xff] %v10976_v47 }
 0xa9d   : > { %4894 = vadd.xlane.f32.xlu1 %v4893_v20  ;;  %v12153_v20 = vld [vmem:[#allocation8_spill] sm:$0xff] }
 0xa9e   : > { %6275 = vmatmul.msk.bf16.gmra.mxu3 %vm1448_vm3, %v4627_v40  ;;  %v10996_v40 = vadd.f32 %v10830_v19, %v10909_v14 }
 0xaa0   : > { %v4716_v60 = vsel %vm1805_vm5, %v10996_v40, -inf }
 0xaa3   : > { %v10983_v43 = vpop.f32.mrf.mxu3 }
 0xaa4   : > { %12152 = vst [vmem:[#allocation6_spill] sm:$0xff] %v10983_v43 }
 0xaa5   : > { %4897 = vadd.xlane.f32.xlu1 %v4896_v17 }
 0xaa9   : > { %v4712_v4 = vpop.xlane.xlu2 %4711 }
 0xaaa   : > { %v4792_v17 = vsub.f32 %v10889_v30, %v4712_v4 }
 0xaac   : > { %v4831_v14 = vmul.f32 1.442695, %v4792_v17 }
 0xaad   : > { %4729 = vmax.xlane.f32.xlu1 %v4728_v54  ;;  %v4731_v54 = vsel %vm1805_vm5, %v11001_v11, -inf }
 0xaae   : > { %7065 = vpow2.f32 %v4831_v14  ;;  %v11030_v14 = vpop.f32.mrf.mxu2 }
 0xaaf   : > { %5172 = vrot.lane.b32.xlu2 %v12153_v20, %s7203_s9  ;;  %v11012_v20 = vadd.f32 %v10863_v8, %v10917_v61  ;;  %12158 = vst [vmem:[#allocation86_spill] sm:$0xff] %v11030_v14 }
 0xab1   : > { %v5100_v47 = vpop.permute.xlu2 %5099  ;;  %v4725_v30 = vsel %vm1805_vm5, %v11012_v20, -inf }
 0xab2   : > { %5121 = vmatpush.bf16.msrb.mxu0 %v5100_v47 }
 0xab4   : > { %v11020_v4 = vpop.eup %7065 }
 0xab5   : > { %4717 = vmax.xlane.f32.xlu0 %v4716_v60  ;;  %4732 = vmax.xlane.f32.xlu1 %v4731_v54  ;;  %v4902_v17 = vsel %vm1805_vm5, %v11020_v4, 0.0 }
 0xab7   : > { %v11008_v43 = vpop.f32.mrf.mxu3 }
 0xab8   : > { %12154 = vst [vmem:[#allocation15_spill] sm:$0xff] %v11008_v43 }
 0xab9   : > { %v5096_v6 = vpop.permute.xlu2 %5095 }
 0xabd   : > { %4726 = vmax.xlane.f32.xlu0 %v4725_v30  ;;  %v11032_v30 = vpop.f32.mrf.mxu2 }
 0xabe   : > { %12159 = vst [vmem:[#allocation87_spill] sm:$0xff] %v11032_v30 }
 0xabf   : > { %v11016_v24 = vpop.f32.mrf.mxu3 }
 0xac0   : > { %12155 = vst [vmem:[#allocation8_spill] sm:$0xff] %v11016_v24 }
 0xac1   : > { %v5094_v55 = vpop.permute.xlu2 %5093 }
 0xac5   : > { %4903 = vadd.xlane.f32.xlu0 %v4902_v17  ;;  %v11034_v43 = vpop.f32.mrf.mxu2 }
 0xac7   : > { %v11024_v60 = vpop.f32.mrf.mxu3 }
 0xac8   : > { %12156 = vst [vmem:[#allocation84_spill] sm:$0xff] %v11024_v60 }
 0xacd   : > { %v11037_v60 = vpop.f32.mrf.mxu2 }
 0xacf   : > { %v11026_v61 = vpop.f32.mrf.mxu3 }
 0xad0   : > { %12157 = vst [vmem:[#allocation85_spill] sm:$0xff] %v11026_v61 }
 0xae8   : > { %v4886_v28 = vpop.xlane.xlu1 %4885 }
 0xaea   : > { %v4883_v47 = vpop.xlane.xlu0 %4882 }
 0xaeb   : > { %7067 = vrcp.f32 %v4883_v47 }
 0xaec   : > { %7069 = vrcp.f32 %v4886_v28 }
 0xaf0   : > { %v4715_v24 = vpop.xlane.xlu1 %4714 }
 0xaf1   : > { %v4793_v17 = vsub.f32 %v10931_v31, %v4715_v24  ;;  %v7068_v0 = vpop.eup %7067 }
 0xaf2   : > { %v7070_v54 = vpop.eup %7069  ;;  %v5009_v61 = vmul.f32 %v7068_v0, %v10923_v23  ;;  %v11046_v0 = vpop.f32.mrf.mxu2 }
 0xaf3   : > { %v4833_v9 = vmul.f32 1.442695, %v4793_v17  ;;  %v5010_v7 = vmul.f32 %v7070_v54, %v10920_v29 }
 0xaf4   : > { %v5041_v28 = vpack.c.bf16 %v5009_v61, %v5009_v61 }
 0xaf5   : > { %7071 = vpow2.f32 %v4833_v9  ;;  %v5042_v9 = vpack.c.bf16 %v5010_v7, %v5010_v7 }
 0xaf6   : > { %v5081_v33 = vunpack.c.l.b16 %v5041_v28 }
 0xaf7   : > { %v5082_v29 = vunpack.c.l.b16 %v5042_v9  ;;  %v12160_v9 = vld [vmem:[#allocation18_spill] sm:$0xff] }
 0xaf8   : > { %v4889_v15 = vpop.xlane.xlu1 %4888 }
 0xaf9   : > { %v5089_v54 = vpack.c.b16 %v5082_v29, %v5081_v33 }
 0xafa   : > { %v4892_v30 = vpop.xlane.xlu2 %4891 }
 0xafb   : > { %v11040_v14 = vpop.eup %7071  ;;  %7073 = vrcp.f32 %v4892_v30 }
 0xafc   : > { %v4905_v47 = vsel %vm1805_vm5, %v11040_v14, 0.0  ;;  %7075 = vrcp.f32 %v4889_v15 }
 0xafd   : > { %v5098_v31 = vpop.permute.xlu0 %5097  ;;  %4906 = vadd.xlane.f32.xlu0 %v4905_v47 }
 0xafe   : > { %5122 = vmatpush.bf16.msrb.mxu0 %v5098_v31  ;;  %v4607_v31 = vpop.f32.mrf.mxu2 }
 0xb00   : > { %v4721_v24 = vpop.xlane.xlu1 %4720 }
 0xb01   : > { %v4795_v17 = vsub.f32 %v10951_v18, %v4721_v24  ;;  %v7074_v32 = vpop.eup %7073 }
 0xb02   : > { %5123 = vmatpush.bf16.msrb.mxu0 %v5096_v6  ;;  %v4901_v23 = vpop.xlane.xlu2 %4900  ;;  %v7076_v7 = vpop.eup %7075  ;;  %v5012_v61 = vmul.f32 %v7074_v32, %v10940_v36 }
 0xb03   : > { %v4837_v49 = vmul.f32 1.442695, %v4795_v17  ;;  %v5011_v18 = vmul.f32 %v7076_v7, %v10938_v59  ;;  %v12161_v7 = vld [vmem:[#allocation32_spill] sm:$0xff] }
 0xb05   : > { %7077 = vpow2.f32 %v4837_v49  ;;  %v11058_v49 = vadd.f32 %v10851_v51, %v4607_v31  ;;  %v5043_v33 = vpack.c.bf16 %v5011_v18, %v5011_v18 }
 0xb06   : > { %5124 = vmatpush.bf16.msrb.mxu0 %v5094_v55  ;;  %v5044_v55 = vpack.c.bf16 %v5012_v61, %v5012_v61 }
 0xb07   : > { %v5083_v24 = vunpack.c.l.b16 %v5043_v33  ;;  %v4746_v59 = vsel %vm1805_vm5, %v11058_v49, -inf  ;;  %v4610_v33 = vpop.f32.mrf.mxu2 }
 0xb08   : > { %v4724_v47 = vpop.xlane.xlu1 %4723  ;;  %v5084_v32 = vunpack.c.l.b16 %v5044_v55 }
 0xb09   : > { %6276 = vmatmul.msk.bf16.vlgmr.msrb.gmra.mxu0 %vm1805_vm5, %v5089_v54 }
 0xb0a   : > { %v11050_v30 = vpop.xlane.xlu2 %4735  ;;  %v5090_v17 = vpack.c.b16 %v5084_v32, %v5083_v24 }
 0xb0b   : > { %v11052_v6 = vpop.eup %7077 }
 0xb0c   : > { %v4911_v15 = vsel %vm1805_vm5, %v11052_v6, 0.0 }
 0xb0d   : > { %4912 = vadd.xlane.f32.xlu2 %v4911_v15 }
 0xb10   : > { %v4895_v28 = vpop.xlane.xlu1 %4894 }
 0xb11   : > { %5170 = vrot.lane.b32.xlu0 %v12160_v9, %s7203_s9  ;;  %7079 = vrcp.f32 %v4895_v28 }
 0xb12   : > { %v5173_v36 = vpop.permute.xlu2 %5172 }
 0xb13   : > { %5194 = vmatpush.bf16.msrb.mxu1 %v5173_v36 }
 0xb15   : > { %4747 = vmax.xlane.f32.xlu2 %v4746_v59 }
 0xb17   : > { %v7080_v54 = vpop.eup %7079 }
 0xb18   : > { %v4898_v29 = vpop.xlane.xlu1 %4897  ;;  %v5013_v61 = vmul.f32 %v7080_v54, %v10974_v62 }
 0xb19   : > { %6277 = vmatmul.msk.bf16.gmra.mxu0 %vm1805_vm5, %v5090_v17  ;;  %7081 = vrcp.f32 %v4898_v29  ;;  %5168 = vrot.lane.b32.xlu0 %v12161_v7, %s7203_s9  ;;  %v4612_v7 = vpop.f32.mrf.mxu2 }
 0xb1a   : > { %v5045_v15 = vpack.c.bf16 %v5013_v61, %v5013_v61  ;;  %v11077_v61 = vadd.f32 %v10801_v10, %v4612_v7 }
 0xb1c   : > { %v5085_v36 = vunpack.c.l.b16 %v5045_v15 }
 0xb1f   : > { %v7082_v18 = vpop.eup %7081 }
 0xb20   : > { %v5014_v31 = vmul.f32 %v7082_v18, %v10981_v5  ;;  %v4730_v55 = vpop.xlane.xlu1 %4729  ;;  %v4796_v18 = vsub.f32 %v10964_v25, %v4724_v47 }
 0xb21   : > { %v4798_v28 = vsub.f32 %v10990_v53, %v4730_v55  ;;  %v4615_v55 = vpop.f32.mrf.mxu2 }
 0xb22   : > { %v5046_v9 = vpack.c.bf16 %v5014_v31, %v5014_v31  ;;  %v4752_v31 = vsel %vm1805_vm5, %v11077_v61, -inf  ;;  %v11091_v25 = vadd.f32 %v10814_v34, %v4615_v55  ;;  %v11103_v34 = vadd.f32 %v10830_v19, %v11037_v60 }
 0xb23   : > { %v4843_v32 = vmul.f32 1.442695, %v4798_v28  ;;  %v4839_v28 = vmul.f32 1.442695, %v4796_v18 }
 0xb24   : > { %v5086_v24 = vunpack.c.l.b16 %v5046_v9  ;;  %v11088_v9 = vadd.f32 %v10835_v57, %v11034_v43 }
 0xb25   : > { %7083 = vpow2.f32 %v4843_v32 }
 0xb26   : > { %v5091_v59 = vpack.c.b16 %v5086_v24, %v5085_v36  ;;  %v4737_v36 = vsel %vm1805_vm5, %v11088_v9, -inf  ;;  %v4755_v24 = vsel %vm1805_vm5, %v11091_v25, -inf }
 0xb28   : > { %v4718_v17 = vpop.xlane.xlu0 %4717 }
 0xb29   : > { %v4794_v29 = vsub.f32 %v10996_v40, %v4718_v17  ;;  %6278 = vmatmul.msk.bf16.gmra.mxu0 %vm1805_vm5, %v5091_v59 }
 0xb2b   : > { %v4835_v62 = vmul.f32 1.442695, %v4794_v29  ;;  %v11072_v54 = vpop.eup %7083 }
 0xb2c   : > { %v4920_v5 = vsel %vm1805_vm5, %v11072_v54, 0.0 }
 0xb2d   : > { %7085 = vpow2.f32 %v4835_v62  ;;  %4921 = vadd.xlane.f32.xlu2 %v4920_v5 }
 0xb2e   : > { %7087 = vrcp.f32 %v4901_v23 }
 0xb30   : > { %v4727_v53 = vpop.xlane.xlu0 %4726 }
 0xb31   : > { %v4797_v23 = vsub.f32 %v11012_v20, %v4727_v53  ;;  %v4740_v53 = vsel %vm1805_vm5, %v11103_v34, -inf }
 0xb33   : > { %v11080_v15 = vpop.eup %7085  ;;  %v4841_v43 = vmul.f32 1.442695, %v4797_v23 }
 0xb34   : > { %v4908_v40 = vsel %vm1805_vm5, %v11080_v15, 0.0  ;;  %v7088_v32 = vpop.eup %7087 }
 0xb35   : > { %4909 = vadd.xlane.f32.xlu1 %v4908_v40  ;;  %4753 = vmax.xlane.f32.xlu2 %v4752_v31  ;;  %v5015_v47 = vmul.f32 %v7088_v32, %v10955_v39  ;;  %v4733_v40 = vpop.xlane.xlu1 %4732 }
 0xb37   : > { %v5047_v29 = vpack.c.bf16 %v5015_v47, %v5015_v47  ;;  %v4617_v47 = vpop.f32.mrf.mxu2 }
 0xb38   : > { %v4904_v10 = vpop.xlane.xlu0 %4903 }
 0xb39   : > { %7089 = vrcp.f32 %v4904_v10  ;;  %v5087_v7 = vunpack.c.l.b16 %v5047_v29 }
 0xb3a   : > { %7091 = vpow2.f32 %v4839_v28  ;;  %v11117_v28 = vadd.f32 %v10863_v8, %v4610_v33 }
 0xb3b   : > { %7093 = vpow2.f32 %v4841_v43 }
 0xb3c   : > { %v4749_v10 = vsel %vm1805_vm5, %v11117_v28, -inf }
 0xb3d   : > { %4738 = vmax.xlane.f32.xlu1 %v4737_v36  ;;  %4756 = vmax.xlane.f32.xlu2 %v4755_v24  ;;  %v4800_v24 = vsub.f32 %v10967_v27, %v11050_v30 }
 0xb3f   : > { %v7090_v59 = vpop.eup %7089  ;;  %v4847_v43 = vmul.f32 1.442695, %v4800_v24 }
 0xb40   : > { %v11099_v17 = vpop.eup %7091  ;;  %v5016_v20 = vmul.f32 %v7090_v59, %v11020_v4  ;;  %v4799_v4 = vsub.f32 %v11001_v11, %v4733_v40  ;;  %v11128_v11 = vadd.f32 %v10885_v2, %v4617_v47  ;;  %v11138_v59 = vadd.f32 %v10787_v50, %v11046_v0 }
 0xb41   : > { %v4914_v62 = vsel %vm1805_vm5, %v11099_v17, 0.0  ;;  %v11110_v31 = vpop.eup %7093 }
 0xb42   : > { %v5048_v39 = vpack.c.bf16 %v5016_v20, %v5016_v20  ;;  %v4917_v60 = vsel %vm1805_vm5, %v11110_v31, 0.0  ;;  %v4845_v55 = vmul.f32 1.442695, %v4799_v4  ;;  %v4758_v33 = vsel %vm1805_vm5, %v11128_v11, -inf }
 0xb43   : > { %4915 = vadd.xlane.f32.xlu0 %v4914_v62  ;;  %v4743_v29 = vsel %vm1805_vm5, %v11138_v59, -inf  ;;  %v4669_v62 = vpop.f32.mrf.mxu3 }
 0xb44   : > { %v5088_v5 = vunpack.c.l.b16 %v5048_v39  ;;  %7095 = vpow2.f32 %v4845_v55 }
 0xb45   : > { %4741 = vmax.xlane.f32.xlu1 %v4740_v53  ;;  %7097 = vpow2.f32 %v4847_v43  ;;  %v11150_v53 = vadd.f32 %v10835_v57, %v4669_v62 }
 0xb46   : > { %v5092_v18 = vpack.c.b16 %v5088_v5, %v5087_v7 }
 0xb47   : > { %v4761_v40 = vsel %vm1805_vm5, %v11150_v53, -inf }
 0xb48   : > { %6279 = vmatmul.msk.bf16.gmra.mxu0 %vm1805_vm5, %v5092_v18 }
 0xb4a   : > { %v11121_v32 = vpop.eup %7095 }
 0xb4b   : > { %4918 = vadd.xlane.f32.xlu0 %v4917_v60  ;;  %v4923_v23 = vsel %vm1805_vm5, %v11121_v32, 0.0  ;;  %v11142_v39 = vpop.eup %7097  ;;  %v11146_v0 = vpop.f32.mrf.mxu3 }
 0xb4c   : > { %v4926_v27 = vsel %vm1805_vm5, %v11142_v39, 0.0 }
 0xb53   : > { %4750 = vmax.xlane.f32.xlu0 %v4749_v10  ;;  %v11152_v18 = vpop.f32.mrf.mxu3 }
 0xb5b   : > { %4924 = vadd.xlane.f32.xlu0 %v4923_v23  ;;  %v4676_v10 = vpop.f32.mrf.mxu3 }
 0xb5e   : > { %5166 = vrot.lane.b32.xlu1 %v8715_v35, %s7203_s9 }
 0xb63   : > { %4759 = vmax.xlane.f32.xlu0 %v4758_v33  ;;  %v4679_v33 = vpop.f32.mrf.mxu3 }
 0xb64   : > { %v11167_v43 = vadd.f32 %v10863_v8, %v4679_v33 }
 0xb70   : > { %v4907_v36 = vpop.xlane.xlu0 %4906 }
 0xb77   : > { %5245 = vrot.lane.b32.xlu0 %v12128_v21, %s7203_s9 }
 0xb80   : > { %v4913_v20 = vpop.xlane.xlu2 %4912 }
 0xb83   : > { %v5171_v35 = vpop.permute.xlu0 %5170 }
 0xb84   : > { %5195 = vmatpush.bf16.msrb.mxu1 %v5171_v35 }
 0xb88   : > { %4744 = vmax.xlane.f32.xlu1 %v4743_v29  ;;  %v4748_v30 = vpop.xlane.xlu2 %4747 }
 0xb89   : > { %v4804_v7 = vsub.f32 %v11058_v49, %v4748_v30  ;;  %v11161_v49 = vadd.f32 %v10851_v51, %v4676_v10  ;;  %v4773_v51 = vsel %vm1805_vm5, %v11167_v43, -inf }
 0xb8b   : > { %v5169_v21 = vpop.permute.xlu0 %5168  ;;  %v4855_v5 = vmul.f32 1.442695, %v4804_v7  ;;  %v4770_v47 = vsel %vm1805_vm5, %v11161_v49, -inf }
 0xb8c   : > { %5196 = vmatpush.bf16.msrb.mxu1 %v5169_v21 }
 0xb8d   : > { %7099 = vpow2.f32 %v4855_v5 }
 0xb90   : > { %4927 = vadd.xlane.f32.xlu1 %v4926_v27 }
 0xb93   : > { %v11156_v4 = vpop.eup %7099 }
 0xb94   : > { %v4938_v55 = vsel %vm1805_vm5, %v11156_v4, 0.0 }
 0xba1   : > { %4762 = vmax.xlane.f32.xlu0 %v4761_v40 }
 0xba8   : > { %v4910_v60 = vpop.xlane.xlu1 %4909 }
 0xba9   : > { %4939 = vadd.xlane.f32.xlu0 %v4938_v55 }
 0xbb0   : > { %v4739_v57 = vpop.xlane.xlu1 %4738 }
 0xbb1   : > { %v4801_v23 = vsub.f32 %v11088_v9, %v4739_v57  ;;  %4771 = vmax.xlane.f32.xlu0 %v4770_v47 }
 0xbb3   : > { %v4849_v24 = vmul.f32 1.442695, %v4801_v23 }
 0xbb5   : > { %7101 = vpow2.f32 %v4849_v24 }
 0xbb6   : > { %v4916_v35 = vpop.xlane.xlu0 %4915  ;;  %7103 = vrcp.f32 %v4910_v60 }
 0xbb8   : > { %v4742_v29 = vpop.xlane.xlu1 %4741 }
 0xbb9   : > { %v4802_v21 = vsub.f32 %v11103_v34, %v4742_v29  ;;  %4774 = vmax.xlane.f32.xlu0 %v4773_v51 }
 0xbbb   : > { %v11172_v62 = vpop.eup %7101  ;;  %v4851_v9 = vmul.f32 1.442695, %v4802_v21 }
 0xbbc   : > { %v4929_v27 = vsel %vm1805_vm5, %v11172_v62, 0.0  ;;  %v7104_v30 = vpop.eup %7103 }
 0xbbd   : > { %7105 = vpow2.f32 %v4851_v9  ;;  %4930 = vadd.xlane.f32.xlu1 %v4929_v27  ;;  %v5018_v40 = vmul.f32 %v7104_v30, %v11080_v15  ;;  %v4922_v30 = vpop.xlane.xlu2 %4921 }
 0xbbe   : > { %7107 = vrcp.f32 %v4907_v36  ;;  %v4919_v8 = vpop.xlane.xlu0 %4918 }
 0xbbf   : > { %v5050_v10 = vpack.c.bf16 %v5018_v40, %v5018_v40  ;;  %7109 = vrcp.f32 %v4916_v35 }
 0xbc0   : > { %7111 = vrcp.f32 %v4913_v20 }
 0xbc1   : > { %v5155_v23 = vunpack.c.l.b16 %v5050_v10 }
 0xbc3   : > { %v11176_v7 = vpop.eup %7105 }
 0xbc4   : > { %v4932_v34 = vsel %vm1805_vm5, %v11176_v7, 0.0  ;;  %v7108_v5 = vpop.eup %7107 }
 0xbc5   : > { %4933 = vadd.xlane.f32.xlu2 %v4932_v34  ;;  %v5017_v60 = vmul.f32 %v7108_v5, %v11040_v14  ;;  %v7110_v29 = vpop.eup %7109 }
 0xbc6   : > { %v11181_v55 = vpop.xlane.xlu0 %4750  ;;  %v7112_v21 = vpop.eup %7111  ;;  %v5020_v15 = vmul.f32 %v7110_v29, %v11099_v17  ;;  %v11204_v29 = vadd.f32 %v10830_v19, %v11146_v0 }
 0xbc7   : > { %v5049_v57 = vpack.c.bf16 %v5017_v60, %v5017_v60  ;;  %v5019_v51 = vmul.f32 %v7112_v21, %v11052_v6 }
 0xbc8   : > { %v5052_v20 = vpack.c.bf16 %v5020_v15, %v5020_v15  ;;  %v4764_v15 = vsel %vm1805_vm5, %v11204_v29, -inf }
 0xbc9   : > { %v5154_v47 = vunpack.c.l.b16 %v5049_v57  ;;  %v5051_v27 = vpack.c.bf16 %v5019_v51, %v5019_v51  ;;  %v11212_v51 = vadd.f32 %v10787_v50, %v11152_v18 }
 0xbca   : > { %v5157_v34 = vunpack.c.l.b16 %v5052_v20  ;;  %v4681_v20 = vpop.f32.mrf.mxu3 }
 0xbcb   : > { %v5162_v24 = vpack.c.b16 %v5155_v23, %v5154_v47  ;;  %v5156_v17 = vunpack.c.l.b16 %v5051_v27 }
 0xbce   : > { %v4925_v36 = vpop.xlane.xlu0 %4924 }
 0xbd0   : > { %v5167_v33 = vpop.permute.xlu1 %5166 }
 0xbd1   : > { %5197 = vmatpush.bf16.msrb.mxu1 %v5167_v33 }
 0xbd4   : > { %6280 = vmatmul.msk.bf16.vlgmr.msrb.gmra.mxu1 %vm1805_vm5, %v5162_v24  ;;  %v4754_v24 = vpop.xlane.xlu2 %4753 }
 0xbd6   : > { %5243 = vrot.lane.b32.xlu1 %v12011_v44, %s7203_s9  ;;  %v4760_v14 = vpop.xlane.xlu0 %4759  ;;  %v5163_v44 = vpack.c.b16 %v5157_v34, %v5156_v17 }
 0xbd7   : > { %v4808_v35 = vsub.f32 %v11128_v11, %v4760_v14 }
 0xbd9   : > { %v4863_v9 = vmul.f32 1.442695, %v4808_v35 }
 0xbdb   : > { %7113 = vpow2.f32 %v4863_v9  ;;  %v4767_v9 = vsel %vm1805_vm5, %v11212_v51, -inf }
 0xbdc   : > { %7115 = vrcp.f32 %v4919_v8  ;;  %v4757_v35 = vpop.xlane.xlu2 %4756 }
 0xbdd   : > { %5241 = vrot.lane.b32.xlu2 %v8689_v41, %s7203_s9  ;;  %7117 = vrcp.f32 %v4922_v30 }
 0xbde   : > { %7119 = vrcp.f32 %v4925_v36 }
 0xbe1   : > { %v11192_v5 = vpop.eup %7113 }
 0xbe2   : > { %v7116_v40 = vpop.eup %7115  ;;  %v4950_v6 = vsel %vm1805_vm5, %v11192_v5, 0.0 }
 0xbe3   : > { %4951 = vadd.xlane.f32.xlu0 %v4950_v6  ;;  %v7118_v11 = vpop.eup %7117  ;;  %v5021_v8 = vmul.f32 %v7116_v40, %v11110_v31  ;;  %v4806_v31 = vsub.f32 %v11077_v61, %v4754_v24  ;;  %v4807_v61 = vsub.f32 %v11091_v25, %v4757_v35  ;;  %v5126_v35 = vpop.f32.mrf.mxu0 }
 0xbe4   : > { %6281 = vmatmul.msk.bf16.gmra.mxu1 %vm1805_vm5, %v5163_v44  ;;  %v5022_v41 = vmul.f32 %v7118_v11, %v11072_v54  ;;  %v7120_v0 = vpop.eup %7119 }
 0xbe5   : > { %5239 = vrot.lane.b32.xlu2 %v12126_v37, %s7203_s9  ;;  %v5053_v60 = vpack.c.bf16 %v5021_v8, %v5021_v8  ;;  %v4859_v14 = vmul.f32 1.442695, %v4806_v31  ;;  %v5023_v36 = vmul.f32 %v7120_v0, %v11121_v32  ;;  %v4861_v30 = vmul.f32 1.442695, %v4807_v61  ;;  %v4684_v32 = vpop.f32.mrf.mxu3  ;;  %v12163_v0 = vld [vmem:[#allocation60_spill] sm:$0xff] }
 0xbe6   : > { %v5054_v57 = vpack.c.bf16 %v5022_v41, %v5022_v41 }
 0xbe7   : > { %v5158_v23 = vunpack.c.l.b16 %v5053_v60  ;;  %v5055_v34 = vpack.c.bf16 %v5023_v36, %v5023_v36 }
 0xbe8   : > { %v5159_v47 = vunpack.c.l.b16 %v5054_v57 }
 0xbe9   : > { %v5246_v10 = vpop.permute.xlu0 %5245 }
 0xbea   : > { %5267 = vmatpush.bf16.msra.mxu2 %v5246_v10  ;;  %v5164_v33 = vpack.c.b16 %v5159_v47, %v5158_v23 }
 0xbed   : > { %v4686_v23 = vpop.f32.mrf.mxu3 }
 0xbf4   : > { %6282 = vmatmul.msk.bf16.gmra.mxu1 %vm1805_vm5, %v5164_v33  ;;  %v7182_v33 = vld [vmem:[%s11748_s7 + $0xe8] sm:$0xff] }
 0xbf5   : > { %v11242_v24 = vadd.f32 %v7182_v33, %v4681_v20 }
 0xbfb   : > { %v4745_v21 = vpop.xlane.xlu1 %4744 }
 0xbfc   : > { %v4803_v37 = vsub.f32 %v11138_v59, %v4745_v21  ;;  %v4805_v59 = vsub.f32 %v11117_v28, %v11181_v55  ;;  %v5160_v55 = vunpack.c.l.b16 %v5055_v34  ;;  %v11245_v21 = vadd.f32 %v10885_v2, %v4686_v23 }
 0xbfe   : > { %v4853_v54 = vmul.f32 1.442695, %v4803_v37  ;;  %v4857_v27 = vmul.f32 1.442695, %v4805_v59  ;;  %v4782_v37 = vsel %vm1805_vm5, %v11245_v21, -inf  ;;  %v5128_v59 = vpop.f32.mrf.mxu0 }
 0xbff   : > { %v6367_v36 = vpack.i.bf16 %v5128_v59, %v5126_v35 }
 0xc00   : > { %4765 = vmax.xlane.f32.xlu1 %v4764_v15  ;;  %7121 = vpow2.f32 %v4853_v54  ;;  %v7183_v54 = vld [vmem:[%s11748_s7 + $0xf0] sm:$0xff] }
 0xc01   : > { %v11256_v15 = vadd.f32 %v7183_v54, %v4684_v32 }
 0xc03   : > { %v4928_v19 = vpop.xlane.xlu1 %4927 }
 0xc04   : > { %7123 = vrcp.f32 %v4928_v19  ;;  %v12162_v19 = vld [vmem:[#allocation4_spill] sm:$0xff] }
 0xc05   : > { %7125 = vpow2.f32 %v4859_v14  ;;  %v4779_v14 = vsel %vm1805_vm5, %v11256_v15, -inf  ;;  %v6357_v20 = vpack.i.bf16 %v12163_v0, %v12162_v19  ;;  %v12164_v19 = vld [vmem:[#allocation14_spill] sm:$0xff] }
 0xc06   : > { %v11220_v50 = vpop.eup %7121  ;;  %7127 = vpow2.f32 %v4857_v27  ;;  %v12165_v0 = vld [vmem:[#allocation66_spill] sm:$0xff] }
 0xc07   : > { %v4935_v25 = vsel %vm1805_vm5, %v11220_v50, 0.0  ;;  %7129 = vpow2.f32 %v4861_v30 }
 0xc08   : > { %4768 = vmax.xlane.f32.xlu1 %v4767_v9 }
 0xc0a   : > { %v7124_v18 = vpop.eup %7123 }
 0xc0b   : > { %v5024_v17 = vmul.f32 %v7124_v18, %v11142_v39  ;;  %v11223_v44 = vpop.eup %7125 }
 0xc0c   : > { %v4944_v6 = vsel %vm1805_vm5, %v11223_v44, 0.0  ;;  %v11229_v8 = vpop.eup %7127 }
 0xc0d   : > { %v5056_v28 = vpack.c.bf16 %v5024_v17, %v5024_v17  ;;  %v11232_v39 = vpop.eup %7129  ;;  %v4941_v60 = vsel %vm1805_vm5, %v11229_v8, 0.0 }
 0xc0e   : > { %4936 = vadd.xlane.f32.xlu2 %v4935_v25  ;;  %v4947_v57 = vsel %vm1805_vm5, %v11232_v39, 0.0 }
 0xc0f   : > { %v5161_v40 = vunpack.c.l.b16 %v5056_v28 }
 0xc10   : > { %4945 = vadd.xlane.f32.xlu1 %v4944_v6 }
 0xc11   : > { %v5165_v11 = vpack.c.b16 %v5161_v40, %v5160_v55 }
 0xc13   : > { %6283 = vmatmul.msk.bf16.gmra.mxu1 %vm1805_vm5, %v5165_v11 }
 0xc14   : > { %v4763_v41 = vpop.xlane.xlu0 %4762 }
 0xc15   : > { %v4809_v10 = vsub.f32 %v11150_v53, %v4763_v41  ;;  %v4776_v53 = vsel %vm1805_vm5, %v11242_v24, -inf }
 0xc16   : > { %4942 = vadd.xlane.f32.xlu2 %v4941_v60 }
 0xc17   : > { %v4865_v47 = vmul.f32 1.442695, %v4809_v10 }
 0xc18   : > { %4948 = vadd.xlane.f32.xlu1 %v4947_v57 }
 0xc19   : > { %7131 = vpow2.f32 %v4865_v47 }
 0xc1c   : > { %v4940_v6 = vpop.xlane.xlu0 %4939 }
 0xc1e   : > { %4777 = vmax.xlane.f32.xlu2 %v4776_v53 }
 0xc1f   : > { %v11251_v31 = vpop.eup %7131 }
 0xc20   : > { %4783 = vmax.xlane.f32.xlu1 %v4782_v37  ;;  %v4953_v2 = vsel %vm1805_vm5, %v11251_v31, 0.0 }
 0xc21   : > { %4954 = vadd.xlane.f32.xlu0 %v4953_v2 }
 0xc26   : > { %4780 = vmax.xlane.f32.xlu2 %v4779_v14 }
 0xc30   : > { %v4931_v9 = vpop.xlane.xlu1 %4930 }
 0xc35   : > { %6358 = vrot.lane.b32.xlu0 %v6357_v20, %s7204_s14 }
 0xc38   : > { %v4934_v61 = vpop.xlane.xlu2 %4933 }
 0xc39   : > { %5318 = vrot.lane.b32.xlu1 %v12072_v46, %s7203_s9  ;;  %7133 = vrcp.f32 %v4934_v61 }
 0xc3a   : > { %7135 = vrcp.f32 %v4931_v9 }
 0xc3d   : > { %6368 = vrot.lane.b32.xlu0 %v6367_v36, %s7205_s15 }
 0xc3f   : > { %v7134_v27 = vpop.eup %7133 }
 0xc40   : > { %v7136_v18 = vpop.eup %7135  ;;  %v5026_v30 = vmul.f32 %v7134_v27, %v11176_v7  ;;  %v5242_v34 = vpop.permute.xlu2 %5241 }
 0xc41   : > { %5316 = vrot.lane.b32.xlu1 %v12069_v63, %s7203_s9  ;;  %v5025_v46 = vmul.f32 %v7136_v18, %v11172_v62  ;;  %v4772_v7 = vpop.xlane.xlu0 %4771 }
 0xc42   : > { %v5058_v28 = vpack.c.bf16 %v5026_v30, %v5026_v30  ;;  %v4812_v11 = vsub.f32 %v11161_v49, %v4772_v7 }
 0xc43   : > { %v5057_v25 = vpack.c.bf16 %v5025_v46, %v5025_v46 }
 0xc44   : > { %v5228_v32 = vunpack.c.l.b16 %v5058_v28  ;;  %v4871_v41 = vmul.f32 1.442695, %v4812_v11  ;;  %v6362_v11 = vpack.i.bf16 %v10689_v45, %v10679_v52 }
 0xc45   : > { %5314 = vrot.lane.b32.xlu0 %v12075_v38, %s7203_s9  ;;  %v5227_v55 = vunpack.c.l.b16 %v5057_v25  ;;  %v11276_v38 = vpop.f32.mrf.mxu0 }
 0xc46   : > { %7137 = vpow2.f32 %v4871_v41 }
 0xc47   : > { %v5235_v63 = vpack.c.b16 %v5228_v32, %v5227_v55 }
 0xc48   : > { %v5244_v17 = vpop.permute.xlu1 %5243  ;;  %v5240_v40 = vpop.permute.xlu2 %5239 }
 0xc49   : > { %5268 = vmatpush.bf16.msra.mxu2 %v5244_v17  ;;  %v11300_v32 = vpop.xlane.xlu0 %4774 }
 0xc4c   : > { %v11278_v62 = vpop.eup %7137 }
 0xc4d   : > { %5269 = vmatpush.bf16.msra.mxu2 %v5242_v34  ;;  %v4962_v60 = vsel %vm1805_vm5, %v11278_v62, 0.0  ;;  %v11282_v10 = vpop.f32.mrf.mxu0 }
 0xc51   : > { %5270 = vmatpush.bf16.msra.mxu2 %v5240_v40 }
 0xc54   : > { %6284 = vmatmul.msk.bf16.vlgmr.msra.gmra.mxu2 %vm1805_vm5, %v5235_v63 }
 0xc55   : > { %v5136_v53 = vpop.f32.mrf.mxu0 }
 0xc5d   : > { %v5138_v59 = vpop.f32.mrf.mxu0 }
 0xc5e   : > { %v6397_v34 = vpack.i.bf16 %v5138_v59, %v5136_v53 }
 0xc6f   : > { %4963 = vadd.xlane.f32.xlu0 %v4962_v60 }
 0xc73   : > { %v4766_v57 = vpop.xlane.xlu1 %4765 }
 0xc74   : > { %v4810_v23 = vsub.f32 %v11204_v29, %v4766_v57  ;;  %v6387_v29 = vpack.i.bf16 %v12165_v0, %v12164_v19  ;;  %v4952_v57 = vpop.xlane.xlu0 %4951  ;;  %v12167_v19 = vld [vmem:[#allocation16_spill] sm:$0xff] }
 0xc76   : > { %v4867_v47 = vmul.f32 1.442695, %v4810_v23 }
 0xc78   : > { %7139 = vpow2.f32 %v4867_v47 }
 0xc79   : > { %7141 = vrcp.f32 %v4940_v6 }
 0xc7b   : > { %v4769_v33 = vpop.xlane.xlu1 %4768 }
 0xc7c   : > { %v4811_v49 = vsub.f32 %v11212_v51, %v4769_v33 }
 0xc7e   : > { %v11286_v37 = vpop.eup %7139  ;;  %v4869_v54 = vmul.f32 1.442695, %v4811_v49 }
 0xc7f   : > { %v4956_v2 = vsel %vm1805_vm5, %v11286_v37, 0.0  ;;  %v7142_v35 = vpop.eup %7141 }
 0xc80   : > { %7143 = vpow2.f32 %v4869_v54  ;;  %4957 = vadd.xlane.f32.xlu2 %v4956_v2  ;;  %v5028_v20 = vmul.f32 %v7142_v35, %v11156_v4  ;;  %v12166_v35 = vld [vmem:[#allocation56_spill] sm:$0xff] }
 0xc81   : > { %v4937_v14 = vpop.xlane.xlu2 %4936  ;;  %v6372_v0 = vpack.i.bf16 %v12167_v19, %v12166_v35  ;;  %v12182_v35 = vld [vmem:[#allocation74_spill] sm:$0xff] }
 0xc82   : > { %7145 = vrcp.f32 %v4937_v14  ;;  %v5060_v9 = vpack.c.bf16 %v5028_v20, %v5028_v20 }
 0xc83   : > { %6388 = vrot.lane.b32.xlu0 %v6387_v29, %s7204_s14  ;;  %v4946_v18 = vpop.xlane.xlu1 %4945 }
 0xc84   : > { %v5230_v4 = vunpack.c.l.b16 %v5060_v9 }
 0xc86   : > { %v11294_v51 = vpop.eup %7143 }
 0xc87   : > { %v4959_v61 = vsel %vm1805_vm5, %v11294_v51, 0.0 }
 0xc88   : > { %v7146_v36 = vpop.eup %7145  ;;  %4960 = vadd.xlane.f32.xlu1 %v4959_v61 }
 0xc89   : > { %v5027_v27 = vmul.f32 %v7146_v36, %v11220_v50  ;;  %v4943_v30 = vpop.xlane.xlu2 %4942 }
 0xc8a   : > { %7147 = vrcp.f32 %v4943_v30  ;;  %v6392_v30 = vpack.i.bf16 %v10717_v22, %v10712_v16 }
 0xc8b   : > { %v5059_v46 = vpack.c.bf16 %v5027_v27, %v5027_v27  ;;  %7149 = vrcp.f32 %v4946_v18  ;;  %6398 = vrot.lane.b32.xlu0 %v6397_v34, %s7205_s15  ;;  %v4949_v60 = vpop.xlane.xlu1 %4948 }
 0xc8d   : > { %v5229_v17 = vunpack.c.l.b16 %v5059_v46  ;;  %v11341_v46 = vpop.f32.mrf.mxu1 }
 0xc8f   : > { %v5236_v28 = vpack.c.b16 %v5230_v4, %v5229_v17  ;;  %v12168_v17 = vld [vmem:[#allocation67_spill] sm:$0xff] }
 0xc90   : > { %v7148_v25 = vpop.eup %7147 }
 0xc91   : > { %v4778_v55 = vpop.xlane.xlu2 %4777  ;;  %6285 = vmatmul.msk.bf16.gmra.mxu2 %vm1805_vm5, %v5236_v28  ;;  %v7150_v40 = vpop.eup %7149  ;;  %v5029_v6 = vmul.f32 %v7148_v25, %v11229_v8  ;;  %v12169_v28 = vld [vmem:[#allocation68_spill] sm:$0xff] }
 0xc92   : > { %v4814_v50 = vsub.f32 %v11242_v24, %v4778_v55  ;;  %v5030_v7 = vmul.f32 %v7150_v40, %v11223_v44  ;;  %v6402_v25 = vpack.i.bf16 %v12169_v28, %v12168_v17  ;;  %v12187_v28 = vld [vmem:[#allocation79_spill] sm:$0xff] }
 0xc93   : > { %v5061_v41 = vpack.c.bf16 %v5029_v6, %v5029_v6  ;;  %v4784_v49 = vpop.xlane.xlu1 %4783  ;;  %v12172_v6 = vld [vmem:[#allocation20_spill] sm:$0xff] }
 0xc94   : > { %v4875_v63 = vmul.f32 1.442695, %v4814_v50  ;;  %v5062_v23 = vpack.c.bf16 %v5030_v7, %v5030_v7  ;;  %v11313_v45 = vpop.xlane.xlu0 %4954  ;;  %v4816_v2 = vsub.f32 %v11245_v21, %v4784_v49 }
 0xc95   : > { %v5231_v47 = vunpack.c.l.b16 %v5061_v41  ;;  %v11347_v22 = vpop.f32.mrf.mxu1  ;;  %v12174_v41 = vld [vmem:[#allocation69_spill] sm:$0xff] }
 0xc96   : > { %7151 = vpow2.f32 %v4875_v63  ;;  %v5232_v8 = vunpack.c.l.b16 %v5062_v23  ;;  %v4879_v20 = vmul.f32 1.442695, %v4816_v2  ;;  %v12173_v63 = vld [vmem:[#allocation9_spill] sm:$0xff] }
 0xc97   : > { %7153 = vrcp.f32 %v4949_v60  ;;  %v6417_v7 = vpack.i.bf16 %v12173_v63, %v12172_v6  ;;  %v12175_v60 = vld [vmem:[#allocation70_spill] sm:$0xff]  ;;  %v12180_v2 = vld [vmem:[#allocation57_spill] sm:$0xff] }
 0xc98   : > { %6363 = vrot.lane.b32.xlu2 %v6362_v11, %s7206_s16  ;;  %7155 = vrcp.f32 %v4952_v57  ;;  %v5237_v24 = vpack.c.b16 %v5232_v8, %v5231_v47  ;;  %v4813_v11 = vsub.f32 %v11167_v43, %v11300_v32  ;;  %v6477_v57 = vpack.i.bf16 %v12175_v60, %v12174_v41  ;;  %v12178_v43 = vld [vmem:[#allocation72_spill] sm:$0xff] }
 0xc99   : > { %7157 = vpow2.f32 %v4879_v20  ;;  %v4781_v47 = vpop.xlane.xlu2 %4780 }
 0xc9a   : > { %v4873_v23 = vmul.f32 1.442695, %v4813_v11 }
 0xc9c   : > { %v11309_v33 = vpop.eup %7151  ;;  %7159 = vpow2.f32 %v4873_v23  ;;  %v6407_v23 = vpack.i.bf16 %v10735_v1, %v10724_v12 }
 0xc9d   : > { %v4968_v44 = vsel %vm1805_vm5, %v11309_v33, 0.0  ;;  %v7154_v52 = vpop.eup %7153  ;;  %v5204_v50 = vpop.f32.mrf.mxu1 }
 0xc9e   : > { %4969 = vadd.xlane.f32.xlu1 %v4968_v44  ;;  %v7156_v53 = vpop.eup %7155  ;;  %v5031_v54 = vmul.f32 %v7154_v52, %v11232_v39  ;;  %v6377_v39 = vpack.i.bf16 %v10705_v42, %v10699_v56  ;;  %v6382_v56 = vpack.i.bf16 %v11282_v10, %v11276_v38  ;;  %v5141_v42 = vpop.f32.mrf.mxu0  ;;  %v12170_v38 = vld [vmem:[#allocation7_spill] sm:$0xff]  ;;  %v4815_v44 = vsub.f32 %v11256_v15, %v4781_v47  ;;  %v12181_v15 = vld [vmem:[#allocation73_spill] sm:$0xff] }
 0xc9f   : > { %v5032_v14 = vmul.f32 %v7156_v53, %v11192_v5  ;;  %v11332_v27 = vpop.eup %7157  ;;  %v12171_v10 = vld [vmem:[#allocation11_spill] sm:$0xff]  ;;  %v6507_v19 = vpack.i.bf16 %v12182_v35, %v12181_v15 }
 0xca0   : > { %5312 = vrot.lane.b32.xlu2 %v12071_v3, %s7203_s9  ;;  %v5063_v29 = vpack.c.bf16 %v5031_v54, %v5031_v54  ;;  %v4974_v34 = vsel %vm1805_vm5, %v11332_v27, 0.0  ;;  %v6447_v40 = vpack.i.bf16 %v12171_v10, %v12170_v38  ;;  %v12177_v52 = vld [vmem:[#allocation71_spill] sm:$0xff]  ;;  %v4877_v49 = vmul.f32 1.442695, %v4815_v44  ;;  %v12179_v54 = vld [vmem:[#allocation28_spill] sm:$0xff] }
 0xca1   : > { %6286 = vmatmul.msk.bf16.gmra.mxu2 %vm1805_vm5, %v5237_v24  ;;  %v5064_v3 = vpack.c.bf16 %v5032_v14, %v5032_v14  ;;  %v12176_v24 = vpack.i.bf16 %v10651_v13, %v10646_v48  ;;  %v6492_v32 = vpack.i.bf16 %v12178_v43, %v12177_v52  ;;  %v6432_v14 = vpack.i.bf16 %v12180_v2, %v12179_v54  ;;  %v6323_v13 = vld [vmem:[%s11746_s5 + $0x8] sm:$0xff]  ;;  %v12191_v52 = vld [vmem:[#allocation13_spill] sm:$0xff]  ;;  %v12192_v43 = vld [vmem:[#allocation2_spill] sm:$0xff] }
 0xca2   : > { %v5233_v61 = vunpack.c.l.b16 %v5063_v29  ;;  %v11369_v53 = vpop.eup %7159  ;;  %7161 = vpow2.f32 %v4877_v49  ;;  %5937 = vmatpush.bf16.msra.mxu0 %v6323_v13  ;;  %v12195_v49 = vld [vmem:[#allocation21_spill] sm:$0xff]  ;;  %v12197_v13 = vld [vmem:[#allocation23_spill] sm:$0xff] }
 0xca3   : > { %v5234_v9 = vunpack.c.l.b16 %v5064_v3  ;;  %v4965_v48 = vsel %vm1805_vm5, %v11369_v53, 0.0  ;;  %v6322_v3 = vld [vmem:[%s11746_s5] sm:$0xff]  ;;  %7163 = vrcp.f32 %v11313_v45 }
 0xca5   : > { %v5238_v21 = vpack.c.b16 %v5234_v9, %v5233_v61  ;;  %v5206_v8 = vpop.f32.mrf.mxu1  ;;  %v12183_v61 = vld [vmem:[#allocation75_spill] sm:$0xff] }
 0xca6   : > { %v5143_v16 = vpop.f32.mrf.mxu0  ;;  %v6442_v20 = vpack.i.bf16 %v5206_v8, %v5204_v50  ;;  %5938 = vmatpush.bf16.msra.mxu0 %v6322_v3 }
 0xca7   : > { %v11323_v59 = vpop.permute.xlu0 %6358  ;;  %v6412_v55 = vpack.i.bf16 %v5143_v16, %v5141_v42 }
 0xca8   : > { %6373 = vrot.lane.b32.xlu2 %v6372_v0, %s7204_s14  ;;  %v11382_v29 = vpop.eup %7161  ;;  %v6360_v38 = vunpack.i.l.bf16 %v11323_v59 }
 0xca9   : > { %v7164_v17 = vpop.eup %7163 }
 0xcaa   : > { %v5033_v45 = vmul.f32 %v7164_v17, %v11251_v31  ;;  %v12204_v17 = vld [vmem:[#allocation12_spill] sm:$0xff] }
 0xcab   : > { %v5319_v36 = vpop.permute.xlu1 %5318 }
 0xcac   : > { %5340 = vmatpush.bf16.msrb.mxu3 %v5319_v36  ;;  %v12184_v36 = vld [vmem:[#allocation76_spill] sm:$0xff]  ;;  %v5065_v47 = vpack.c.bf16 %v5033_v45, %v5033_v45 }
 0xcad   : > { %v5209_v0 = vpop.f32.mrf.mxu1  ;;  %v6522_v9 = vpack.i.bf16 %v12184_v36, %v12183_v61  ;;  %v12199_v61 = vld [vmem:[#allocation3_spill] sm:$0xff]  ;;  %v12200_v36 = vld [vmem:[#allocation34_spill] sm:$0xff] }
 0xcae   : > { %v5300_v1 = vunpack.c.l.b16 %v5065_v47 }
 0xcaf   : > { %v11328_v5 = vpop.permute.xlu0 %6368 }
 0xcb0   : > { %6378 = vrot.lane.b32.xlu2 %v6377_v39, %s7206_s16  ;;  %v4971_v39 = vsel %vm1805_vm5, %v11382_v29, 0.0  ;;  %v6370_v41 = vunpack.i.l.bf16 %v11328_v5 }
 0xcb1   : > { %6287 = vmatmul.msk.bf16.gmra.mxu2 %vm1805_vm5, %v5238_v21 }
 0xcb3   : > { %v5317_v18 = vpop.permute.xlu1 %5316 }
 0xcb4   : > { %5341 = vmatpush.bf16.msrb.mxu3 %v5317_v18 }
 0xcb5   : > { %4975 = vadd.xlane.f32.xlu0 %v4974_v34  ;;  %v5211_v21 = vpop.f32.mrf.mxu1  ;;  %v12186_v34 = vld [vmem:[#allocation78_spill] sm:$0xff] }
 0xcb6   : > { %v6457_v18 = vpack.i.bf16 %v5211_v21, %v5209_v0  ;;  %v6427_v0 = vpack.i.bf16 %v11347_v22, %v11341_v46 }
 0xcb7   : > { %6393 = vrot.lane.b32.xlu1 %v6392_v30, %s7206_s16  ;;  %v5315_v4 = vpop.permute.xlu0 %5314  ;;  %v12185_v30 = vld [vmem:[#allocation77_spill] sm:$0xff] }
 0xcb8   : > { %6383 = vrot.lane.b32.xlu2 %v6382_v56, %s7205_s15  ;;  %5342 = vmatpush.bf16.msrb.mxu3 %v5315_v4  ;;  %v6537_v56 = vpack.i.bf16 %v12186_v34, %v12185_v30  ;;  %v6467_v4 = vpack.i.bf16 %v10901_v26, %v10898_v58  ;;  %v12189_v58 = vld [vmem:[#allocation59_spill] sm:$0xff] }
 0xcb9   : > { %v12201_v34 = vld [vmem:[#allocation83_spill] sm:$0xff] }
 0xcbf   : > { %6403 = vrot.lane.b32.xlu1 %v6402_v25, %s7204_s14  ;;  %v12188_v25 = vld [vmem:[#allocation80_spill] sm:$0xff] }
 0xcc0   : > { %v6552_v16 = vpack.i.bf16 %v12188_v25, %v12187_v28  ;;  %v12205_v28 = vld [vmem:[#allocation17_spill] sm:$0xff] }
 0xcc7   : > { %6413 = vrot.lane.b32.xlu1 %v6412_v55, %s7205_s15  ;;  %v6361_v55 = vunpack.i.h.bf16 %v11323_v59  ;;  %v6371_v59 = vunpack.i.h.bf16 %v11328_v5  ;;  %v12194_v5 = vld [vmem:[#allocation5_spill] sm:$0xff] }
 0xcc8   : > { %v6567_v54 = vpack.i.bf16 %v12195_v49, %v12194_v5  ;;  %v12215_v5 = vld [vmem:[#allocation27_spill] sm:$0xff] }
 0xcc9   : > { %6448 = vrot.lane.b32.xlu0 %v6447_v40, %s7204_s14  ;;  %v5750_v26 = vsel %vm1448_vm3, %v12189_v58, %v6361_v55 }
 0xccf   : > { %6418 = vrot.lane.b32.xlu1 %v6417_v7, %s7204_s14  ;;  %v12190_v7 = vld [vmem:[#allocation35_spill] sm:$0xff] }
 0xcd0   : > { %v5749_v11 = vsel %vm1448_vm3, %v12190_v7, %v6360_v38  ;;  %v12207_v38 = vld [vmem:[#allocation86_spill] sm:$0xff] }
 0xcd1   : > { %6478 = vrot.lane.b32.xlu0 %v6477_v57, %s7204_s14 }
 0xcd7   : > { %6423 = vrot.lane.b32.xlu1 %v12176_v24, %s7206_s16  ;;  %v11427_v12 = vpop.f32.mrf.mxu2 }
 0xcd9   : > { %6493 = vrot.lane.b32.xlu0 %v6492_v32, %s7204_s14  ;;  %v12193_v32 = vpack.i.bf16 %v12191_v52, %v12192_v43 }
 0xcdf   : > { %6433 = vrot.lane.b32.xlu1 %v6432_v14, %s7204_s14  ;;  %v5274_v22 = vpop.f32.mrf.mxu2 }
 0xce1   : > { %4966 = vadd.xlane.f32.xlu2 %v4965_v48  ;;  %6508 = vrot.lane.b32.xlu0 %v6507_v19, %s7204_s14  ;;  %v12196_v48 = vld [vmem:[#allocation81_spill] sm:$0xff] }
 0xce2   : > { %v4964_v8 = vpop.xlane.xlu0 %4963 }
 0xce7   : > { %6443 = vrot.lane.b32.xlu1 %v6442_v20, %s7205_s15  ;;  %v12198_v20 = vpack.i.bf16 %v12196_v48, %v12197_v13 }
 0xce9   : > { %4972 = vadd.xlane.f32.xlu2 %v4971_v39  ;;  %6523 = vrot.lane.b32.xlu0 %v6522_v9, %s7204_s14  ;;  %v6582_v9 = vpack.i.bf16 %v12200_v36, %v12199_v61 }
 0xcef   : > { %6458 = vrot.lane.b32.xlu1 %v6457_v18, %s7205_s15 }
 0xcf1   : > { %6538 = vrot.lane.b32.xlu0 %v6537_v56, %s7204_s14  ;;  %v12202_v56 = vld [vmem:[#allocation82_spill] sm:$0xff] }
 0xcf3   : > { %v4958_v42 = vpop.xlane.xlu2 %4957 }
 0xcf4   : > { %7165 = vrcp.f32 %v4958_v42  ;;  %v12203_v42 = vpack.i.bf16 %v12201_v34, %v12202_v56 }
 0xcf7   : > { %6468 = vrot.lane.b32.xlu1 %v6467_v4, %s7206_s16 }
 0xcf9   : > { %6553 = vrot.lane.b32.xlu0 %v6552_v16, %s7204_s14 }
 0xcfa   : > { %v7166_v10 = vpop.eup %7165 }
 0xcfb   : > { %v5034_v40 = vmul.f32 %v7166_v10, %v11286_v37  ;;  %v6364_v50 = vpop.permute.xlu2 %6363  ;;  %v4961_v57 = vpop.xlane.xlu1 %4960 }
 0xcfc   : > { %v6366_v6 = vunpack.i.h.bf16 %v6364_v50  ;;  %v6365_v63 = vunpack.i.l.bf16 %v6364_v50  ;;  %7167 = vrcp.f32 %v4961_v57  ;;  %v12213_v57 = vld [vmem:[#allocation46_spill] sm:$0xff] }
 0xcfd   : > { %v5066_v60 = vpack.c.bf16 %v5034_v40, %v5034_v40  ;;  %7169 = vrcp.f32 %v4964_v8 }
 0xcfe   : > { %v5782_v31 = vsel %vm5781_vm14, %v5749_v11, %v6365_v63  ;;  %v5783_v37 = vsel %vm5781_vm14, %v5750_v26, %v6366_v6  ;;  %v12209_v6 = vld [vmem:[#allocation43_spill] sm:$0xff]  ;;  %v12210_v63 = vld [vmem:[#allocation26_spill] sm:$0xff]  ;;  %v5214_v11 = vpop.f32.mrf.mxu1 }
 0xcff   : > { %v5815_v44 = vsel %vm5814_vm7, %v5782_v31, %v6370_v41  ;;  %v5816_v24 = vsel %vm5814_vm7, %v5783_v37, %v6371_v59  ;;  %6483 = vrot.lane.b32.xlu1 %v12193_v32, %s7206_s16  ;;  %v5301_v14 = vunpack.c.l.b16 %v5066_v60  ;;  %v12211_v7 = vpack.i.bf16 %v12209_v6, %v12210_v63  ;;  %v12212_v41 = vld [vmem:[#allocation51_spill] sm:$0xff]  ;;  %v12214_v32 = vld [vmem:[#allocation38_spill] sm:$0xff] }
 0xd00   : > { %v5847_v2 = vpack.c.bf16 %v5816_v24, %v5815_v44  ;;  %v6389_v24 = vpop.permute.xlu0 %6388  ;;  %v6462_v49 = vpack.i.bf16 %v12215_v5, %v12214_v32 }
 0xd01   : > { %6408 = vrot.lane.b32.xlu2 %v6407_v23, %s7206_s16  ;;  %6568 = vrot.lane.b32.xlu0 %v6567_v54, %s7204_s14  ;;  %v5308_v35 = vpack.c.b16 %v5301_v14, %v5300_v1  ;;  %v12217_v14 = vld [vmem:[#allocation29_spill] sm:$0xff]  ;;  %v6391_v48 = vunpack.i.h.bf16 %v6389_v24  ;;  %v6390_v13 = vunpack.i.l.bf16 %v6389_v24 }
 0xd02   : > { %6300 = vmatmul.msk.bf16.vlgmr.msra.gmra.mxu0 %vm339_vm0, %v5847_v2  ;;  %v7168_v19 = vpop.eup %7167  ;;  %v12216_v2 = vld [vmem:[#allocation22_spill] sm:$0xff] }
 0xd03   : > { %v5313_v15 = vpop.permute.xlu2 %5312  ;;  %v7170_v3 = vpop.eup %7169  ;;  %v5035_v39 = vmul.f32 %v7168_v19, %v11294_v51  ;;  %v12206_v51 = vpack.i.bf16 %v12204_v17, %v12205_v28  ;;  %v12218_v1 = vpack.i.bf16 %v12216_v2, %v12217_v14 }
 0xd04   : > { %5343 = vmatpush.bf16.msrb.mxu3 %v5313_v15  ;;  %v5036_v21 = vmul.f32 %v7170_v3, %v11278_v62  ;;  %v12208_v62 = vld [vmem:[#allocation87_spill] sm:$0xff]  ;;  %v12220_v3 = vld [vmem:[#allocation10_spill] sm:$0xff] }
 0xd05   : > { %v5067_v18 = vpack.c.bf16 %v5035_v39, %v5035_v39  ;;  %v6527_v10 = vpack.i.bf16 %v12208_v62, %v12207_v38  ;;  %v12224_v38 = vld [vmem:[#allocation8_spill] sm:$0xff]  ;;  %v12225_v62 = vld [vmem:[#allocation15_spill] sm:$0xff] }
 0xd06   : > { %v5068_v30 = vpack.c.bf16 %v5036_v21, %v5036_v21 }
 0xd07   : > { %6498 = vrot.lane.b32.xlu1 %v12198_v20, %s7206_s16  ;;  %6288 = vmatmul.msk.bf16.vlgmr.msrb.gmra.mxu3 %vm1805_vm5, %v5308_v35  ;;  %v5302_v4 = vunpack.c.l.b16 %v5067_v18  ;;  %v5216_v35 = vpop.f32.mrf.mxu1  ;;  %v12219_v20 = vld [vmem:[#allocation6_spill] sm:$0xff] }
 0xd08   : > { %v5303_v25 = vunpack.c.l.b16 %v5068_v30  ;;  %v12221_v61 = vpack.i.bf16 %v12219_v20, %v12220_v3  ;;  %v6399_v36 = vpop.permute.xlu0 %6398  ;;  %v12223_v30 = vld [vmem:[#allocation25_spill] sm:$0xff] }
 0xd09   : > { %6428 = vrot.lane.b32.xlu2 %v6427_v0, %s7205_s15  ;;  %6583 = vrot.lane.b32.xlu0 %v6582_v9, %s7204_s14  ;;  %v6472_v0 = vpack.i.bf16 %v5216_v35, %v5214_v11  ;;  %v5753_v34 = vsel %vm1448_vm3, %v12223_v30, %v6390_v13  ;;  %v6401_v56 = vunpack.i.h.bf16 %v6399_v36 }
 0xd0a   : > { %v5309_v45 = vpack.c.b16 %v5303_v25, %v5302_v4 }
 0xd0b   : > { %v6374_v46 = vpop.permute.xlu2 %6373 }
 0xd0c   : > { %v6376_v40 = vunpack.i.h.bf16 %v6374_v46  ;;  %v6375_v50 = vunpack.i.l.bf16 %v6374_v46  ;;  %v12222_v46 = vld [vmem:[#allocation48_spill] sm:$0xff] }
 0xd0d   : > { %v5754_v18 = vsel %vm1448_vm3, %v12222_v46, %v6391_v48 }
 0xd0e   : > { %v5752_v60 = vsel %vm1448_vm3, %v12212_v41, %v6376_v40  ;;  %v5751_v31 = vsel %vm1448_vm3, %v12213_v57, %v6375_v50  ;;  %v12227_v50 = vld [vmem:[#allocation85_spill] sm:$0xff] }
 0xd0f   : > { %6513 = vrot.lane.b32.xlu1 %v12203_v42, %s7206_s16  ;;  %v6400_v42 = vunpack.i.l.bf16 %v6399_v36 }
 0xd11   : > { %6438 = vrot.lane.b32.xlu2 %v12206_v51, %s7206_s16  ;;  %v4970_v15 = vpop.xlane.xlu1 %4969 }
 0xd12   : > { %7171 = vrcp.f32 %v4970_v15 }
 0xd13   : > { %v6379_v16 = vpop.permute.xlu2 %6378 }
 0xd14   : > { %v5277_v55 = vpop.f32.mrf.mxu2  ;;  %v6381_v58 = vunpack.i.h.bf16 %v6379_v16  ;;  %v6380_v26 = vunpack.i.l.bf16 %v6379_v16  ;;  %v6487_v16 = vpack.i.bf16 %v5274_v22, %v11427_v12 }
 0xd16   : > { %v5784_v8 = vsel %vm5781_vm14, %v5751_v31, %v6380_v26  ;;  %v5785_v44 = vsel %vm5781_vm14, %v5752_v60, %v6381_v58  ;;  %v12228_v58 = vld [vmem:[#allocation84_spill] sm:$0xff] }
 0xd17   : > { %6528 = vrot.lane.b32.xlu1 %v6527_v10, %s7206_s16  ;;  %6289 = vmatmul.msk.bf16.gmra.mxu3 %vm1805_vm5, %v5309_v45  ;;  %v12226_v10 = vpack.i.bf16 %v12224_v38, %v12225_v62  ;;  %v12229_v26 = vpack.i.bf16 %v12227_v50, %v12228_v58 }
 0xd19   : > { %6453 = vrot.lane.b32.xlu2 %v12211_v7, %s7206_s16 }
 0xd1b   : > { %v6384_v59 = vpop.permute.xlu2 %6383 }
 0xd1c   : > { %v6386_v37 = vunpack.i.h.bf16 %v6384_v59  ;;  %v6385_v23 = vunpack.i.l.bf16 %v6384_v59  ;;  %v5279_v47 = vpop.f32.mrf.mxu2  ;;  %v7172_v59 = vpop.eup %7171 }
 0xd1d   : > { %v6502_v40 = vpack.i.bf16 %v5279_v47, %v5277_v55  ;;  %v5038_v55 = vmul.f32 %v7172_v59, %v11309_v33 }
 0xd1e   : > { %v5817_v52 = vsel %vm5814_vm7, %v5784_v8, %v6385_v23  ;;  %v5818_v43 = vsel %vm5814_vm7, %v5785_v44, %v6386_v37 }
 0xd1f   : > { %v5848_v54 = vpack.c.bf16 %v5818_v43, %v5817_v52  ;;  %6543 = vrot.lane.b32.xlu1 %v12218_v1, %s7206_s16  ;;  %v5070_v57 = vpack.c.bf16 %v5038_v55, %v5038_v55  ;;  %v12231_v1 = vld [vmem:[#allocation55_spill] sm:$0xff]  ;;  %v12234_v55 = vld [vmem:[#allocation42_spill] sm:$0xff] }
 0xd21   : > { %6463 = vrot.lane.b32.xlu2 %v6462_v49, %s7204_s14  ;;  %6301 = vmatmul.msk.bf16.gmra.mxu0 %vm339_vm0, %v5848_v54  ;;  %v5305_v8 = vunpack.c.l.b16 %v5070_v57  ;;  %v12230_v54 = vld [vmem:[#allocation30_spill] sm:$0xff] }
 0xd24   : > { %v5282_v19 = vpop.f32.mrf.mxu2 }
 0xd27   : > { %6558 = vrot.lane.b32.xlu1 %v12221_v61, %s7206_s16 }
 0xd28   : > { %v4976_v31 = vpop.xlane.xlu0 %4975 }
 0xd29   : > { %v6394_v9 = vpop.permute.xlu1 %6393  ;;  %6473 = vrot.lane.b32.xlu2 %v6472_v0, %s7205_s15 }
 0xd2a   : > { %v6396_v39 = vunpack.i.h.bf16 %v6394_v9  ;;  %v6395_v21 = vunpack.i.l.bf16 %v6394_v9 }
 0xd2c   : > { %v5786_v4 = vsel %vm5781_vm14, %v5753_v34, %v6395_v21  ;;  %v5787_v17 = vsel %vm5781_vm14, %v5754_v18, %v6396_v39  ;;  %v5284_v45 = vpop.f32.mrf.mxu2 }
 0xd2d   : > { %v5819_v28 = vsel %vm5814_vm7, %v5786_v4, %v6400_v42  ;;  %v5820_v51 = vsel %vm5814_vm7, %v5787_v17, %v6401_v56  ;;  %v6517_v12 = vpack.i.bf16 %v5284_v45, %v5282_v19 }
 0xd2e   : > { %v5849_v25 = vpack.c.bf16 %v5820_v51, %v5819_v28  ;;  %v12232_v28 = vld [vmem:[#allocation24_spill] sm:$0xff] }
 0xd2f   : > { %6573 = vrot.lane.b32.xlu1 %v12226_v10, %s7206_s16 }
 0xd31   : > { %6488 = vrot.lane.b32.xlu2 %v6487_v16, %s7205_s15  ;;  %6302 = vmatmul.msk.bf16.gmra.mxu0 %vm339_vm0, %v5849_v25  ;;  %v6404_v7 = vpop.permute.xlu1 %6403  ;;  %v12233_v25 = vld [vmem:[#allocation52_spill] sm:$0xff] }
 0xd32   : > { %v6406_v24 = vunpack.i.h.bf16 %v6404_v7  ;;  %v6405_v52 = vunpack.i.l.bf16 %v6404_v7 }
 0xd34   : > { %v5287_v6 = vpop.f32.mrf.mxu2  ;;  %v5756_v2 = vsel %vm1448_vm3, %v12230_v54, %v6406_v24  ;;  %v5755_v15 = vsel %vm1448_vm3, %v12231_v1, %v6405_v52  ;;  %v12236_v1 = vld [vmem:[#allocation44_spill] sm:$0xff] }
 0xd37   : > { %6588 = vrot.lane.b32.xlu1 %v12229_v26, %s7206_s16  ;;  %v11530_v26 = vld [vmem:[%s11747_s6] ss:$0 sm:$0xff] }
 0xd39   : > { %6503 = vrot.lane.b32.xlu2 %v6502_v40, %s7205_s15  ;;  %v6414_v41 = vpop.permute.xlu1 %6413 }
 0xd3a   : > { %v6416_v35 = vunpack.i.h.bf16 %v6414_v41  ;;  %v6415_v19 = vunpack.i.l.bf16 %v6414_v41 }
 0xd3c   : > { %v5289_v22 = vpop.f32.mrf.mxu2 }
 0xd3d   : > { %v6532_v63 = vpack.i.bf16 %v5289_v22, %v5287_v6 }
 0xd41   : > { %6518 = vrot.lane.b32.xlu2 %v6517_v12, %s7205_s15  ;;  %v6419_v5 = vpop.permute.xlu1 %6418 }
 0xd42   : > { %v6420_v34 = vunpack.i.l.bf16 %v6419_v5 }
 0xd44   : > { %v5757_v16 = vsel %vm1448_vm3, %v12233_v25, %v6420_v34 }
 0xd49   : > { %6533 = vrot.lane.b32.xlu2 %v6532_v63, %s7205_s15  ;;  %v6424_v21 = vpop.permute.xlu1 %6423 }
 0xd4a   : > { %v6426_v56 = vunpack.i.h.bf16 %v6424_v21  ;;  %v6425_v42 = vunpack.i.l.bf16 %v6424_v21 }
 0xd4c   : > { %v5790_v38 = vsel %vm5781_vm14, %v5757_v16, %v6425_v42 }
 0xd51   : > { %v6434_v40 = vpop.permute.xlu1 %6433 }
 0xd52   : > { %v6436_v6 = vunpack.i.h.bf16 %v6434_v40  ;;  %v6435_v12 = vunpack.i.l.bf16 %v6434_v40 }
 0xd54   : > { %v4967_v11 = vpop.xlane.xlu2 %4966  ;;  %v5760_v41 = vsel %vm1448_vm3, %v12234_v55, %v6436_v6 }
 0xd55   : > { %7173 = vrcp.f32 %v4967_v11 }
 0xd59   : > { %v6444_v59 = vpop.permute.xlu1 %6443 }
 0xd5b   : > { %v7174_v60 = vpop.eup %7173 }
 0xd5c   : > { %v5037_v37 = vmul.f32 %v7174_v60, %v11369_v53  ;;  %v4973_v23 = vpop.xlane.xlu2 %4972  ;;  %v12235_v60 = vld [vmem:[#allocation37_spill] sm:$0xff] }
 0xd5d   : > { %7175 = vrcp.f32 %v4973_v23  ;;  %v5759_v57 = vsel %vm1448_vm3, %v12235_v60, %v6435_v12  ;;  %v6446_v23 = vunpack.i.h.bf16 %v6444_v59 }
 0xd5e   : > { %v5069_v47 = vpack.c.bf16 %v5037_v37, %v5037_v37  ;;  %7177 = vrcp.f32 %v4976_v31 }
 0xd60   : > { %v5304_v44 = vunpack.c.l.b16 %v5069_v47  ;;  %v6445_v47 = vunpack.i.l.bf16 %v6444_v59 }
 0xd62   : > { %v5310_v43 = vpack.c.b16 %v5305_v8, %v5304_v44 }
 0xd63   : > { %v7176_v32 = vpop.eup %7175 }
 0xd64   : > { %v6409_v49 = vpop.permute.xlu2 %6408  ;;  %6290 = vmatmul.msk.bf16.gmra.mxu3 %vm1805_vm5, %v5310_v43  ;;  %v7178_v33 = vpop.eup %7177  ;;  %v5039_v0 = vmul.f32 %v7176_v32, %v11382_v29  ;;  %v6421_v29 = vunpack.i.h.bf16 %v6419_v5 }
 0xd65   : > { %v6411_v14 = vunpack.i.h.bf16 %v6409_v49  ;;  %v6410_v53 = vunpack.i.l.bf16 %v6409_v49  ;;  %v5040_v20 = vmul.f32 %v7178_v33, %v11332_v27  ;;  %v6449_v5 = vpop.permute.xlu0 %6448 }
 0xd66   : > { %v5071_v9 = vpack.c.bf16 %v5039_v0, %v5039_v0  ;;  %v5758_v51 = vsel %vm1448_vm3, %v12232_v28, %v6421_v29  ;;  %v6451_v33 = vunpack.i.h.bf16 %v6449_v5  ;;  %v6450_v54 = vunpack.i.l.bf16 %v6449_v5 }
 0xd67   : > { %v5789_v48 = vsel %vm5781_vm14, %v5756_v2, %v6411_v14  ;;  %v5788_v13 = vsel %vm5781_vm14, %v5755_v15, %v6410_v53  ;;  %v5072_v39 = vpack.c.bf16 %v5040_v20, %v5040_v20  ;;  %v5791_v62 = vsel %vm5781_vm14, %v5758_v51, %v6426_v56  ;;  %v6459_v53 = vpop.permute.xlu1 %6458 }
 0xd68   : > { %v5821_v3 = vsel %vm5814_vm7, %v5788_v13, %v6415_v19  ;;  %v5822_v61 = vsel %vm5814_vm7, %v5789_v48, %v6416_v35  ;;  %v5306_v46 = vunpack.c.l.b16 %v5071_v9  ;;  %v5762_v15 = vsel %vm1448_vm3, %v12236_v1, %v6451_v33  ;;  %v12237_v35 = vld [vmem:[#allocation58_spill] sm:$0xff] }
 0xd69   : > { %v5850_v36 = vpack.c.bf16 %v5822_v61, %v5821_v3  ;;  %v5307_v30 = vunpack.c.l.b16 %v5072_v39  ;;  %v5761_v19 = vsel %vm1448_vm3, %v12237_v35, %v6450_v54  ;;  %v6461_v3 = vunpack.i.h.bf16 %v6459_v53 }
 0xd6a   : > { %v6460_v61 = vunpack.i.l.bf16 %v6459_v53 }
 0xd6b   : > { %6303 = vmatmul.msk.bf16.gmra.mxu0 %vm339_vm0, %v5850_v36  ;;  %v5311_v27 = vpack.c.b16 %v5307_v30, %v5306_v46 }
 0xd6c   : > { %v6429_v18 = vpop.permute.xlu2 %6428 }
 0xd6d   : > { %v6431_v4 = vunpack.i.h.bf16 %v6429_v18  ;;  %v6430_v17 = vunpack.i.l.bf16 %v6429_v18 }
 0xd6f   : > { %v5824_v10 = vsel %vm5814_vm7, %v5791_v62, %v6431_v4  ;;  %v5823_v45 = vsel %vm5814_vm7, %v5790_v38, %v6430_v17  ;;  %v6469_v42 = vpop.permute.xlu1 %6468  ;;  %v12238_v4 = vld [vmem:[#allocation47_spill] sm:$0xff] }
 0xd70   : > { %v5851_v50 = vpack.c.bf16 %v5824_v10, %v5823_v45  ;;  %v6471_v38 = vunpack.i.h.bf16 %v6469_v42  ;;  %v6470_v62 = vunpack.i.l.bf16 %v6469_v42 }
 0xd74   : > { %6291 = vmatmul.msk.bf16.gmra.mxu3 %vm1805_vm5, %v5311_v27  ;;  %v6439_v58 = vpop.permute.xlu2 %6438  ;;  %v12239_v27 = vld [vmem:[#allocation33_spill] sm:$0xff] }
 0xd75   : > { %v6441_v22 = vunpack.i.h.bf16 %v6439_v58  ;;  %v6440_v63 = vunpack.i.l.bf16 %v6439_v58 }
 0xd77   : > { %v5793_v31 = vsel %vm5781_vm14, %v5760_v41, %v6441_v22  ;;  %v5792_v37 = vsel %vm5781_vm14, %v5759_v57, %v6440_v63  ;;  %v6479_v63 = vpop.permute.xlu0 %6478 }
 0xd78   : > { %v5825_v8 = vsel %vm5814_vm7, %v5792_v37, %v6445_v47  ;;  %v5826_v44 = vsel %vm5814_vm7, %v5793_v31, %v6446_v23  ;;  %v6481_v41 = vunpack.i.h.bf16 %v6479_v63  ;;  %v6480_v60 = vunpack.i.l.bf16 %v6479_v63  ;;  %v12240_v47 = vld [vmem:[#allocation19_spill] sm:$0xff] }
 0xd79   : > { %v5852_v43 = vpack.c.bf16 %v5826_v44, %v5825_v8  ;;  %v12241_v44 = vld [vmem:[#allocation45_spill] sm:$0xff] }
 0xd7a   : > { %v5766_v8 = vsel %vm1448_vm3, %v12240_v47, %v6481_v41 }
 0xd7b   : > { %6304 = vmatmul.msk.bf16.gmra.mxu0 %vm339_vm0, %v5851_v50 }
 0xd7c   : > { %v6454_v49 = vpop.permute.xlu2 %6453 }
 0xd7d   : > { %v6456_v2 = vunpack.i.h.bf16 %v6454_v49  ;;  %v6455_v14 = vunpack.i.l.bf16 %v6454_v49 }
 0xd7f   : > { %v5940_v7 = vpop.f32.mrf.mxu0  ;;  %v5794_v48 = vsel %vm5781_vm14, %v5761_v19, %v6455_v14  ;;  %v5795_v13 = vsel %vm5781_vm14, %v5762_v15, %v6456_v2  ;;  %v6494_v2 = vpop.permute.xlu0 %6493 }
 0xd80   : > { %v5941_v11 = vadd.f32 %v11530_v26, %v5940_v7  ;;  %v5827_v9 = vsel %vm5814_vm7, %v5794_v48, %v6460_v61  ;;  %v5828_v39 = vsel %vm5814_vm7, %v5795_v13, %v6461_v3  ;;  %v6484_v7 = vpop.permute.xlu1 %6483  ;;  %v6496_v1 = vunpack.i.h.bf16 %v6494_v2  ;;  %v12242_v13 = vld [vmem:[#allocation53_spill] sm:$0xff]  ;;  %v12243_v3 = vld [vmem:[#allocation31_spill] sm:$0xff] }
 0xd81   : > { %v5853_v21 = vpack.c.bf16 %v5828_v39, %v5827_v9  ;;  %v6486_v57 = vunpack.i.h.bf16 %v6484_v7  ;;  %v6485_v31 = vunpack.i.l.bf16 %v6484_v7  ;;  %v6495_v15 = vunpack.i.l.bf16 %v6494_v2 }
 0xd82   : > { %6020 = vst.msk [vmem:[%s11537_s25] sm:$0xff] %vm339_vm0, %v5941_v11 }
 0xd83   : > { %v5767_v61 = vsel %vm1448_vm3, %v12243_v3, %v6495_v15 }
 0xd84   : > { %v6464_v36 = vpop.permute.xlu2 %6463 }
 0xd85   : > { %v6466_v18 = vunpack.i.h.bf16 %v6464_v36  ;;  %v6465_v30 = vunpack.i.l.bf16 %v6464_v36 }
 0xd87   : > { %v5942_v24 = vpop.f32.mrf.mxu0  ;;  %v5764_v17 = vsel %vm1448_vm3, %v12238_v4, %v6466_v18  ;;  %v5763_v28 = vsel %vm1448_vm3, %v12239_v27, %v6465_v30  ;;  %v6509_v18 = vpop.permute.xlu0 %6508 }
 0xd88   : > { %v5943_v52 = vadd.f32 %v11530_v26, %v5942_v24  ;;  %v5796_v45 = vsel %vm5781_vm14, %v5763_v28, %v6470_v62  ;;  %v5797_v40 = vsel %vm5781_vm14, %v5764_v17, %v6471_v38  ;;  %v5765_v24 = vsel %vm1448_vm3, %v12241_v44, %v6480_v60  ;;  %v6499_v14 = vpop.permute.xlu1 %6498  ;;  %v12244_v28 = vld [vmem:[#allocation54_spill] sm:$0xff]  ;;  %v12247_v60 = vld [vmem:[#allocation39_spill] sm:$0xff] }
 0xd89   : > { %v6501_v35 = vunpack.i.h.bf16 %v6499_v14  ;;  %v6500_v19 = vunpack.i.l.bf16 %v6499_v14 }
 0xd8a   : > { %6021 = vst.msk [vmem:[%s11537_s25 + $0x8] sm:$0xff] %vm339_vm0, %v5943_v52  ;;  %v5345_v32 = vpop.f32.mrf.mxu3  ;;  %v5798_v52 = vsel %vm5781_vm14, %v5765_v24, %v6485_v31 }
 0xd8b   : > { %6305 = vmatmul.msk.bf16.gmra.mxu0 %vm339_vm0, %v5852_v43  ;;  %v5799_v43 = vsel %vm5781_vm14, %v5766_v8, %v6486_v57  ;;  %v5800_v36 = vsel %vm5781_vm14, %v5767_v61, %v6500_v19 }
 0xd8c   : > { %v6474_v34 = vpop.permute.xlu2 %6473 }
 0xd8d   : > { %v6476_v51 = vunpack.i.h.bf16 %v6474_v34  ;;  %v6475_v25 = vunpack.i.l.bf16 %v6474_v34  ;;  %v6511_v34 = vunpack.i.h.bf16 %v6509_v18 }
 0xd8f   : > { %v5829_v50 = vsel %vm5814_vm7, %v5796_v45, %v6475_v25  ;;  %v5830_v58 = vsel %vm5814_vm7, %v5797_v40, %v6476_v51  ;;  %v5770_v51 = vsel %vm1448_vm3, %v12244_v28, %v6511_v34  ;;  %v12245_v25 = vld [vmem:[#allocation50_spill] sm:$0xff] }
 0xd90   : > { %v5854_v22 = vpack.c.bf16 %v5830_v58, %v5829_v50  ;;  %v6514_v30 = vpop.permute.xlu1 %6513  ;;  %v6524_v50 = vpop.permute.xlu0 %6523 }
 0xd91   : > { %v6516_v42 = vunpack.i.h.bf16 %v6514_v30  ;;  %v6515_v4 = vunpack.i.l.bf16 %v6514_v30 }
 0xd92   : > { %v5347_v0 = vpop.f32.mrf.mxu3 }
 0xd93   : > { %v6547_v20 = vpack.i.bf16 %v5347_v0, %v5345_v32  ;;  %v5803_v62 = vsel %vm5781_vm14, %v5770_v51, %v6516_v42 }
 0xd94   : > { %v6489_v59 = vpop.permute.xlu2 %6488 }
 0xd95   : > { %6548 = vrot.lane.b32.xlu2 %v6547_v20, %s7205_s15  ;;  %v6491_v37 = vunpack.i.h.bf16 %v6489_v59  ;;  %v6490_v23 = vunpack.i.l.bf16 %v6489_v59  ;;  %v5768_v20 = vsel %vm1448_vm3, %v12242_v13, %v6496_v1  ;;  %v12249_v13 = vld [vmem:[#allocation36_spill] sm:$0xff] }
 0xd96   : > { %v5801_v9 = vsel %vm5781_vm14, %v5768_v20, %v6501_v35 }
 0xd97   : > { %v5831_v32 = vsel %vm5814_vm7, %v5798_v52, %v6490_v23  ;;  %v5832_v5 = vsel %vm5814_vm7, %v5799_v43, %v6491_v37 }
 0xd98   : > { %v5855_v54 = vpack.c.bf16 %v5832_v5, %v5831_v32  ;;  %v6529_v58 = vpop.permute.xlu1 %6528  ;;  %v6539_v43 = vpop.permute.xlu0 %6538 }
 0xd99   : > { %v6531_v63 = vunpack.i.h.bf16 %v6529_v58  ;;  %v6530_v7 = vunpack.i.l.bf16 %v6529_v58 }
 0xd9a   : > { %v5350_v46 = vpop.f32.mrf.mxu3 }
 0xd9b   : > { %6306 = vmatmul.msk.bf16.gmra.mxu0 %vm339_vm0, %v5853_v21 }
 0xd9c   : > { %v6504_v53 = vpop.permute.xlu2 %6503 }
 0xd9d   : > { %v6506_v0 = vunpack.i.h.bf16 %v6504_v53  ;;  %v6505_v48 = vunpack.i.l.bf16 %v6504_v53 }
 0xd9e   : > { %v5945_v29 = vpop.f32.mrf.mxu0 }
 0xd9f   : > { %v5946_v56 = vadd.f32 %v11530_v26, %v5945_v29  ;;  %v5833_v39 = vsel %vm5814_vm7, %v5800_v36, %v6505_v48  ;;  %v5834_v21 = vsel %vm5814_vm7, %v5801_v9, %v6506_v0  ;;  %v12248_v0 = vld [vmem:[#allocation40_spill] sm:$0xff] }
 0xda0   : > { %v6544_v32 = vpop.permute.xlu1 %6543  ;;  %v6554_v30 = vpop.permute.xlu0 %6553 }
 0xda1   : > { %6022 = vst.msk [vmem:[%s11537_s25 + $0x10] sm:$0xff] %vm339_vm0, %v5946_v56  ;;  %v6510_v56 = vunpack.i.l.bf16 %v6509_v18  ;;  %v6546_v53 = vunpack.i.h.bf16 %v6544_v32  ;;  %v6545_v1 = vunpack.i.l.bf16 %v6544_v32  ;;  %v6556_v42 = vunpack.i.h.bf16 %v6554_v30 }
 0xda2   : > { %v5352_v16 = vpop.f32.mrf.mxu3 }
 0xda3   : > { %v6562_v10 = vpack.i.bf16 %v5352_v16, %v5350_v46  ;;  %v5856_v46 = vpack.c.bf16 %v5834_v21, %v5833_v39  ;;  %v5769_v16 = vsel %vm1448_vm3, %v12245_v25, %v6510_v56 }
 0xda4   : > { %v6519_v29 = vpop.permute.xlu2 %6518  ;;  %v5802_v38 = vsel %vm5781_vm14, %v5769_v16, %v6515_v4  ;;  %v6555_v4 = vunpack.i.l.bf16 %v6554_v30 }
 0xda5   : > { %6563 = vrot.lane.b32.xlu2 %v6562_v10, %s7205_s15  ;;  %v6521_v17 = vunpack.i.h.bf16 %v6519_v29  ;;  %v6520_v27 = vunpack.i.l.bf16 %v6519_v29 }
 0xda6   : > { %v5947_v6 = vpop.f32.mrf.mxu0 }
 0xda7   : > { %v5948_v12 = vadd.f32 %v11530_v26, %v5947_v6  ;;  %v5835_v10 = vsel %vm5814_vm7, %v5802_v38, %v6520_v27  ;;  %v5836_v45 = vsel %vm5814_vm7, %v5803_v62, %v6521_v17  ;;  %v12250_v62 = vld [vmem:[#allocation61_spill] sm:$0xff] }
 0xda8   : > { %v5857_v40 = vpack.c.bf16 %v5836_v45, %v5835_v10  ;;  %v6559_v29 = vpop.permute.xlu1 %6558  ;;  %v5776_v10 = vsel %vm1448_vm3, %v12250_v62, %v6556_v42  ;;  %v12251_v45 = vld [vmem:[#allocation49_spill] sm:$0xff] }
 0xda9   : > { %6023 = vst.msk [vmem:[%s11537_s25 + $0x18] sm:$0xff] %vm339_vm0, %v5948_v12  ;;  %v6526_v12 = vunpack.i.h.bf16 %v6524_v50  ;;  %v6561_v28 = vunpack.i.h.bf16 %v6559_v29  ;;  %v6560_v51 = vunpack.i.l.bf16 %v6559_v29 }
 0xdab   : > { %6307 = vmatmul.msk.bf16.gmra.mxu0 %vm339_vm0, %v5854_v22  ;;  %v6525_v22 = vunpack.i.l.bf16 %v6524_v50  ;;  %v5809_v58 = vsel %vm5781_vm14, %v5776_v10, %v6561_v28  ;;  %v12255_v28 = vld [vmem:[#allocation64_spill] sm:$0xff] }
 0xdac   : > { %v6534_v6 = vpop.permute.xlu2 %6533 }
 0xdad   : > { %v6535_v59 = vunpack.i.l.bf16 %v6534_v6  ;;  %v5771_v57 = vsel %vm1448_vm3, %v12247_v60, %v6525_v22 }
 0xdae   : > { %v5950_v11 = vpop.f32.mrf.mxu0  ;;  %v5804_v31 = vsel %vm5781_vm14, %v5771_v57, %v6530_v7 }
 0xdaf   : > { %v5951_v55 = vadd.f32 %v11530_v26, %v5950_v11  ;;  %v6536_v11 = vunpack.i.h.bf16 %v6534_v6  ;;  %v5837_v23 = vsel %vm5814_vm7, %v5804_v31, %v6535_v59 }
 0xdb0   : > { %v6574_v32 = vpop.permute.xlu1 %6573 }
 0xdb1   : > { %6024 = vst.msk [vmem:[%s11537_s25 + $0x20] sm:$0xff] %vm339_vm0, %v5951_v55  ;;  %v12246_v55 = vld [vmem:[#allocation41_spill] sm:$0xff] }
 0xdb2   : > { %v5772_v41 = vsel %vm1448_vm3, %v12246_v55, %v6526_v12 }
 0xdb3   : > { %v5805_v37 = vsel %vm5781_vm14, %v5772_v41, %v6531_v63 }
 0xdb4   : > { %v5838_v47 = vsel %vm5814_vm7, %v5805_v37, %v6536_v11 }
 0xdb5   : > { %v5858_v24 = vpack.c.bf16 %v5838_v47, %v5837_v23 }
 0xdb6   : > { %v5952_v49 = vpop.f32.mrf.mxu0 }
 0xdb7   : > { %v5953_v33 = vadd.f32 %v11530_v26, %v5952_v49 }
 0xdb9   : > { %6025 = vst.msk [vmem:[%s11537_s25 + $0x28] sm:$0xff] %vm339_vm0, %v5953_v33  ;;  %v6541_v33 = vunpack.i.h.bf16 %v6539_v43 }
 0xdbb   : > { %6308 = vmatmul.msk.bf16.gmra.mxu0 %vm339_vm0, %v5855_v54  ;;  %v6540_v54 = vunpack.i.l.bf16 %v6539_v43  ;;  %v5774_v48 = vsel %vm1448_vm3, %v12248_v0, %v6541_v33  ;;  %v6569_v43 = vpop.permute.xlu0 %6568 }
 0xdbc   : > { %v5807_v61 = vsel %vm5781_vm14, %v5774_v48, %v6546_v53  ;;  %v6570_v33 = vunpack.i.l.bf16 %v6569_v43 }
 0xdbd   : > { %v5773_v20 = vsel %vm1448_vm3, %v12249_v13, %v6540_v54 }
 0xdbe   : > { %v5806_v3 = vsel %vm5781_vm14, %v5773_v20, %v6545_v1  ;;  %v12252_v1 = vld [vmem:[#allocation63_spill] sm:$0xff] }
 0xdcb   : > { %6309 = vmatmul.msk.bf16.gmra.mxu0 %vm339_vm0, %v5856_v46 }
 0xddb   : > { %6310 = vmatmul.msk.bf16.gmra.mxu0 %vm339_vm0, %v5857_v40  ;;  %v5775_v40 = vsel %vm1448_vm3, %v12251_v45, %v6555_v4 }
 0xddc   : > { %v5808_v50 = vsel %vm5781_vm14, %v5775_v40, %v6560_v51 }
 0xde7   : > { %v5355_v8 = vpop.f32.mrf.mxu3 }
 0xde8   : > { %v5955_v44 = vpop.f32.mrf.mxu0 }
 0xde9   : > { %v5956_v52 = vadd.f32 %v11530_v26, %v5955_v44 }
 0xdeb   : > { %6026 = vst.msk [vmem:[%s11537_s25 + $0x30] sm:$0xff] %vm339_vm0, %v5956_v52  ;;  %6311 = vmatmul.msk.bf16.gmra.mxu0 %vm339_vm0, %v5858_v24 }
 0xdef   : > { %v6549_v5 = vpop.permute.xlu2 %6548  ;;  %v5357_v49 = vpop.f32.mrf.mxu3 }
 0xdf0   : > { %v6577_v2 = vpack.i.bf16 %v5357_v49, %v5355_v8  ;;  %v5957_v14 = vpop.f32.mrf.mxu0  ;;  %v6551_v35 = vunpack.i.h.bf16 %v6549_v5  ;;  %v6550_v19 = vunpack.i.l.bf16 %v6549_v5  ;;  %v6571_v49 = vunpack.i.h.bf16 %v6569_v43 }
 0xdf1   : > { %v5958_v15 = vadd.f32 %v11530_v26, %v5957_v14  ;;  %v6575_v14 = vunpack.i.l.bf16 %v6574_v32 }
 0xdf2   : > { %6578 = vrot.lane.b32.xlu2 %v6577_v2, %s7205_s15  ;;  %v5839_v36 = vsel %vm5814_vm7, %v5806_v3, %v6550_v19  ;;  %v5840_v9 = vsel %vm5814_vm7, %v5807_v61, %v6551_v35  ;;  %v6576_v2 = vunpack.i.h.bf16 %v6574_v32  ;;  %v12253_v35 = vld [vmem:[#allocation62_spill] sm:$0xff] }
 0xdf3   : > { %6027 = vst.msk [vmem:[%s11537_s25 + $0x38] sm:$0xff] %vm339_vm0, %v5958_v15  ;;  %v5859_v46 = vpack.c.bf16 %v5840_v9, %v5839_v36  ;;  %v5778_v15 = vsel %vm1448_vm3, %v12252_v1, %v6571_v49  ;;  %v5777_v19 = vsel %vm1448_vm3, %v12253_v35, %v6570_v33 }
 0xdf4   : > { %v5810_v13 = vsel %vm5781_vm14, %v5777_v19, %v6575_v14  ;;  %v5811_v20 = vsel %vm5781_vm14, %v5778_v15, %v6576_v2 }
 0xdf7   : > { %v5360_v39 = vpop.f32.mrf.mxu3 }
 0xdf8   : > { %v5960_v21 = vpop.f32.mrf.mxu0 }
 0xdf9   : > { %v5961_v18 = vadd.f32 %v11530_v26, %v5960_v21  ;;  %v6584_v21 = vpop.permute.xlu0 %6583 }
 0xdfa   : > { %v6586_v30 = vunpack.i.h.bf16 %v6584_v21  ;;  %v6585_v29 = vunpack.i.l.bf16 %v6584_v21 }
 0xdfb   : > { %6028 = vst.msk [vmem:[%s11537_s25 + $0x40] sm:$0xff] %vm339_vm0, %v5961_v18  ;;  %6312 = vmatmul.msk.bf16.gmra.mxu0 %vm339_vm0, %v5859_v46  ;;  %v6589_v46 = vpop.permute.xlu1 %6588 }
 0xdfc   : > { %v6590_v42 = vunpack.i.l.bf16 %v6589_v46  ;;  %v5779_v51 = vsel %vm1448_vm3, %v12255_v28, %v6585_v29 }
 0xdff   : > { %v6564_v34 = vpop.permute.xlu2 %6563  ;;  %v5362_v56 = vpop.f32.mrf.mxu3 }
 0xe00   : > { %v6592_v17 = vpack.i.bf16 %v5362_v56, %v5360_v39  ;;  %v5962_v27 = vpop.f32.mrf.mxu0  ;;  %v6566_v16 = vunpack.i.h.bf16 %v6564_v34  ;;  %v6565_v38 = vunpack.i.l.bf16 %v6564_v34  ;;  %v6591_v56 = vunpack.i.h.bf16 %v6589_v46 }
 0xe01   : > { %v5963_v25 = vadd.f32 %v11530_v26, %v5962_v27 }
 0xe02   : > { %6593 = vrot.lane.b32.xlu2 %v6592_v17, %s7205_s15  ;;  %v5841_v6 = vsel %vm5814_vm7, %v5808_v50, %v6565_v38  ;;  %v5842_v12 = vsel %vm5814_vm7, %v5809_v58, %v6566_v16  ;;  %v12254_v17 = vld [vmem:[#allocation65_spill] sm:$0xff]  ;;  %v5812_v38 = vsel %vm5781_vm14, %v5779_v51, %v6590_v42 }
 0xe03   : > { %6029 = vst.msk [vmem:[%s11537_s25 + $0x48] sm:$0xff] %vm339_vm0, %v5963_v25  ;;  %v5860_v63 = vpack.c.bf16 %v5842_v12, %v5841_v6  ;;  %v5780_v27 = vsel %vm1448_vm3, %v12254_v17, %v6586_v30 }
 0xe04   : > { %v5813_v62 = vsel %vm5781_vm14, %v5780_v27, %v6591_v56 }
 0xe08   : > { %v5965_v22 = vpop.f32.mrf.mxu0 }
 0xe09   : > { %v5966_v7 = vadd.f32 %v11530_v26, %v5965_v22 }
 0xe0b   : > { %6030 = vst.msk [vmem:[%s11537_s25 + $0x50] sm:$0xff] %vm339_vm0, %v5966_v7  ;;  %6313 = vmatmul.msk.bf16.gmra.mxu0 %vm339_vm0, %v5860_v63 }
 0xe10   : > { %v5967_v11 = vpop.f32.mrf.mxu0 }
 0xe11   : > { %v5968_v59 = vadd.f32 %v11530_v26, %v5967_v11 }
 0xe13   : > { %6031 = vst.msk [vmem:[%s11537_s25 + $0x58] sm:$0xff] %vm339_vm0, %v5968_v59 }
 0xe18   : > { %v5970_v55 = vpop.f32.mrf.mxu0 }
 0xe19   : > { %v5971_v41 = vadd.f32 %v11530_v26, %v5970_v55 }
 0xe1b   : > { %6032 = vst.msk [vmem:[%s11537_s25 + $0x60] sm:$0xff] %vm339_vm0, %v5971_v41 }
 0xe20   : > { %v5972_v60 = vpop.f32.mrf.mxu0 }
 0xe21   : > { %v5973_v57 = vadd.f32 %v11530_v26, %v5972_v60 }
 0xe23   : > { %6033 = vst.msk [vmem:[%s11537_s25 + $0x68] sm:$0xff] %vm339_vm0, %v5973_v57 }
 0xe28   : > { %v5975_v31 = vpop.f32.mrf.mxu0 }
 0xe29   : > { %v5976_v37 = vadd.f32 %v11530_v26, %v5975_v31 }
 0xe2b   : > { %6034 = vst.msk [vmem:[%s11537_s25 + $0x70] sm:$0xff] %vm339_vm0, %v5976_v37 }
 0xe30   : > { %v5977_v23 = vpop.f32.mrf.mxu0 }
 0xe31   : > { %v5978_v47 = vadd.f32 %v11530_v26, %v5977_v23 }
 0xe33   : > { %6035 = vst.msk [vmem:[%s11537_s25 + $0x78] sm:$0xff] %vm339_vm0, %v5978_v47 }
 0xe38   : > { %v5980_v8 = vpop.f32.mrf.mxu0 }
 0xe39   : > { %v5981_v44 = vadd.f32 %v11530_v26, %v5980_v8 }
 0xe3b   : > { %6036 = vst.msk [vmem:[%s11537_s25 + $0x80] sm:$0xff] %vm339_vm0, %v5981_v44 }
 0xe40   : > { %v5982_v24 = vpop.f32.mrf.mxu0 }
 0xe41   : > { %v5983_v52 = vadd.f32 %v11530_v26, %v5982_v24 }
 0xe43   : > { %6037 = vst.msk [vmem:[%s11537_s25 + $0x88] sm:$0xff] %vm339_vm0, %v5983_v52 }
 0xe48   : > { %v5985_v5 = vpop.f32.mrf.mxu0 }
 0xe49   : > { %v5986_v54 = vadd.f32 %v11530_v26, %v5985_v5 }
 0xe4b   : > { %6038 = vst.msk [vmem:[%s11537_s25 + $0x90] sm:$0xff] %vm339_vm0, %v5986_v54 }
 0xe4c   : > { %v6579_v53 = vpop.permute.xlu2 %6578 }
 0xe4d   : > { %v6581_v0 = vunpack.i.h.bf16 %v6579_v53  ;;  %v6580_v48 = vunpack.i.l.bf16 %v6579_v53 }
 0xe4f   : > { %v5843_v3 = vsel %vm5814_vm7, %v5810_v13, %v6580_v48  ;;  %v5844_v61 = vsel %vm5814_vm7, %v5811_v20, %v6581_v0 }
 0xe50   : > { %v5861_v36 = vpack.c.bf16 %v5844_v61, %v5843_v3  ;;  %v5987_v9 = vpop.f32.mrf.mxu0 }
 0xe51   : > { %v5988_v39 = vadd.f32 %v11530_v26, %v5987_v9 }
 0xe52   : > { %6314 = vmatmul.msk.bf16.gmra.mxu0 %vm339_vm0, %v5861_v36 }
 0xe53   : > { %6039 = vst.msk [vmem:[%s11537_s25 + $0x98] sm:$0xff] %vm339_vm0, %v5988_v39 }
 0xe58   : > { %v5990_v18 = vpop.f32.mrf.mxu0 }
 0xe59   : > { %v5991_v34 = vadd.f32 %v11530_v26, %v5990_v18 }
 0xe5b   : > { %6040 = vst.msk [vmem:[%s11537_s25 + $0xa0] sm:$0xff] %vm339_vm0, %v5991_v34 }
 0xe5c   : > { %v6594_v4 = vpop.permute.xlu2 %6593 }
 0xe5d   : > { %v6596_v25 = vunpack.i.h.bf16 %v6594_v4  ;;  %v6595_v16 = vunpack.i.l.bf16 %v6594_v4 }
 0xe5f   : > { %v5845_v10 = vsel %vm5814_vm7, %v5812_v38, %v6595_v16  ;;  %v5846_v45 = vsel %vm5814_vm7, %v5813_v62, %v6596_v25 }
 0xe60   : > { %v5862_v40 = vpack.c.bf16 %v5846_v45, %v5845_v10  ;;  %v5992_v50 = vpop.f32.mrf.mxu0 }
 0xe61   : > { %v5993_v58 = vadd.f32 %v11530_v26, %v5992_v50 }
 0xe62   : > { %6315 = vmatmul.msk.bf16.gmra.mxu0 %vm339_vm0, %v5862_v40 }
 0xe63   : > { %6041 = vst.msk [vmem:[%s11537_s25 + $0xa8] sm:$0xff] %vm339_vm0, %v5993_v58 }
 0xe68   : > { %v5995_v6 = vpop.f32.mrf.mxu0 }
 0xe69   : > { %v5996_v12 = vadd.f32 %v11530_v26, %v5995_v6 }
 0xe6b   : > { %6042 = vst.msk [vmem:[%s11537_s25 + $0xb0] sm:$0xff] %vm339_vm0, %v5996_v12 }
 0xe70   : > { %v5997_v22 = vpop.f32.mrf.mxu0 }
 0xe71   : > { %v5998_v63 = vadd.f32 %v11530_v26, %v5997_v22 }
 0xe73   : > { %6043 = vst.msk [vmem:[%s11537_s25 + $0xb8] sm:$0xff] %vm339_vm0, %v5998_v63 }
 0xe78   : > { %v6000_v7 = vpop.f32.mrf.mxu0 }
 0xe79   : > { %v6001_v11 = vadd.f32 %v11530_v26, %v6000_v7 }
 0xe7b   : > { %6044 = vst.msk [vmem:[%s11537_s25 + $0xc0] sm:$0xff] %vm339_vm0, %v6001_v11 }
 0xe80   : > { %v6002_v59 = vpop.f32.mrf.mxu0 }
 0xe81   : > { %v6003_v55 = vadd.f32 %v11530_v26, %v6002_v59 }
 0xe83   : > { %6045 = vst.msk [vmem:[%s11537_s25 + $0xc8] sm:$0xff] %vm339_vm0, %v6003_v55 }
 0xe88   : > { %v6005_v41 = vpop.f32.mrf.mxu0 }
 0xe89   : > { %v6006_v60 = vadd.f32 %v11530_v26, %v6005_v41 }
 0xe8b   : > { %6046 = vst.msk [vmem:[%s11537_s25 + $0xd0] sm:$0xff] %vm339_vm0, %v6006_v60 }
 0xe90   : > { %v6007_v57 = vpop.f32.mrf.mxu0 }
 0xe91   : > { %v6008_v31 = vadd.f32 %v11530_v26, %v6007_v57 }
 0xe93   : > { %6047 = vst.msk [vmem:[%s11537_s25 + $0xd8] sm:$0xff] %vm339_vm0, %v6008_v31 }
 0xecf   : > { %v6010_v37 = vpop.f32.mrf.mxu0 }
 0xed0   : > { %v6011_v23 = vadd.f32 %v11530_v26, %v6010_v37 }
 0xed2   : > { %6048 = vst.msk [vmem:[%s11537_s25 + $0xe0] sm:$0xff] %vm339_vm0, %v6011_v23 }
 0xed7   : > { %v6012_v47 = vpop.f32.mrf.mxu0 }
 0xed8   : > { %v6013_v8 = vadd.f32 %v11530_v26, %v6012_v47 }
 0xeda   : > { %6049 = vst.msk [vmem:[%s11537_s25 + $0xe8] sm:$0xff] %vm339_vm0, %v6013_v8 }
 0xedf   : > { %v6015_v44 = vpop.f32.mrf.mxu0 }
 0xee0   : > { %v6016_v24 = vadd.f32 %v11530_v26, %v6015_v44 }
 0xee2   : > { %6050 = vst.msk [vmem:[%s11537_s25 + $0xf0] sm:$0xff] %vm339_vm0, %v6016_v24 }
 0xee7   : > { %v6017_v52 = vpop.f32.mrf.mxu0 }
 0xee8   : > { %v6018_v43 = vadd.f32 %v11530_v26, %v6017_v52 }
 0xeea   : > { %6051 = vst.msk [vmem:[%s11537_s25 + $0xf8] sm:$0xff] %vm339_vm0, %v6018_v43 }
 0xeeb PF: > { %s18_s27 = sadd.s32 1, %s7190_s27  }
 0xeec   : > { %p15_p4 = scmp.ge.s32.totalorder %s18_s27, 4  }
 0xeee   :  { %17 = sbr.rel (!%p15_p4) target bundleno = 1 (0x1), region = 85 }

</bundles_post_ra>
